<compile_context>
chip_gen: v7x
topology: tpu7x:2x2x1
jax: 0.10.0
libtpu: 0.0.40
codegen_flags: <defaults>
</compile_context>

<pallas_src>
import math
import numpy as np
import jax
import jax.numpy as jnp
from jax.experimental import pallas as pl
from jax.experimental.pallas import tpu as pltpu

MATMUL_DTYPE = jnp.bfloat16   # MXU-native on v5e/v6e/v7x; accumulation stays f32.


# ----------------------------------------------------------------------------
# In-kernel helper: 3x3 conv (stride 1, pad 1) on a (Cin, H*W) feature map.
# ----------------------------------------------------------------------------
def _conv3x3_im2col(v, w_m, bias_col, masks9, width, relu=False):
    """v: (Cin, N=H*W) f32 value.  w_m: (Cout, 9*Cin) packed weight (bf16).
    bias_col: (Cout, 1) f32 or None.  masks9: (9, N) f32 zero-padding masks.
    The 9 taps are lane rolls of v (XLU slot), concatenated along sublanes into a
    (9*Cin, N) im2col block consumed by a single K=9*Cin MXU matmul."""
    cin, n_flat = v.shape
    taps = []
    for t in range(9):
        dy, dx = t // 3 - 1, t % 3 - 1
        s = dy * width + dx
        if s == 0:
            taps.append(v)                        # centre tap: mask is all ones
        else:
            r = pltpu.roll(v, shift=(-s) % n_flat, axis=1)
            taps.append(r * masks9[t:t + 1, :])   # zero out wrapped border reads
    patches = jnp.concatenate(taps, axis=0).astype(w_m.dtype)     # (9*Cin, N)
    y = jnp.dot(w_m, patches, preferred_element_type=jnp.float32)  # (Cout, N)
    if bias_col is not None:
        y = y + bias_col
    if relu:
        y = jnp.maximum(y, 0.0)
    return y


# ----------------------------------------------------------------------------
# Kernel 1/3: fused chain of ResidualBlocks (conv-relu-conv + skip, repeated)
# ----------------------------------------------------------------------------
def res_chain(x, w, b, masks, width, final_lrelu=None):
    """x: (G, B, C, N) f32.  w: (G, 2*nblk, C, 9*C) bf16.  b: (G, 2*nblk, C, 1) f32.
    masks: (9, N) f32.  The whole chain for one (group, batch) element runs in one
    program with all intermediates resident in VMEM/vregs (no HBM round-trips)."""
    G, B, C, N = x.shape
    K = w.shape[1]

    # TODO(synk): at production resolutions tile H into 8-row strips (1-row halo)
    # as an extra grid axis and set vmem_limit_bytes; whole-image blocks only fit
    # comfortably in VMEM at these small demo shapes (v7x has 64 MiB).
    def kernel(m_ref, x_ref, w_ref, b_ref, o_ref):
        m = m_ref[...]
        h = x_ref[0, 0]
        for blk in range(K // 2):
            t = _conv3x3_im2col(h, w_ref[0, 2 * blk], b_ref[0, 2 * blk],
                                m, width, relu=True)
            h = _conv3x3_im2col(t, w_ref[0, 2 * blk + 1], b_ref[0, 2 * blk + 1],
                                m, width) + h
        if final_lrelu is not None:
            h = jnp.where(h >= 0.0, h, final_lrelu * h)
        o_ref[0, 0] = h

    return pl.pallas_call(
        kernel,
        grid=(G, B),
        in_specs=[pl.BlockSpec((9, N), lambda g, i: (0, 0)),
                  pl.BlockSpec((1, 1, C, N), lambda g, i: (g, i, 0, 0)),
                  pl.BlockSpec((1, K, C, 9 * C), lambda g, i: (g, 0, 0, 0)),
                  pl.BlockSpec((1, K, C, 1), lambda g, i: (g, 0, 0, 0))],
        out_specs=pl.BlockSpec((1, 1, C, N), lambda g, i: (g, i, 0, 0)),
        out_shape=jax.ShapeDtypeStruct((G, B, C, N), jnp.float32),
        compiler_params=pltpu.CompilerParams(
            dimension_semantics=("parallel", "parallel")),
    )(masks, x, w, b)


# ----------------------------------------------------------------------------
# Kernel 2/3: the whole ACM module in a single pallas_call (grid over batch)
# ----------------------------------------------------------------------------
def acm_fused(feats, acm, masks, width):
    """feats: (2, B, C, N) f32 -- feats[0] = img (sr branch), feats[1] = lang (ref)."""
    _, B, C, N = feats.shape
    Wp, bp, PT = acm['Wp'], acm['bp'], acm['PT']
    Wbd, bW, Wc = acm['Wbd'], acm['bW'], acm['Wc']
    kc, vc = acm['kc'], acm['vc']
    alpha = float(acm['prelu_alpha'])
    nq, nk = 2 * kc, 2 * kc
    P_rows = Wp.shape[0]
    TN = (((0,), (0,)), ((), ()))   # contract dim0 of both  (A^T @ B)
    NT = (((1,), (1,)), ((), ()))   # contract dim1 of both  (A @ B^T)

    def kernel(m_ref, img_ref, lang_ref, wp_ref, bp_ref, pt_ref,
               wbd_ref, bw_ref, wc_ref, o_ref):
        m = m_ref[...]
        x_img = img_ref[0, 0]                                     # (C, N)
        x_lang = lang_ref[0, 0]                                   # (C, N)

        # --- six fused 1x1 projections (BN + softmax scale folded into Wp) -----
        xcat = jnp.concatenate([x_img, x_lang], axis=0)           # (2C, N)
        proj = jnp.dot(wp_ref[...], xcat,
                       preferred_element_type=jnp.float32) + bp_ref[...]
        # ReLU only on the query/key rows; value rows stay linear.
        row = jax.lax.broadcasted_iota(jnp.int32, (P_rows, 1), 0)
        proj = jnp.where(row < nq + nk, jnp.maximum(proj, 0.0), proj)
        q = proj[:nq]                                             # (2kc, N)
        kv = proj[nq:]                                            # (2kc+2vc, N)

        # --- PSP pooling of keys + values fused into one matmul ----------------
        pooled = jnp.dot(kv, pt_ref[...],
                         preferred_element_type=jnp.float32)      # (2kc+2vc, S)
        kp = pooled[:nk]                                          # (2kc, S)
        vp = pooled[nk:]                                          # (2vc, S)

        # --- attention: img & lang similarities fused into one contraction -----
        sim = jax.lax.dot_general(q, kp, TN,
                                  preferred_element_type=jnp.float32)  # (N, S)
        sim = sim - jnp.max(sim, axis=-1, keepdims=True)
        e = jnp.exp(sim)
        p = e * pl.reciprocal(jnp.sum(e, axis=-1, keepdims=True), approx=True)
        ctx = jax.lax.dot_general(p, vp, NT,
                                  preferred_element_type=jnp.float32)  # (N, 2vc)

        # --- W_img / W_lang projection + channel concat (block-diagonal) -------
        out_cat = jax.lax.dot_general(wbd_ref[...], ctx, NT,
                                      preferred_element_type=jnp.float32)
        out_cat = out_cat + bw_ref[...]                           # (2C, N)

        # --- 3x3 conv (bias-free) + PReLU + multiply by lang features ----------
        y = _conv3x3_im2col(out_cat, wc_ref[...], None, m, width)
        y = jnp.where(y >= 0.0, y, alpha * y)
        o_ref[0] = x_lang * y

    return pl.pallas_call(
        kernel,
        grid=(B,),
        in_specs=[pl.BlockSpec((9, N), lambda i: (0, 0)),
                  pl.BlockSpec((1, 1, C, N), lambda i: (0, i, 0, 0)),
                  pl.BlockSpec((1, 1, C, N), lambda i: (1, i, 0, 0)),
                  pl.BlockSpec(Wp.shape, lambda i: (0, 0)),
                  pl.BlockSpec(bp.shape, lambda i: (0, 0)),
                  pl.BlockSpec(PT.shape, lambda i: (0, 0)),
                  pl.BlockSpec(Wbd.shape, lambda i: (0, 0)),
                  pl.BlockSpec(bW.shape, lambda i: (0, 0)),
                  pl.BlockSpec(Wc.shape, lambda i: (0, 0))],
        out_specs=pl.BlockSpec((1, C, N), lambda i: (i, 0, 0)),
        out_shape=jax.ShapeDtypeStruct((B, C, N), jnp.float32),
        compiler_params=pltpu.CompilerParams(dimension_semantics=("parallel",)),
    )(masks, feats, feats, Wp, bp, PT, Wbd, bW, Wc)


# ----------------------------------------------------------------------------
# Module composition (thin JAX glue only)
# ----------------------------------------------------------------------------
def contrastive_offset_generator(sr_nchw, ref_nchw, params):
    """Matches Contrastive_offset_generator(nf).forward(sr, ref) (eval-mode BN)."""
    B, C, H, W = sr_nchw.shape
    N = H * W
    masks = params['masks']
    # NCHW -> (branch, B, C, H*W): pure reshape + stack, no transposes.
    x = jnp.stack([sr_nchw.reshape(B, C, N),
                   ref_nchw.reshape(B, C, N)], axis=0).astype(jnp.float32)
    feats = res_chain(x, params['branch_w'], params['branch_b'], masks, W)  # (2,B,C,N)
    z = acm_fused(feats, params['acm'], masks, W)                           # (B,C,N)
    z = res_chain(z[None], params['out_w'], params['out_b'], masks, W,
                  final_lrelu=0.2)[0]
    return z.reshape(B, C, H, W)


# ----------------------------------------------------------------------------
# Host-side constant builders & deterministic parameter init / packing
# ----------------------------------------------------------------------------
def build_tap_masks(H, W):
    """masks[t, h*W+w] = 1 if 3x3 tap t = 3*ky+kx reads an in-bounds input pixel."""
    m = np.zeros((9, H * W), np.float32)
    for t in range(9):
        dy, dx = t // 3 - 1, t % 3 - 1
        for h in range(H):
            for w in range(W):
                if 0 <= h + dy < H and 0 <= w + dx < W:
                    m[t, h * W + w] = 1.0
    return jnp.asarray(m)


def build_psp_matrix_T(H, W, sizes=(1, 3, 6, 8)):
    """(H*W, S) pooling matrix: pooled = x(C, H*W) @ PT, exact AdaptiveAvgPool2d
    bin semantics, concatenated over sizes in PSPModule order.  S = 1+9+36+64."""
    cols = []
    for s in sizes:
        for i in range(s):
            h0, h1 = (i * H) // s, math.ceil((i + 1) * H / s)
            for j in range(s):
                w0, w1 = (j * W) // s, math.ceil((j + 1) * W / s)
                g = np.zeros((H, W), np.float32)
                g[h0:h1, w0:w1] = 1.0 / ((h1 - h0) * (w1 - w0))
                cols.append(g.reshape(-1))
    return jnp.asarray(np.stack(cols, axis=1))   # (H*W, S)


def _pack_conv3x3(w_oihw):
    """PyTorch Conv2d weight (Co, Ci, 3, 3) -> (Co, 9*Ci) matching the im2col order."""
    co = w_oihw.shape[0]
    return np.transpose(w_oihw, (0, 2, 3, 1)).reshape(co, -1)


def init_params(key, nf, H, W):
    kc = vc = nf // 16
    keys = iter(jax.random.split(key, 64))

    def nrm(shape, fan_in):
        return np.asarray(jax.random.normal(next(keys), shape, jnp.float32)) / np.sqrt(fan_in)

    def bias(n):
        return np.asarray(0.01 * jax.random.normal(next(keys), (n,), jnp.float32))

    def packed_chain(n_blocks):
        ws, bs = [], []
        for _ in range(2 * n_blocks):          # conv1, conv2 per block
            ws.append(_pack_conv3x3(nrm((nf, nf, 3, 3), 9 * nf)))
            bs.append(bias(nf).reshape(nf, 1))
        return np.stack(ws), np.stack(bs)

    sr_w, sr_b = packed_chain(2)
    ref_w, ref_b = packed_chain(2)
    out_w, out_b = packed_chain(2)

    def folded_conv_bn(cin, cout):
        # Conv2d(1x1, bias) + BatchNorm2d in eval mode (running_mean=0, running_var=1)
        # folded into an effective (w, b).
        # TODO(synk): training-mode BN (batch statistics) has no static fold.
        w = nrm((cout, cin), cin)
        b = bias(cout)
        gamma = 1.0 + 0.1 * np.asarray(jax.random.normal(next(keys), (cout,), jnp.float32))
        beta = 0.1 * np.asarray(jax.random.normal(next(keys), (cout,), jnp.float32))
        s = gamma / np.sqrt(1.0 + 1e-5)
        return w * s[:, None], b * s + beta

    q_img = folded_conv_bn(nf, kc)
    q_lang = folded_conv_bn(nf, kc)
    k_img = folded_conv_bn(nf, kc)
    k_lang = folded_conv_bn(nf, kc)
    v_img = (nrm((vc, nf), nf), bias(vc))
    v_lang = (nrm((vc, nf), nf), bias(vc))
    w_img = (nrm((nf, vc), vc), bias(nf))
    w_lang = (nrm((nf, vc), vc), bias(nf))
    conv_w = nrm((nf, 2 * nf, 3, 3), 9 * 2 * nf)      # ACM.conv, bias=False

    # Pack the six 1x1 projections into one block-structured weight.  Row order:
    # [q_img, q_lang, k_img, k_lang, v_img, v_lang]; img rows read cols 0:nf,
    # lang rows read cols nf:2nf.  Softmax scale kc**-0.5 folded into the queries
    # (commutes with the positive-scale ReLU).
    scale = float(kc) ** (-0.5)
    rows = 4 * kc + 2 * vc
    Wp = np.zeros((rows, 2 * nf), np.float32)
    bp = np.zeros((rows, 1), np.float32)
    specs = [(q_img, 0, scale), (q_lang, 1, scale),
             (k_img, 0, 1.0), (k_lang, 1, 1.0),
             (v_img, 0, 1.0), (v_lang, 1, 1.0)]
    r = 0
    for (w_, b_), side, sc in specs:
        co = w_.shape[0]
        Wp[r:r + co, side * nf:(side + 1) * nf] = w_ * sc
        bp[r:r + co, 0] = b_ * sc
        r += co

    # Block-diagonal W_img / W_lang so the channel concat comes out of one matmul.
    Wbd = np.zeros((2 * nf, 2 * vc), np.float32)
    bW = np.zeros((2 * nf, 1), np.float32)
    Wbd[:nf, :vc] = w_img[0]; bW[:nf, 0] = w_img[1]
    Wbd[nf:, vc:] = w_lang[0]; bW[nf:, 0] = w_lang[1]

    acm = dict(
        Wp=jnp.asarray(Wp), bp=jnp.asarray(bp),
        PT=build_psp_matrix_T(H, W),
        Wbd=jnp.asarray(Wbd), bW=jnp.asarray(bW),
        Wc=jnp.asarray(_pack_conv3x3(conv_w), MATMUL_DTYPE),
        prelu_alpha=0.25,                 # nn.PReLU() default (single shared alpha)
        kc=kc, vc=vc,
    )
    # NOTE: ACM.pool (MaxPool2d, scale=1) and ACM.bn are defined but unused in forward.
    return dict(
        branch_w=jnp.asarray(np.stack([sr_w, ref_w]), MATMUL_DTYPE),   # (2,4,nf,9nf)
        branch_b=jnp.asarray(np.stack([sr_b, ref_b]), jnp.float32),    # (2,4,nf,1)
        out_w=jnp.asarray(out_w[None], MATMUL_DTYPE),                  # (1,4,nf,9nf)
        out_b=jnp.asarray(out_b[None], jnp.float32),                   # (1,4,nf,1)
        masks=build_tap_masks(H, W),
        acm=acm,
    )


# ----------------------------------------------------------------------------
if __name__ == "__main__":
    nf, B, H, W = 32, 2, 16, 16   # nf >= 16 so key/value channels = nf // 16 >= 1
    key = jax.random.PRNGKey(0)
    kparam, ksr, kref = jax.random.split(key, 3)
    params = init_params(kparam, nf, H, W)

    sr = jax.random.normal(ksr, (B, nf, H, W), jnp.float32)    # NCHW like PyTorch
    ref = jax.random.normal(kref, (B, nf, H, W), jnp.float32)

    fwd = jax.jit(lambda a, b: contrastive_offset_generator(a, b, params))
    out = jax.block_until_ready(fwd(sr, ref))

    assert out.shape == (B, nf, H, W), out.shape
    assert bool(jnp.all(jnp.isfinite(out)))
    print("KERNEL_OK")
</pallas_src>

<mosaic_0001>
module attributes {stable_mosaic.version = 11 : i64} {
  func.func @kernel(%arg0: i32, %arg1: memref<9x256xf32, #tpu.memory_space<vmem>>, %arg2: memref<1x1x32x256xf32, #tpu.memory_space<vmem>>, %arg3: memref<1x1x32x256xf32, #tpu.memory_space<vmem>>, %arg4: memref<12x64xf32, #tpu.memory_space<vmem>>, %arg5: memref<12x1xf32, #tpu.memory_space<vmem>>, %arg6: memref<256x110xf32, #tpu.memory_space<vmem>>, %arg7: memref<64x4xf32, #tpu.memory_space<vmem>>, %arg8: memref<64x1xf32, #tpu.memory_space<vmem>>, %arg9: memref<32x576xbf16, #tpu.memory_space<vmem>>, %arg10: memref<1x32x256xf32, #tpu.memory_space<vmem>>) attributes {dimension_semantics = [#tpu.dimension_semantics<parallel>], iteration_bounds = array<i64: 2>, scalar_prefetch = 0 : i64, scratch_operands = 0 : i64, tpu.core_type = #tpu.core_type<tc>, window_params = [{pipeline_mode = #tpu.pipeline_mode<synchronous>, transform_indices = @transform_0, window_bounds = array<i64: 9, 256>}, {transform_indices = @transform_1, window_bounds = array<i64: 1, 1, 32, 256>}, {transform_indices = @transform_2, window_bounds = array<i64: 1, 1, 32, 256>}, {pipeline_mode = #tpu.pipeline_mode<synchronous>, transform_indices = @transform_3, window_bounds = array<i64: 12, 64>}, {pipeline_mode = #tpu.pipeline_mode<synchronous>, transform_indices = @transform_4, window_bounds = array<i64: 12, 1>}, {pipeline_mode = #tpu.pipeline_mode<synchronous>, transform_indices = @transform_5, window_bounds = array<i64: 256, 110>}, {pipeline_mode = #tpu.pipeline_mode<synchronous>, transform_indices = @transform_6, window_bounds = array<i64: 64, 4>}, {pipeline_mode = #tpu.pipeline_mode<synchronous>, transform_indices = @transform_7, window_bounds = array<i64: 64, 1>}, {pipeline_mode = #tpu.pipeline_mode<synchronous>, transform_indices = @transform_8, window_bounds = array<i64: 32, 576>}, {transform_indices = @transform_9, window_bounds = array<i64: 1, 32, 256>}]} {
    %c0 = arith.constant 0 : index
    %c0_0 = arith.constant 0 : index
    %0 = vector.load %arg1[%c0, %c0_0] : memref<9x256xf32, #tpu.memory_space<vmem>>, vector<9x256xf32>
    %c0_1 = arith.constant 0 : index
    %c0_2 = arith.constant 0 : index
    %c0_3 = arith.constant 0 : index
    %c0_4 = arith.constant 0 : index
    %1 = vector.load %arg2[%c0_1, %c0_2, %c0_3, %c0_4] : memref<1x1x32x256xf32, #tpu.memory_space<vmem>>, vector<1x1x32x256xf32>
    %2 = vector.shape_cast %1 : vector<1x1x32x256xf32> to vector<32x256xf32>
    %c0_5 = arith.constant 0 : index
    %c0_6 = arith.constant 0 : index
    %c0_7 = arith.constant 0 : index
    %c0_8 = arith.constant 0 : index
    %3 = vector.load %arg3[%c0_5, %c0_6, %c0_7, %c0_8] : memref<1x1x32x256xf32, #tpu.memory_space<vmem>>, vector<1x1x32x256xf32>
    %4 = vector.shape_cast %3 : vector<1x1x32x256xf32> to vector<32x256xf32>
    %5 = tpu.concatenate %2, %4 in 0 : vector<32x256xf32>, vector<32x256xf32> -> vector<64x256xf32>
    %c0_9 = arith.constant 0 : index
    %c0_10 = arith.constant 0 : index
    %6 = vector.load %arg4[%c0_9, %c0_10] : memref<12x64xf32, #tpu.memory_space<vmem>>, vector<12x64xf32>
    %cst = arith.constant dense<0.000000e+00> : vector<12x256xf32>
    %7 = tpu.matmul %6, %5, %cst {dimension_numbers = #tpu.dot_dimension_numbers<[1], [0], [0], [1], [0, 0, 1, 1], [], []>} : vector<12x64xf32>, vector<64x256xf32>, vector<12x256xf32> -> vector<12x256xf32>
    %c0_11 = arith.constant 0 : index
    %c0_12 = arith.constant 0 : index
    %8 = vector.load %arg5[%c0_11, %c0_12] : memref<12x1xf32, #tpu.memory_space<vmem>>, vector<12x1xf32>
    %9 = vector.broadcast %8 : vector<12x1xf32> to vector<12x256xf32>
    %10 = arith.addf %7, %9 : vector<12x256xf32>
    %11 = tpu.iota {dimensions = array<i32: 0>} : vector<12x1xi32>
    %c8_i32 = arith.constant 8 : i32
    %12 = vector.broadcast %c8_i32 : i32 to vector<12x1xi32>
    %13 = arith.cmpi slt, %11, %12 : vector<12x1xi32>
    %cst_13 = arith.constant 0.000000e+00 : f32
    %14 = vector.broadcast %cst_13 : f32 to vector<12x256xf32>
    %15 = arith.maximumf %10, %14 : vector<12x256xf32>
    %16 = vector.shape_cast %13 : vector<12x1xi1> to vector<12x1xi1>
    %17 = vector.broadcast %16 : vector<12x1xi1> to vector<12x256xi1>
    %18 = arith.select %17, %15, %10 : vector<12x256xi1>, vector<12x256xf32>
    %19 = vector.extract_strided_slice %18 {offsets = [0, 0], sizes = [4, 256], strides = [1, 1]} : vector<12x256xf32> to vector<4x256xf32>
    %20 = vector.extract_strided_slice %18 {offsets = [4, 0], sizes = [8, 256], strides = [1, 1]} : vector<12x256xf32> to vector<8x256xf32>
    %c0_14 = arith.constant 0 : index
    %c0_15 = arith.constant 0 : index
    %21 = vector.load %arg6[%c0_14, %c0_15] : memref<256x110xf32, #tpu.memory_space<vmem>>, vector<256x110xf32>
    %cst_16 = arith.constant dense<0.000000e+00> : vector<8x110xf32>
    %22 = tpu.matmul %20, %21, %cst_16 {dimension_numbers = #tpu.dot_dimension_numbers<[1], [0], [0], [1], [0, 0, 1, 1], [], []>} : vector<8x256xf32>, vector<256x110xf32>, vector<8x110xf32> -> vector<8x110xf32>
    %23 = vector.extract_strided_slice %22 {offsets = [0, 0], sizes = [4, 110], strides = [1, 1]} : vector<8x110xf32> to vector<4x110xf32>
    %24 = vector.extract_strided_slice %22 {offsets = [4, 0], sizes = [4, 110], strides = [1, 1]} : vector<8x110xf32> to vector<4x110xf32>
    %cst_17 = arith.constant dense<0.000000e+00> : vector<256x110xf32>
    %25 = tpu.matmul %19, %23, %cst_17 {dimension_numbers = #tpu.dot_dimension_numbers<[0], [0], [1], [1], [0, 1, 1, 1], [], []>} : vector<4x256xf32>, vector<4x110xf32>, vector<256x110xf32> -> vector<256x110xf32>
    %cst_18 = arith.constant dense<0xFF800000> : vector<256xf32>
    %26 = vector.multi_reduction <maximumf>, %25, %cst_18 [1] : vector<256x110xf32> to vector<256xf32>
    %27 = vector.shape_cast %26 : vector<256xf32> to vector<256x1xf32>
    %28 = vector.broadcast %27 : vector<256x1xf32> to vector<256x110xf32>
    %29 = arith.subf %25, %28 : vector<256x110xf32>
    %30 = math.exp %29 : vector<256x110xf32>
    %cst_19 = arith.constant dense<0.000000e+00> : vector<256xf32>
    %31 = vector.multi_reduction <add>, %30, %cst_19 [1] : vector<256x110xf32> to vector<256xf32>
    %32 = vector.shape_cast %31 : vector<256xf32> to vector<256x1xf32>
    %33 = tpu.reciprocal %32 {approx = true} : vector<256x1xf32> -> vector<256x1xf32>
    %34 = vector.broadcast %33 : vector<256x1xf32> to vector<256x110xf32>
    %35 = arith.mulf %30, %34 : vector<256x110xf32>
    %cst_20 = arith.constant dense<0.000000e+00> : vector<256x4xf32>
    %36 = tpu.matmul %35, %24, %cst_20 {dimension_numbers = #tpu.dot_dimension_numbers<[1], [1], [0], [0], [0, 0, 1, 0], [], []>} : vector<256x110xf32>, vector<4x110xf32>, vector<256x4xf32> -> vector<256x4xf32>
    %c0_21 = arith.constant 0 : index
    %c0_22 = arith.constant 0 : index
    %37 = vector.load %arg7[%c0_21, %c0_22] : memref<64x4xf32, #tpu.memory_space<vmem>>, vector<64x4xf32>
    %cst_23 = arith.constant dense<0.000000e+00> : vector<64x256xf32>
    %38 = tpu.matmul %37, %36, %cst_23 {dimension_numbers = #tpu.dot_dimension_numbers<[1], [1], [0], [0], [0, 0, 1, 0], [], []>} : vector<64x4xf32>, vector<256x4xf32>, vector<64x256xf32> -> vector<64x256xf32>
    %c0_24 = arith.constant 0 : index
    %c0_25 = arith.constant 0 : index
    %39 = vector.load %arg8[%c0_24, %c0_25] : memref<64x1xf32, #tpu.memory_space<vmem>>, vector<64x1xf32>
    %40 = vector.broadcast %39 : vector<64x1xf32> to vector<64x256xf32>
    %41 = arith.addf %38, %40 : vector<64x256xf32>
    %c0_26 = arith.constant 0 : index
    %c0_27 = arith.constant 0 : index
    %42 = vector.load %arg9[%c0_26, %c0_27] : memref<32x576xbf16, #tpu.memory_space<vmem>>, vector<32x576xbf16>
    %c17_i32 = arith.constant 17 : i32
    %43 = tpu.dynamic_rotate %41 by %c17_i32 dim 1 : vector<64x256xf32>, i32 -> vector<64x256xf32>
    %44 = vector.extract_strided_slice %0 {offsets = [0, 0], sizes = [1, 256], strides = [1, 1]} : vector<9x256xf32> to vector<1x256xf32>
    %45 = vector.broadcast %44 : vector<1x256xf32> to vector<64x256xf32>
    %46 = arith.mulf %43, %45 : vector<64x256xf32>
    %c16_i32 = arith.constant 16 : i32
    %47 = tpu.dynamic_rotate %41 by %c16_i32 dim 1 : vector<64x256xf32>, i32 -> vector<64x256xf32>
    %48 = vector.extract_strided_slice %0 {offsets = [1, 0], sizes = [1, 256], strides = [1, 1]} : vector<9x256xf32> to vector<1x256xf32>
    %49 = vector.broadcast %48 : vector<1x256xf32> to vector<64x256xf32>
    %50 = arith.mulf %47, %49 : vector<64x256xf32>
    %c15_i32 = arith.constant 15 : i32
    %51 = tpu.dynamic_rotate %41 by %c15_i32 dim 1 : vector<64x256xf32>, i32 -> vector<64x256xf32>
    %52 = vector.extract_strided_slice %0 {offsets = [2, 0], sizes = [1, 256], strides = [1, 1]} : vector<9x256xf32> to vector<1x256xf32>
    %53 = vector.broadcast %52 : vector<1x256xf32> to vector<64x256xf32>
    %54 = arith.mulf %51, %53 : vector<64x256xf32>
    %c1_i32 = arith.constant 1 : i32
    %55 = tpu.dynamic_rotate %41 by %c1_i32 dim 1 : vector<64x256xf32>, i32 -> vector<64x256xf32>
    %56 = vector.extract_strided_slice %0 {offsets = [3, 0], sizes = [1, 256], strides = [1, 1]} : vector<9x256xf32> to vector<1x256xf32>
    %57 = vector.broadcast %56 : vector<1x256xf32> to vector<64x256xf32>
    %58 = arith.mulf %55, %57 : vector<64x256xf32>
    %c255_i32 = arith.constant 255 : i32
    %59 = tpu.dynamic_rotate %41 by %c255_i32 dim 1 : vector<64x256xf32>, i32 -> vector<64x256xf32>
    %60 = vector.extract_strided_slice %0 {offsets = [5, 0], sizes = [1, 256], strides = [1, 1]} : vector<9x256xf32> to vector<1x256xf32>
    %61 = vector.broadcast %60 : vector<1x256xf32> to vector<64x256xf32>
    %62 = arith.mulf %59, %61 : vector<64x256xf32>
    %c241_i32 = arith.constant 241 : i32
    %63 = tpu.dynamic_rotate %41 by %c241_i32 dim 1 : vector<64x256xf32>, i32 -> vector<64x256xf32>
    %64 = vector.extract_strided_slice %0 {offsets = [6, 0], sizes = [1, 256], strides = [1, 1]} : vector<9x256xf32> to vector<1x256xf32>
    %65 = vector.broadcast %64 : vector<1x256xf32> to vector<64x256xf32>
    %66 = arith.mulf %63, %65 : vector<64x256xf32>
    %c240_i32 = arith.constant 240 : i32
    %67 = tpu.dynamic_rotate %41 by %c240_i32 dim 1 : vector<64x256xf32>, i32 -> vector<64x256xf32>
    %68 = vector.extract_strided_slice %0 {offsets = [7, 0], sizes = [1, 256], strides = [1, 1]} : vector<9x256xf32> to vector<1x256xf32>
    %69 = vector.broadcast %68 : vector<1x256xf32> to vector<64x256xf32>
    %70 = arith.mulf %67, %69 : vector<64x256xf32>
    %c239_i32 = arith.constant 239 : i32
    %71 = tpu.dynamic_rotate %41 by %c239_i32 dim 1 : vector<64x256xf32>, i32 -> vector<64x256xf32>
    %72 = vector.extract_strided_slice %0 {offsets = [8, 0], sizes = [1, 256], strides = [1, 1]} : vector<9x256xf32> to vector<1x256xf32>
    %73 = vector.broadcast %72 : vector<1x256xf32> to vector<64x256xf32>
    %74 = arith.mulf %71, %73 : vector<64x256xf32>
    %75 = tpu.concatenate %46, %50, %54, %58, %41, %62, %66, %70, %74 in 0 : vector<64x256xf32>, vector<64x256xf32>, vector<64x256xf32>, vector<64x256xf32>, vector<64x256xf32>, vector<64x256xf32>, vector<64x256xf32>, vector<64x256xf32>, vector<64x256xf32> -> vector<576x256xf32>
    %76 = arith.truncf %75 : vector<576x256xf32> to vector<576x256xbf16>
    %cst_28 = arith.constant dense<0.000000e+00> : vector<32x256xf32>
    %77 = tpu.matmul %42, %76, %cst_28 {dimension_numbers = #tpu.dot_dimension_numbers<[1], [0], [0], [1], [0, 0, 1, 1], [], []>} : vector<32x576xbf16>, vector<576x256xbf16>, vector<32x256xf32> -> vector<32x256xf32>
    %cst_29 = arith.constant 0.000000e+00 : f32
    %78 = vector.broadcast %cst_29 : f32 to vector<32x256xf32>
    %79 = arith.cmpf oge, %77, %78 : vector<32x256xf32>
    %cst_30 = arith.constant 2.500000e-01 : f32
    %80 = vector.broadcast %cst_30 : f32 to vector<32x256xf32>
    %81 = arith.mulf %80, %77 : vector<32x256xf32>
    %82 = arith.select %79, %77, %81 : vector<32x256xi1>, vector<32x256xf32>
    %83 = arith.mulf %4, %82 : vector<32x256xf32>
    %c0_31 = arith.constant 0 : index
    %c0_32 = arith.constant 0 : index
    %c0_33 = arith.constant 0 : index
    %84 = vector.load %arg10[%c0_31, %c0_32, %c0_33] : memref<1x32x256xf32, #tpu.memory_space<vmem>>, vector<1x32x256xf32>
    %85 = vector.shape_cast %84 : vector<1x32x256xf32> to vector<32x256xf32>
    %86 = vector.shape_cast %83 : vector<32x256xf32> to vector<1x32x256xf32>
    tpu.vector_store %arg10[%c0_31, %c0_32, %c0_33], %86 {strides = array<i32>} : memref<1x32x256xf32, #tpu.memory_space<vmem>>, vector<1x32x256xf32>,
    return
  }
  func.func @transform_0(%arg0: i32) -> (i32, i32) {
    %c0_i32 = arith.constant 0 : i32
    %c0_i32_0 = arith.constant 0 : i32
    %c0_i32_1 = arith.constant 0 : i32
    return %c0_i32, %c0_i32_0 : i32, i32
  }
  func.func @transform_1(%arg0: i32) -> (i32, i32, i32, i32) {
    %c0_i32 = arith.constant 0 : i32
    %c0_i32_0 = arith.constant 0 : i32
    %c0_i32_1 = arith.constant 0 : i32
    %c0_i32_2 = arith.constant 0 : i32
    return %c0_i32, %arg0, %c0_i32_0, %c0_i32_1 : i32, i32, i32, i32
  }
  func.func @transform_2(%arg0: i32) -> (i32, i32, i32, i32) {
    %c1_i32 = arith.constant 1 : i32
    %c0_i32 = arith.constant 0 : i32
    %c0_i32_0 = arith.constant 0 : i32
    %c0_i32_1 = arith.constant 0 : i32
    return %c1_i32, %arg0, %c0_i32, %c0_i32_0 : i32, i32, i32, i32
  }
  func.func @transform_3(%arg0: i32) -> (i32, i32) {
    %c0_i32 = arith.constant 0 : i32
    %c0_i32_0 = arith.constant 0 : i32
    %c0_i32_1 = arith.constant 0 : i32
    return %c0_i32, %c0_i32_0 : i32, i32
  }
  func.func @transform_4(%arg0: i32) -> (i32, i32) {
    %c0_i32 = arith.constant 0 : i32
    %c0_i32_0 = arith.constant 0 : i32
    %c0_i32_1 = arith.constant 0 : i32
    return %c0_i32, %c0_i32_0 : i32, i32
  }
  func.func @transform_5(%arg0: i32) -> (i32, i32) {
    %c0_i32 = arith.constant 0 : i32
    %c0_i32_0 = arith.constant 0 : i32
    %c0_i32_1 = arith.constant 0 : i32
    return %c0_i32, %c0_i32_0 : i32, i32
  }
  func.func @transform_6(%arg0: i32) -> (i32, i32) {
    %c0_i32 = arith.constant 0 : i32
    %c0_i32_0 = arith.constant 0 : i32
    %c0_i32_1 = arith.constant 0 : i32
    return %c0_i32, %c0_i32_0 : i32, i32
  }
  func.func @transform_7(%arg0: i32) -> (i32, i32) {
    %c0_i32 = arith.constant 0 : i32
    %c0_i32_0 = arith.constant 0 : i32
    %c0_i32_1 = arith.constant 0 : i32
    return %c0_i32, %c0_i32_0 : i32, i32
  }
  func.func @transform_8(%arg0: i32) -> (i32, i32) {
    %c0_i32 = arith.constant 0 : i32
    %c0_i32_0 = arith.constant 0 : i32
    %c0_i32_1 = arith.constant 0 : i32
    return %c0_i32, %c0_i32_0 : i32, i32
  }
  func.func @transform_9(%arg0: i32) -> (i32, i32, i32) {
    %c0_i32 = arith.constant 0 : i32
    %c0_i32_0 = arith.constant 0 : i32
    %c0_i32_1 = arith.constant 0 : i32
    return %arg0, %c0_i32, %c0_i32_0 : i32, i32, i32
  }
}

module attributes {stable_mosaic.version = 11 : i64} {
  func.func @kernel(%arg0: i32, %arg1: i32, %arg2: memref<9x256xf32, #tpu.memory_space<vmem>>, %arg3: memref<1x1x32x256xf32, #tpu.memory_space<vmem>>, %arg4: memref<1x4x32x288xbf16, #tpu.memory_space<vmem>>, %arg5: memref<1x4x32x1xf32, #tpu.memory_space<vmem>>, %arg6: memref<1x1x32x256xf32, #tpu.memory_space<vmem>>) attributes {dimension_semantics = [#tpu.dimension_semantics<parallel>, #tpu.dimension_semantics<parallel>], iteration_bounds = array<i64: 2, 2>, scalar_prefetch = 0 : i64, scratch_operands = 0 : i64, tpu.core_type = #tpu.core_type<tc>, window_params = [{pipeline_mode = #tpu.pipeline_mode<synchronous>, transform_indices = @transform_0, window_bounds = array<i64: 9, 256>}, {transform_indices = @transform_1, window_bounds = array<i64: 1, 1, 32, 256>}, {transform_indices = @transform_2, window_bounds = array<i64: 1, 4, 32, 288>}, {transform_indices = @transform_3, window_bounds = array<i64: 1, 4, 32, 1>}, {transform_indices = @transform_4, window_bounds = array<i64: 1, 1, 32, 256>}]} {
    %c0 = arith.constant 0 : index
    %c0_0 = arith.constant 0 : index
    %0 = vector.load %arg2[%c0, %c0_0] : memref<9x256xf32, #tpu.memory_space<vmem>>, vector<9x256xf32>
    %c0_1 = arith.constant 0 : index
    %c0_2 = arith.constant 0 : index
    %c0_3 = arith.constant 0 : index
    %c0_4 = arith.constant 0 : index
    %1 = vector.load %arg3[%c0_1, %c0_2, %c0_3, %c0_4] : memref<1x1x32x256xf32, #tpu.memory_space<vmem>>, vector<1x1x32x256xf32>
    %2 = vector.shape_cast %1 : vector<1x1x32x256xf32> to vector<32x256xf32>
    %c0_5 = arith.constant 0 : index
    %c0_6 = arith.constant 0 : index
    %c0_7 = arith.constant 0 : index
    %c0_8 = arith.constant 0 : index
    %3 = vector.load %arg4[%c0_5, %c0_6, %c0_7, %c0_8] : memref<1x4x32x288xbf16, #tpu.memory_space<vmem>>, vector<1x1x32x288xbf16>
    %4 = vector.shape_cast %3 : vector<1x1x32x288xbf16> to vector<32x288xbf16>
    %c0_9 = arith.constant 0 : index
    %c0_10 = arith.constant 0 : index
    %c0_11 = arith.constant 0 : index
    %c0_12 = arith.constant 0 : index
    %5 = vector.load %arg5[%c0_9, %c0_10, %c0_11, %c0_12] : memref<1x4x32x1xf32, #tpu.memory_space<vmem>>, vector<1x1x32x1xf32>
    %6 = vector.shape_cast %5 : vector<1x1x32x1xf32> to vector<32x1xf32>
    %c17_i32 = arith.constant 17 : i32
    %7 = tpu.dynamic_rotate %2 by %c17_i32 dim 1 : vector<32x256xf32>, i32 -> vector<32x256xf32>
    %8 = vector.extract_strided_slice %0 {offsets = [0, 0], sizes = [1, 256], strides = [1, 1]} : vector<9x256xf32> to vector<1x256xf32>
    %9 = vector.broadcast %8 : vector<1x256xf32> to vector<32x256xf32>
    %10 = arith.mulf %7, %9 : vector<32x256xf32>
    %c16_i32 = arith.constant 16 : i32
    %11 = tpu.dynamic_rotate %2 by %c16_i32 dim 1 : vector<32x256xf32>, i32 -> vector<32x256xf32>
    %12 = vector.extract_strided_slice %0 {offsets = [1, 0], sizes = [1, 256], strides = [1, 1]} : vector<9x256xf32> to vector<1x256xf32>
    %13 = vector.broadcast %12 : vector<1x256xf32> to vector<32x256xf32>
    %14 = arith.mulf %11, %13 : vector<32x256xf32>
    %c15_i32 = arith.constant 15 : i32
    %15 = tpu.dynamic_rotate %2 by %c15_i32 dim 1 : vector<32x256xf32>, i32 -> vector<32x256xf32>
    %16 = vector.extract_strided_slice %0 {offsets = [2, 0], sizes = [1, 256], strides = [1, 1]} : vector<9x256xf32> to vector<1x256xf32>
    %17 = vector.broadcast %16 : vector<1x256xf32> to vector<32x256xf32>
    %18 = arith.mulf %15, %17 : vector<32x256xf32>
    %c1_i32 = arith.constant 1 : i32
    %19 = tpu.dynamic_rotate %2 by %c1_i32 dim 1 : vector<32x256xf32>, i32 -> vector<32x256xf32>
    %20 = vector.extract_strided_slice %0 {offsets = [3, 0], sizes = [1, 256], strides = [1, 1]} : vector<9x256xf32> to vector<1x256xf32>
    %21 = vector.broadcast %20 : vector<1x256xf32> to vector<32x256xf32>
    %22 = arith.mulf %19, %21 : vector<32x256xf32>
    %c255_i32 = arith.constant 255 : i32
    %23 = tpu.dynamic_rotate %2 by %c255_i32 dim 1 : vector<32x256xf32>, i32 -> vector<32x256xf32>
    %24 = vector.extract_strided_slice %0 {offsets = [5, 0], sizes = [1, 256], strides = [1, 1]} : vector<9x256xf32> to vector<1x256xf32>
    %25 = vector.broadcast %24 : vector<1x256xf32> to vector<32x256xf32>
    %26 = arith.mulf %23, %25 : vector<32x256xf32>
    %c241_i32 = arith.constant 241 : i32
    %27 = tpu.dynamic_rotate %2 by %c241_i32 dim 1 : vector<32x256xf32>, i32 -> vector<32x256xf32>
    %28 = vector.extract_strided_slice %0 {offsets = [6, 0], sizes = [1, 256], strides = [1, 1]} : vector<9x256xf32> to vector<1x256xf32>
    %29 = vector.broadcast %28 : vector<1x256xf32> to vector<32x256xf32>
    %30 = arith.mulf %27, %29 : vector<32x256xf32>
    %c240_i32 = arith.constant 240 : i32
    %31 = tpu.dynamic_rotate %2 by %c240_i32 dim 1 : vector<32x256xf32>, i32 -> vector<32x256xf32>
    %32 = vector.extract_strided_slice %0 {offsets = [7, 0], sizes = [1, 256], strides = [1, 1]} : vector<9x256xf32> to vector<1x256xf32>
    %33 = vector.broadcast %32 : vector<1x256xf32> to vector<32x256xf32>
    %34 = arith.mulf %31, %33 : vector<32x256xf32>
    %c239_i32 = arith.constant 239 : i32
    %35 = tpu.dynamic_rotate %2 by %c239_i32 dim 1 : vector<32x256xf32>, i32 -> vector<32x256xf32>
    %36 = vector.extract_strided_slice %0 {offsets = [8, 0], sizes = [1, 256], strides = [1, 1]} : vector<9x256xf32> to vector<1x256xf32>
    %37 = vector.broadcast %36 : vector<1x256xf32> to vector<32x256xf32>
    %38 = arith.mulf %35, %37 : vector<32x256xf32>
    %39 = tpu.concatenate %10, %14, %18, %22, %2, %26, %30, %34, %38 in 0 : vector<32x256xf32>, vector<32x256xf32>, vector<32x256xf32>, vector<32x256xf32>, vector<32x256xf32>, vector<32x256xf32>, vector<32x256xf32>, vector<32x256xf32>, vector<32x256xf32> -> vector<288x256xf32>
    %40 = arith.truncf %39 : vector<288x256xf32> to vector<288x256xbf16>
    %cst = arith.constant dense<0.000000e+00> : vector<32x256xf32>
    %41 = tpu.matmul %4, %40, %cst {dimension_numbers = #tpu.dot_dimension_numbers<[1], [0], [0], [1], [0, 0, 1, 1], [], []>} : vector<32x288xbf16>, vector<288x256xbf16>, vector<32x256xf32> -> vector<32x256xf32>
    %42 = vector.broadcast %6 : vector<32x1xf32> to vector<32x256xf32>
    %43 = arith.addf %41, %42 : vector<32x256xf32>
    %cst_13 = arith.constant 0.000000e+00 : f32
    %44 = vector.broadcast %cst_13 : f32 to vector<32x256xf32>
    %45 = arith.maximumf %43, %44 : vector<32x256xf32>
    %c0_14 = arith.constant 0 : index
    %c1 = arith.constant 1 : index
    %c0_15 = arith.constant 0 : index
    %c0_16 = arith.constant 0 : index
    %46 = vector.load %arg4[%c0_14, %c1, %c0_15, %c0_16] : memref<1x4x32x288xbf16, #tpu.memory_space<vmem>>, vector<1x1x32x288xbf16>
    %47 = vector.shape_cast %46 : vector<1x1x32x288xbf16> to vector<32x288xbf16>
    %c0_17 = arith.constant 0 : index
    %c1_18 = arith.constant 1 : index
    %c0_19 = arith.constant 0 : index
    %c0_20 = arith.constant 0 : index
    %48 = vector.load %arg5[%c0_17, %c1_18, %c0_19, %c0_20] : memref<1x4x32x1xf32, #tpu.memory_space<vmem>>, vector<1x1x32x1xf32>
    %49 = vector.shape_cast %48 : vector<1x1x32x1xf32> to vector<32x1xf32>
    %c17_i32_21 = arith.constant 17 : i32
    %50 = tpu.dynamic_rotate %45 by %c17_i32_21 dim 1 : vector<32x256xf32>, i32 -> vector<32x256xf32>
    %51 = vector.extract_strided_slice %0 {offsets = [0, 0], sizes = [1, 256], strides = [1, 1]} : vector<9x256xf32> to vector<1x256xf32>
    %52 = vector.broadcast %51 : vector<1x256xf32> to vector<32x256xf32>
    %53 = arith.mulf %50, %52 : vector<32x256xf32>
    %c16_i32_22 = arith.constant 16 : i32
    %54 = tpu.dynamic_rotate %45 by %c16_i32_22 dim 1 : vector<32x256xf32>, i32 -> vector<32x256xf32>
    %55 = vector.extract_strided_slice %0 {offsets = [1, 0], sizes = [1, 256], strides = [1, 1]} : vector<9x256xf32> to vector<1x256xf32>
    %56 = vector.broadcast %55 : vector<1x256xf32> to vector<32x256xf32>
    %57 = arith.mulf %54, %56 : vector<32x256xf32>
    %c15_i32_23 = arith.constant 15 : i32
    %58 = tpu.dynamic_rotate %45 by %c15_i32_23 dim 1 : vector<32x256xf32>, i32 -> vector<32x256xf32>
    %59 = vector.extract_strided_slice %0 {offsets = [2, 0], sizes = [1, 256], strides = [1, 1]} : vector<9x256xf32> to vector<1x256xf32>
    %60 = vector.broadcast %59 : vector<1x256xf32> to vector<32x256xf32>
    %61 = arith.mulf %58, %60 : vector<32x256xf32>
    %c1_i32_24 = arith.constant 1 : i32
    %62 = tpu.dynamic_rotate %45 by %c1_i32_24 dim 1 : vector<32x256xf32>, i32 -> vector<32x256xf32>
    %63 = vector.extract_strided_slice %0 {offsets = [3, 0], sizes = [1, 256], strides = [1, 1]} : vector<9x256xf32> to vector<1x256xf32>
    %64 = vector.broadcast %63 : vector<1x256xf32> to vector<32x256xf32>
    %65 = arith.mulf %62, %64 : vector<32x256xf32>
    %c255_i32_25 = arith.constant 255 : i32
    %66 = tpu.dynamic_rotate %45 by %c255_i32_25 dim 1 : vector<32x256xf32>, i32 -> vector<32x256xf32>
    %67 = vector.extract_strided_slice %0 {offsets = [5, 0], sizes = [1, 256], strides = [1, 1]} : vector<9x256xf32> to vector<1x256xf32>
    %68 = vector.broadcast %67 : vector<1x256xf32> to vector<32x256xf32>
    %69 = arith.mulf %66, %68 : vector<32x256xf32>
    %c241_i32_26 = arith.constant 241 : i32
    %70 = tpu.dynamic_rotate %45 by %c241_i32_26 dim 1 : vector<32x256xf32>, i32 -> vector<32x256xf32>
    %71 = vector.extract_strided_slice %0 {offsets = [6, 0], sizes = [1, 256], strides = [1, 1]} : vector<9x256xf32> to vector<1x256xf32>
    %72 = vector.broadcast %71 : vector<1x256xf32> to vector<32x256xf32>
    %73 = arith.mulf %70, %72 : vector<32x256xf32>
    %c240_i32_27 = arith.constant 240 : i32
    %74 = tpu.dynamic_rotate %45 by %c240_i32_27 dim 1 : vector<32x256xf32>, i32 -> vector<32x256xf32>
    %75 = vector.extract_strided_slice %0 {offsets = [7, 0], sizes = [1, 256], strides = [1, 1]} : vector<9x256xf32> to vector<1x256xf32>
    %76 = vector.broadcast %75 : vector<1x256xf32> to vector<32x256xf32>
    %77 = arith.mulf %74, %76 : vector<32x256xf32>
    %c239_i32_28 = arith.constant 239 : i32
    %78 = tpu.dynamic_rotate %45 by %c239_i32_28 dim 1 : vector<32x256xf32>, i32 -> vector<32x256xf32>
    %79 = vector.extract_strided_slice %0 {offsets = [8, 0], sizes = [1, 256], strides = [1, 1]} : vector<9x256xf32> to vector<1x256xf32>
    %80 = vector.broadcast %79 : vector<1x256xf32> to vector<32x256xf32>
    %81 = arith.mulf %78, %80 : vector<32x256xf32>
    %82 = tpu.concatenate %53, %57, %61, %65, %45, %69, %73, %77, %81 in 0 : vector<32x256xf32>, vector<32x256xf32>, vector<32x256xf32>, vector<32x256xf32>, vector<32x256xf32>, vector<32x256xf32>, vector<32x256xf32>, vector<32x256xf32>, vector<32x256xf32> -> vector<288x256xf32>
    %83 = arith.truncf %82 : vector<288x256xf32> to vector<288x256xbf16>
    %cst_29 = arith.constant dense<0.000000e+00> : vector<32x256xf32>
    %84 = tpu.matmul %47, %83, %cst_29 {dimension_numbers = #tpu.dot_dimension_numbers<[1], [0], [0], [1], [0, 0, 1, 1], [], []>} : vector<32x288xbf16>, vector<288x256xbf16>, vector<32x256xf32> -> vector<32x256xf32>
    %85 = vector.broadcast %49 : vector<32x1xf32> to vector<32x256xf32>
    %86 = arith.addf %84, %85 : vector<32x256xf32>
    %87 = arith.addf %86, %2 : vector<32x256xf32>
    %c0_30 = arith.constant 0 : index
    %c2 = arith.constant 2 : index
    %c0_31 = arith.constant 0 : index
    %c0_32 = arith.constant 0 : index
    %88 = vector.load %arg4[%c0_30, %c2, %c0_31, %c0_32] : memref<1x4x32x288xbf16, #tpu.memory_space<vmem>>, vector<1x1x32x288xbf16>
    %89 = vector.shape_cast %88 : vector<1x1x32x288xbf16> to vector<32x288xbf16>
    %c0_33 = arith.constant 0 : index
    %c2_34 = arith.constant 2 : index
    %c0_35 = arith.constant 0 : index
    %c0_36 = arith.constant 0 : index
    %90 = vector.load %arg5[%c0_33, %c2_34, %c0_35, %c0_36] : memref<1x4x32x1xf32, #tpu.memory_space<vmem>>, vector<1x1x32x1xf32>
    %91 = vector.shape_cast %90 : vector<1x1x32x1xf32> to vector<32x1xf32>
    %c17_i32_37 = arith.constant 17 : i32
    %92 = tpu.dynamic_rotate %87 by %c17_i32_37 dim 1 : vector<32x256xf32>, i32 -> vector<32x256xf32>
    %93 = vector.extract_strided_slice %0 {offsets = [0, 0], sizes = [1, 256], strides = [1, 1]} : vector<9x256xf32> to vector<1x256xf32>
    %94 = vector.broadcast %93 : vector<1x256xf32> to vector<32x256xf32>
    %95 = arith.mulf %92, %94 : vector<32x256xf32>
    %c16_i32_38 = arith.constant 16 : i32
    %96 = tpu.dynamic_rotate %87 by %c16_i32_38 dim 1 : vector<32x256xf32>, i32 -> vector<32x256xf32>
    %97 = vector.extract_strided_slice %0 {offsets = [1, 0], sizes = [1, 256], strides = [1, 1]} : vector<9x256xf32> to vector<1x256xf32>
    %98 = vector.broadcast %97 : vector<1x256xf32> to vector<32x256xf32>
    %99 = arith.mulf %96, %98 : vector<32x256xf32>
    %c15_i32_39 = arith.constant 15 : i32
    %100 = tpu.dynamic_rotate %87 by %c15_i32_39 dim 1 : vector<32x256xf32>, i32 -> vector<32x256xf32>
    %101 = vector.extract_strided_slice %0 {offsets = [2, 0], sizes = [1, 256], strides = [1, 1]} : vector<9x256xf32> to vector<1x256xf32>
    %102 = vector.broadcast %101 : vector<1x256xf32> to vector<32x256xf32>
    %103 = arith.mulf %100, %102 : vector<32x256xf32>
    %c1_i32_40 = arith.constant 1 : i32
    %104 = tpu.dynamic_rotate %87 by %c1_i32_40 dim 1 : vector<32x256xf32>, i32 -> vector<32x256xf32>
    %105 = vector.extract_strided_slice %0 {offsets = [3, 0], sizes = [1, 256], strides = [1, 1]} : vector<9x256xf32> to vector<1x256xf32>
    %106 = vector.broadcast %105 : vector<1x256xf32> to vector<32x256xf32>
    %107 = arith.mulf %104, %106 : vector<32x256xf32>
    %c255_i32_41 = arith.constant 255 : i32
    %108 = tpu.dynamic_rotate %87 by %c255_i32_41 dim 1 : vector<32x256xf32>, i32 -> vector<32x256xf32>
    %109 = vector.extract_strided_slice %0 {offsets = [5, 0], sizes = [1, 256], strides = [1, 1]} : vector<9x256xf32> to vector<1x256xf32>
    %110 = vector.broadcast %109 : vector<1x256xf32> to vector<32x256xf32>
    %111 = arith.mulf %108, %110 : vector<32x256xf32>
    %c241_i32_42 = arith.constant 241 : i32
    %112 = tpu.dynamic_rotate %87 by %c241_i32_42 dim 1 : vector<32x256xf32>, i32 -> vector<32x256xf32>
    %113 = vector.extract_strided_slice %0 {offsets = [6, 0], sizes = [1, 256], strides = [1, 1]} : vector<9x256xf32> to vector<1x256xf32>
    %114 = vector.broadcast %113 : vector<1x256xf32> to vector<32x256xf32>
    %115 = arith.mulf %112, %114 : vector<32x256xf32>
    %c240_i32_43 = arith.constant 240 : i32
    %116 = tpu.dynamic_rotate %87 by %c240_i32_43 dim 1 : vector<32x256xf32>, i32 -> vector<32x256xf32>
    %117 = vector.extract_strided_slice %0 {offsets = [7, 0], sizes = [1, 256], strides = [1, 1]} : vector<9x256xf32> to vector<1x256xf32>
    %118 = vector.broadcast %117 : vector<1x256xf32> to vector<32x256xf32>
    %119 = arith.mulf %116, %118 : vector<32x256xf32>
    %c239_i32_44 = arith.constant 239 : i32
    %120 = tpu.dynamic_rotate %87 by %c239_i32_44 dim 1 : vector<32x256xf32>, i32 -> vector<32x256xf32>
    %121 = vector.extract_strided_slice %0 {offsets = [8, 0], sizes = [1, 256], strides = [1, 1]} : vector<9x256xf32> to vector<1x256xf32>
    %122 = vector.broadcast %121 : vector<1x256xf32> to vector<32x256xf32>
    %123 = arith.mulf %120, %122 : vector<32x256xf32>
    %124 = tpu.concatenate %95, %99, %103, %107, %87, %111, %115, %119, %123 in 0 : vector<32x256xf32>, vector<32x256xf32>, vector<32x256xf32>, vector<32x256xf32>, vector<32x256xf32>, vector<32x256xf32>, vector<32x256xf32>, vector<32x256xf32>, vector<32x256xf32> -> vector<288x256xf32>
    %125 = arith.truncf %124 : vector<288x256xf32> to vector<288x256xbf16>
    %cst_45 = arith.constant dense<0.000000e+00> : vector<32x256xf32>
    %126 = tpu.matmul %89, %125, %cst_45 {dimension_numbers = #tpu.dot_dimension_numbers<[1], [0], [0], [1], [0, 0, 1, 1], [], []>} : vector<32x288xbf16>, vector<288x256xbf16>, vector<32x256xf32> -> vector<32x256xf32>
    %127 = vector.broadcast %91 : vector<32x1xf32> to vector<32x256xf32>
    %128 = arith.addf %126, %127 : vector<32x256xf32>
    %cst_46 = arith.constant 0.000000e+00 : f32
    %129 = vector.broadcast %cst_46 : f32 to vector<32x256xf32>
    %130 = arith.maximumf %128, %129 : vector<32x256xf32>
    %c0_47 = arith.constant 0 : index
    %c3 = arith.constant 3 : index
    %c0_48 = arith.constant 0 : index
    %c0_49 = arith.constant 0 : index
    %131 = vector.load %arg4[%c0_47, %c3, %c0_48, %c0_49] : memref<1x4x32x288xbf16, #tpu.memory_space<vmem>>, vector<1x1x32x288xbf16>
    %132 = vector.shape_cast %131 : vector<1x1x32x288xbf16> to vector<32x288xbf16>
    %c0_50 = arith.constant 0 : index
    %c3_51 = arith.constant 3 : index
    %c0_52 = arith.constant 0 : index
    %c0_53 = arith.constant 0 : index
    %133 = vector.load %arg5[%c0_50, %c3_51, %c0_52, %c0_53] : memref<1x4x32x1xf32, #tpu.memory_space<vmem>>, vector<1x1x32x1xf32>
    %134 = vector.shape_cast %133 : vector<1x1x32x1xf32> to vector<32x1xf32>
    %c17_i32_54 = arith.constant 17 : i32
    %135 = tpu.dynamic_rotate %130 by %c17_i32_54 dim 1 : vector<32x256xf32>, i32 -> vector<32x256xf32>
    %136 = vector.extract_strided_slice %0 {offsets = [0, 0], sizes = [1, 256], strides = [1, 1]} : vector<9x256xf32> to vector<1x256xf32>
    %137 = vector.broadcast %136 : vector<1x256xf32> to vector<32x256xf32>
    %138 = arith.mulf %135, %137 : vector<32x256xf32>
    %c16_i32_55 = arith.constant 16 : i32
    %139 = tpu.dynamic_rotate %130 by %c16_i32_55 dim 1 : vector<32x256xf32>, i32 -> vector<32x256xf32>
    %140 = vector.extract_strided_slice %0 {offsets = [1, 0], sizes = [1, 256], strides = [1, 1]} : vector<9x256xf32> to vector<1x256xf32>
    %141 = vector.broadcast %140 : vector<1x256xf32> to vector<32x256xf32>
    %142 = arith.mulf %139, %141 : vector<32x256xf32>
    %c15_i32_56 = arith.constant 15 : i32
    %143 = tpu.dynamic_rotate %130 by %c15_i32_56 dim 1 : vector<32x256xf32>, i32 -> vector<32x256xf32>
    %144 = vector.extract_strided_slice %0 {offsets = [2, 0], sizes = [1, 256], strides = [1, 1]} : vector<9x256xf32> to vector<1x256xf32>
    %145 = vector.broadcast %144 : vector<1x256xf32> to vector<32x256xf32>
    %146 = arith.mulf %143, %145 : vector<32x256xf32>
    %c1_i32_57 = arith.constant 1 : i32
    %147 = tpu.dynamic_rotate %130 by %c1_i32_57 dim 1 : vector<32x256xf32>, i32 -> vector<32x256xf32>
    %148 = vector.extract_strided_slice %0 {offsets = [3, 0], sizes = [1, 256], strides = [1, 1]} : vector<9x256xf32> to vector<1x256xf32>
    %149 = vector.broadcast %148 : vector<1x256xf32> to vector<32x256xf32>
    %150 = arith.mulf %147, %149 : vector<32x256xf32>
    %c255_i32_58 = arith.constant 255 : i32
    %151 = tpu.dynamic_rotate %130 by %c255_i32_58 dim 1 : vector<32x256xf32>, i32 -> vector<32x256xf32>
    %152 = vector.extract_strided_slice %0 {offsets = [5, 0], sizes = [1, 256], strides = [1, 1]} : vector<9x256xf32> to vector<1x256xf32>
    %153 = vector.broadcast %152 : vector<1x256xf32> to vector<32x256xf32>
    %154 = arith.mulf %151, %153 : vector<32x256xf32>
    %c241_i32_59 = arith.constant 241 : i32
    %155 = tpu.dynamic_rotate %130 by %c241_i32_59 dim 1 : vector<32x256xf32>, i32 -> vector<32x256xf32>
    %156 = vector.extract_strided_slice %0 {offsets = [6, 0], sizes = [1, 256], strides = [1, 1]} : vector<9x256xf32> to vector<1x256xf32>
    %157 = vector.broadcast %156 : vector<1x256xf32> to vector<32x256xf32>
    %158 = arith.mulf %155, %157 : vector<32x256xf32>
    %c240_i32_60 = arith.constant 240 : i32
    %159 = tpu.dynamic_rotate %130 by %c240_i32_60 dim 1 : vector<32x256xf32>, i32 -> vector<32x256xf32>
    %160 = vector.extract_strided_slice %0 {offsets = [7, 0], sizes = [1, 256], strides = [1, 1]} : vector<9x256xf32> to vector<1x256xf32>
    %161 = vector.broadcast %160 : vector<1x256xf32> to vector<32x256xf32>
    %162 = arith.mulf %159, %161 : vector<32x256xf32>
    %c239_i32_61 = arith.constant 239 : i32
    %163 = tpu.dynamic_rotate %130 by %c239_i32_61 dim 1 : vector<32x256xf32>, i32 -> vector<32x256xf32>
    %164 = vector.extract_strided_slice %0 {offsets = [8, 0], sizes = [1, 256], strides = [1, 1]} : vector<9x256xf32> to vector<1x256xf32>
    %165 = vector.broadcast %164 : vector<1x256xf32> to vector<32x256xf32>
    %166 = arith.mulf %163, %165 : vector<32x256xf32>
    %167 = tpu.concatenate %138, %142, %146, %150, %130, %154, %158, %162, %166 in 0 : vector<32x256xf32>, vector<32x256xf32>, vector<32x256xf32>, vector<32x256xf32>, vector<32x256xf32>, vector<32x256xf32>, vector<32x256xf32>, vector<32x256xf32>, vector<32x256xf32> -> vector<288x256xf32>
    %168 = arith.truncf %167 : vector<288x256xf32> to vector<288x256xbf16>
    %cst_62 = arith.constant dense<0.000000e+00> : vector<32x256xf32>
    %169 = tpu.matmul %132, %168, %cst_62 {dimension_numbers = #tpu.dot_dimension_numbers<[1], [0], [0], [1], [0, 0, 1, 1], [], []>} : vector<32x288xbf16>, vector<288x256xbf16>, vector<32x256xf32> -> vector<32x256xf32>
    %170 = vector.broadcast %134 : vector<32x1xf32> to vector<32x256xf32>
    %171 = arith.addf %169, %170 : vector<32x256xf32>
    %172 = arith.addf %171, %87 : vector<32x256xf32>
    %c0_63 = arith.constant 0 : index
    %c0_64 = arith.constant 0 : index
    %c0_65 = arith.constant 0 : index
    %c0_66 = arith.constant 0 : index
    %173 = vector.load %arg6[%c0_63, %c0_64, %c0_65, %c0_66] : memref<1x1x32x256xf32, #tpu.memory_space<vmem>>, vector<1x1x32x256xf32>
    %174 = vector.shape_cast %173 : vector<1x1x32x256xf32> to vector<32x256xf32>
    %175 = vector.shape_cast %172 : vector<32x256xf32> to vector<1x1x32x256xf32>
    tpu.vector_store %arg6[%c0_63, %c0_64, %c0_65, %c0_66], %175 {strides = array<i32>} : memref<1x1x32x256xf32, #tpu.memory_space<vmem>>, vector<1x1x32x256xf32>,
    return
  }
  func.func @transform_0(%arg0: i32, %arg1: i32) -> (i32, i32) {
    %c0_i32 = arith.constant 0 : i32
    %c0_i32_0 = arith.constant 0 : i32
    %c0_i32_1 = arith.constant 0 : i32
    return %c0_i32, %c0_i32_0 : i32, i32
  }
  func.func @transform_1(%arg0: i32, %arg1: i32) -> (i32, i32, i32, i32) {
    %c0_i32 = arith.constant 0 : i32
    %c0_i32_0 = arith.constant 0 : i32
    %c0_i32_1 = arith.constant 0 : i32
    return %arg0, %arg1, %c0_i32, %c0_i32_0 : i32, i32, i32, i32
  }
  func.func @transform_2(%arg0: i32, %arg1: i32) -> (i32, i32, i32, i32) {
    %c0_i32 = arith.constant 0 : i32
    %c0_i32_0 = arith.constant 0 : i32
    %c0_i32_1 = arith.constant 0 : i32
    %c0_i32_2 = arith.constant 0 : i32
    return %arg0, %c0_i32, %c0_i32_0, %c0_i32_1 : i32, i32, i32, i32
  }
  func.func @transform_3(%arg0: i32, %arg1: i32) -> (i32, i32, i32, i32) {
    %c0_i32 = arith.constant 0 : i32
    %c0_i32_0 = arith.constant 0 : i32
    %c0_i32_1 = arith.constant 0 : i32
    %c0_i32_2 = arith.constant 0 : i32
    return %arg0, %c0_i32, %c0_i32_0, %c0_i32_1 : i32, i32, i32, i32
  }
  func.func @transform_4(%arg0: i32, %arg1: i32) -> (i32, i32, i32, i32) {
    %c0_i32 = arith.constant 0 : i32
    %c0_i32_0 = arith.constant 0 : i32
    %c0_i32_1 = arith.constant 0 : i32
    return %arg0, %arg1, %c0_i32, %c0_i32_0 : i32, i32, i32, i32
  }
}

module attributes {stable_mosaic.version = 11 : i64} {
  func.func @kernel(%arg0: i32, %arg1: i32, %arg2: memref<9x256xf32, #tpu.memory_space<vmem>>, %arg3: memref<1x1x32x256xf32, #tpu.memory_space<vmem>>, %arg4: memref<1x4x32x288xbf16, #tpu.memory_space<vmem>>, %arg5: memref<1x4x32x1xf32, #tpu.memory_space<vmem>>, %arg6: memref<1x1x32x256xf32, #tpu.memory_space<vmem>>) attributes {dimension_semantics = [#tpu.dimension_semantics<parallel>, #tpu.dimension_semantics<parallel>], iteration_bounds = array<i64: 1, 2>, scalar_prefetch = 0 : i64, scratch_operands = 0 : i64, tpu.core_type = #tpu.core_type<tc>, window_params = [{pipeline_mode = #tpu.pipeline_mode<synchronous>, transform_indices = @transform_0, window_bounds = array<i64: 9, 256>}, {transform_indices = @transform_1, window_bounds = array<i64: 1, 1, 32, 256>}, {transform_indices = @transform_2, window_bounds = array<i64: 1, 4, 32, 288>}, {transform_indices = @transform_3, window_bounds = array<i64: 1, 4, 32, 1>}, {transform_indices = @transform_4, window_bounds = array<i64: 1, 1, 32, 256>}]} {
    %c0 = arith.constant 0 : index
    %c0_0 = arith.constant 0 : index
    %0 = vector.load %arg2[%c0, %c0_0] : memref<9x256xf32, #tpu.memory_space<vmem>>, vector<9x256xf32>
    %c0_1 = arith.constant 0 : index
    %c0_2 = arith.constant 0 : index
    %c0_3 = arith.constant 0 : index
    %c0_4 = arith.constant 0 : index
    %1 = vector.load %arg3[%c0_1, %c0_2, %c0_3, %c0_4] : memref<1x1x32x256xf32, #tpu.memory_space<vmem>>, vector<1x1x32x256xf32>
    %2 = vector.shape_cast %1 : vector<1x1x32x256xf32> to vector<32x256xf32>
    %c0_5 = arith.constant 0 : index
    %c0_6 = arith.constant 0 : index
    %c0_7 = arith.constant 0 : index
    %c0_8 = arith.constant 0 : index
    %3 = vector.load %arg4[%c0_5, %c0_6, %c0_7, %c0_8] : memref<1x4x32x288xbf16, #tpu.memory_space<vmem>>, vector<1x1x32x288xbf16>
    %4 = vector.shape_cast %3 : vector<1x1x32x288xbf16> to vector<32x288xbf16>
    %c0_9 = arith.constant 0 : index
    %c0_10 = arith.constant 0 : index
    %c0_11 = arith.constant 0 : index
    %c0_12 = arith.constant 0 : index
    %5 = vector.load %arg5[%c0_9, %c0_10, %c0_11, %c0_12] : memref<1x4x32x1xf32, #tpu.memory_space<vmem>>, vector<1x1x32x1xf32>
    %6 = vector.shape_cast %5 : vector<1x1x32x1xf32> to vector<32x1xf32>
    %c17_i32 = arith.constant 17 : i32
    %7 = tpu.dynamic_rotate %2 by %c17_i32 dim 1 : vector<32x256xf32>, i32 -> vector<32x256xf32>
    %8 = vector.extract_strided_slice %0 {offsets = [0, 0], sizes = [1, 256], strides = [1, 1]} : vector<9x256xf32> to vector<1x256xf32>
    %9 = vector.broadcast %8 : vector<1x256xf32> to vector<32x256xf32>
    %10 = arith.mulf %7, %9 : vector<32x256xf32>
    %c16_i32 = arith.constant 16 : i32
    %11 = tpu.dynamic_rotate %2 by %c16_i32 dim 1 : vector<32x256xf32>, i32 -> vector<32x256xf32>
    %12 = vector.extract_strided_slice %0 {offsets = [1, 0], sizes = [1, 256], strides = [1, 1]} : vector<9x256xf32> to vector<1x256xf32>
    %13 = vector.broadcast %12 : vector<1x256xf32> to vector<32x256xf32>
    %14 = arith.mulf %11, %13 : vector<32x256xf32>
    %c15_i32 = arith.constant 15 : i32
    %15 = tpu.dynamic_rotate %2 by %c15_i32 dim 1 : vector<32x256xf32>, i32 -> vector<32x256xf32>
    %16 = vector.extract_strided_slice %0 {offsets = [2, 0], sizes = [1, 256], strides = [1, 1]} : vector<9x256xf32> to vector<1x256xf32>
    %17 = vector.broadcast %16 : vector<1x256xf32> to vector<32x256xf32>
    %18 = arith.mulf %15, %17 : vector<32x256xf32>
    %c1_i32 = arith.constant 1 : i32
    %19 = tpu.dynamic_rotate %2 by %c1_i32 dim 1 : vector<32x256xf32>, i32 -> vector<32x256xf32>
    %20 = vector.extract_strided_slice %0 {offsets = [3, 0], sizes = [1, 256], strides = [1, 1]} : vector<9x256xf32> to vector<1x256xf32>
    %21 = vector.broadcast %20 : vector<1x256xf32> to vector<32x256xf32>
    %22 = arith.mulf %19, %21 : vector<32x256xf32>
    %c255_i32 = arith.constant 255 : i32
    %23 = tpu.dynamic_rotate %2 by %c255_i32 dim 1 : vector<32x256xf32>, i32 -> vector<32x256xf32>
    %24 = vector.extract_strided_slice %0 {offsets = [5, 0], sizes = [1, 256], strides = [1, 1]} : vector<9x256xf32> to vector<1x256xf32>
    %25 = vector.broadcast %24 : vector<1x256xf32> to vector<32x256xf32>
    %26 = arith.mulf %23, %25 : vector<32x256xf32>
    %c241_i32 = arith.constant 241 : i32
    %27 = tpu.dynamic_rotate %2 by %c241_i32 dim 1 : vector<32x256xf32>, i32 -> vector<32x256xf32>
    %28 = vector.extract_strided_slice %0 {offsets = [6, 0], sizes = [1, 256], strides = [1, 1]} : vector<9x256xf32> to vector<1x256xf32>
    %29 = vector.broadcast %28 : vector<1x256xf32> to vector<32x256xf32>
    %30 = arith.mulf %27, %29 : vector<32x256xf32>
    %c240_i32 = arith.constant 240 : i32
    %31 = tpu.dynamic_rotate %2 by %c240_i32 dim 1 : vector<32x256xf32>, i32 -> vector<32x256xf32>
    %32 = vector.extract_strided_slice %0 {offsets = [7, 0], sizes = [1, 256], strides = [1, 1]} : vector<9x256xf32> to vector<1x256xf32>
    %33 = vector.broadcast %32 : vector<1x256xf32> to vector<32x256xf32>
    %34 = arith.mulf %31, %33 : vector<32x256xf32>
    %c239_i32 = arith.constant 239 : i32
    %35 = tpu.dynamic_rotate %2 by %c239_i32 dim 1 : vector<32x256xf32>, i32 -> vector<32x256xf32>
    %36 = vector.extract_strided_slice %0 {offsets = [8, 0], sizes = [1, 256], strides = [1, 1]} : vector<9x256xf32> to vector<1x256xf32>
    %37 = vector.broadcast %36 : vector<1x256xf32> to vector<32x256xf32>
    %38 = arith.mulf %35, %37 : vector<32x256xf32>
    %39 = tpu.concatenate %10, %14, %18, %22, %2, %26, %30, %34, %38 in 0 : vector<32x256xf32>, vector<32x256xf32>, vector<32x256xf32>, vector<32x256xf32>, vector<32x256xf32>, vector<32x256xf32>, vector<32x256xf32>, vector<32x256xf32>, vector<32x256xf32> -> vector<288x256xf32>
    %40 = arith.truncf %39 : vector<288x256xf32> to vector<288x256xbf16>
    %cst = arith.constant dense<0.000000e+00> : vector<32x256xf32>
    %41 = tpu.matmul %4, %40, %cst {dimension_numbers = #tpu.dot_dimension_numbers<[1], [0], [0], [1], [0, 0, 1, 1], [], []>} : vector<32x288xbf16>, vector<288x256xbf16>, vector<32x256xf32> -> vector<32x256xf32>
    %42 = vector.broadcast %6 : vector<32x1xf32> to vector<32x256xf32>
    %43 = arith.addf %41, %42 : vector<32x256xf32>
    %cst_13 = arith.constant 0.000000e+00 : f32
    %44 = vector.broadcast %cst_13 : f32 to vector<32x256xf32>
    %45 = arith.maximumf %43, %44 : vector<32x256xf32>
    %c0_14 = arith.constant 0 : index
    %c1 = arith.constant 1 : index
    %c0_15 = arith.constant 0 : index
    %c0_16 = arith.constant 0 : index
    %46 = vector.load %arg4[%c0_14, %c1, %c0_15, %c0_16] : memref<1x4x32x288xbf16, #tpu.memory_space<vmem>>, vector<1x1x32x288xbf16>
    %47 = vector.shape_cast %46 : vector<1x1x32x288xbf16> to vector<32x288xbf16>
    %c0_17 = arith.constant 0 : index
    %c1_18 = arith.constant 1 : index
    %c0_19 = arith.constant 0 : index
    %c0_20 = arith.constant 0 : index
    %48 = vector.load %arg5[%c0_17, %c1_18, %c0_19, %c0_20] : memref<1x4x32x1xf32, #tpu.memory_space<vmem>>, vector<1x1x32x1xf32>
    %49 = vector.shape_cast %48 : vector<1x1x32x1xf32> to vector<32x1xf32>
    %c17_i32_21 = arith.constant 17 : i32
    %50 = tpu.dynamic_rotate %45 by %c17_i32_21 dim 1 : vector<32x256xf32>, i32 -> vector<32x256xf32>
    %51 = vector.extract_strided_slice %0 {offsets = [0, 0], sizes = [1, 256], strides = [1, 1]} : vector<9x256xf32> to vector<1x256xf32>
    %52 = vector.broadcast %51 : vector<1x256xf32> to vector<32x256xf32>
    %53 = arith.mulf %50, %52 : vector<32x256xf32>
    %c16_i32_22 = arith.constant 16 : i32
    %54 = tpu.dynamic_rotate %45 by %c16_i32_22 dim 1 : vector<32x256xf32>, i32 -> vector<32x256xf32>
    %55 = vector.extract_strided_slice %0 {offsets = [1, 0], sizes = [1, 256], strides = [1, 1]} : vector<9x256xf32> to vector<1x256xf32>
    %56 = vector.broadcast %55 : vector<1x256xf32> to vector<32x256xf32>
    %57 = arith.mulf %54, %56 : vector<32x256xf32>
    %c15_i32_23 = arith.constant 15 : i32
    %58 = tpu.dynamic_rotate %45 by %c15_i32_23 dim 1 : vector<32x256xf32>, i32 -> vector<32x256xf32>
    %59 = vector.extract_strided_slice %0 {offsets = [2, 0], sizes = [1, 256], strides = [1, 1]} : vector<9x256xf32> to vector<1x256xf32>
    %60 = vector.broadcast %59 : vector<1x256xf32> to vector<32x256xf32>
    %61 = arith.mulf %58, %60 : vector<32x256xf32>
    %c1_i32_24 = arith.constant 1 : i32
    %62 = tpu.dynamic_rotate %45 by %c1_i32_24 dim 1 : vector<32x256xf32>, i32 -> vector<32x256xf32>
    %63 = vector.extract_strided_slice %0 {offsets = [3, 0], sizes = [1, 256], strides = [1, 1]} : vector<9x256xf32> to vector<1x256xf32>
    %64 = vector.broadcast %63 : vector<1x256xf32> to vector<32x256xf32>
    %65 = arith.mulf %62, %64 : vector<32x256xf32>
    %c255_i32_25 = arith.constant 255 : i32
    %66 = tpu.dynamic_rotate %45 by %c255_i32_25 dim 1 : vector<32x256xf32>, i32 -> vector<32x256xf32>
    %67 = vector.extract_strided_slice %0 {offsets = [5, 0], sizes = [1, 256], strides = [1, 1]} : vector<9x256xf32> to vector<1x256xf32>
    %68 = vector.broadcast %67 : vector<1x256xf32> to vector<32x256xf32>
    %69 = arith.mulf %66, %68 : vector<32x256xf32>
    %c241_i32_26 = arith.constant 241 : i32
    %70 = tpu.dynamic_rotate %45 by %c241_i32_26 dim 1 : vector<32x256xf32>, i32 -> vector<32x256xf32>
    %71 = vector.extract_strided_slice %0 {offsets = [6, 0], sizes = [1, 256], strides = [1, 1]} : vector<9x256xf32> to vector<1x256xf32>
    %72 = vector.broadcast %71 : vector<1x256xf32> to vector<32x256xf32>
    %73 = arith.mulf %70, %72 : vector<32x256xf32>
    %c240_i32_27 = arith.constant 240 : i32
    %74 = tpu.dynamic_rotate %45 by %c240_i32_27 dim 1 : vector<32x256xf32>, i32 -> vector<32x256xf32>
    %75 = vector.extract_strided_slice %0 {offsets = [7, 0], sizes = [1, 256], strides = [1, 1]} : vector<9x256xf32> to vector<1x256xf32>
    %76 = vector.broadcast %75 : vector<1x256xf32> to vector<32x256xf32>
    %77 = arith.mulf %74, %76 : vector<32x256xf32>
    %c239_i32_28 = arith.constant 239 : i32
    %78 = tpu.dynamic_rotate %45 by %c239_i32_28 dim 1 : vector<32x256xf32>, i32 -> vector<32x256xf32>
    %79 = vector.extract_strided_slice %0 {offsets = [8, 0], sizes = [1, 256], strides = [1, 1]} : vector<9x256xf32> to vector<1x256xf32>
    %80 = vector.broadcast %79 : vector<1x256xf32> to vector<32x256xf32>
    %81 = arith.mulf %78, %80 : vector<32x256xf32>
    %82 = tpu.concatenate %53, %57, %61, %65, %45, %69, %73, %77, %81 in 0 : vector<32x256xf32>, vector<32x256xf32>, vector<32x256xf32>, vector<32x256xf32>, vector<32x256xf32>, vector<32x256xf32>, vector<32x256xf32>, vector<32x256xf32>, vector<32x256xf32> -> vector<288x256xf32>
    %83 = arith.truncf %82 : vector<288x256xf32> to vector<288x256xbf16>
    %cst_29 = arith.constant dense<0.000000e+00> : vector<32x256xf32>
    %84 = tpu.matmul %47, %83, %cst_29 {dimension_numbers = #tpu.dot_dimension_numbers<[1], [0], [0], [1], [0, 0, 1, 1], [], []>} : vector<32x288xbf16>, vector<288x256xbf16>, vector<32x256xf32> -> vector<32x256xf32>
    %85 = vector.broadcast %49 : vector<32x1xf32> to vector<32x256xf32>
    %86 = arith.addf %84, %85 : vector<32x256xf32>
    %87 = arith.addf %86, %2 : vector<32x256xf32>
    %c0_30 = arith.constant 0 : index
    %c2 = arith.constant 2 : index
    %c0_31 = arith.constant 0 : index
    %c0_32 = arith.constant 0 : index
    %88 = vector.load %arg4[%c0_30, %c2, %c0_31, %c0_32] : memref<1x4x32x288xbf16, #tpu.memory_space<vmem>>, vector<1x1x32x288xbf16>
    %89 = vector.shape_cast %88 : vector<1x1x32x288xbf16> to vector<32x288xbf16>
    %c0_33 = arith.constant 0 : index
    %c2_34 = arith.constant 2 : index
    %c0_35 = arith.constant 0 : index
    %c0_36 = arith.constant 0 : index
    %90 = vector.load %arg5[%c0_33, %c2_34, %c0_35, %c0_36] : memref<1x4x32x1xf32, #tpu.memory_space<vmem>>, vector<1x1x32x1xf32>
    %91 = vector.shape_cast %90 : vector<1x1x32x1xf32> to vector<32x1xf32>
    %c17_i32_37 = arith.constant 17 : i32
    %92 = tpu.dynamic_rotate %87 by %c17_i32_37 dim 1 : vector<32x256xf32>, i32 -> vector<32x256xf32>
    %93 = vector.extract_strided_slice %0 {offsets = [0, 0], sizes = [1, 256], strides = [1, 1]} : vector<9x256xf32> to vector<1x256xf32>
    %94 = vector.broadcast %93 : vector<1x256xf32> to vector<32x256xf32>
    %95 = arith.mulf %92, %94 : vector<32x256xf32>
    %c16_i32_38 = arith.constant 16 : i32
    %96 = tpu.dynamic_rotate %87 by %c16_i32_38 dim 1 : vector<32x256xf32>, i32 -> vector<32x256xf32>
    %97 = vector.extract_strided_slice %0 {offsets = [1, 0], sizes = [1, 256], strides = [1, 1]} : vector<9x256xf32> to vector<1x256xf32>
    %98 = vector.broadcast %97 : vector<1x256xf32> to vector<32x256xf32>
    %99 = arith.mulf %96, %98 : vector<32x256xf32>
    %c15_i32_39 = arith.constant 15 : i32
    %100 = tpu.dynamic_rotate %87 by %c15_i32_39 dim 1 : vector<32x256xf32>, i32 -> vector<32x256xf32>
    %101 = vector.extract_strided_slice %0 {offsets = [2, 0], sizes = [1, 256], strides = [1, 1]} : vector<9x256xf32> to vector<1x256xf32>
    %102 = vector.broadcast %101 : vector<1x256xf32> to vector<32x256xf32>
    %103 = arith.mulf %100, %102 : vector<32x256xf32>
    %c1_i32_40 = arith.constant 1 : i32
    %104 = tpu.dynamic_rotate %87 by %c1_i32_40 dim 1 : vector<32x256xf32>, i32 -> vector<32x256xf32>
    %105 = vector.extract_strided_slice %0 {offsets = [3, 0], sizes = [1, 256], strides = [1, 1]} : vector<9x256xf32> to vector<1x256xf32>
    %106 = vector.broadcast %105 : vector<1x256xf32> to vector<32x256xf32>
    %107 = arith.mulf %104, %106 : vector<32x256xf32>
    %c255_i32_41 = arith.constant 255 : i32
    %108 = tpu.dynamic_rotate %87 by %c255_i32_41 dim 1 : vector<32x256xf32>, i32 -> vector<32x256xf32>
    %109 = vector.extract_strided_slice %0 {offsets = [5, 0], sizes = [1, 256], strides = [1, 1]} : vector<9x256xf32> to vector<1x256xf32>
    %110 = vector.broadcast %109 : vector<1x256xf32> to vector<32x256xf32>
    %111 = arith.mulf %108, %110 : vector<32x256xf32>
    %c241_i32_42 = arith.constant 241 : i32
    %112 = tpu.dynamic_rotate %87 by %c241_i32_42 dim 1 : vector<32x256xf32>, i32 -> vector<32x256xf32>
    %113 = vector.extract_strided_slice %0 {offsets = [6, 0], sizes = [1, 256], strides = [1, 1]} : vector<9x256xf32> to vector<1x256xf32>
    %114 = vector.broadcast %113 : vector<1x256xf32> to vector<32x256xf32>
    %115 = arith.mulf %112, %114 : vector<32x256xf32>
    %c240_i32_43 = arith.constant 240 : i32
    %116 = tpu.dynamic_rotate %87 by %c240_i32_43 dim 1 : vector<32x256xf32>, i32 -> vector<32x256xf32>
    %117 = vector.extract_strided_slice %0 {offsets = [7, 0], sizes = [1, 256], strides = [1, 1]} : vector<9x256xf32> to vector<1x256xf32>
    %118 = vector.broadcast %117 : vector<1x256xf32> to vector<32x256xf32>
    %119 = arith.mulf %116, %118 : vector<32x256xf32>
    %c239_i32_44 = arith.constant 239 : i32
    %120 = tpu.dynamic_rotate %87 by %c239_i32_44 dim 1 : vector<32x256xf32>, i32 -> vector<32x256xf32>
    %121 = vector.extract_strided_slice %0 {offsets = [8, 0], sizes = [1, 256], strides = [1, 1]} : vector<9x256xf32> to vector<1x256xf32>
    %122 = vector.broadcast %121 : vector<1x256xf32> to vector<32x256xf32>
    %123 = arith.mulf %120, %122 : vector<32x256xf32>
    %124 = tpu.concatenate %95, %99, %103, %107, %87, %111, %115, %119, %123 in 0 : vector<32x256xf32>, vector<32x256xf32>, vector<32x256xf32>, vector<32x256xf32>, vector<32x256xf32>, vector<32x256xf32>, vector<32x256xf32>, vector<32x256xf32>, vector<32x256xf32> -> vector<288x256xf32>
    %125 = arith.truncf %124 : vector<288x256xf32> to vector<288x256xbf16>
    %cst_45 = arith.constant dense<0.000000e+00> : vector<32x256xf32>
    %126 = tpu.matmul %89, %125, %cst_45 {dimension_numbers = #tpu.dot_dimension_numbers<[1], [0], [0], [1], [0, 0, 1, 1], [], []>} : vector<32x288xbf16>, vector<288x256xbf16>, vector<32x256xf32> -> vector<32x256xf32>
    %127 = vector.broadcast %91 : vector<32x1xf32> to vector<32x256xf32>
    %128 = arith.addf %126, %127 : vector<32x256xf32>
    %cst_46 = arith.constant 0.000000e+00 : f32
    %129 = vector.broadcast %cst_46 : f32 to vector<32x256xf32>
    %130 = arith.maximumf %128, %129 : vector<32x256xf32>
    %c0_47 = arith.constant 0 : index
    %c3 = arith.constant 3 : index
    %c0_48 = arith.constant 0 : index
    %c0_49 = arith.constant 0 : index
    %131 = vector.load %arg4[%c0_47, %c3, %c0_48, %c0_49] : memref<1x4x32x288xbf16, #tpu.memory_space<vmem>>, vector<1x1x32x288xbf16>
    %132 = vector.shape_cast %131 : vector<1x1x32x288xbf16> to vector<32x288xbf16>
    %c0_50 = arith.constant 0 : index
    %c3_51 = arith.constant 3 : index
    %c0_52 = arith.constant 0 : index
    %c0_53 = arith.constant 0 : index
    %133 = vector.load %arg5[%c0_50, %c3_51, %c0_52, %c0_53] : memref<1x4x32x1xf32, #tpu.memory_space<vmem>>, vector<1x1x32x1xf32>
    %134 = vector.shape_cast %133 : vector<1x1x32x1xf32> to vector<32x1xf32>
    %c17_i32_54 = arith.constant 17 : i32
    %135 = tpu.dynamic_rotate %130 by %c17_i32_54 dim 1 : vector<32x256xf32>, i32 -> vector<32x256xf32>
    %136 = vector.extract_strided_slice %0 {offsets = [0, 0], sizes = [1, 256], strides = [1, 1]} : vector<9x256xf32> to vector<1x256xf32>
    %137 = vector.broadcast %136 : vector<1x256xf32> to vector<32x256xf32>
    %138 = arith.mulf %135, %137 : vector<32x256xf32>
    %c16_i32_55 = arith.constant 16 : i32
    %139 = tpu.dynamic_rotate %130 by %c16_i32_55 dim 1 : vector<32x256xf32>, i32 -> vector<32x256xf32>
    %140 = vector.extract_strided_slice %0 {offsets = [1, 0], sizes = [1, 256], strides = [1, 1]} : vector<9x256xf32> to vector<1x256xf32>
    %141 = vector.broadcast %140 : vector<1x256xf32> to vector<32x256xf32>
    %142 = arith.mulf %139, %141 : vector<32x256xf32>
    %c15_i32_56 = arith.constant 15 : i32
    %143 = tpu.dynamic_rotate %130 by %c15_i32_56 dim 1 : vector<32x256xf32>, i32 -> vector<32x256xf32>
    %144 = vector.extract_strided_slice %0 {offsets = [2, 0], sizes = [1, 256], strides = [1, 1]} : vector<9x256xf32> to vector<1x256xf32>
    %145 = vector.broadcast %144 : vector<1x256xf32> to vector<32x256xf32>
    %146 = arith.mulf %143, %145 : vector<32x256xf32>
    %c1_i32_57 = arith.constant 1 : i32
    %147 = tpu.dynamic_rotate %130 by %c1_i32_57 dim 1 : vector<32x256xf32>, i32 -> vector<32x256xf32>
    %148 = vector.extract_strided_slice %0 {offsets = [3, 0], sizes = [1, 256], strides = [1, 1]} : vector<9x256xf32> to vector<1x256xf32>
    %149 = vector.broadcast %148 : vector<1x256xf32> to vector<32x256xf32>
    %150 = arith.mulf %147, %149 : vector<32x256xf32>
    %c255_i32_58 = arith.constant 255 : i32
    %151 = tpu.dynamic_rotate %130 by %c255_i32_58 dim 1 : vector<32x256xf32>, i32 -> vector<32x256xf32>
    %152 = vector.extract_strided_slice %0 {offsets = [5, 0], sizes = [1, 256], strides = [1, 1]} : vector<9x256xf32> to vector<1x256xf32>
    %153 = vector.broadcast %152 : vector<1x256xf32> to vector<32x256xf32>
    %154 = arith.mulf %151, %153 : vector<32x256xf32>
    %c241_i32_59 = arith.constant 241 : i32
    %155 = tpu.dynamic_rotate %130 by %c241_i32_59 dim 1 : vector<32x256xf32>, i32 -> vector<32x256xf32>
    %156 = vector.extract_strided_slice %0 {offsets = [6, 0], sizes = [1, 256], strides = [1, 1]} : vector<9x256xf32> to vector<1x256xf32>
    %157 = vector.broadcast %156 : vector<1x256xf32> to vector<32x256xf32>
    %158 = arith.mulf %155, %157 : vector<32x256xf32>
    %c240_i32_60 = arith.constant 240 : i32
    %159 = tpu.dynamic_rotate %130 by %c240_i32_60 dim 1 : vector<32x256xf32>, i32 -> vector<32x256xf32>
    %160 = vector.extract_strided_slice %0 {offsets = [7, 0], sizes = [1, 256], strides = [1, 1]} : vector<9x256xf32> to vector<1x256xf32>
    %161 = vector.broadcast %160 : vector<1x256xf32> to vector<32x256xf32>
    %162 = arith.mulf %159, %161 : vector<32x256xf32>
    %c239_i32_61 = arith.constant 239 : i32
    %163 = tpu.dynamic_rotate %130 by %c239_i32_61 dim 1 : vector<32x256xf32>, i32 -> vector<32x256xf32>
    %164 = vector.extract_strided_slice %0 {offsets = [8, 0], sizes = [1, 256], strides = [1, 1]} : vector<9x256xf32> to vector<1x256xf32>
    %165 = vector.broadcast %164 : vector<1x256xf32> to vector<32x256xf32>
    %166 = arith.mulf %163, %165 : vector<32x256xf32>
    %167 = tpu.concatenate %138, %142, %146, %150, %130, %154, %158, %162, %166 in 0 : vector<32x256xf32>, vector<32x256xf32>, vector<32x256xf32>, vector<32x256xf32>, vector<32x256xf32>, vector<32x256xf32>, vector<32x256xf32>, vector<32x256xf32>, vector<32x256xf32> -> vector<288x256xf32>
    %168 = arith.truncf %167 : vector<288x256xf32> to vector<288x256xbf16>
    %cst_62 = arith.constant dense<0.000000e+00> : vector<32x256xf32>
    %169 = tpu.matmul %132, %168, %cst_62 {dimension_numbers = #tpu.dot_dimension_numbers<[1], [0], [0], [1], [0, 0, 1, 1], [], []>} : vector<32x288xbf16>, vector<288x256xbf16>, vector<32x256xf32> -> vector<32x256xf32>
    %170 = vector.broadcast %134 : vector<32x1xf32> to vector<32x256xf32>
    %171 = arith.addf %169, %170 : vector<32x256xf32>
    %172 = arith.addf %171, %87 : vector<32x256xf32>
    %cst_63 = arith.constant 0.000000e+00 : f32
    %173 = vector.broadcast %cst_63 : f32 to vector<32x256xf32>
    %174 = arith.cmpf oge, %172, %173 : vector<32x256xf32>
    %cst_64 = arith.constant 2.000000e-01 : f32
    %175 = vector.broadcast %cst_64 : f32 to vector<32x256xf32>
    %176 = arith.mulf %175, %172 : vector<32x256xf32>
    %177 = arith.select %174, %172, %176 : vector<32x256xi1>, vector<32x256xf32>
    %c0_65 = arith.constant 0 : index
    %c0_66 = arith.constant 0 : index
    %c0_67 = arith.constant 0 : index
    %c0_68 = arith.constant 0 : index
    %178 = vector.load %arg6[%c0_65, %c0_66, %c0_67, %c0_68] : memref<1x1x32x256xf32, #tpu.memory_space<vmem>>, vector<1x1x32x256xf32>
    %179 = vector.shape_cast %178 : vector<1x1x32x256xf32> to vector<32x256xf32>
    %180 = vector.shape_cast %177 : vector<32x256xf32> to vector<1x1x32x256xf32>
    tpu.vector_store %arg6[%c0_65, %c0_66, %c0_67, %c0_68], %180 {strides = array<i32>} : memref<1x1x32x256xf32, #tpu.memory_space<vmem>>, vector<1x1x32x256xf32>,
    return
  }
  func.func @transform_0(%arg0: i32, %arg1: i32) -> (i32, i32) {
    %c0_i32 = arith.constant 0 : i32
    %c0_i32_0 = arith.constant 0 : i32
    %c0_i32_1 = arith.constant 0 : i32
    return %c0_i32, %c0_i32_0 : i32, i32
  }
  func.func @transform_1(%arg0: i32, %arg1: i32) -> (i32, i32, i32, i32) {
    %c0_i32 = arith.constant 0 : i32
    %c0_i32_0 = arith.constant 0 : i32
    %c0_i32_1 = arith.constant 0 : i32
    return %arg0, %arg1, %c0_i32, %c0_i32_0 : i32, i32, i32, i32
  }
  func.func @transform_2(%arg0: i32, %arg1: i32) -> (i32, i32, i32, i32) {
    %c0_i32 = arith.constant 0 : i32
    %c0_i32_0 = arith.constant 0 : i32
    %c0_i32_1 = arith.constant 0 : i32
    %c0_i32_2 = arith.constant 0 : i32
    return %arg0, %c0_i32, %c0_i32_0, %c0_i32_1 : i32, i32, i32, i32
  }
  func.func @transform_3(%arg0: i32, %arg1: i32) -> (i32, i32, i32, i32) {
    %c0_i32 = arith.constant 0 : i32
    %c0_i32_0 = arith.constant 0 : i32
    %c0_i32_1 = arith.constant 0 : i32
    %c0_i32_2 = arith.constant 0 : i32
    return %arg0, %c0_i32, %c0_i32_0, %c0_i32_1 : i32, i32, i32, i32
  }
  func.func @transform_4(%arg0: i32, %arg1: i32) -> (i32, i32, i32, i32) {
    %c0_i32 = arith.constant 0 : i32
    %c0_i32_0 = arith.constant 0 : i32
    %c0_i32_1 = arith.constant 0 : i32
    return %arg0, %arg1, %c0_i32, %c0_i32_0 : i32, i32, i32, i32
  }
}

</mosaic_0001>

<bundles_post_ra>
// kernel: _lambda_.3
= control target key start
LH: loop header
LB: loop body
LE: loop exit
PB: predicated region body
PF: predicated region fallthrough
CT: control target
= control target key end

     0   :  { %s2710_s15 = smov 0   ;;  %s2712_s16 = smov 0   ;;  %s4538_s0 = inlined_call_operand.vmem [shape: f32[9,256], index: 0, kind: input, shape index: {}]   ;;  %s4539_s1 = inlined_call_operand.vmem [shape: f32[2,2,32,256], index: 1, kind: input, shape index: {}]   ;;  %s4540_s2 = inlined_call_operand.vmem [shape: bf16[2,4,32,288], index: 2, kind: input, shape index: {}]   ;;  %s4541_s3 = inlined_call_operand.vmem [shape: f32[2,4,32,1], index: 3, kind: input, shape index: {}]   ;;  %s4542_s4 = inlined_call_operand.vmem [shape: f32[2,2,32,256], index: 4, kind: output, shape index: {}]  }
   0x1   :  { %s2714_s17 = smov 0   ;;  %s2716_s18 = smov 0  }
   0x2   :  { %s2718_s19 = smov 0  }
   0x3 LB: > { %s23_s20 = sadd.s32 1, %s2666_s17  ;;  %s26_s21 = sadd.s32 1, %s2670_s18  ;;  %s2674_s19 = sphi %s2718_s19, %s14_s19   ;;  %s2670_s18 = sphi %s2716_s18, %s4561_s18   ;;  %s2666_s17 = sphi %s2714_s17, %s4560_s17   ;;  %s2662_s16 = sphi %s2712_s16, %s4559_s16   ;;  %s2658_s15 = sphi %s2710_s15, %s4558_s15  }
   0x4   : > { %p24_p0 = scmp.ge.s32.totalorder %s23_s20, 2  ;;  %p2395_p1 = scmp.ge.s32.totalorder %s2674_s19, 1 }
   0x5   : > { %p202_p2 = scmp.lt.s32.totalorder %s2674_s19, 5 }
   0x6   : > { %s4563_s20 = smov (%p24_p0, %s23_s20), 0  ;;  %s4565_s21 = smov (!%p24_p0, %s26_s21), %s2670_s18 }
   0x7   : > { %p203_p3 = pnand %p2395_p1, %p202_p2  ;;  %p28_p4 = scmp.ge.s32.totalorder %s4565_s21, 2 }
   0x9   : > { %s4567_s21 = smov (%p28_p4, %s4565_s21), 0  ;;  %206 = sbr.rel (%p203_p3) target bundleno = 1899 (0x76b), region = 36 }
  0x10   : > { %p246_p5 = scmp.lt.s32.totalorder %s2662_s16, 1  ;;  %p248_p6 = scmp.lt.s32.totalorder %s2658_s15, 1  ;;  %v315_v9 = vlaneseq  ;;  %v2908_v13 = vld [vmem:[%s4538_s0 + $0x8] sm:$0xff]  ;;  %v2914_v14 = vld [vmem:[%s4538_s0] sm:$0xff]  ;;  %v4543_v23 = vmov 0   ;;  %vm715_vm8 = vcmask 261120  }
  0x11   : > { %s2676_s7 = smov 17   ;;  %s2677_s8 = smov 16   ;;  %2593 = vset.pattern.permute.xlu1 %v4543_v23  ;;  %2592 = vset.pattern.permute.xlu0 %v4543_v23 }
  0x12   : > { %s4569_s16 = smov (!%p246_p5, %s2662_s16), 1  ;;  %s4571_s15 = smov (!%p248_p6, %s2658_s15), 1  ;;  %v2892_v10 = vshrl.u32 %v315_v9, 7  ;;  %v2898_v11 = vand.u32 127, %v315_v9 }
  0x13   : > { %s2397_s22 = sshll.u32 %s4569_s16, 4  ;;  %s2542_s23 = smul.u32 192, %s4569_s16 }
  0x14   : > { %s2396_s24 = sshll.u32 %s4571_s15, 3  ;;  %s2678_s9 = smov 15   ;;  %v328_v12 = vsub.s32 0, %v2892_v10  ;;  %vm317_vm0 = vcmp.lt.s32.totalorder %v2898_v11, 17  ;;  %v369_v36 = vsub.s32 1, %v2892_v10  ;;  %vm358_vm1 = vcmp.lt.s32.totalorder %v2898_v11, 16 }
  0x15   : > { %s2744_s25 = sadd.s32 %s2397_s22, %s2396_s24  ;;  %s2749_s28 = scalar_lea.vmem %s4540_s2, %s2542_s23  ;;  %vm399_vm2 = vcmp.lt.s32.totalorder %v2898_v11, 15  ;;  %vm440_vm3 = vcmp.lt.s32.totalorder %v2898_v11, 1  ;;  %vm481_vm4 = vcmp.lt.s32.totalorder %v2898_v11, 127  ;;  %vm522_vm5 = vcmp.lt.s32.totalorder %v2898_v11, 113 }
  0x16   : > { %s2398_s29 = sshll.u32 %s2744_s25, 3  ;;  %s2679_s10 = smov 1   ;;  %v2596_v8 = vld [vmem:[%s2749_s28 + $0x4] ss:$12 sps:$4 sm:$0xff]   ;;  %v2917_v17 = vrot.slane %v2908_v13, %v328_v12  ;;  %v2926_v19 = vrot.slane %v2914_v14, %v328_v12  ;;  %v2973_v53 = vrot.slane %v2914_v14, %v369_v36  ;;  %v2976_v54 = vrot.slane %v2908_v13, %v369_v36 }
  0x17   : > { %s2757_s6 = scalar_lea.vmem %s4539_s1, %s2398_s29  ;;  %s2680_s11 = smov 127   ;;  %754 = vmatprep.mubr.bf16.mxu0 %v2596_v8  ;;  %vm563_vm6 = vcmp.lt.s32.totalorder %v2898_v11, 112  ;;  %vm604_vm7 = vcmp.lt.s32.totalorder %v2898_v11, 111  ;;  %v2625_v11 = vld [vmem:[%s2749_s28 + $0xb0] ss:$12 sps:$4 sm:$0xff]  }
  0x18   : > { %v2760_v0 = vld [vmem:[%s2757_s6 + $0x8] sm:$0xff]  ;;  %v2763_v1 = vld [vmem:[%s2757_s6] sm:$0xff]  ;;  %v2770_v2 = vld [vmem:[%s2757_s6 + $0x18] sm:$0xff]  ;;  %s2681_s12 = smov 113   ;;  %s2682_s13 = smov 112  }
  0x19   : > { %307 = vrot.lane.b32.xlu1 %v2760_v0, %s2676_s7  ;;  %299 = vrot.lane.b32.xlu0 %v2763_v1, %s2676_s7  ;;  %v2773_v3 = vld [vmem:[%s2757_s6 + $0x10] sm:$0xff]  ;;  %v2779_v5 = vld [vmem:[%s2757_s6 + $0x20] sm:$0xff]  ;;  %s2683_s14 = smov 111   ;;  %s2477_s26 = sshll.u32 %s4569_s16, 7 }
  0x1a   : > { %v2776_v4 = vld [vmem:[%s2757_s6 + $0x30] sm:$0xff]  ;;  %v2786_v6 = vld [vmem:[%s2757_s6 + $0x38] sm:$0xff]  ;;  %v2789_v7 = vld [vmem:[%s2757_s6 + $0x28] sm:$0xff]  ;;  %s2952_s5 = scalar_lea.vmem %s4541_s3, %s2477_s26 }
  0x1b   : > { %v296_v45 = vld [vmem:[%s2952_s5 + $0x8] sm:$0xff]  ;;  %v295_v46 = vld [vmem:[%s2952_s5] sm:$0xff]  ;;  %v297_v51 = vld [vmem:[%s2952_s5 + $0x10] sm:$0xff] }
  0x1c   : > { %v298_v52 = vld [vmem:[%s2952_s5 + $0x18] sm:$0xff] }
  0x1d   : > { %309 = vrot.lane.b32.xlu1 %v2770_v2, %s2676_s7  ;;  %301 = vrot.lane.b32.xlu0 %v2773_v3, %s2676_s7 }
  0x21   : > { %305 = vrot.lane.b32.xlu1 %v2776_v4, %s2676_s7  ;;  %303 = vrot.lane.b32.xlu0 %v2779_v5, %s2676_s7 }
  0x25   : > { %313 = vrot.lane.b32.xlu1 %v2786_v6, %s2676_s7  ;;  %311 = vrot.lane.b32.xlu0 %v2789_v7, %s2676_s7 }
  0x29   : > { %344 = vrot.lane.b32.xlu1 %v2773_v3, %s2677_s8  ;;  %342 = vrot.lane.b32.xlu0 %v2763_v1, %s2677_s8 }
  0x2d   : > { %352 = vrot.lane.b32.xlu1 %v2770_v2, %s2677_s8  ;;  %350 = vrot.lane.b32.xlu0 %v2760_v0, %s2677_s8 }
  0x31   : > { %348 = vrot.lane.b32.xlu1 %v2776_v4, %s2677_s8  ;;  %346 = vrot.lane.b32.xlu0 %v2779_v5, %s2677_s8 }
  0x35   : > { %356 = vrot.lane.b32.xlu1 %v2786_v6, %s2677_s8  ;;  %354 = vrot.lane.b32.xlu0 %v2789_v7, %s2677_s8 }
  0x39   : > { %385 = vrot.lane.b32.xlu1 %v2773_v3, %s2678_s9  ;;  %383 = vrot.lane.b32.xlu0 %v2763_v1, %s2678_s9 }
  0x3d   : > { %393 = vrot.lane.b32.xlu1 %v2770_v2, %s2678_s9  ;;  %391 = vrot.lane.b32.xlu0 %v2760_v0, %s2678_s9 }
  0x41   : > { %389 = vrot.lane.b32.xlu1 %v2776_v4, %s2678_s9  ;;  %387 = vrot.lane.b32.xlu0 %v2779_v5, %s2678_s9 }
  0x45   : > { %397 = vrot.lane.b32.xlu1 %v2786_v6, %s2678_s9  ;;  %395 = vrot.lane.b32.xlu0 %v2789_v7, %s2678_s9 }
  0x49   : > { %426 = vrot.lane.b32.xlu1 %v2773_v3, %s2679_s10  ;;  %424 = vrot.lane.b32.xlu0 %v2763_v1, %s2679_s10 }
  0x4d   : > { %434 = vrot.lane.b32.xlu1 %v2770_v2, %s2679_s10  ;;  %432 = vrot.lane.b32.xlu0 %v2760_v0, %s2679_s10 }
  0x51   : > { %430 = vrot.lane.b32.xlu1 %v2776_v4, %s2679_s10  ;;  %428 = vrot.lane.b32.xlu0 %v2779_v5, %s2679_s10 }
  0x55   : > { %438 = vrot.lane.b32.xlu1 %v2786_v6, %s2679_s10  ;;  %436 = vrot.lane.b32.xlu0 %v2789_v7, %s2679_s10 }
  0x59   : > { %467 = vrot.lane.b32.xlu1 %v2773_v3, %s2680_s11  ;;  %465 = vrot.lane.b32.xlu0 %v2763_v1, %s2680_s11 }
  0x5d   : > { %475 = vrot.lane.b32.xlu1 %v2770_v2, %s2680_s11  ;;  %473 = vrot.lane.b32.xlu0 %v2760_v0, %s2680_s11 }
  0x61   : > { %471 = vrot.lane.b32.xlu1 %v2776_v4, %s2680_s11  ;;  %469 = vrot.lane.b32.xlu0 %v2779_v5, %s2680_s11 }
  0x65   : > { %479 = vrot.lane.b32.xlu1 %v2786_v6, %s2680_s11  ;;  %477 = vrot.lane.b32.xlu0 %v2789_v7, %s2680_s11 }
  0x69   : > { %508 = vrot.lane.b32.xlu1 %v2773_v3, %s2681_s12  ;;  %506 = vrot.lane.b32.xlu0 %v2763_v1, %s2681_s12 }
  0x6d   : > { %516 = vrot.lane.b32.xlu1 %v2770_v2, %s2681_s12  ;;  %514 = vrot.lane.b32.xlu0 %v2760_v0, %s2681_s12 }
  0x71   : > { %512 = vrot.lane.b32.xlu1 %v2776_v4, %s2681_s12  ;;  %510 = vrot.lane.b32.xlu0 %v2779_v5, %s2681_s12 }
  0x75   : > { %520 = vrot.lane.b32.xlu1 %v2786_v6, %s2681_s12  ;;  %518 = vrot.lane.b32.xlu0 %v2789_v7, %s2681_s12 }
  0x79   : > { %549 = vrot.lane.b32.xlu1 %v2773_v3, %s2682_s13  ;;  %547 = vrot.lane.b32.xlu0 %v2763_v1, %s2682_s13 }
  0x7d   : > { %557 = vrot.lane.b32.xlu1 %v2770_v2, %s2682_s13  ;;  %555 = vrot.lane.b32.xlu0 %v2760_v0, %s2682_s13 }
  0x81   : > { %553 = vrot.lane.b32.xlu1 %v2776_v4, %s2682_s13  ;;  %551 = vrot.lane.b32.xlu0 %v2779_v5, %s2682_s13 }
  0x85   : > { %561 = vrot.lane.b32.xlu1 %v2786_v6, %s2682_s13  ;;  %559 = vrot.lane.b32.xlu0 %v2789_v7, %s2682_s13 }
  0x89   : > { %590 = vrot.lane.b32.xlu1 %v2773_v3, %s2683_s14  ;;  %588 = vrot.lane.b32.xlu0 %v2763_v1, %s2683_s14 }
  0x8b   : > { %v308_v15 = vpop.permute.xlu1 %307  ;;  %v300_v16 = vpop.permute.xlu0 %299 }
  0x8c   : > { %v318_v18 = vsel %vm317_vm0, %v300_v16, %v308_v15  ;;  %v322_v20 = vsel %vm317_vm0, %v308_v15, %v300_v16 }
  0x8d   : > { %598 = vrot.lane.b32.xlu1 %v2770_v2, %s2683_s14  ;;  %596 = vrot.lane.b32.xlu0 %v2760_v0, %s2683_s14  ;;  %v335_v26 = vmul.f32 %v2917_v17, %v318_v18  ;;  %v334_v28 = vmul.f32 %v2926_v19, %v322_v20 }
  0x8f   : > { %v310_v21 = vpop.permute.xlu1 %309  ;;  %v302_v22 = vpop.permute.xlu0 %301 }
  0x90   : > { %v323_v24 = vsel %vm317_vm0, %v310_v21, %v302_v22  ;;  %v319_v25 = vsel %vm317_vm0, %v302_v22, %v310_v21  ;;  %v410_v21 = vsub.s32 2, %v2892_v10 }
  0x91   : > { %594 = vrot.lane.b32.xlu1 %v2776_v4, %s2683_s14  ;;  %592 = vrot.lane.b32.xlu0 %v2779_v5, %s2683_s14  ;;  %v337_v27 = vmul.f32 %v2917_v17, %v319_v25  ;;  %v336_v29 = vmul.f32 %v2926_v19, %v323_v24 }
  0x92   : > { %v3008_v36 = vrot.slane %v2908_v13, %v410_v21 }
  0x93   : > { %v306_v30 = vpop.permute.xlu1 %305  ;;  %v304_v31 = vpop.permute.xlu0 %303  ;;  %v630_v32 = vpack.c.bf16 %v337_v27, %v335_v26  ;;  %v629_v33 = vpack.c.bf16 %v336_v29, %v334_v28 }
  0x95   : > { %602 = vrot.lane.b32.xlu1 %v2786_v6, %s2683_s14  ;;  %600 = vrot.lane.b32.xlu0 %v2789_v7, %s2683_s14 }
  0x96   : > { %722 = vmatprep.subr.bf16.mxu0 %v630_v32 }
  0x97   : > { %723 = vmatpush1.bf16.msra.mxu0 %v629_v33  ;;  %v314_v34 = vpop.permute.xlu1 %313  ;;  %v312_v35 = vpop.permute.xlu0 %311 }
  0x98   : > { %v321_v37 = vsel %vm317_vm0, %v306_v30, %v314_v34  ;;  %v325_v38 = vsel %vm317_vm0, %v314_v34, %v306_v30  ;;  %v320_v39 = vsel %vm317_vm0, %v304_v31, %v312_v35  ;;  %v324_v40 = vsel %vm317_vm0, %v312_v35, %v304_v31 }
  0x99   : > { %v340_v41 = vmul.f32 %v2926_v19, %v325_v38  ;;  %v341_v42 = vmul.f32 %v2917_v17, %v321_v37  ;;  %v338_v43 = vmul.f32 %v2926_v19, %v324_v40  ;;  %v339_v44 = vmul.f32 %v2917_v17, %v320_v39  ;;  %672 = vperm.xlu1 %2593, %v296_v45  }
  0x9a   : > { %667 = vperm.xlu0 %2592, %v295_v46   ;;  %v3005_v35 = vrot.slane %v2914_v14, %v410_v21 }
  0x9b   : > { %v345_v47 = vpop.permute.xlu1 %344  ;;  %v343_v48 = vpop.permute.xlu0 %342  ;;  %v632_v49 = vpack.c.bf16 %v341_v42, %v339_v44  ;;  %v631_v50 = vpack.c.bf16 %v340_v41, %v338_v43 }
  0x9d   : > { %724 = vmatprep.subr.bf16.mxu0 %v632_v49  ;;  %677 = vperm.xlu1 %2593, %v297_v51  }
  0x9e   : > { %725 = vmatpush1.bf16.msra.mxu0 %v631_v50  ;;  %682 = vperm.xlu0 %2592, %v298_v52  }
  0x9f   : > { %v353_v55 = vpop.permute.xlu1 %352  ;;  %v351_v56 = vpop.permute.xlu0 %350 }
  0xa0   : > { %v360_v57 = vsel %vm358_vm1, %v345_v47, %v353_v55  ;;  %v364_v58 = vsel %vm358_vm1, %v353_v55, %v345_v47  ;;  %v359_v59 = vsel %vm358_vm1, %v343_v48, %v351_v56  ;;  %v363_v60 = vsel %vm358_vm1, %v351_v56, %v343_v48 }
  0xa1   : > { %v377_v61 = vmul.f32 %v2973_v53, %v364_v58  ;;  %v378_v62 = vmul.f32 %v2976_v54, %v360_v57  ;;  %v375_v63 = vmul.f32 %v2973_v53, %v363_v60  ;;  %v376_v8 = vmul.f32 %v2976_v54, %v359_v59 }
  0xa2   : > { %v451_v55 = vsub.s32 3, %v2892_v10 }
  0xa3   : > { %v349_v9 = vpop.permute.xlu1 %348  ;;  %v347_v12 = vpop.permute.xlu0 %346  ;;  %v634_v15 = vpack.c.bf16 %v378_v62, %v376_v8  ;;  %v633_v16 = vpack.c.bf16 %v377_v61, %v375_v63 }
  0xa5   : > { %726 = vmatprep.subr.bf16.mxu0 %v634_v15 }
  0xa6   : > { %727 = vmatpush1.bf16.msra.mxu0 %v633_v16  ;;  %v3037_v16 = vrot.slane %v2914_v14, %v451_v55 }
  0xa7   : > { %v357_v18 = vpop.permute.xlu1 %356  ;;  %v355_v20 = vpop.permute.xlu0 %354 }
  0xa8   : > { %v362_v22 = vsel %vm358_vm1, %v349_v9, %v357_v18  ;;  %v366_v24 = vsel %vm358_vm1, %v357_v18, %v349_v9  ;;  %v361_v25 = vsel %vm358_vm1, %v347_v12, %v355_v20  ;;  %v365_v26 = vsel %vm358_vm1, %v355_v20, %v347_v12 }
  0xa9   : > { %v381_v27 = vmul.f32 %v2973_v53, %v366_v24  ;;  %v382_v28 = vmul.f32 %v2976_v54, %v362_v22  ;;  %v379_v29 = vmul.f32 %v2973_v53, %v365_v26  ;;  %v380_v30 = vmul.f32 %v2976_v54, %v361_v25 }
  0xaa   : > { %v3040_v18 = vrot.slane %v2908_v13, %v451_v55 }
  0xab   : > { %v386_v31 = vpop.permute.xlu1 %385  ;;  %v384_v32 = vpop.permute.xlu0 %383  ;;  %v636_v33 = vpack.c.bf16 %v382_v28, %v380_v30  ;;  %v635_v34 = vpack.c.bf16 %v381_v27, %v379_v29 }
  0xad   : > { %728 = vmatprep.subr.bf16.mxu0 %v636_v33 }
  0xae   : > { %729 = vmatpush1.bf16.msra.mxu0 %v635_v34 }
  0xaf   : > { %v394_v37 = vpop.permute.xlu1 %393  ;;  %v392_v38 = vpop.permute.xlu0 %391 }
  0xb0   : > { %v401_v39 = vsel %vm399_vm2, %v386_v31, %v394_v37  ;;  %v405_v40 = vsel %vm399_vm2, %v394_v37, %v386_v31  ;;  %v400_v41 = vsel %vm399_vm2, %v384_v32, %v392_v38  ;;  %v404_v42 = vsel %vm399_vm2, %v392_v38, %v384_v32 }
  0xb1   : > { %v418_v43 = vmul.f32 %v3005_v35, %v405_v40  ;;  %v419_v44 = vmul.f32 %v3008_v36, %v401_v39  ;;  %v416_v45 = vmul.f32 %v3005_v35, %v404_v42  ;;  %v417_v46 = vmul.f32 %v3008_v36, %v400_v41 }
  0xb2   : > { %v492_v39 = vsub.s32 5, %v2892_v10 }
  0xb3   : > { %v390_v47 = vpop.permute.xlu1 %389  ;;  %v388_v48 = vpop.permute.xlu0 %387  ;;  %v638_v49 = vpack.c.bf16 %v419_v44, %v417_v46  ;;  %v637_v50 = vpack.c.bf16 %v418_v43, %v416_v45 }
  0xb4   : > { %v3071_v55 = vrot.slane %v2908_v13, %v492_v39 }
  0xb5   : > { %730 = vmatprep.subr.bf16.mxu0 %v638_v49 }
  0xb6   : > { %731 = vmatpush1.bf16.msra.mxu0 %v637_v50 }
  0xb7   : > { %v398_v51 = vpop.permute.xlu1 %397  ;;  %v396_v52 = vpop.permute.xlu0 %395 }
  0xb8   : > { %v403_v56 = vsel %vm399_vm2, %v390_v47, %v398_v51  ;;  %v407_v57 = vsel %vm399_vm2, %v398_v51, %v390_v47  ;;  %v402_v58 = vsel %vm399_vm2, %v388_v48, %v396_v52  ;;  %v406_v59 = vsel %vm399_vm2, %v396_v52, %v388_v48 }
  0xb9   : > { %v422_v60 = vmul.f32 %v3005_v35, %v407_v57  ;;  %v423_v61 = vmul.f32 %v3008_v36, %v403_v56  ;;  %v420_v62 = vmul.f32 %v3005_v35, %v406_v59  ;;  %v421_v63 = vmul.f32 %v3008_v36, %v402_v58 }
  0xba   : > { %v646_v52 = vpack.c.bf16 %v2770_v2, %v2760_v0  ;;  %v645_v56 = vpack.c.bf16 %v2773_v3, %v2763_v1  ;;  %v3076_v57 = vrot.slane %v2914_v14, %v492_v39 }
  0xbb   : > { %v427_v8 = vpop.permute.xlu1 %426  ;;  %v425_v9 = vpop.permute.xlu0 %424  ;;  %v640_v12 = vpack.c.bf16 %v423_v61, %v421_v63  ;;  %v639_v15 = vpack.c.bf16 %v422_v60, %v420_v62  ;;  %v648_v60 = vpack.c.bf16 %v2786_v6, %v2789_v7  ;;  %v647_v6 = vpack.c.bf16 %v2776_v4, %v2779_v5 }
  0xbd   : > { %732 = vmatprep.subr.bf16.mxu0 %v640_v12 }
  0xbe   : > { %733 = vmatpush1.bf16.msra.mxu0 %v639_v15 }
  0xbf   : > { %v435_v20 = vpop.permute.xlu1 %434  ;;  %v433_v21 = vpop.permute.xlu0 %432 }
  0xc0   : > { %v442_v22 = vsel %vm440_vm3, %v427_v8, %v435_v20  ;;  %v446_v24 = vsel %vm440_vm3, %v435_v20, %v427_v8  ;;  %v441_v25 = vsel %vm440_vm3, %v425_v9, %v433_v21  ;;  %v445_v26 = vsel %vm440_vm3, %v433_v21, %v425_v9 }
  0xc1   : > { %v459_v27 = vmul.f32 %v3037_v16, %v446_v24  ;;  %v460_v28 = vmul.f32 %v3040_v18, %v442_v22  ;;  %v457_v29 = vmul.f32 %v3037_v16, %v445_v26  ;;  %v458_v30 = vmul.f32 %v3040_v18, %v441_v25 }
  0xc2   : > { %v533_v22 = vsub.s32 6, %v2892_v10 }
  0xc3   : > { %v431_v31 = vpop.permute.xlu1 %430  ;;  %v429_v32 = vpop.permute.xlu0 %428  ;;  %v642_v33 = vpack.c.bf16 %v460_v28, %v458_v30  ;;  %v641_v34 = vpack.c.bf16 %v459_v27, %v457_v29 }
  0xc5   : > { %734 = vmatprep.subr.bf16.mxu0 %v642_v33 }
  0xc6   : > { %735 = vmatpush1.bf16.msra.mxu0 %v641_v34  ;;  %v3109_v34 = vrot.slane %v2914_v14, %v533_v22 }
  0xc7   : > { %v439_v37 = vpop.permute.xlu1 %438  ;;  %v437_v38 = vpop.permute.xlu0 %436 }
  0xc8   : > { %v444_v40 = vsel %vm440_vm3, %v431_v31, %v439_v37  ;;  %v448_v41 = vsel %vm440_vm3, %v439_v37, %v431_v31  ;;  %v443_v42 = vsel %vm440_vm3, %v429_v32, %v437_v38  ;;  %v447_v43 = vsel %vm440_vm3, %v437_v38, %v429_v32 }
  0xc9   : > { %v463_v44 = vmul.f32 %v3037_v16, %v448_v41  ;;  %v464_v45 = vmul.f32 %v3040_v18, %v444_v40  ;;  %v461_v46 = vmul.f32 %v3037_v16, %v447_v43  ;;  %v462_v47 = vmul.f32 %v3040_v18, %v443_v42 }
  0xca   : > { %v3112_v37 = vrot.slane %v2908_v13, %v533_v22 }
  0xcb   : > { %v468_v48 = vpop.permute.xlu1 %467  ;;  %v466_v49 = vpop.permute.xlu0 %465  ;;  %v644_v50 = vpack.c.bf16 %v464_v45, %v462_v47  ;;  %v643_v51 = vpack.c.bf16 %v463_v44, %v461_v46 }
  0xcd   : > { %736 = vmatprep.subr.bf16.mxu0 %v644_v50 }
  0xce   : > { %737 = vmatpush1.bf16.msra.mxu0 %v643_v51 }
  0xcf   : > { %v476_v58 = vpop.permute.xlu1 %475  ;;  %v474_v59 = vpop.permute.xlu0 %473  ;;  %738 = vmatprep.subr.bf16.mxu0 %v646_v52 }
  0xd0   : > { %v483_v0 = vsel %vm481_vm4, %v468_v48, %v476_v58  ;;  %v487_v2 = vsel %vm481_vm4, %v476_v58, %v468_v48  ;;  %v482_v61 = vsel %vm481_vm4, %v466_v49, %v474_v59  ;;  %v486_v1 = vsel %vm481_vm4, %v474_v59, %v466_v49 }
  0xd1   : > { %v501_v3 = vmul.f32 %v3071_v55, %v487_v2  ;;  %v499_v62 = vmul.f32 %v3071_v55, %v486_v1  ;;  %v500_v7 = vmul.f32 %v3076_v57, %v483_v0  ;;  %v498_v63 = vmul.f32 %v3076_v57, %v482_v61 }
  0xd2   : > { %739 = vmatpush1.bf16.msra.mxu0 %v645_v56  ;;  %v574_v58 = vsub.s32 7, %v2892_v10 }
  0xd3   : > { %v472_v8 = vpop.permute.xlu1 %471  ;;  %v470_v9 = vpop.permute.xlu0 %469  ;;  %740 = vmatprep.subr.bf16.mxu0 %v648_v60  ;;  %v650_v12 = vpack.c.bf16 %v501_v3, %v499_v62  ;;  %v649_v21 = vpack.c.bf16 %v500_v7, %v498_v63 }
  0xd6   : > { %741 = vmatpush1.bf16.msra.mxu0 %v647_v6 }
  0xd7   : > { %v480_v15 = vpop.permute.xlu1 %479  ;;  %v478_v20 = vpop.permute.xlu0 %477  ;;  %742 = vmatprep.subr.bf16.mxu0 %v650_v12 }
  0xd8   : > { %v485_v24 = vsel %vm481_vm4, %v472_v8, %v480_v15  ;;  %v489_v4 = vsel %vm481_vm4, %v480_v15, %v472_v8  ;;  %v484_v5 = vsel %vm481_vm4, %v470_v9, %v478_v20  ;;  %v488_v25 = vsel %vm481_vm4, %v478_v20, %v470_v9 }
  0xd9   : > { %v504_v26 = vmul.f32 %v3076_v57, %v485_v24  ;;  %v505_v27 = vmul.f32 %v3071_v55, %v489_v4  ;;  %v502_v28 = vmul.f32 %v3076_v57, %v484_v5  ;;  %v503_v29 = vmul.f32 %v3071_v55, %v488_v25 }
  0xda   : > { %743 = vmatpush1.bf16.msra.mxu0 %v649_v21  ;;  %v3141_v8 = vrot.slane %v2914_v14, %v574_v58  ;;  %v3144_v9 = vrot.slane %v2908_v13, %v574_v58 }
  0xdb   : > { %v509_v30 = vpop.permute.xlu1 %508  ;;  %v507_v31 = vpop.permute.xlu0 %506  ;;  %v652_v32 = vpack.c.bf16 %v505_v27, %v503_v29  ;;  %v651_v33 = vpack.c.bf16 %v504_v26, %v502_v28 }
  0xdd   : > { %744 = vmatprep.subr.bf16.mxu0 %v652_v32 }
  0xde   : > { %745 = vmatpush1.bf16.msra.mxu0 %v651_v33 }
  0xdf   : > { %v517_v38 = vpop.permute.xlu1 %516  ;;  %v515_v39 = vpop.permute.xlu0 %514 }
  0xe0   : > { %v524_v40 = vsel %vm522_vm5, %v509_v30, %v517_v38  ;;  %v528_v41 = vsel %vm522_vm5, %v517_v38, %v509_v30  ;;  %v523_v42 = vsel %vm522_vm5, %v507_v31, %v515_v39  ;;  %v527_v43 = vsel %vm522_vm5, %v515_v39, %v507_v31 }
  0xe1   : > { %v541_v44 = vmul.f32 %v3109_v34, %v524_v40  ;;  %v542_v45 = vmul.f32 %v3112_v37, %v528_v41  ;;  %v539_v46 = vmul.f32 %v3109_v34, %v523_v42  ;;  %v540_v47 = vmul.f32 %v3112_v37, %v527_v43 }
  0xe3   : > { %v513_v48 = vpop.permute.xlu1 %512  ;;  %v511_v49 = vpop.permute.xlu0 %510  ;;  %v654_v50 = vpack.c.bf16 %v542_v45, %v540_v47  ;;  %v653_v51 = vpack.c.bf16 %v541_v44, %v539_v46  ;;  %v2594_v47 = vld [vmem:[%s2749_s28] ss:$12 sps:$4 sm:$0xff]  }
  0xe5   : > { %746 = vmatprep.subr.bf16.mxu0 %v654_v50  ;;  %v2597_v50 = vld [vmem:[%s2749_s28 + $0x1c] ss:$12 sps:$4 sm:$0xff]  }
  0xe6   : > { %747 = vmatpush1.bf16.msra.mxu0 %v653_v51 }
  0xe7   : > { %v521_v52 = vpop.permute.xlu1 %520  ;;  %v519_v56 = vpop.permute.xlu0 %518 }
  0xe8   : > { %v526_v59 = vsel %vm522_vm5, %v513_v48, %v521_v52  ;;  %v530_v60 = vsel %vm522_vm5, %v521_v52, %v513_v48  ;;  %v525_v0 = vsel %vm522_vm5, %v511_v49, %v519_v56  ;;  %v529_v2 = vsel %vm522_vm5, %v519_v56, %v511_v49  ;;  %v3175_v48 = vld [vmem:[%s4538_s0 + $0x10] ss:$0 sm:$0xff]  ;;  %v3180_v49 = vld [vmem:[%s4538_s0 + $0x18] ss:$0 sm:$0xff] }
  0xe9   : > { %v545_v61 = vmul.f32 %v3109_v34, %v526_v59  ;;  %v546_v1 = vmul.f32 %v3112_v37, %v530_v60  ;;  %v543_v3 = vmul.f32 %v3109_v34, %v525_v0  ;;  %v544_v10 = vmul.f32 %v3112_v37, %v529_v2 }
  0xeb   : > { %v550_v62 = vpop.permute.xlu1 %549  ;;  %v548_v6 = vpop.permute.xlu0 %547  ;;  %v656_v7 = vpack.c.bf16 %v546_v1, %v544_v10  ;;  %v655_v63 = vpack.c.bf16 %v545_v61, %v543_v3 }
  0xed   : > { %748 = vmatprep.subr.bf16.mxu0 %v656_v7  ;;  %v2599_v7 = vld [vmem:[%s2749_s28 + $0x18] ss:$12 sps:$4 sm:$0xff]  }
  0xee   : > { %749 = vmatpush1.bf16.msra.mxu0 %v655_v63 }
  0xef   : > { %v558_v12 = vpop.permute.xlu1 %557  ;;  %v556_v15 = vpop.permute.xlu0 %555 }
  0xf0   : > { %v565_v20 = vsel %vm563_vm6, %v550_v62, %v558_v12  ;;  %v569_v21 = vsel %vm563_vm6, %v558_v12, %v550_v62  ;;  %v564_v22 = vsel %vm563_vm6, %v548_v6, %v556_v15  ;;  %v568_v24 = vsel %vm563_vm6, %v556_v15, %v548_v6 }
  0xf1   : > { %v582_v14 = vmul.f32 %v3141_v8, %v565_v20  ;;  %v583_v13 = vmul.f32 %v3144_v9, %v569_v21  ;;  %v580_v4 = vmul.f32 %v3141_v8, %v564_v22  ;;  %v581_v5 = vmul.f32 %v3144_v9, %v568_v24 }
  0xf3   : > { %v554_v25 = vpop.permute.xlu1 %553  ;;  %v552_v26 = vpop.permute.xlu0 %551  ;;  %v658_v27 = vpack.c.bf16 %v583_v13, %v581_v5  ;;  %v657_v28 = vpack.c.bf16 %v582_v14, %v580_v4 }
  0xf5   : > { %750 = vmatprep.subr.bf16.mxu0 %v658_v27  ;;  %v2601_v27 = vld [vmem:[%s2749_s28 + $0x20] ss:$12 sps:$4 sm:$0xff]  }
  0xf6   : > { %751 = vmatpush1.bf16.msra.mxu0 %v657_v28 }
  0xf7   : > { %v562_v29 = vpop.permute.xlu1 %561  ;;  %v560_v30 = vpop.permute.xlu0 %559 }
  0xf8   : > { %v567_v31 = vsel %vm563_vm6, %v554_v25, %v562_v29  ;;  %v571_v32 = vsel %vm563_vm6, %v562_v29, %v554_v25  ;;  %v566_v33 = vsel %vm563_vm6, %v552_v26, %v560_v30  ;;  %v570_v38 = vsel %vm563_vm6, %v560_v30, %v552_v26  ;;  %v2600_v26 = vld [vmem:[%s2749_s28 + $0x8] ss:$12 sps:$4 sm:$0xff]  }
  0xf9   : > { %v586_v39 = vmul.f32 %v3141_v8, %v567_v31  ;;  %v587_v40 = vmul.f32 %v3144_v9, %v571_v32  ;;  %v584_v41 = vmul.f32 %v3141_v8, %v566_v33  ;;  %v585_v42 = vmul.f32 %v3144_v9, %v570_v38 }
  0xfb   : > { %v591_v43 = vpop.permute.xlu1 %590  ;;  %v589_v44 = vpop.permute.xlu0 %588  ;;  %v660_v45 = vpack.c.bf16 %v587_v40, %v585_v42  ;;  %v659_v46 = vpack.c.bf16 %v586_v39, %v584_v41 }
  0xfd   : > { %752 = vmatprep.subr.bf16.mxu0 %v660_v45 }
  0xfe   : > { %753 = vmatpush1.bf16.msra.mxu0 %v659_v46 }
  0xff   : > { %v599_v51 = vpop.permute.xlu1 %598  ;;  %v597_v52 = vpop.permute.xlu0 %596 }
 0x100   : > { %v606_v56 = vsel %vm604_vm7, %v591_v43, %v599_v51  ;;  %v610_v58 = vsel %vm604_vm7, %v599_v51, %v591_v43  ;;  %v605_v59 = vsel %vm604_vm7, %v589_v44, %v597_v52  ;;  %v609_v60 = vsel %vm604_vm7, %v597_v52, %v589_v44 }
 0x101   : > { %v623_v0 = vmul.f32 %v3175_v48, %v606_v56  ;;  %v624_v2 = vmul.f32 %v3180_v49, %v610_v58  ;;  %v621_v61 = vmul.f32 %v3175_v48, %v605_v59  ;;  %v622_v1 = vmul.f32 %v3180_v49, %v609_v60  ;;  %755 = vmatmul.mubr.bf16.vlgmr.msra.gmra.mrb[0].mxu0 %v2594_v47 }
 0x102   : > { %764 = vmatprep.mubr.bf16.mxu0 %v2597_v50 }
 0x103   : > { %v661_v3 = vpack.c.bf16 %v623_v0, %v621_v61  ;;  %v595_v10 = vpop.permute.xlu1 %594  ;;  %v593_v62 = vpop.permute.xlu0 %592  ;;  %v662_v6 = vpack.c.bf16 %v624_v2, %v622_v1 }
 0x105   : > { %775 = vmatprep.subr.bf16.mxu0 %v662_v6 }
 0x106   : > { %776 = vmatpush1.bf16.msra.mxu0 %v661_v3 }
 0x107   : > { %v603_v63 = vpop.permute.xlu1 %602  ;;  %v601_v12 = vpop.permute.xlu0 %600 }
 0x108   : > { %v608_v15 = vsel %vm604_vm7, %v595_v10, %v603_v63  ;;  %v612_v20 = vsel %vm604_vm7, %v603_v63, %v595_v10  ;;  %v607_v21 = vsel %vm604_vm7, %v593_v62, %v601_v12  ;;  %v611_v22 = vsel %vm604_vm7, %v601_v12, %v593_v62  ;;  %v2604_v10 = vld [vmem:[%s2749_s28 + $0x34] ss:$12 sps:$4 sm:$0xff]  }
 0x109   : > { %v627_v24 = vmul.f32 %v3175_v48, %v608_v15  ;;  %v628_v14 = vmul.f32 %v3180_v49, %v612_v20  ;;  %v625_v13 = vmul.f32 %v3175_v48, %v607_v21  ;;  %v626_v4 = vmul.f32 %v3180_v49, %v611_v22  ;;  %765 = vmatmul.mubr.bf16.gmra.mrb[4].mxu0 %v2599_v7  ;;  %v2423_v20 = vld [vmem:[%s2952_s5 + $0x20] sm:$0xff]  ;;  %v2424_v22 = vld [vmem:[%s2952_s5 + $0x28] sm:$0xff] }
 0x10a   : > { %807 = vmatprep.mubr.bf16.mxu0 %v4543_v23  ;;  %1230 = vmatprep.mubr.bf16.mxu1 %v2604_v10 }
 0x10b   : > { %v663_v5 = vpack.c.bf16 %v627_v24, %v625_v13  ;;  %v664_v25 = vpack.c.bf16 %v628_v14, %v626_v4  ;;  %v2425_v14 = vld [vmem:[%s2952_s5 + $0x30] sm:$0xff]  ;;  %v2426_v4 = vld [vmem:[%s2952_s5 + $0x38] sm:$0xff] }
 0x10d   : > { %777 = vmatprep.subr.bf16.mxu0 %v664_v25 }
 0x10e   : > { %778 = vmatpush1.bf16.msra.mxu0 %v663_v5 }
 0x111   : > { %2413 = vmatmul.mubr.msk.bf16.vlgmr.msra.gmra.mrb[0].mxu0 %vm715_vm8, %v2600_v26 }
 0x112   : > { %817 = vmatprep.mubr.bf16.mxu0 %v4543_v23 }
 0x118   : > { %v673_v32 = vpop.permute.xlu1 %672 }
 0x119   : > { %2414 = vmatmul.mubr.msk.bf16.gmra.mrb[4].mxu0 %vm715_vm8, %v2601_v27  ;;  %v668_v28 = vpop.permute.xlu0 %667 }
 0x11c   : > { %v678_v52 = vpop.permute.xlu1 %677 }
 0x11d   : > { %v683_v58 = vpop.permute.xlu0 %682 }
 0x1e4   : > { %v809_v29 = vpop.f32.mrb[0].mxu0 }
 0x1e5   : > { %v2478_v30 = vadd.f32 %v809_v29, %v668_v28  ;;  %v811_v31 = vpop.f32.mrb[1].mxu0 }
 0x1e6   : > { %v813_v33 = vpop.f32.mrb[2].mxu0  ;;  %v2479_v46 = vadd.f32 %v811_v31, %v668_v28 }
 0x1e7   : > { %v3214_v38 = vmax.f32 %v2478_v30, 0.0  ;;  %v2480_v39 = vadd.f32 %v813_v33, %v673_v32  ;;  %v815_v40 = vpop.f32.mrb[3].mxu0 }
 0x1e8   : > { %v2481_v47 = vadd.f32 %v815_v40, %v673_v32  ;;  %v3236_v50 = vmax.f32 %v2479_v46, 0.0 }
 0x1e9   : > { %v3216_v41 = vmax.f32 %v2480_v39, 0.0  ;;  %850 = vrot.lane.b32.xlu1 %v3214_v38, %s2676_s7 }
 0x1ea   : > { %v3240_v51 = vmax.f32 %v2481_v47, 0.0 }
 0x1eb   : > { %852 = vrot.lane.b32.xlu0 %v3216_v41, %s2676_s7 }
 0x1ec   : > { %v819_v42 = vpop.f32.mrb[4].mxu0 }
 0x1ed   : > { %v821_v43 = vpop.f32.mrb[5].mxu0  ;;  %882 = vrot.lane.b32.xlu1 %v3214_v38, %s2677_s8  ;;  %v2482_v56 = vadd.f32 %v819_v42, %v678_v52 }
 0x1ee   : > { %v823_v44 = vpop.f32.mrb[6].mxu0  ;;  %v2483_v2 = vadd.f32 %v821_v43, %v678_v52 }
 0x1ef   : > { %v825_v45 = vpop.f32.mrb[7].mxu0  ;;  %884 = vrot.lane.b32.xlu0 %v3216_v41, %s2677_s8  ;;  %v2484_v59 = vadd.f32 %v823_v44, %v683_v58  ;;  %v3256_v60 = vmax.f32 %v2482_v56, 0.0 }
 0x1f0   : > { %v2485_v61 = vadd.f32 %v825_v45, %v683_v58  ;;  %v3276_v1 = vmax.f32 %v2483_v2, 0.0 }
 0x1f1   : > { %914 = vrot.lane.b32.xlu1 %v3214_v38, %s2678_s9  ;;  %v3260_v0 = vmax.f32 %v2484_v59, 0.0 }
 0x1f2   : > { %v3280_v3 = vmax.f32 %v2485_v61, 0.0 }
 0x1f3   : > { %916 = vrot.lane.b32.xlu0 %v3216_v41, %s2678_s9 }
 0x1f5   : > { %946 = vrot.lane.b32.xlu1 %v3214_v38, %s2679_s10 }
 0x1f7   : > { %948 = vrot.lane.b32.xlu0 %v3216_v41, %s2679_s10 }
 0x1f9   : > { %978 = vrot.lane.b32.xlu1 %v3214_v38, %s2680_s11 }
 0x1fb   : > { %980 = vrot.lane.b32.xlu0 %v3216_v41, %s2680_s11 }
 0x1fd   : > { %858 = vrot.lane.b32.xlu1 %v3236_v50, %s2676_s7 }
 0x1ff   : > { %860 = vrot.lane.b32.xlu0 %v3240_v51, %s2676_s7 }
 0x201   : > { %890 = vrot.lane.b32.xlu1 %v3236_v50, %s2677_s8 }
 0x203   : > { %892 = vrot.lane.b32.xlu0 %v3240_v51, %s2677_s8 }
 0x205   : > { %922 = vrot.lane.b32.xlu1 %v3236_v50, %s2678_s9 }
 0x207   : > { %924 = vrot.lane.b32.xlu0 %v3240_v51, %s2678_s9 }
 0x209   : > { %954 = vrot.lane.b32.xlu1 %v3236_v50, %s2679_s10 }
 0x20b   : > { %956 = vrot.lane.b32.xlu0 %v3240_v51, %s2679_s10 }
 0x20d   : > { %854 = vrot.lane.b32.xlu1 %v3256_v60, %s2676_s7 }
 0x20f   : > { %856 = vrot.lane.b32.xlu0 %v3260_v0, %s2676_s7 }
 0x211   : > { %886 = vrot.lane.b32.xlu1 %v3256_v60, %s2677_s8 }
 0x213   : > { %888 = vrot.lane.b32.xlu0 %v3260_v0, %s2677_s8 }
 0x215   : > { %918 = vrot.lane.b32.xlu1 %v3256_v60, %s2678_s9 }
 0x217   : > { %920 = vrot.lane.b32.xlu0 %v3260_v0, %s2678_s9 }
 0x219   : > { %950 = vrot.lane.b32.xlu1 %v3256_v60, %s2679_s10 }
 0x21b   : > { %952 = vrot.lane.b32.xlu0 %v3260_v0, %s2679_s10 }
 0x21d   : > { %862 = vrot.lane.b32.xlu1 %v3276_v1, %s2676_s7 }
 0x21f   : > { %864 = vrot.lane.b32.xlu0 %v3280_v3, %s2676_s7 }
 0x221   : > { %986 = vrot.lane.b32.xlu1 %v3236_v50, %s2680_s11 }
 0x223   : > { %988 = vrot.lane.b32.xlu0 %v3240_v51, %s2680_s11 }
 0x225   : > { %894 = vrot.lane.b32.xlu1 %v3276_v1, %s2677_s8 }
 0x227   : > { %896 = vrot.lane.b32.xlu0 %v3280_v3, %s2677_s8 }
 0x229   : > { %926 = vrot.lane.b32.xlu1 %v3276_v1, %s2678_s9 }
 0x22b   : > { %984 = vrot.lane.b32.xlu0 %v3260_v0, %s2680_s11 }
 0x22d   : > { %958 = vrot.lane.b32.xlu1 %v3276_v1, %s2679_s10 }
 0x22f   : > { %928 = vrot.lane.b32.xlu0 %v3280_v3, %s2678_s9 }
 0x231   : > { %982 = vrot.lane.b32.xlu1 %v3256_v60, %s2680_s11 }
 0x233   : > { %1012 = vrot.lane.b32.xlu0 %v3216_v41, %s2681_s12 }
 0x235   : > { %990 = vrot.lane.b32.xlu1 %v3276_v1, %s2680_s11 }
 0x237   : > { %960 = vrot.lane.b32.xlu0 %v3280_v3, %s2679_s10 }
 0x239   : > { %1010 = vrot.lane.b32.xlu1 %v3214_v38, %s2681_s12 }
 0x23b   : > { %1020 = vrot.lane.b32.xlu0 %v3240_v51, %s2681_s12 }
 0x23d   : > { %1018 = vrot.lane.b32.xlu1 %v3236_v50, %s2681_s12 }
 0x23f   : > { %1016 = vrot.lane.b32.xlu0 %v3260_v0, %s2681_s12 }
 0x241   : > { %1014 = vrot.lane.b32.xlu1 %v3256_v60, %s2681_s12 }
 0x243   : > { %1044 = vrot.lane.b32.xlu0 %v3216_v41, %s2682_s13 }
 0x245   : > { %1022 = vrot.lane.b32.xlu1 %v3276_v1, %s2681_s12 }
 0x247   : > { %992 = vrot.lane.b32.xlu0 %v3280_v3, %s2680_s11 }
 0x249   : > { %1042 = vrot.lane.b32.xlu1 %v3214_v38, %s2682_s13 }
 0x24b   : > { %1052 = vrot.lane.b32.xlu0 %v3240_v51, %s2682_s13 }
 0x24d   : > { %1050 = vrot.lane.b32.xlu1 %v3236_v50, %s2682_s13 }
 0x24f   : > { %1024 = vrot.lane.b32.xlu0 %v3280_v3, %s2681_s12 }
 0x251   : > { %1046 = vrot.lane.b32.xlu1 %v3256_v60, %s2682_s13 }
 0x253   : > { %1048 = vrot.lane.b32.xlu0 %v3260_v0, %s2682_s13 }
 0x255   : > { %1054 = vrot.lane.b32.xlu1 %v3276_v1, %s2682_s13 }
 0x257   : > { %1056 = vrot.lane.b32.xlu0 %v3280_v3, %s2682_s13 }
 0x259   : > { %1074 = vrot.lane.b32.xlu1 %v3214_v38, %s2683_s14 }
 0x25b   : > { %1076 = vrot.lane.b32.xlu0 %v3216_v41, %s2683_s14  ;;  %v851_v62 = vpop.permute.xlu1 %850 }
 0x25d   : > { %v853_v6 = vpop.permute.xlu0 %852  ;;  %1082 = vrot.lane.b32.xlu1 %v3236_v50, %s2683_s14 }
 0x25f   : > { %1084 = vrot.lane.b32.xlu0 %v3240_v51, %s2683_s14  ;;  %v3351_v7 = vpop.permute.xlu1 %882 }
 0x261   : > { %v885_v63 = vpop.permute.xlu0 %884  ;;  %1078 = vrot.lane.b32.xlu1 %v3256_v60, %s2683_s14 }
 0x263   : > { %1080 = vrot.lane.b32.xlu0 %v3260_v0, %s2683_s14  ;;  %v3357_v12 = vpop.permute.xlu1 %914 }
 0x265   : > { %v3359_v15 = vpop.permute.xlu0 %916  ;;  %1086 = vrot.lane.b32.xlu1 %v3276_v1, %s2683_s14 }
 0x267   : > { %1088 = vrot.lane.b32.xlu0 %v3280_v3, %s2683_s14  ;;  %v3366_v21 = vpop.permute.xlu1 %946 }
 0x269   : > { %v3369_v24 = vpop.permute.xlu0 %948  ;;  %1144 = vperm.xlu1 %2593, %v2423_v20  }
 0x26b   : > { %1149 = vperm.xlu0 %2592, %v2424_v22   ;;  %v3372_v13 = vpop.permute.xlu1 %978 }
 0x26d   : > { %v3375_v5 = vpop.permute.xlu0 %980  ;;  %1154 = vperm.xlu1 %2593, %v2425_v14  }
 0x26f   : > { %1159 = vperm.xlu0 %2592, %v2426_v4   ;;  %v859_v25 = vpop.permute.xlu1 %858 }
 0x270   : > { %v870_v26 = vsel %vm317_vm0, %v859_v25, %v851_v62  ;;  %v866_v27 = vsel %vm317_vm0, %v851_v62, %v859_v25 }
 0x271   : > { %v861_v28 = vpop.permute.xlu0 %860  ;;  %v875_v32 = vmul.f32 %v866_v27, %v2917_v17  ;;  %v874_v39 = vmul.f32 %v870_v26, %v2926_v19 }
 0x272   : > { %v871_v29 = vsel %vm317_vm0, %v861_v28, %v853_v6  ;;  %v867_v30 = vsel %vm317_vm0, %v853_v6, %v861_v28 }
 0x273   : > { %v891_v31 = vpop.permute.xlu1 %890  ;;  %v877_v33 = vmul.f32 %v867_v30, %v2917_v17  ;;  %v876_v40 = vmul.f32 %v871_v29, %v2926_v19 }
 0x274   : > { %v898_v25 = vsel %vm358_vm1, %v3351_v7, %v891_v31 }
 0x275   : > { %v893_v42 = vpop.permute.xlu0 %892  ;;  %v1107_v43 = vpack.c.bf16 %v877_v33, %v875_v32  ;;  %v1106_v44 = vpack.c.bf16 %v876_v40, %v874_v39 }
 0x276   : > { %v899_v20 = vsel %vm358_vm1, %v885_v63, %v893_v42  ;;  %v903_v27 = vsel %vm358_vm1, %v893_v42, %v885_v63  ;;  %v902_v63 = vsel %vm358_vm1, %v891_v31, %v3351_v7  ;;  %v907_v42 = vmul.f32 %v898_v25, %v2976_v54 }
 0x277   : > { %1198 = vmatprep.subr.bf16.mxu1 %v1107_v43  ;;  %v923_v45 = vpop.permute.xlu1 %922  ;;  %v909_v28 = vmul.f32 %v899_v20, %v2976_v54 }
 0x278   : > { %1199 = vmatpush1.bf16.msra.mxu1 %v1106_v44  ;;  %v908_v44 = vmul.f32 %v903_v27, %v2973_v53  ;;  %v930_v25 = vsel %vm399_vm2, %v3357_v12, %v923_v45 }
 0x279   : > { %v925_v46 = vpop.permute.xlu0 %924 }
 0x27b   : > { %v3389_v47 = vpop.permute.xlu1 %954 }
 0x27d   : > { %v3391_v52 = vpop.permute.xlu0 %956 }
 0x27f   : > { %v855_v56 = vpop.permute.xlu1 %854 }
 0x281   : > { %v857_v58 = vpop.permute.xlu0 %856 }
 0x283   : > { %v887_v59 = vpop.permute.xlu1 %886 }
 0x285   : > { %v889_v2 = vpop.permute.xlu0 %888 }
 0x287   : > { %v919_v61 = vpop.permute.xlu1 %918 }
 0x289   : > { %v3393_v10 = vpop.permute.xlu0 %920 }
 0x28b   : > { %v3395_v62 = vpop.permute.xlu1 %950 }
 0x28d   : > { %v3397_v6 = vpop.permute.xlu0 %952 }
 0x28f   : > { %v863_v22 = vpop.permute.xlu1 %862 }
 0x290   : > { %v868_v14 = vsel %vm317_vm0, %v855_v56, %v863_v22  ;;  %v872_v4 = vsel %vm317_vm0, %v863_v22, %v855_v56  ;;  %v906_v22 = vmul.f32 %v902_v63, %v2973_v53 }
 0x291   : > { %v865_v26 = vpop.permute.xlu0 %864  ;;  %v878_v32 = vmul.f32 %v872_v4, %v2926_v19  ;;  %v879_v33 = vmul.f32 %v868_v14, %v2917_v17  ;;  %v931_v14 = vsel %vm399_vm2, %v3359_v15, %v925_v46 }
 0x292   : > { %v869_v29 = vsel %vm317_vm0, %v857_v58, %v865_v26  ;;  %v873_v30 = vsel %vm317_vm0, %v865_v26, %v857_v58  ;;  %v1111_v26 = vpack.c.bf16 %v909_v28, %v907_v42  ;;  %v941_v28 = vmul.f32 %v931_v14, %v3008_v36 }
 0x293   : > { %v880_v39 = vmul.f32 %v873_v30, %v2926_v19  ;;  %v881_v40 = vmul.f32 %v869_v29, %v2917_v17  ;;  %v3419_v43 = vpop.permute.xlu1 %986  ;;  %v1110_v29 = vpack.c.bf16 %v908_v44, %v906_v22  ;;  %v935_v30 = vsel %vm399_vm2, %v925_v46, %v3359_v15 }
 0x294   : > { %v934_v15 = vsel %vm399_vm2, %v923_v45, %v3357_v12  ;;  %v939_v46 = vmul.f32 %v930_v25, %v3008_v36  ;;  %v940_v44 = vmul.f32 %v935_v30, %v3005_v35  ;;  %v963_v14 = vsel %vm440_vm3, %v3369_v24, %v3391_v52 }
 0x295   : > { %v3426_v56 = vpop.permute.xlu0 %988  ;;  %v1109_v58 = vpack.c.bf16 %v881_v40, %v879_v33  ;;  %v1108_v20 = vpack.c.bf16 %v880_v39, %v878_v32  ;;  %v938_v22 = vmul.f32 %v934_v15, %v3005_v35 }
 0x297   : > { %1200 = vmatprep.subr.bf16.mxu1 %v1109_v58  ;;  %v895_v4 = vpop.permute.xlu1 %894  ;;  %v1114_v25 = vpack.c.bf16 %v940_v44, %v938_v22 }
 0x298   : > { %v900_v7 = vsel %vm358_vm1, %v887_v59, %v895_v4  ;;  %v904_v31 = vsel %vm358_vm1, %v895_v4, %v887_v59  ;;  %1201 = vmatpush1.bf16.msra.mxu1 %v1108_v20 }
 0x299   : > { %v897_v27 = vpop.permute.xlu0 %896  ;;  %1202 = vmatprep.subr.bf16.mxu1 %v1111_v26  ;;  %v910_v33 = vmul.f32 %v904_v31, %v2973_v53  ;;  %v911_v39 = vmul.f32 %v900_v7, %v2976_v54  ;;  %v1115_v26 = vpack.c.bf16 %v941_v28, %v939_v46  ;;  %v962_v7 = vsel %vm440_vm3, %v3366_v21, %v3389_v47 }
 0x29a   : > { %v901_v32 = vsel %vm358_vm1, %v889_v2, %v897_v27  ;;  %v905_v59 = vsel %vm358_vm1, %v897_v27, %v889_v2  ;;  %v967_v27 = vsel %vm440_vm3, %v3391_v52, %v3369_v24  ;;  %v966_v24 = vsel %vm440_vm3, %v3389_v47, %v3366_v21 }
 0x29b   : > { %v912_v40 = vmul.f32 %v905_v59, %v2973_v53  ;;  %v913_v63 = vmul.f32 %v901_v32, %v2976_v54  ;;  %v927_v42 = vpop.permute.xlu1 %926  ;;  %v971_v52 = vmul.f32 %v962_v7, %v3040_v18  ;;  %v970_v44 = vmul.f32 %v966_v24, %v3037_v16 }
 0x29c   : > { %1203 = vmatpush1.bf16.msra.mxu1 %v1110_v29  ;;  %v932_v12 = vsel %vm399_vm2, %v919_v61, %v927_v42  ;;  %v936_v45 = vsel %vm399_vm2, %v927_v42, %v919_v61  ;;  %v973_v29 = vmul.f32 %v963_v14, %v3040_v18  ;;  %v972_v42 = vmul.f32 %v967_v27, %v3037_v16 }
 0x29d   : > { %v3456_v58 = vpop.permute.xlu0 %984  ;;  %v1113_v2 = vpack.c.bf16 %v913_v63, %v911_v39  ;;  %v1112_v20 = vpack.c.bf16 %v912_v40, %v910_v33  ;;  %v942_v28 = vmul.f32 %v936_v45, %v3005_v35  ;;  %v943_v32 = vmul.f32 %v932_v12, %v3008_v36 }
 0x29e   : > { %v1119_v46 = vpack.c.bf16 %v973_v29, %v971_v52  ;;  %v1118_v14 = vpack.c.bf16 %v972_v42, %v970_v44  ;;  %v1123_v29 = vpack.c.bf16 %v3240_v51, %v3236_v50  ;;  %v1122_v50 = vpack.c.bf16 %v3216_v41, %v3214_v38 }
 0x29f   : > { %1204 = vmatprep.subr.bf16.mxu1 %v1113_v2  ;;  %v959_v4 = vpop.permute.xlu1 %958  ;;  %v1124_v41 = vpack.c.bf16 %v3260_v0, %v3256_v60 }
 0x2a0   : > { %1205 = vmatpush1.bf16.msra.mxu1 %v1112_v20  ;;  %v964_v2 = vsel %vm440_vm3, %v3395_v62, %v959_v4  ;;  %v968_v21 = vsel %vm440_vm3, %v959_v4, %v3395_v62 }
 0x2a1   : > { %v929_v31 = vpop.permute.xlu0 %928  ;;  %1206 = vmatprep.subr.bf16.mxu1 %v1115_v26  ;;  %v974_v26 = vmul.f32 %v968_v21, %v3037_v16  ;;  %v975_v12 = vmul.f32 %v964_v2, %v3040_v18 }
 0x2a2   : > { %v933_v61 = vsel %vm399_vm2, %v3393_v10, %v929_v31  ;;  %v937_v30 = vsel %vm399_vm2, %v929_v31, %v3393_v10 }
 0x2a3   : > { %v944_v59 = vmul.f32 %v937_v30, %v3005_v35  ;;  %v945_v33 = vmul.f32 %v933_v61, %v3008_v36  ;;  %v983_v39 = vpop.permute.xlu1 %982  ;;  %v998_v30 = vsel %vm481_vm4, %v3419_v43, %v3372_v13 }
 0x2a4   : > { %1207 = vmatpush1.bf16.msra.mxu1 %v1114_v25  ;;  %v1003_v24 = vmul.f32 %v998_v30, %v3071_v55 }
 0x2a5   : > { %v3491_v40 = vpop.permute.xlu0 %1012  ;;  %v1117_v10 = vpack.c.bf16 %v945_v33, %v943_v32  ;;  %v1116_v63 = vpack.c.bf16 %v944_v59, %v942_v28  ;;  %v995_v28 = vsel %vm481_vm4, %v3375_v5, %v3426_v56  ;;  %v1125_v59 = vpack.c.bf16 %v3280_v3, %v3276_v1 }
 0x2a6   : > { %v994_v33 = vsel %vm481_vm4, %v3372_v13, %v3419_v43  ;;  %v1004_v52 = vmul.f32 %v995_v28, %v3076_v57 }
 0x2a7   : > { %1208 = vmatprep.subr.bf16.mxu1 %v1117_v10  ;;  %v991_v15 = vpop.permute.xlu1 %990  ;;  %v1002_v1 = vmul.f32 %v994_v33, %v3076_v57 }
 0x2a8   : > { %1209 = vmatpush1.bf16.msra.mxu1 %v1116_v63  ;;  %v996_v38 = vsel %vm481_vm4, %v983_v39, %v991_v15  ;;  %v1000_v13 = vsel %vm481_vm4, %v991_v15, %v983_v39 }
 0x2a9   : > { %v961_v47 = vpop.permute.xlu0 %960  ;;  %1210 = vmatprep.subr.bf16.mxu1 %v1119_v46  ;;  %v1006_v10 = vmul.f32 %v996_v38, %v3076_v57  ;;  %v1126_v42 = vpack.c.bf16 %v1004_v52, %v1002_v1  ;;  %v1007_v46 = vmul.f32 %v1000_v13, %v3071_v55 }
 0x2aa   : > { %v965_v20 = vsel %vm440_vm3, %v3397_v6, %v961_v47  ;;  %v969_v22 = vsel %vm440_vm3, %v961_v47, %v3397_v6  ;;  %v999_v6 = vsel %vm481_vm4, %v3426_v56, %v3375_v5 }
 0x2ab   : > { %v976_v45 = vmul.f32 %v969_v22, %v3037_v16  ;;  %v977_v62 = vmul.f32 %v965_v20, %v3040_v18  ;;  %v1011_v4 = vpop.permute.xlu1 %1010  ;;  %v1005_v51 = vmul.f32 %v999_v6, %v3071_v55 }
 0x2ac   : > { %1211 = vmatpush1.bf16.msra.mxu1 %v1118_v14 }
 0x2ad   : > { %v1021_v7 = vpop.permute.xlu0 %1020  ;;  %v1121_v31 = vpack.c.bf16 %v977_v62, %v975_v12  ;;  %v1120_v25 = vpack.c.bf16 %v976_v45, %v974_v26  ;;  %v1127_v56 = vpack.c.bf16 %v1005_v51, %v1003_v24 }
 0x2ae   : > { %v1031_v60 = vsel %vm522_vm5, %v1021_v7, %v3491_v40  ;;  %v1027_v20 = vsel %vm522_vm5, %v3491_v40, %v1021_v7 }
 0x2af   : > { %1212 = vmatprep.subr.bf16.mxu1 %v1121_v31  ;;  %v1019_v27 = vpop.permute.xlu1 %1018  ;;  %v1037_v22 = vmul.f32 %v1031_v60, %v3112_v37  ;;  %v1036_v62 = vmul.f32 %v1027_v20, %v3109_v34 }
 0x2b0   : > { %1213 = vmatpush1.bf16.msra.mxu1 %v1120_v25  ;;  %v1030_v43 = vsel %vm522_vm5, %v1019_v27, %v1011_v4  ;;  %v1026_v0 = vsel %vm522_vm5, %v1011_v4, %v1019_v27 }
 0x2b1   : > { %v1017_v61 = vpop.permute.xlu0 %1016  ;;  %1214 = vmatprep.subr.bf16.mxu1 %v1123_v29  ;;  %v1035_v44 = vmul.f32 %v1030_v43, %v3112_v37  ;;  %v1034_v14 = vmul.f32 %v1026_v0, %v3109_v34 }
 0x2b3   : > { %v1015_v32 = vpop.permute.xlu1 %1014  ;;  %v1131_v25 = vpack.c.bf16 %v1037_v22, %v1035_v44  ;;  %v1130_v29 = vpack.c.bf16 %v1036_v62, %v1034_v14  ;;  %v2602_v14 = vld [vmem:[%s2749_s28 + $0x30] ss:$12 sps:$4 sm:$0xff]  }
 0x2b4   : > { %1215 = vmatpush1.bf16.msra.mxu1 %v1122_v50 }
 0x2b5   : > { %v1045_v5 = vpop.permute.xlu0 %1044  ;;  %1216 = vmatprep.subr.bf16.mxu1 %v1125_v59 }
 0x2b7   : > { %v1023_v3 = vpop.permute.xlu1 %1022 }
 0x2b8   : > { %1217 = vmatpush1.bf16.msra.mxu1 %v1124_v41  ;;  %v1028_v45 = vsel %vm522_vm5, %v1015_v32, %v1023_v3  ;;  %v1032_v4 = vsel %vm522_vm5, %v1023_v3, %v1015_v32 }
 0x2b9   : > { %v993_v63 = vpop.permute.xlu0 %992  ;;  %1218 = vmatprep.subr.bf16.mxu1 %v1127_v56  ;;  %v1038_v7 = vmul.f32 %v1028_v45, %v3109_v34  ;;  %v1039_v6 = vmul.f32 %v1032_v4, %v3112_v37 }
 0x2ba   : > { %v997_v39 = vsel %vm481_vm4, %v3456_v58, %v993_v63  ;;  %v1001_v15 = vsel %vm481_vm4, %v993_v63, %v3456_v58 }
 0x2bb   : > { %v1008_v2 = vmul.f32 %v997_v39, %v3076_v57  ;;  %v1009_v21 = vmul.f32 %v1001_v15, %v3071_v55  ;;  %v1043_v47 = vpop.permute.xlu1 %1042 }
 0x2bc   : > { %1219 = vmatpush1.bf16.msra.mxu1 %v1126_v42 }
 0x2bd   : > { %v1053_v26 = vpop.permute.xlu0 %1052  ;;  %v1129_v58 = vpack.c.bf16 %v1009_v21, %v1007_v46  ;;  %v1128_v12 = vpack.c.bf16 %v1008_v2, %v1006_v10 }
 0x2be   : > { %v1063_v30 = vsel %vm563_vm6, %v1053_v26, %v1045_v5  ;;  %v1059_v52 = vsel %vm563_vm6, %v1045_v5, %v1053_v26 }
 0x2bf   : > { %v1051_v31 = vpop.permute.xlu1 %1050  ;;  %1220 = vmatprep.subr.bf16.mxu1 %v1129_v58  ;;  %v1069_v38 = vmul.f32 %v1063_v30, %v3144_v9  ;;  %v1068_v43 = vmul.f32 %v1059_v52, %v3141_v8 }
 0x2c0   : > { %v1062_v40 = vsel %vm563_vm6, %v1051_v31, %v1043_v47  ;;  %1221 = vmatpush1.bf16.msra.mxu1 %v1128_v12  ;;  %v1058_v51 = vsel %vm563_vm6, %v1043_v47, %v1051_v31  ;;  %v2605_v12 = vld [vmem:[%s2749_s28 + $0x4c] ss:$12 sps:$4 sm:$0xff]  }
 0x2c1   : > { %v1025_v27 = vpop.permute.xlu0 %1024  ;;  %1222 = vmatprep.subr.bf16.mxu1 %v1131_v25  ;;  %v1067_v32 = vmul.f32 %v1062_v40, %v3144_v9 }
 0x2c2   : > { %v1029_v28 = vsel %vm522_vm5, %v1017_v61, %v1025_v27  ;;  %v1033_v50 = vsel %vm522_vm5, %v1025_v27, %v1017_v61  ;;  %v1066_v61 = vmul.f32 %v1058_v51, %v3141_v8 }
 0x2c3   : > { %v1040_v59 = vmul.f32 %v1029_v28, %v3109_v34  ;;  %v1041_v33 = vmul.f32 %v1033_v50, %v3112_v37  ;;  %v1047_v24 = vpop.permute.xlu1 %1046  ;;  %v1135_v13 = vpack.c.bf16 %v1069_v38, %v1067_v32  ;;  %v2607_v50 = vld [vmem:[%s2749_s28 + $0x48] ss:$12 sps:$4 sm:$0xff]  }
 0x2c4   : > { %1223 = vmatpush1.bf16.msra.mxu1 %v1130_v29  ;;  %v1134_v0 = vpack.c.bf16 %v1068_v43, %v1066_v61 }
 0x2c5   : > { %v1049_v41 = vpop.permute.xlu0 %1048  ;;  %v1133_v1 = vpack.c.bf16 %v1041_v33, %v1039_v6  ;;  %v1132_v3 = vpack.c.bf16 %v1040_v59, %v1038_v7 }
 0x2c7   : > { %v1055_v56 = vpop.permute.xlu1 %1054  ;;  %1224 = vmatprep.subr.bf16.mxu1 %v1133_v1 }
 0x2c8   : > { %v1060_v10 = vsel %vm563_vm6, %v1047_v24, %v1055_v56  ;;  %v1064_v63 = vsel %vm563_vm6, %v1055_v56, %v1047_v24  ;;  %1225 = vmatpush1.bf16.msra.mxu1 %v1132_v3  ;;  %v2608_v56 = vld [vmem:[%s2749_s28 + $0x38] ss:$12 sps:$4 sm:$0xff]  }
 0x2c9   : > { %v1057_v5 = vpop.permute.xlu0 %1056  ;;  %1226 = vmatprep.subr.bf16.mxu1 %v1135_v13  ;;  %v1070_v39 = vmul.f32 %v1060_v10, %v3141_v8  ;;  %v1071_v15 = vmul.f32 %v1064_v63, %v3144_v9  ;;  %v2609_v13 = vld [vmem:[%s2749_s28 + $0x50] ss:$12 sps:$4 sm:$0xff]  }
 0x2ca   : > { %v1061_v42 = vsel %vm563_vm6, %v1049_v41, %v1057_v5  ;;  %v1065_v60 = vsel %vm563_vm6, %v1057_v5, %v1049_v41 }
 0x2cb   : > { %v1072_v46 = vmul.f32 %v1061_v42, %v3141_v8  ;;  %v1073_v44 = vmul.f32 %v1065_v60, %v3144_v9  ;;  %v1075_v2 = vpop.permute.xlu1 %1074  ;;  %v2626_v42 = vld [vmem:[%s2757_s6] sm:$0xff] }
 0x2cc   : > { %1227 = vmatpush1.bf16.msra.mxu1 %v1134_v0 }
 0x2cd   : > { %v1077_v21 = vpop.permute.xlu0 %1076  ;;  %v1137_v47 = vpack.c.bf16 %v1073_v44, %v1071_v15  ;;  %v1136_v20 = vpack.c.bf16 %v1072_v46, %v1070_v39  ;;  %v2627_v15 = vld [vmem:[%s2757_s6 + $0x10] sm:$0xff] }
 0x2cf   : > { %v1083_v22 = vpop.permute.xlu1 %1082  ;;  %1228 = vmatprep.subr.bf16.mxu1 %v1137_v47 }
 0x2d0   : > { %v1090_v26 = vsel %vm604_vm7, %v1075_v2, %v1083_v22  ;;  %v1094_v58 = vsel %vm604_vm7, %v1083_v22, %v1075_v2  ;;  %1229 = vmatpush1.bf16.msra.mxu1 %v1136_v20 }
 0x2d1   : > { %v1085_v45 = vpop.permute.xlu0 %1084  ;;  %v1098_v31 = vmul.f32 %v3175_v48, %v1090_v26  ;;  %v1099_v25 = vmul.f32 %v3180_v49, %v1094_v58  ;;  %v2629_v58 = vld [vmem:[%s2757_s6 + $0x18] sm:$0xff] }
 0x2d2   : > { %v1091_v62 = vsel %vm604_vm7, %v1077_v21, %v1085_v45  ;;  %v1095_v4 = vsel %vm604_vm7, %v1085_v45, %v1077_v21 }
 0x2d3   : > { %v1100_v40 = vmul.f32 %v3175_v48, %v1091_v62  ;;  %v1101_v7 = vmul.f32 %v3180_v49, %v1095_v4  ;;  %v1079_v27 = vpop.permute.xlu1 %1078  ;;  %1231 = vmatmul.mubr.bf16.vlgmr.msra.gmra.mrb[0].mxu1 %v2602_v14  ;;  %v2628_v14 = vld [vmem:[%s2757_s6 + $0x8] sm:$0xff] }
 0x2d4   : > { %1240 = vmatprep.mubr.bf16.mxu1 %v2605_v12 }
 0x2d5   : > { %v1138_v29 = vpack.c.bf16 %v1100_v40, %v1098_v31  ;;  %v1081_v6 = vpop.permute.xlu0 %1080  ;;  %v1139_v30 = vpack.c.bf16 %v1101_v7, %v1099_v25  ;;  %v2630_v25 = vld [vmem:[%s2757_s6 + $0x20] sm:$0xff]  ;;  %v2631_v7 = vld [vmem:[%s2757_s6 + $0x30] sm:$0xff] }
 0x2d7   : > { %v1087_v28 = vpop.permute.xlu1 %1086  ;;  %1251 = vmatprep.subr.bf16.mxu1 %v1139_v30  ;;  %v2632_v30 = vld [vmem:[%s2757_s6 + $0x28] sm:$0xff] }
 0x2d8   : > { %v1092_v51 = vsel %vm604_vm7, %v1079_v27, %v1087_v28  ;;  %v1096_v32 = vsel %vm604_vm7, %v1087_v28, %v1079_v27  ;;  %1252 = vmatpush1.bf16.msra.mxu1 %v1138_v29 }
 0x2d9   : > { %v1089_v59 = vpop.permute.xlu0 %1088  ;;  %v1102_v52 = vmul.f32 %v3175_v48, %v1092_v51  ;;  %v1103_v38 = vmul.f32 %v3180_v49, %v1096_v32  ;;  %v2612_v32 = vld [vmem:[%s2749_s28 + $0x64] ss:$12 sps:$4 sm:$0xff]  }
 0x2da   : > { %v1093_v33 = vsel %vm604_vm7, %v1081_v6, %v1089_v59  ;;  %v1097_v24 = vsel %vm604_vm7, %v1089_v59, %v1081_v6  ;;  %1706 = vmatprep.mubr.bf16.mxu0 %v2612_v32 }
 0x2db   : > { %v1104_v41 = vmul.f32 %v3175_v48, %v1093_v33  ;;  %v1105_v1 = vmul.f32 %v3180_v49, %v1097_v24  ;;  %1241 = vmatmul.mubr.bf16.gmra.mrb[4].mxu1 %v2607_v50  ;;  %v2633_v50 = vld [vmem:[%s2757_s6 + $0x38] sm:$0xff] }
 0x2dc   : > { %1283 = vmatprep.mubr.bf16.mxu1 %v4543_v23 }
 0x2dd   : > { %v1140_v3 = vpack.c.bf16 %v1104_v41, %v1102_v52  ;;  %v1141_v61 = vpack.c.bf16 %v1105_v1, %v1103_v38  ;;  %v2443_v1 = vld [vmem:[%s2952_s5 + $0x40] sm:$0xff] }
 0x2df   : > { %1253 = vmatprep.subr.bf16.mxu1 %v1141_v61  ;;  %v2444_v61 = vld [vmem:[%s2952_s5 + $0x48] sm:$0xff] }
 0x2e0   : > { %1254 = vmatpush1.bf16.msra.mxu1 %v1140_v3 }
 0x2e3   : > { %2433 = vmatmul.mubr.msk.bf16.vlgmr.msra.gmra.mrb[0].mxu1 %vm715_vm8, %v2608_v56 }
 0x2e4   : > { %1293 = vmatprep.mubr.bf16.mxu1 %v4543_v23 }
 0x2e8   : > { %v1145_v48 = vpop.permute.xlu1 %1144 }
 0x2ea   : > { %v1150_v63 = vpop.permute.xlu0 %1149 }
 0x2eb   : > { %2434 = vmatmul.mubr.msk.bf16.gmra.mrb[4].mxu1 %vm715_vm8, %v2609_v13  ;;  %v2445_v13 = vld [vmem:[%s2952_s5 + $0x50] sm:$0xff] }
 0x2ec   : > { %v1155_v45 = vpop.permute.xlu1 %1154 }
 0x2ee   : > { %v1160_v4 = vpop.permute.xlu0 %1159 }
 0x3b6   : > { %v1285_v43 = vpop.f32.mrb[0].mxu1 }
 0x3b7   : > { %v2486_v49 = vadd.f32 %v1285_v43, %v1145_v48  ;;  %v1287_v10 = vpop.f32.mrb[1].mxu1  ;;  %v2446_v43 = vld [vmem:[%s2952_s5 + $0x58] sm:$0xff] }
 0x3b8   : > { %v1289_v5 = vpop.f32.mrb[2].mxu1  ;;  %v2487_v20 = vadd.f32 %v1287_v10, %v1145_v48 }
 0x3b9   : > { %v3637_v60 = vadd.f32 %v2626_v42, %v2486_v49  ;;  %v2488_v0 = vadd.f32 %v1289_v5, %v1150_v63  ;;  %v1291_v39 = vpop.f32.mrb[3].mxu1 }
 0x3ba   : > { %v2489_v22 = vadd.f32 %v1291_v39, %v1150_v63  ;;  %v3661_v26 = vadd.f32 %v2628_v14, %v2487_v20 }
 0x3bb   : > { %v3640_v46 = vadd.f32 %v2627_v15, %v2488_v0  ;;  %1326 = vrot.lane.b32.xlu1 %v3637_v60, %s2676_s7 }
 0x3bc   : > { %v3666_v12 = vadd.f32 %v2629_v58, %v2489_v22 }
 0x3bd   : > { %1328 = vrot.lane.b32.xlu0 %v3640_v46, %s2676_s7 }
 0x3be   : > { %v1295_v44 = vpop.f32.mrb[4].mxu1 }
 0x3bf   : > { %v1297_v2 = vpop.f32.mrb[5].mxu1  ;;  %1358 = vrot.lane.b32.xlu1 %v3637_v60, %s2677_s8  ;;  %v2490_v62 = vadd.f32 %v1295_v44, %v1155_v45 }
 0x3c0   : > { %v1299_v21 = vpop.f32.mrb[6].mxu1  ;;  %v2491_v29 = vadd.f32 %v1297_v2, %v1155_v45 }
 0x3c1   : > { %v1301_v47 = vpop.f32.mrb[7].mxu1  ;;  %1360 = vrot.lane.b32.xlu0 %v3640_v46, %s2677_s8  ;;  %v2492_v31 = vadd.f32 %v1299_v21, %v1160_v4  ;;  %v3683_v40 = vadd.f32 %v2630_v25, %v2490_v62 }
 0x3c2   : > { %v2493_v6 = vadd.f32 %v1301_v47, %v1160_v4  ;;  %v3705_v28 = vadd.f32 %v2632_v30, %v2491_v29 }
 0x3c3   : > { %1390 = vrot.lane.b32.xlu1 %v3637_v60, %s2678_s9  ;;  %4549 = vst [vmem:[#allocation2_spill] sm:$0xff] %v3683_v40  ;;  %v3688_v27 = vadd.f32 %v2631_v7, %v2492_v31 }
 0x3c4   : > { %4551 = vst [vmem:[#allocation4_spill] sm:$0xff] %v3705_v28  ;;  %v3710_v51 = vadd.f32 %v2633_v50, %v2493_v6 }
 0x3c5   : > { %1392 = vrot.lane.b32.xlu0 %v3640_v46, %s2678_s9  ;;  %4550 = vst [vmem:[#allocation3_spill] sm:$0xff] %v3688_v27 }
 0x3c6   : > { %4552 = vst [vmem:[#allocation5_spill] sm:$0xff] %v3710_v51 }
 0x3c7   : > { %1422 = vrot.lane.b32.xlu1 %v3637_v60, %s2679_s10 }
 0x3c9   : > { %1424 = vrot.lane.b32.xlu0 %v3640_v46, %s2679_s10 }
 0x3cb   : > { %1454 = vrot.lane.b32.xlu1 %v3637_v60, %s2680_s11 }
 0x3cd   : > { %1456 = vrot.lane.b32.xlu0 %v3640_v46, %s2680_s11 }
 0x3cf   : > { %1334 = vrot.lane.b32.xlu1 %v3661_v26, %s2676_s7 }
 0x3d1   : > { %1336 = vrot.lane.b32.xlu0 %v3666_v12, %s2676_s7 }
 0x3d3   : > { %1366 = vrot.lane.b32.xlu1 %v3661_v26, %s2677_s8 }
 0x3d5   : > { %1368 = vrot.lane.b32.xlu0 %v3666_v12, %s2677_s8 }
 0x3d7   : > { %1398 = vrot.lane.b32.xlu1 %v3661_v26, %s2678_s9 }
 0x3d9   : > { %1400 = vrot.lane.b32.xlu0 %v3666_v12, %s2678_s9 }
 0x3db   : > { %1430 = vrot.lane.b32.xlu1 %v3661_v26, %s2679_s10 }
 0x3dd   : > { %1432 = vrot.lane.b32.xlu0 %v3666_v12, %s2679_s10 }
 0x3df   : > { %1330 = vrot.lane.b32.xlu1 %v3683_v40, %s2676_s7 }
 0x3e1   : > { %1332 = vrot.lane.b32.xlu0 %v3688_v27, %s2676_s7 }
 0x3e3   : > { %1362 = vrot.lane.b32.xlu1 %v3683_v40, %s2677_s8 }
 0x3e5   : > { %1364 = vrot.lane.b32.xlu0 %v3688_v27, %s2677_s8 }
 0x3e7   : > { %1394 = vrot.lane.b32.xlu1 %v3683_v40, %s2678_s9 }
 0x3e9   : > { %1396 = vrot.lane.b32.xlu0 %v3688_v27, %s2678_s9 }
 0x3eb   : > { %1426 = vrot.lane.b32.xlu1 %v3683_v40, %s2679_s10 }
 0x3ed   : > { %1428 = vrot.lane.b32.xlu0 %v3688_v27, %s2679_s10 }
 0x3ef   : > { %1338 = vrot.lane.b32.xlu1 %v3705_v28, %s2676_s7 }
 0x3f1   : > { %1340 = vrot.lane.b32.xlu0 %v3710_v51, %s2676_s7 }
 0x3f3   : > { %1462 = vrot.lane.b32.xlu1 %v3661_v26, %s2680_s11 }
 0x3f5   : > { %1464 = vrot.lane.b32.xlu0 %v3666_v12, %s2680_s11 }
 0x3f7   : > { %1370 = vrot.lane.b32.xlu1 %v3705_v28, %s2677_s8 }
 0x3f9   : > { %1372 = vrot.lane.b32.xlu0 %v3710_v51, %s2677_s8 }
 0x3fb   : > { %1402 = vrot.lane.b32.xlu1 %v3705_v28, %s2678_s9 }
 0x3fd   : > { %1460 = vrot.lane.b32.xlu0 %v3688_v27, %s2680_s11 }
 0x3ff   : > { %1434 = vrot.lane.b32.xlu1 %v3705_v28, %s2679_s10 }
 0x401   : > { %1404 = vrot.lane.b32.xlu0 %v3710_v51, %s2678_s9 }
 0x403   : > { %1458 = vrot.lane.b32.xlu1 %v3683_v40, %s2680_s11 }
 0x405   : > { %1488 = vrot.lane.b32.xlu0 %v3640_v46, %s2681_s12 }
 0x407   : > { %1466 = vrot.lane.b32.xlu1 %v3705_v28, %s2680_s11 }
 0x409   : > { %1436 = vrot.lane.b32.xlu0 %v3710_v51, %s2679_s10 }
 0x40b   : > { %1486 = vrot.lane.b32.xlu1 %v3637_v60, %s2681_s12 }
 0x40d   : > { %1496 = vrot.lane.b32.xlu0 %v3666_v12, %s2681_s12 }
 0x40f   : > { %1494 = vrot.lane.b32.xlu1 %v3661_v26, %s2681_s12 }
 0x411   : > { %1492 = vrot.lane.b32.xlu0 %v3688_v27, %s2681_s12 }
 0x413   : > { %1490 = vrot.lane.b32.xlu1 %v3683_v40, %s2681_s12 }
 0x415   : > { %1520 = vrot.lane.b32.xlu0 %v3640_v46, %s2682_s13 }
 0x417   : > { %1498 = vrot.lane.b32.xlu1 %v3705_v28, %s2681_s12 }
 0x419   : > { %1468 = vrot.lane.b32.xlu0 %v3710_v51, %s2680_s11 }
 0x41b   : > { %1518 = vrot.lane.b32.xlu1 %v3637_v60, %s2682_s13 }
 0x41d   : > { %1528 = vrot.lane.b32.xlu0 %v3666_v12, %s2682_s13 }
 0x41f   : > { %1526 = vrot.lane.b32.xlu1 %v3661_v26, %s2682_s13 }
 0x421   : > { %1500 = vrot.lane.b32.xlu0 %v3710_v51, %s2681_s12 }
 0x423   : > { %1522 = vrot.lane.b32.xlu1 %v3683_v40, %s2682_s13 }
 0x425   : > { %1524 = vrot.lane.b32.xlu0 %v3688_v27, %s2682_s13 }
 0x427   : > { %1530 = vrot.lane.b32.xlu1 %v3705_v28, %s2682_s13 }
 0x429   : > { %1532 = vrot.lane.b32.xlu0 %v3710_v51, %s2682_s13 }
 0x42b   : > { %1550 = vrot.lane.b32.xlu1 %v3637_v60, %s2683_s14 }
 0x42d   : > { %1552 = vrot.lane.b32.xlu0 %v3640_v46, %s2683_s14  ;;  %v1327_v59 = vpop.permute.xlu1 %1326 }
 0x42f   : > { %v1329_v33 = vpop.permute.xlu0 %1328  ;;  %1558 = vrot.lane.b32.xlu1 %v3661_v26, %s2683_s14 }
 0x431   : > { %1560 = vrot.lane.b32.xlu0 %v3666_v12, %s2683_s14  ;;  %v3781_v24 = vpop.permute.xlu1 %1358 }
 0x433   : > { %v1361_v52 = vpop.permute.xlu0 %1360  ;;  %1554 = vrot.lane.b32.xlu1 %v3683_v40, %s2683_s14 }
 0x435   : > { %1556 = vrot.lane.b32.xlu0 %v3688_v27, %s2683_s14  ;;  %v3787_v38 = vpop.permute.xlu1 %1390 }
 0x437   : > { %v3789_v41 = vpop.permute.xlu0 %1392  ;;  %1562 = vrot.lane.b32.xlu1 %v3705_v28, %s2683_s14 }
 0x439   : > { %1564 = vrot.lane.b32.xlu0 %v3710_v51, %s2683_s14  ;;  %v3796_v3 = vpop.permute.xlu1 %1422 }
 0x43b   : > { %v3799_v56 = vpop.permute.xlu0 %1424  ;;  %1620 = vperm.xlu1 %2593, %v2443_v1  }
 0x43d   : > { %1625 = vperm.xlu0 %2592, %v2444_v61   ;;  %v3802_v48 = vpop.permute.xlu1 %1454 }
 0x43f   : > { %v3805_v49 = vpop.permute.xlu0 %1456  ;;  %1630 = vperm.xlu1 %2593, %v2445_v13  }
 0x441   : > { %1635 = vperm.xlu0 %2592, %v2446_v43   ;;  %v1335_v10 = vpop.permute.xlu1 %1334 }
 0x442   : > { %v1342_v63 = vsel %vm317_vm0, %v1327_v59, %v1335_v10  ;;  %v1346_v5 = vsel %vm317_vm0, %v1335_v10, %v1327_v59 }
 0x443   : > { %v1337_v42 = vpop.permute.xlu0 %1336  ;;  %v1350_v15 = vmul.f32 %v1346_v5, %v2926_v19  ;;  %v1351_v44 = vmul.f32 %v1342_v63, %v2917_v17 }
 0x444   : > { %v1343_v0 = vsel %vm317_vm0, %v1329_v33, %v1337_v42  ;;  %v1347_v39 = vsel %vm317_vm0, %v1337_v42, %v1329_v33 }
 0x445   : > { %v1352_v2 = vmul.f32 %v1347_v39, %v2926_v19  ;;  %v1353_v21 = vmul.f32 %v1343_v0, %v2917_v17  ;;  %v1367_v47 = vpop.permute.xlu1 %1366 }
 0x446   : > { %v1374_v13 = vsel %vm358_vm1, %v3781_v24, %v1367_v47 }
 0x447   : > { %v1582_v20 = vpack.c.bf16 %v1352_v2, %v1350_v15  ;;  %v1369_v22 = vpop.permute.xlu0 %1368  ;;  %v1583_v14 = vpack.c.bf16 %v1353_v21, %v1351_v44  ;;  %v1383_v21 = vmul.f32 %v1374_v13, %v2976_v54 }
 0x448   : > { %v1375_v59 = vsel %vm358_vm1, %v1361_v52, %v1369_v22  ;;  %v1379_v10 = vsel %vm358_vm1, %v1369_v22, %v1361_v52  ;;  %v1378_v52 = vsel %vm358_vm1, %v1367_v47, %v3781_v24 }
 0x449   : > { %1674 = vmatprep.subr.bf16.mxu0 %v1583_v14  ;;  %v1399_v58 = vpop.permute.xlu1 %1398  ;;  %v1385_v63 = vmul.f32 %v1375_v59, %v2976_v54 }
 0x44a   : > { %1675 = vmatpush1.bf16.msra.mxu0 %v1582_v20  ;;  %v1384_v20 = vmul.f32 %v1379_v10, %v2973_v53  ;;  %v1406_v13 = vsel %vm399_vm2, %v3787_v38, %v1399_v58 }
 0x44b   : > { %v1401_v45 = vpop.permute.xlu0 %1400 }
 0x44c   : > { %v1407_v59 = vsel %vm399_vm2, %v3789_v41, %v1401_v45  ;;  %v1411_v10 = vsel %vm399_vm2, %v1401_v45, %v3789_v41  ;;  %v1410_v41 = vsel %vm399_vm2, %v1399_v58, %v3787_v38  ;;  %v1415_v45 = vmul.f32 %v1406_v13, %v3008_v36 }
 0x44d   : > { %v3819_v62 = vpop.permute.xlu1 %1430 }
 0x44f   : > { %v3821_v4 = vpop.permute.xlu0 %1432 }
 0x451   : > { %v1331_v31 = vpop.permute.xlu1 %1330 }
 0x453   : > { %v1333_v25 = vpop.permute.xlu0 %1332 }
 0x455   : > { %v1363_v7 = vpop.permute.xlu1 %1362 }
 0x457   : > { %v1365_v29 = vpop.permute.xlu0 %1364 }
 0x459   : > { %v1395_v6 = vpop.permute.xlu1 %1394 }
 0x45b   : > { %v3823_v30 = vpop.permute.xlu0 %1396 }
 0x45d   : > { %v3825_v50 = vpop.permute.xlu1 %1426 }
 0x45f   : > { %v3827_v32 = vpop.permute.xlu0 %1428 }
 0x461   : > { %v1339_v33 = vpop.permute.xlu1 %1338 }
 0x462   : > { %v1344_v1 = vsel %vm317_vm0, %v1331_v31, %v1339_v33  ;;  %v1348_v61 = vsel %vm317_vm0, %v1339_v33, %v1331_v31 }
 0x463   : > { %v1341_v43 = vpop.permute.xlu0 %1340  ;;  %v1354_v0 = vmul.f32 %v1348_v61, %v2926_v19  ;;  %v1355_v39 = vmul.f32 %v1344_v1, %v2917_v17  ;;  %v1587_v1 = vpack.c.bf16 %v1385_v63, %v1383_v21  ;;  %v1417_v63 = vmul.f32 %v1407_v59, %v3008_v36 }
 0x464   : > { %v1345_v5 = vsel %vm317_vm0, %v1333_v25, %v1341_v43  ;;  %v1349_v42 = vsel %vm317_vm0, %v1341_v43, %v1333_v25  ;;  %v1382_v25 = vmul.f32 %v1378_v52, %v2973_v53  ;;  %v1416_v52 = vmul.f32 %v1411_v10, %v3005_v35 }
 0x465   : > { %v1356_v15 = vmul.f32 %v1349_v42, %v2926_v19  ;;  %v1357_v44 = vmul.f32 %v1345_v5, %v2917_v17  ;;  %v3849_v2 = vpop.permute.xlu1 %1462  ;;  %v1591_v59 = vpack.c.bf16 %v1417_v63, %v1415_v45 }
 0x466   : > { %v1586_v61 = vpack.c.bf16 %v1384_v20, %v1382_v25 }
 0x467   : > { %v1584_v22 = vpack.c.bf16 %v1356_v15, %v1354_v0  ;;  %v3856_v14 = vpop.permute.xlu0 %1464  ;;  %v1585_v31 = vpack.c.bf16 %v1357_v44, %v1355_v39 }
 0x469   : > { %1676 = vmatprep.subr.bf16.mxu0 %v1585_v31  ;;  %v1371_v33 = vpop.permute.xlu1 %1370  ;;  %v1439_v31 = vsel %vm440_vm3, %v3799_v56, %v3821_v4 }
 0x46a   : > { %v1376_v24 = vsel %vm358_vm1, %v1363_v7, %v1371_v33  ;;  %v1380_v47 = vsel %vm358_vm1, %v1371_v33, %v1363_v7  ;;  %1677 = vmatpush1.bf16.msra.mxu0 %v1584_v22  ;;  %v1414_v22 = vmul.f32 %v1410_v41, %v3005_v35 }
 0x46b   : > { %v1373_v43 = vpop.permute.xlu0 %1372  ;;  %1678 = vmatprep.subr.bf16.mxu0 %v1587_v1  ;;  %v1386_v42 = vmul.f32 %v1380_v47, %v2973_v53  ;;  %v1387_v0 = vmul.f32 %v1376_v24, %v2976_v54  ;;  %v1438_v1 = vsel %vm440_vm3, %v3796_v3, %v3819_v62  ;;  %v1443_v47 = vsel %vm440_vm3, %v3821_v4, %v3799_v56 }
 0x46c   : > { %v1377_v5 = vsel %vm358_vm1, %v1365_v29, %v1373_v43  ;;  %v1381_v7 = vsel %vm358_vm1, %v1373_v43, %v1365_v29  ;;  %v1590_v33 = vpack.c.bf16 %v1416_v52, %v1414_v22  ;;  %v1442_v56 = vsel %vm440_vm3, %v3819_v62, %v3796_v3 }
 0x46d   : > { %v1388_v39 = vmul.f32 %v1381_v7, %v2973_v53  ;;  %v1389_v15 = vmul.f32 %v1377_v5, %v2976_v54  ;;  %v1403_v44 = vpop.permute.xlu1 %1402  ;;  %v1447_v4 = vmul.f32 %v1438_v1, %v3040_v18  ;;  %v1446_v41 = vmul.f32 %v1442_v56, %v3037_v16 }
 0x46e   : > { %1679 = vmatpush1.bf16.msra.mxu0 %v1586_v61  ;;  %v1408_v38 = vsel %vm399_vm2, %v1395_v6, %v1403_v44  ;;  %v1412_v58 = vsel %vm399_vm2, %v1403_v44, %v1395_v6  ;;  %v1449_v61 = vmul.f32 %v1439_v31, %v3040_v18 }
 0x46f   : > { %v1588_v21 = vpack.c.bf16 %v1388_v39, %v1386_v42  ;;  %v3886_v29 = vpop.permute.xlu0 %1460  ;;  %v1589_v20 = vpack.c.bf16 %v1389_v15, %v1387_v0  ;;  %v1418_v43 = vmul.f32 %v1412_v58, %v3005_v35  ;;  %v1419_v10 = vmul.f32 %v1408_v38, %v3008_v36 }
 0x470   : > { %v1448_v39 = vmul.f32 %v1443_v47, %v3037_v16  ;;  %v1595_v44 = vpack.c.bf16 %v1449_v61, %v1447_v4  ;;  %v1474_v61 = vsel %vm481_vm4, %v3849_v2, %v3802_v48 }
 0x471   : > { %1680 = vmatprep.subr.bf16.mxu0 %v1589_v20  ;;  %v1435_v25 = vpop.permute.xlu1 %1434  ;;  %v1479_v56 = vmul.f32 %v1474_v61, %v3071_v55 }
 0x472   : > { %1681 = vmatpush1.bf16.msra.mxu0 %v1588_v21  ;;  %v1440_v45 = vsel %vm440_vm3, %v3825_v50, %v1435_v25  ;;  %v1444_v3 = vsel %vm440_vm3, %v1435_v25, %v3825_v50  ;;  %v1594_v52 = vpack.c.bf16 %v1448_v39, %v1446_v41 }
 0x473   : > { %v1405_v24 = vpop.permute.xlu0 %1404  ;;  %1682 = vmatprep.subr.bf16.mxu0 %v1591_v59  ;;  %v1450_v22 = vmul.f32 %v1444_v3, %v3037_v16  ;;  %v1451_v31 = vmul.f32 %v1440_v45, %v3040_v18 }
 0x474   : > { %v1409_v6 = vsel %vm399_vm2, %v3823_v30, %v1405_v24  ;;  %v1413_v13 = vsel %vm399_vm2, %v1405_v24, %v3823_v30  ;;  %v1599_v24 = vpack.c.bf16 %v3666_v12, %v3661_v26 }
 0x475   : > { %v1420_v63 = vmul.f32 %v1413_v13, %v3005_v35  ;;  %v1421_v5 = vmul.f32 %v1409_v6, %v3008_v36  ;;  %v1459_v7 = vpop.permute.xlu1 %1458  ;;  %v1471_v6 = vsel %vm481_vm4, %v3805_v49, %v3856_v14  ;;  %v1598_v13 = vpack.c.bf16 %v3640_v46, %v3637_v60 }
 0x476   : > { %1683 = vmatpush1.bf16.msra.mxu0 %v1590_v33  ;;  %v1480_v4 = vmul.f32 %v1471_v6, %v3076_v57 }
 0x477   : > { %v1592_v42 = vpack.c.bf16 %v1420_v63, %v1418_v43  ;;  %v3921_v0 = vpop.permute.xlu0 %1488  ;;  %v1593_v30 = vpack.c.bf16 %v1421_v5, %v1419_v10  ;;  %v1601_v63 = vpack.c.bf16 %v3710_v51, %v3705_v28  ;;  %v1470_v5 = vsel %vm481_vm4, %v3802_v48, %v3849_v2 }
 0x479   : > { %1684 = vmatprep.subr.bf16.mxu0 %v1593_v30  ;;  %v1467_v15 = vpop.permute.xlu1 %1466  ;;  %v1478_v30 = vmul.f32 %v1470_v5, %v3076_v57 }
 0x47a   : > { %1685 = vmatpush1.bf16.msra.mxu0 %v1592_v42  ;;  %v1600_v42 = vpack.c.bf16 %v3688_v27, %v3683_v40  ;;  %v1476_v48 = vsel %vm481_vm4, %v1467_v15, %v1459_v7 }
 0x47b   : > { %v1437_v62 = vpop.permute.xlu0 %1436  ;;  %1686 = vmatprep.subr.bf16.mxu0 %v1595_v44  ;;  %v1602_v41 = vpack.c.bf16 %v1480_v4, %v1478_v30 }
 0x47c   : > { %v1441_v21 = vsel %vm440_vm3, %v3827_v32, %v1437_v62  ;;  %v1445_v20 = vsel %vm440_vm3, %v1437_v62, %v3827_v32  ;;  %v1475_v32 = vsel %vm481_vm4, %v3856_v14, %v3805_v49  ;;  %v1472_v14 = vsel %vm481_vm4, %v1459_v7, %v1467_v15 }
 0x47d   : > { %v1452_v59 = vmul.f32 %v1445_v20, %v3037_v16  ;;  %v1453_v50 = vmul.f32 %v1441_v21, %v3040_v18  ;;  %v1487_v25 = vpop.permute.xlu1 %1486  ;;  %v1481_v43 = vmul.f32 %v1475_v32, %v3071_v55  ;;  %v1482_v45 = vmul.f32 %v1472_v14, %v3076_v57 }
 0x47e   : > { %1687 = vmatpush1.bf16.msra.mxu0 %v1594_v52  ;;  %v1483_v21 = vmul.f32 %v1476_v48, %v3071_v55 }
 0x47f   : > { %v1596_v38 = vpack.c.bf16 %v1452_v59, %v1450_v22  ;;  %v1497_v58 = vpop.permute.xlu0 %1496  ;;  %v1597_v33 = vpack.c.bf16 %v1453_v50, %v1451_v31  ;;  %v1603_v44 = vpack.c.bf16 %v1481_v43, %v1479_v56 }
 0x480   : > { %v1507_v62 = vsel %vm522_vm5, %v1497_v58, %v3921_v0  ;;  %v1503_v50 = vsel %vm522_vm5, %v3921_v0, %v1497_v58 }
 0x481   : > { %1688 = vmatprep.subr.bf16.mxu0 %v1597_v33  ;;  %v1495_v1 = vpop.permute.xlu1 %1494  ;;  %v1512_v32 = vmul.f32 %v1503_v50, %v3109_v34 }
 0x482   : > { %1689 = vmatpush1.bf16.msra.mxu0 %v1596_v38  ;;  %v1506_v2 = vsel %vm522_vm5, %v1495_v1, %v1487_v25  ;;  %v1502_v52 = vsel %vm522_vm5, %v1487_v25, %v1495_v1  ;;  %v1513_v25 = vmul.f32 %v1507_v62, %v3112_v37 }
 0x483   : > { %v1493_v47 = vpop.permute.xlu0 %1492  ;;  %1690 = vmatprep.subr.bf16.mxu0 %v1599_v24  ;;  %v1511_v20 = vmul.f32 %v1506_v2, %v3112_v37  ;;  %v1510_v38 = vmul.f32 %v1502_v52, %v3109_v34 }
 0x485   : > { %v1491_v10 = vpop.permute.xlu1 %1490  ;;  %v1606_v58 = vpack.c.bf16 %v1512_v32, %v1510_v38 }
 0x486   : > { %1691 = vmatpush1.bf16.msra.mxu0 %v1598_v13  ;;  %v1607_v13 = vpack.c.bf16 %v1513_v25, %v1511_v20 }
 0x487   : > { %v1521_v49 = vpop.permute.xlu0 %1520  ;;  %1692 = vmatprep.subr.bf16.mxu0 %v1601_v63 }
 0x489   : > { %v1499_v39 = vpop.permute.xlu1 %1498 }
 0x48a   : > { %1693 = vmatpush1.bf16.msra.mxu0 %v1600_v42  ;;  %v1504_v24 = vsel %vm522_vm5, %v1491_v10, %v1499_v39  ;;  %v1508_v61 = vsel %vm522_vm5, %v1499_v39, %v1491_v10 }
 0x48b   : > { %v1469_v3 = vpop.permute.xlu0 %1468  ;;  %1694 = vmatprep.subr.bf16.mxu0 %v1603_v44  ;;  %v1514_v43 = vmul.f32 %v1504_v24, %v3109_v34  ;;  %v1515_v5 = vmul.f32 %v1508_v61, %v3112_v37  ;;  %v2610_v61 = vld [vmem:[%s2749_s28 + $0x60] ss:$12 sps:$4 sm:$0xff]  }
 0x48c   : > { %v1473_v7 = vsel %vm481_vm4, %v3886_v29, %v1469_v3  ;;  %v1477_v15 = vsel %vm481_vm4, %v1469_v3, %v3886_v29 }
 0x48d   : > { %v1484_v22 = vmul.f32 %v1473_v7, %v3076_v57  ;;  %v1485_v31 = vmul.f32 %v1477_v15, %v3071_v55  ;;  %v1519_v59 = vpop.permute.xlu1 %1518 }
 0x48e   : > { %1695 = vmatpush1.bf16.msra.mxu0 %v1602_v41 }
 0x48f   : > { %v1604_v33 = vpack.c.bf16 %v1484_v22, %v1482_v45  ;;  %v1529_v29 = vpop.permute.xlu0 %1528  ;;  %v1605_v1 = vpack.c.bf16 %v1485_v31, %v1483_v21 }
 0x490   : > { %v1539_v56 = vsel %vm563_vm6, %v1529_v29, %v1521_v49  ;;  %v1535_v48 = vsel %vm563_vm6, %v1521_v49, %v1529_v29 }
 0x491   : > { %v1527_v6 = vpop.permute.xlu1 %1526  ;;  %1696 = vmatprep.subr.bf16.mxu0 %v1605_v1  ;;  %v1545_v2 = vmul.f32 %v1539_v56, %v3144_v9  ;;  %v1544_v7 = vmul.f32 %v1535_v48, %v3141_v8 }
 0x492   : > { %v1538_v0 = vsel %vm563_vm6, %v1527_v6, %v1519_v59  ;;  %1697 = vmatpush1.bf16.msra.mxu0 %v1604_v33  ;;  %v1534_v14 = vsel %vm563_vm6, %v1519_v59, %v1527_v6 }
 0x493   : > { %v1501_v63 = vpop.permute.xlu0 %1500  ;;  %1698 = vmatprep.subr.bf16.mxu0 %v1607_v13  ;;  %v1543_v42 = vmul.f32 %v1538_v0, %v3144_v9  ;;  %v2613_v0 = vld [vmem:[%s2749_s28 + $0x7c] ss:$12 sps:$4 sm:$0xff]  }
 0x494   : > { %v1505_v10 = vsel %vm522_vm5, %v1493_v47, %v1501_v63  ;;  %v1509_v4 = vsel %vm522_vm5, %v1501_v63, %v1493_v47  ;;  %v1542_v47 = vmul.f32 %v1534_v14, %v3141_v8 }
 0x495   : > { %v1516_v30 = vmul.f32 %v1505_v10, %v3109_v34  ;;  %v1517_v39 = vmul.f32 %v1509_v4, %v3112_v37  ;;  %v1523_v44 = vpop.permute.xlu1 %1522  ;;  %v1611_v52 = vpack.c.bf16 %v1545_v2, %v1543_v42  ;;  %v4052_v10 = vld [vmem:[%s4538_s0 + $0x18] ss:$0 sm:$0xff] }
 0x496   : > { %1699 = vmatpush1.bf16.msra.mxu0 %v1606_v58  ;;  %v1610_v20 = vpack.c.bf16 %v1544_v7, %v1542_v47 }
 0x497   : > { %v1608_v41 = vpack.c.bf16 %v1516_v30, %v1514_v43  ;;  %v1525_v45 = vpop.permute.xlu0 %1524  ;;  %v1609_v3 = vpack.c.bf16 %v1517_v39, %v1515_v5  ;;  %v4046_v5 = vld [vmem:[%s4538_s0 + $0x10] ss:$0 sm:$0xff] }
 0x499   : > { %v1531_v62 = vpop.permute.xlu1 %1530  ;;  %1700 = vmatprep.subr.bf16.mxu0 %v1609_v3 }
 0x49a   : > { %v1536_v15 = vsel %vm563_vm6, %v1523_v44, %v1531_v62  ;;  %v1540_v21 = vsel %vm563_vm6, %v1531_v62, %v1523_v44  ;;  %1701 = vmatpush1.bf16.msra.mxu0 %v1608_v41  ;;  %v2615_v41 = vld [vmem:[%s2749_s28 + $0x78] ss:$12 sps:$4 sm:$0xff]  }
 0x49b   : > { %v1533_v49 = vpop.permute.xlu0 %1532  ;;  %1702 = vmatprep.subr.bf16.mxu0 %v1611_v52  ;;  %v1546_v59 = vmul.f32 %v1536_v15, %v3141_v8  ;;  %v1547_v50 = vmul.f32 %v1540_v21, %v3144_v9 }
 0x49c   : > { %v1537_v22 = vsel %vm563_vm6, %v1525_v45, %v1533_v49  ;;  %v1541_v31 = vsel %vm563_vm6, %v1533_v49, %v1525_v45 }
 0x49d   : > { %v1548_v25 = vmul.f32 %v1537_v22, %v3141_v8  ;;  %v1549_v38 = vmul.f32 %v1541_v31, %v3144_v9  ;;  %v1551_v33 = vpop.permute.xlu1 %1550  ;;  %v2616_v31 = vld [vmem:[%s2749_s28 + $0x68] ss:$12 sps:$4 sm:$0xff]  }
 0x49e   : > { %1703 = vmatpush1.bf16.msra.mxu0 %v1610_v20 }
 0x49f   : > { %v1612_v29 = vpack.c.bf16 %v1548_v25, %v1546_v59  ;;  %v1553_v1 = vpop.permute.xlu0 %1552  ;;  %v1613_v24 = vpack.c.bf16 %v1549_v38, %v1547_v50  ;;  %v2617_v59 = vld [vmem:[%s2749_s28 + $0x80] ss:$12 sps:$4 sm:$0xff]  }
 0x4a1   : > { %v1559_v32 = vpop.permute.xlu1 %1558  ;;  %1704 = vmatprep.subr.bf16.mxu0 %v1613_v24 }
 0x4a2   : > { %v1566_v6 = vsel %vm604_vm7, %v1551_v33, %v1559_v32  ;;  %v1570_v13 = vsel %vm604_vm7, %v1559_v32, %v1551_v33  ;;  %1705 = vmatpush1.bf16.msra.mxu0 %v1612_v29 }
 0x4a3   : > { %v1561_v58 = vpop.permute.xlu0 %1560  ;;  %v1574_v56 = vmul.f32 %v4046_v5, %v1566_v6  ;;  %v1575_v4 = vmul.f32 %v4052_v10, %v1570_v13 }
 0x4a4   : > { %v1567_v43 = vsel %vm604_vm7, %v1553_v1, %v1561_v58  ;;  %v1571_v63 = vsel %vm604_vm7, %v1561_v58, %v1553_v1 }
 0x4a5   : > { %v1576_v14 = vmul.f32 %v4046_v5, %v1567_v43  ;;  %v1577_v42 = vmul.f32 %v4052_v10, %v1571_v63  ;;  %v1555_v30 = vpop.permute.xlu1 %1554  ;;  %1707 = vmatmul.mubr.bf16.vlgmr.msra.gmra.mrb[8].mxu0 %v2610_v61 }
 0x4a6   : > { %1716 = vmatprep.mubr.bf16.mxu0 %v2613_v0 }
 0x4a7   : > { %v1614_v39 = vpack.c.bf16 %v1576_v14, %v1574_v56  ;;  %v1557_v44 = vpop.permute.xlu0 %1556  ;;  %v1615_v48 = vpack.c.bf16 %v1577_v42, %v1575_v4 }
 0x4a9   : > { %v1563_v2 = vpop.permute.xlu1 %1562  ;;  %1727 = vmatprep.subr.bf16.mxu0 %v1615_v48 }
 0x4aa   : > { %v1568_v45 = vsel %vm604_vm7, %v1555_v30, %v1563_v2  ;;  %v1572_v3 = vsel %vm604_vm7, %v1563_v2, %v1555_v30  ;;  %1728 = vmatpush1.bf16.msra.mxu0 %v1614_v39 }
 0x4ab   : > { %v1565_v47 = vpop.permute.xlu0 %1564  ;;  %v1578_v7 = vmul.f32 %v4046_v5, %v1568_v45  ;;  %v1579_v15 = vmul.f32 %v4052_v10, %v1572_v3 }
 0x4ac   : > { %v1569_v62 = vsel %vm604_vm7, %v1557_v44, %v1565_v47  ;;  %v1573_v52 = vsel %vm604_vm7, %v1565_v47, %v1557_v44 }
 0x4ad   : > { %v1580_v21 = vmul.f32 %v4046_v5, %v1569_v62  ;;  %v1581_v49 = vmul.f32 %v4052_v10, %v1573_v52  ;;  %1717 = vmatmul.mubr.bf16.gmra.mrb[12].mxu0 %v2615_v41  ;;  %v2620_v62 = vld [vmem:[%s2749_s28 + $0x94] ss:$12 sps:$4 sm:$0xff]  }
 0x4ae   : > { %1759 = vmatprep.mubr.bf16.mxu0 %v4543_v23  ;;  %2182 = vmatprep.mubr.bf16.mxu1 %v2620_v62 }
 0x4af   : > { %v1616_v20 = vpack.c.bf16 %v1580_v21, %v1578_v7  ;;  %v1617_v22 = vpack.c.bf16 %v1581_v49, %v1579_v15 }
 0x4b1   : > { %1729 = vmatprep.subr.bf16.mxu0 %v1617_v22  ;;  %v2463_v22 = vld [vmem:[%s2952_s5 + $0x60] sm:$0xff] }
 0x4b2   : > { %1730 = vmatpush1.bf16.msra.mxu0 %v1616_v20 }
 0x4b5   : > { %2453 = vmatmul.mubr.msk.bf16.vlgmr.msra.gmra.mrb[8].mxu0 %vm715_vm8, %v2616_v31 }
 0x4b6   : > { %1769 = vmatprep.mubr.bf16.mxu0 %v4543_v23 }
 0x4ba   : > { %v1621_v50 = vpop.permute.xlu1 %1620 }
 0x4bc   : > { %v1626_v29 = vpop.permute.xlu0 %1625 }
 0x4bd   : > { %2454 = vmatmul.mubr.msk.bf16.gmra.mrb[12].mxu0 %vm715_vm8, %v2617_v59  ;;  %v2464_v59 = vld [vmem:[%s2952_s5 + $0x68] sm:$0xff] }
 0x4be   : > { %v1631_v42 = vpop.permute.xlu1 %1630 }
 0x4c0   : > { %v1636_v39 = vpop.permute.xlu0 %1635 }
 0x588   : > { %v1761_v25 = vpop.f32.mrb[8].mxu0 }
 0x589   : > { %v2494_v38 = vadd.f32 %v1761_v25, %v1621_v50  ;;  %v1763_v33 = vpop.f32.mrb[9].mxu0  ;;  %v2465_v25 = vld [vmem:[%s2952_s5 + $0x70] sm:$0xff] }
 0x58a   : > { %v1765_v1 = vpop.f32.mrb[10].mxu0  ;;  %v2495_v63 = vadd.f32 %v1763_v33, %v1621_v50  ;;  %v2466_v33 = vld [vmem:[%s2952_s5 + $0x78] sm:$0xff] }
 0x58b   : > { %v4076_v24 = vmax.f32 %v2494_v38, 0.0  ;;  %v2496_v32 = vadd.f32 %v1765_v1, %v1626_v29  ;;  %v1767_v61 = vpop.f32.mrb[11].mxu0 }
 0x58c   : > { %v2497_v56 = vadd.f32 %v1767_v61, %v1626_v29  ;;  %v4098_v4 = vmax.f32 %v2495_v63, 0.0 }
 0x58d   : > { %v4078_v6 = vmax.f32 %v2496_v32, 0.0  ;;  %1802 = vrot.lane.b32.xlu1 %v4076_v24, %s2676_s7 }
 0x58e   : > { %v4102_v14 = vmax.f32 %v2497_v56, 0.0 }
 0x58f   : > { %1804 = vrot.lane.b32.xlu0 %v4078_v6, %s2676_s7 }
 0x590   : > { %v1771_v13 = vpop.f32.mrb[12].mxu0 }
 0x591   : > { %v1773_v0 = vpop.f32.mrb[13].mxu0  ;;  %1834 = vrot.lane.b32.xlu1 %v4076_v24, %s2677_s8  ;;  %v2498_v30 = vadd.f32 %v1771_v13, %v1631_v42 }
 0x592   : > { %v1775_v58 = vpop.f32.mrb[14].mxu0  ;;  %v2499_v41 = vadd.f32 %v1773_v0, %v1631_v42 }
 0x593   : > { %v1777_v43 = vpop.f32.mrb[15].mxu0  ;;  %1836 = vrot.lane.b32.xlu0 %v4078_v6, %s2677_s8  ;;  %v2500_v44 = vadd.f32 %v1775_v58, %v1636_v39  ;;  %v4118_v48 = vmax.f32 %v2498_v30, 0.0 }
 0x594   : > { %v2501_v45 = vadd.f32 %v1777_v43, %v1636_v39  ;;  %v4138_v3 = vmax.f32 %v2499_v41, 0.0 }
 0x595   : > { %1866 = vrot.lane.b32.xlu1 %v4076_v24, %s2678_s9  ;;  %v4122_v2 = vmax.f32 %v2500_v44, 0.0 }
 0x596   : > { %v4142_v47 = vmax.f32 %v2501_v45, 0.0 }
 0x597   : > { %1868 = vrot.lane.b32.xlu0 %v4078_v6, %s2678_s9 }
 0x599   : > { %1898 = vrot.lane.b32.xlu1 %v4076_v24, %s2679_s10 }
 0x59b   : > { %1900 = vrot.lane.b32.xlu0 %v4078_v6, %s2679_s10 }
 0x59d   : > { %1930 = vrot.lane.b32.xlu1 %v4076_v24, %s2680_s11 }
 0x59f   : > { %1932 = vrot.lane.b32.xlu0 %v4078_v6, %s2680_s11 }
 0x5a1   : > { %1810 = vrot.lane.b32.xlu1 %v4098_v4, %s2676_s7 }
 0x5a3   : > { %1812 = vrot.lane.b32.xlu0 %v4102_v14, %s2676_s7 }
 0x5a5   : > { %1842 = vrot.lane.b32.xlu1 %v4098_v4, %s2677_s8 }
 0x5a7   : > { %1844 = vrot.lane.b32.xlu0 %v4102_v14, %s2677_s8 }
 0x5a9   : > { %1874 = vrot.lane.b32.xlu1 %v4098_v4, %s2678_s9 }
 0x5ab   : > { %1876 = vrot.lane.b32.xlu0 %v4102_v14, %s2678_s9 }
 0x5ad   : > { %1906 = vrot.lane.b32.xlu1 %v4098_v4, %s2679_s10 }
 0x5af   : > { %1908 = vrot.lane.b32.xlu0 %v4102_v14, %s2679_s10 }
 0x5b1   : > { %1806 = vrot.lane.b32.xlu1 %v4118_v48, %s2676_s7 }
 0x5b3   : > { %1808 = vrot.lane.b32.xlu0 %v4122_v2, %s2676_s7 }
 0x5b5   : > { %1838 = vrot.lane.b32.xlu1 %v4118_v48, %s2677_s8 }
 0x5b7   : > { %1840 = vrot.lane.b32.xlu0 %v4122_v2, %s2677_s8 }
 0x5b9   : > { %1870 = vrot.lane.b32.xlu1 %v4118_v48, %s2678_s9 }
 0x5bb   : > { %1872 = vrot.lane.b32.xlu0 %v4122_v2, %s2678_s9 }
 0x5bd   : > { %1902 = vrot.lane.b32.xlu1 %v4118_v48, %s2679_s10 }
 0x5bf   : > { %1904 = vrot.lane.b32.xlu0 %v4122_v2, %s2679_s10 }
 0x5c1   : > { %1814 = vrot.lane.b32.xlu1 %v4138_v3, %s2676_s7 }
 0x5c3   : > { %1816 = vrot.lane.b32.xlu0 %v4142_v47, %s2676_s7 }
 0x5c5   : > { %1938 = vrot.lane.b32.xlu1 %v4098_v4, %s2680_s11 }
 0x5c7   : > { %1940 = vrot.lane.b32.xlu0 %v4102_v14, %s2680_s11 }
 0x5c9   : > { %1846 = vrot.lane.b32.xlu1 %v4138_v3, %s2677_s8 }
 0x5cb   : > { %1848 = vrot.lane.b32.xlu0 %v4142_v47, %s2677_s8 }
 0x5cd   : > { %1878 = vrot.lane.b32.xlu1 %v4138_v3, %s2678_s9 }
 0x5cf   : > { %1936 = vrot.lane.b32.xlu0 %v4122_v2, %s2680_s11 }
 0x5d1   : > { %1910 = vrot.lane.b32.xlu1 %v4138_v3, %s2679_s10 }
 0x5d3   : > { %1880 = vrot.lane.b32.xlu0 %v4142_v47, %s2678_s9  ;;  %s4505_s9 = scalar_lea.vmem %s4542_s4, %s2398_s29 }
 0x5d5   : > { %1934 = vrot.lane.b32.xlu1 %v4118_v48, %s2680_s11 }
 0x5d7   : > { %1964 = vrot.lane.b32.xlu0 %v4078_v6, %s2681_s12 }
 0x5d9   : > { %1942 = vrot.lane.b32.xlu1 %v4138_v3, %s2680_s11 }
 0x5db   : > { %1912 = vrot.lane.b32.xlu0 %v4142_v47, %s2679_s10 }
 0x5dd   : > { %1962 = vrot.lane.b32.xlu1 %v4076_v24, %s2681_s12 }
 0x5df   : > { %1972 = vrot.lane.b32.xlu0 %v4102_v14, %s2681_s12 }
 0x5e1   : > { %1970 = vrot.lane.b32.xlu1 %v4098_v4, %s2681_s12 }
 0x5e3   : > { %1968 = vrot.lane.b32.xlu0 %v4122_v2, %s2681_s12 }
 0x5e5   : > { %1966 = vrot.lane.b32.xlu1 %v4118_v48, %s2681_s12 }
 0x5e7   : > { %1996 = vrot.lane.b32.xlu0 %v4078_v6, %s2682_s13 }
 0x5e9   : > { %1974 = vrot.lane.b32.xlu1 %v4138_v3, %s2681_s12 }
 0x5eb   : > { %1944 = vrot.lane.b32.xlu0 %v4142_v47, %s2680_s11 }
 0x5ed   : > { %1994 = vrot.lane.b32.xlu1 %v4076_v24, %s2682_s13 }
 0x5ef   : > { %2004 = vrot.lane.b32.xlu0 %v4102_v14, %s2682_s13 }
 0x5f1   : > { %2002 = vrot.lane.b32.xlu1 %v4098_v4, %s2682_s13 }
 0x5f3   : > { %1976 = vrot.lane.b32.xlu0 %v4142_v47, %s2681_s12 }
 0x5f5   : > { %1998 = vrot.lane.b32.xlu1 %v4118_v48, %s2682_s13 }
 0x5f7   : > { %2000 = vrot.lane.b32.xlu0 %v4122_v2, %s2682_s13 }
 0x5f9   : > { %2006 = vrot.lane.b32.xlu1 %v4138_v3, %s2682_s13 }
 0x5fb   : > { %2008 = vrot.lane.b32.xlu0 %v4142_v47, %s2682_s13 }
 0x5fd   : > { %2026 = vrot.lane.b32.xlu1 %v4076_v24, %s2683_s14 }
 0x5ff   : > { %2028 = vrot.lane.b32.xlu0 %v4078_v6, %s2683_s14  ;;  %v1803_v52 = vpop.permute.xlu1 %1802 }
 0x601   : > { %v1805_v7 = vpop.permute.xlu0 %1804  ;;  %2034 = vrot.lane.b32.xlu1 %v4098_v4, %s2683_s14 }
 0x603   : > { %2036 = vrot.lane.b32.xlu0 %v4102_v14, %s2683_s14  ;;  %v1835_v15 = vpop.permute.xlu1 %1834 }
 0x605   : > { %v1837_v21 = vpop.permute.xlu0 %1836  ;;  %2030 = vrot.lane.b32.xlu1 %v4118_v48, %s2683_s14 }
 0x607   : > { %2032 = vrot.lane.b32.xlu0 %v4122_v2, %s2683_s14  ;;  %v4217_v49 = vpop.permute.xlu1 %1866 }
 0x609   : > { %v4219_v20 = vpop.permute.xlu0 %1868  ;;  %2038 = vrot.lane.b32.xlu1 %v4138_v3, %s2683_s14 }
 0x60b   : > { %2040 = vrot.lane.b32.xlu0 %v4142_v47, %s2683_s14  ;;  %v4226_v31 = vpop.permute.xlu1 %1898 }
 0x60d   : > { %v4229_v50 = vpop.permute.xlu0 %1900  ;;  %2096 = vperm.xlu1 %2593, %v2463_v22  }
 0x60f   : > { %2101 = vperm.xlu0 %2592, %v2464_v59   ;;  %v1931_v38 = vpop.permute.xlu1 %1930 }
 0x611   : > { %v1933_v29 = vpop.permute.xlu0 %1932  ;;  %2106 = vperm.xlu1 %2593, %v2465_v25  }
 0x613   : > { %2111 = vperm.xlu0 %2592, %v2466_v33   ;;  %v1811_v1 = vpop.permute.xlu1 %1810 }
 0x614   : > { %v1818_v32 = vsel %vm317_vm0, %v1803_v52, %v1811_v1  ;;  %v1822_v61 = vsel %vm317_vm0, %v1811_v1, %v1803_v52 }
 0x615   : > { %v1813_v13 = vpop.permute.xlu0 %1812  ;;  %v1826_v43 = vmul.f32 %v1822_v61, %v2926_v19  ;;  %v1827_v63 = vmul.f32 %v1818_v32, %v2917_v17 }
 0x616   : > { %v1819_v0 = vsel %vm317_vm0, %v1805_v7, %v1813_v13  ;;  %v1823_v58 = vsel %vm317_vm0, %v1813_v13, %v1805_v7 }
 0x617   : > { %v1828_v56 = vmul.f32 %v1823_v58, %v2926_v19  ;;  %v1829_v42 = vmul.f32 %v1819_v0, %v2917_v17  ;;  %v1843_v30 = vpop.permute.xlu1 %1842 }
 0x619   : > { %v2058_v39 = vpack.c.bf16 %v1828_v56, %v1826_v43  ;;  %v1845_v44 = vpop.permute.xlu0 %1844  ;;  %v2059_v41 = vpack.c.bf16 %v1829_v42, %v1827_v63  ;;  %v1850_v56 = vsel %vm358_vm1, %v1835_v15, %v1843_v30  ;;  %v1854_v42 = vsel %vm358_vm1, %v1843_v30, %v1835_v15 }
 0x61a   : > { %v1851_v0 = vsel %vm358_vm1, %v1837_v21, %v1845_v44  ;;  %v1859_v40 = vmul.f32 %v1850_v56, %v2976_v54 }
 0x61b   : > { %2150 = vmatprep.subr.bf16.mxu1 %v2059_v41  ;;  %v4245_v45 = vpop.permute.xlu1 %1874  ;;  %v1855_v41 = vsel %vm358_vm1, %v1845_v44, %v1837_v21  ;;  %v1861_v23 = vmul.f32 %v1851_v0, %v2976_v54  ;;  %v1858_v0 = vmul.f32 %v1854_v42, %v2973_v53 }
 0x61c   : > { %2151 = vmatpush1.bf16.msra.mxu1 %v2058_v39 }
 0x61d   : > { %v1877_v62 = vpop.permute.xlu0 %1876 }
 0x61f   : > { %v4247_v52 = vpop.permute.xlu1 %1906 }
 0x621   : > { %v4249_v7 = vpop.permute.xlu0 %1908 }
 0x623   : > { %v1807_v22 = vpop.permute.xlu1 %1806 }
 0x625   : > { %v1809_v59 = vpop.permute.xlu0 %1808 }
 0x627   : > { %v1839_v25 = vpop.permute.xlu1 %1838 }
 0x629   : > { %v1841_v33 = vpop.permute.xlu0 %1840 }
 0x62b   : > { %v4251_v1 = vpop.permute.xlu1 %1870 }
 0x62d   : > { %v4253_v32 = vpop.permute.xlu0 %1872 }
 0x62f   : > { %v4255_v61 = vpop.permute.xlu1 %1902 }
 0x631   : > { %v4257_v13 = vpop.permute.xlu0 %1904 }
 0x633   : > { %v1815_v58 = vpop.permute.xlu1 %1814 }
 0x634   : > { %v1820_v43 = vsel %vm317_vm0, %v1807_v22, %v1815_v58  ;;  %v1824_v63 = vsel %vm317_vm0, %v1815_v58, %v1807_v22 }
 0x635   : > { %v1817_v39 = vpop.permute.xlu0 %1816  ;;  %v1830_v22 = vmul.f32 %v1824_v63, %v2926_v19  ;;  %v1831_v58 = vmul.f32 %v1820_v43, %v2917_v17 }
 0x636   : > { %v1821_v51 = vsel %vm317_vm0, %v1809_v59, %v1817_v39  ;;  %v1825_v27 = vsel %vm317_vm0, %v1817_v39, %v1809_v59  ;;  %v1860_v59 = vmul.f32 %v1855_v41, %v2973_v53 }
 0x637   : > { %v1832_v28 = vmul.f32 %v1825_v27, %v2926_v19  ;;  %v1833_v15 = vmul.f32 %v1821_v51, %v2917_v17  ;;  %v1939_v30 = vpop.permute.xlu1 %1938  ;;  %v1883_v17 = vsel %vm399_vm2, %v4219_v20, %v1877_v62  ;;  %v2063_v51 = vpack.c.bf16 %v1861_v23, %v1859_v40 }
 0x638   : > { %v1946_v21 = vsel %vm481_vm4, %v1931_v38, %v1939_v30  ;;  %v1950_v44 = vsel %vm481_vm4, %v1939_v30, %v1931_v38  ;;  %v2062_v40 = vpack.c.bf16 %v1860_v59, %v1858_v0 }
 0x639   : > { %v2060_v63 = vpack.c.bf16 %v1832_v28, %v1830_v22  ;;  %v1941_v39 = vpop.permute.xlu0 %1940  ;;  %v2061_v43 = vpack.c.bf16 %v1833_v15, %v1831_v58  ;;  %v4295_v38 = vmul.f32 %v1946_v21, %v3076_v57  ;;  %v4298_v56 = vmul.f32 %v1950_v44, %v3071_v55 }
 0x63a   : > { %v1947_v19 = vsel %vm481_vm4, %v1933_v29, %v1941_v39  ;;  %v1951_v27 = vsel %vm481_vm4, %v1941_v39, %v1933_v29  ;;  %v1882_v29 = vsel %vm399_vm2, %v4217_v49, %v4245_v45  ;;  %v1887_v21 = vsel %vm399_vm2, %v1877_v62, %v4219_v20 }
 0x63b   : > { %v4301_v28 = vmul.f32 %v1947_v19, %v3076_v57  ;;  %v4304_v42 = vmul.f32 %v1951_v27, %v3071_v55  ;;  %2152 = vmatprep.subr.bf16.mxu1 %v2061_v43  ;;  %v1847_v41 = vpop.permute.xlu1 %1846  ;;  %v1886_v20 = vsel %vm399_vm2, %v4245_v45, %v4217_v49  ;;  %v1891_v62 = vmul.f32 %v1882_v29, %v3008_v36 }
 0x63c   : > { %v1852_v22 = vsel %vm358_vm1, %v1839_v25, %v1847_v41  ;;  %v1856_v23 = vsel %vm358_vm1, %v1847_v41, %v1839_v25  ;;  %2153 = vmatpush1.bf16.msra.mxu1 %v2060_v63  ;;  %v1893_v25 = vmul.f32 %v1883_v17, %v3008_v36  ;;  %v1892_v17 = vmul.f32 %v1887_v21, %v3005_v35 }
 0x63d   : > { %v2078_v58 = vpack.c.bf16 %v4301_v28, %v4295_v38  ;;  %v1849_v15 = vpop.permute.xlu0 %1848  ;;  %2154 = vmatprep.subr.bf16.mxu1 %v2063_v51  ;;  %v2079_v30 = vpack.c.bf16 %v4304_v42, %v4298_v56  ;;  %v1862_v59 = vmul.f32 %v1856_v23, %v2973_v53  ;;  %v1863_v63 = vmul.f32 %v1852_v22, %v2976_v54 }
 0x63e   : > { %v1853_v44 = vsel %vm358_vm1, %v1841_v33, %v1849_v15  ;;  %v1857_v0 = vsel %vm358_vm1, %v1849_v15, %v1841_v33  ;;  %v1890_v41 = vmul.f32 %v1886_v20, %v3005_v35  ;;  %v2067_v22 = vpack.c.bf16 %v1893_v25, %v1891_v62 }
 0x63f   : > { %v1864_v39 = vmul.f32 %v1857_v0, %v2973_v53  ;;  %v1865_v43 = vmul.f32 %v1853_v44, %v2976_v54  ;;  %v1879_v19 = vpop.permute.xlu1 %1878  ;;  %v1915_v53 = vsel %vm440_vm3, %v4229_v50, %v4249_v7  ;;  %v1919_v15 = vsel %vm440_vm3, %v4249_v7, %v4229_v50 }
 0x640   : > { %2155 = vmatpush1.bf16.msra.mxu1 %v2062_v40  ;;  %v1884_v49 = vsel %vm399_vm2, %v4251_v1, %v1879_v19  ;;  %v1888_v45 = vsel %vm399_vm2, %v1879_v19, %v4251_v1  ;;  %v2066_v23 = vpack.c.bf16 %v1892_v17, %v1890_v41  ;;  %v1914_v40 = vsel %vm440_vm3, %v4226_v31, %v4247_v52 }
 0x641   : > { %v2064_v33 = vpack.c.bf16 %v1864_v39, %v1862_v59  ;;  %v4336_v27 = vpop.permute.xlu0 %1936  ;;  %v2065_v51 = vpack.c.bf16 %v1865_v43, %v1863_v63  ;;  %v1925_v21 = vmul.f32 %v1915_v53, %v3040_v18  ;;  %v1894_v44 = vmul.f32 %v1888_v45, %v3005_v35 }
 0x642   : > { %v1895_v0 = vmul.f32 %v1884_v49, %v3008_v36  ;;  %v1918_v50 = vsel %vm440_vm3, %v4247_v52, %v4226_v31  ;;  %v1923_v7 = vmul.f32 %v1914_v40, %v3040_v18  ;;  %v1924_v20 = vmul.f32 %v1919_v15, %v3037_v16 }
 0x643   : > { %2156 = vmatprep.subr.bf16.mxu1 %v2065_v51  ;;  %v1911_v54 = vpop.permute.xlu1 %1910  ;;  %v2075_v15 = vpack.c.bf16 %v4102_v14, %v4098_v4 }
 0x644   : > { %2157 = vmatpush1.bf16.msra.mxu1 %v2064_v33  ;;  %v2071_v17 = vpack.c.bf16 %v1925_v21, %v1923_v7  ;;  %v1920_v31 = vsel %vm440_vm3, %v1911_v54, %v4255_v61  ;;  %v2074_v21 = vpack.c.bf16 %v4078_v6, %v4076_v24 }
 0x645   : > { %v1881_v29 = vpop.permute.xlu0 %1880  ;;  %2158 = vmatprep.subr.bf16.mxu1 %v2067_v22  ;;  %v1926_v53 = vmul.f32 %v1920_v31, %v3037_v16 }
 0x646   : > { %v1885_v1 = vsel %vm399_vm2, %v4253_v32, %v1881_v29  ;;  %v1889_v25 = vsel %vm399_vm2, %v1881_v29, %v4253_v32 }
 0x647   : > { %v1896_v59 = vmul.f32 %v1889_v25, %v3005_v35  ;;  %v1897_v63 = vmul.f32 %v1885_v1, %v3008_v36  ;;  %v1935_v39 = vpop.permute.xlu1 %1934  ;;  %v1922_v35 = vmul.f32 %v1918_v50, %v3037_v16  ;;  %v1916_v36 = vsel %vm440_vm3, %v4255_v61, %v1911_v54 }
 0x648   : > { %2159 = vmatpush1.bf16.msra.mxu1 %v2066_v23  ;;  %v1927_v22 = vmul.f32 %v1916_v36, %v3040_v18 }
 0x649   : > { %v2068_v43 = vpack.c.bf16 %v1896_v59, %v1894_v44  ;;  %v1965_v19 = vpop.permute.xlu0 %1964  ;;  %v2069_v32 = vpack.c.bf16 %v1897_v63, %v1895_v0  ;;  %v2070_v33 = vpack.c.bf16 %v1924_v20, %v1922_v35  ;;  %v2076_v44 = vpack.c.bf16 %v4122_v2, %v4118_v48 }
 0x64b   : > { %2160 = vmatprep.subr.bf16.mxu1 %v2069_v32  ;;  %v1943_v62 = vpop.permute.xlu1 %1942 }
 0x64c   : > { %2161 = vmatpush1.bf16.msra.mxu1 %v2068_v43  ;;  %v1948_v25 = vsel %vm481_vm4, %v1935_v39, %v1943_v62  ;;  %v1952_v14 = vsel %vm481_vm4, %v1943_v62, %v1935_v39 }
 0x64d   : > { %v1913_v52 = vpop.permute.xlu0 %1912  ;;  %2162 = vmatprep.subr.bf16.mxu1 %v2071_v17  ;;  %v1958_v6 = vmul.f32 %v1948_v25, %v3076_v57  ;;  %v1959_v59 = vmul.f32 %v1952_v14, %v3071_v55 }
 0x64e   : > { %v1917_v51 = vsel %vm440_vm3, %v4257_v13, %v1913_v52  ;;  %v1921_v41 = vsel %vm440_vm3, %v1913_v52, %v4257_v13 }
 0x64f   : > { %v1928_v49 = vmul.f32 %v1921_v41, %v3037_v16  ;;  %v1929_v61 = vmul.f32 %v1917_v51, %v3040_v18  ;;  %v1963_v54 = vpop.permute.xlu1 %1962  ;;  %v2077_v16 = vpack.c.bf16 %v4142_v47, %v4138_v3 }
 0x650   : > { %2163 = vmatpush1.bf16.msra.mxu1 %v2070_v33 }
 0x651   : > { %v2072_v45 = vpack.c.bf16 %v1928_v49, %v1926_v53  ;;  %v1973_v23 = vpop.permute.xlu0 %1972  ;;  %v2073_v40 = vpack.c.bf16 %v1929_v61, %v1927_v22 }
 0x652   : > { %v1983_v47 = vsel %vm522_vm5, %v1973_v23, %v1965_v19  ;;  %v1979_v39 = vsel %vm522_vm5, %v1965_v19, %v1973_v23 }
 0x653   : > { %2164 = vmatprep.subr.bf16.mxu1 %v2073_v40  ;;  %v1971_v29 = vpop.permute.xlu1 %1970  ;;  %v1989_v50 = vmul.f32 %v1983_v47, %v3112_v37 }
 0x654   : > { %2165 = vmatpush1.bf16.msra.mxu1 %v2072_v45  ;;  %v1982_v24 = vsel %vm522_vm5, %v1971_v29, %v1963_v54  ;;  %v1978_v48 = vsel %vm522_vm5, %v1963_v54, %v1971_v29 }
 0x655   : > { %v1969_v13 = vpop.permute.xlu0 %1968  ;;  %2166 = vmatprep.subr.bf16.mxu1 %v2075_v15  ;;  %v1987_v63 = vmul.f32 %v1982_v24, %v3112_v37 }
 0x657   : > { %v1967_v1 = vpop.permute.xlu1 %1966  ;;  %v2083_v62 = vpack.c.bf16 %v1989_v50, %v1987_v63  ;;  %v2621_v63 = vld [vmem:[%s2749_s28 + $0xac] ss:$12 sps:$4 sm:$0xff]  }
 0x658   : > { %2167 = vmatpush1.bf16.msra.mxu1 %v2074_v21 }
 0x659   : > { %v1997_v18 = vpop.permute.xlu0 %1996  ;;  %2168 = vmatprep.subr.bf16.mxu1 %v2077_v16 }
 0x65b   : > { %v1975_v4 = vpop.permute.xlu1 %1974 }
 0x65c   : > { %2169 = vmatpush1.bf16.msra.mxu1 %v2076_v44  ;;  %v1984_v20 = vsel %vm522_vm5, %v1975_v4, %v1967_v1 }
 0x65d   : > { %v1945_v3 = vpop.permute.xlu0 %1944  ;;  %2170 = vmatprep.subr.bf16.mxu1 %v2079_v30  ;;  %v1991_v35 = vmul.f32 %v1984_v20, %v3112_v37 }
 0x65e   : > { %v1949_v2 = vsel %vm481_vm4, %v4336_v27, %v1945_v3  ;;  %v1953_v0 = vsel %vm481_vm4, %v1945_v3, %v4336_v27  ;;  %v1986_v27 = vmul.f32 %v1978_v48, %v3109_v34 }
 0x65f   : > { %v1960_v56 = vmul.f32 %v1949_v2, %v3076_v57  ;;  %v1961_v42 = vmul.f32 %v1953_v0, %v3071_v55  ;;  %v1995_v30 = vpop.permute.xlu1 %1994  ;;  %v1980_v57 = vsel %vm522_vm5, %v1967_v1, %v1975_v4  ;;  %v1988_v55 = vmul.f32 %v1979_v39, %v3109_v34  ;;  %v2618_v2 = vld [vmem:[%s2749_s28 + $0x90] ss:$12 sps:$4 sm:$0xff]  }
 0x660   : > { %2171 = vmatpush1.bf16.msra.mxu1 %v2078_v58  ;;  %v1990_v58 = vmul.f32 %v1980_v57, %v3109_v34 }
 0x661   : > { %v2080_v7 = vpack.c.bf16 %v1960_v56, %v1958_v6  ;;  %v2005_v43 = vpop.permute.xlu0 %2004  ;;  %v2081_v32 = vpack.c.bf16 %v1961_v42, %v1959_v59  ;;  %v2082_v28 = vpack.c.bf16 %v1988_v55, %v1986_v27  ;;  %v2623_v55 = vld [vmem:[%s2749_s28 + $0xa8] ss:$12 sps:$4 sm:$0xff]  }
 0x662   : > { %v2015_v36 = vsel %vm563_vm6, %v2005_v43, %v1997_v18  ;;  %v2011_v49 = vsel %vm563_vm6, %v1997_v18, %v2005_v43 }
 0x663   : > { %v2003_v19 = vpop.permute.xlu1 %2002  ;;  %2172 = vmatprep.subr.bf16.mxu1 %v2081_v32  ;;  %v2021_v61 = vmul.f32 %v2015_v36, %v3144_v9 }
 0x664   : > { %v2014_v38 = vsel %vm563_vm6, %v2003_v19, %v1995_v30  ;;  %2173 = vmatpush1.bf16.msra.mxu1 %v2080_v7  ;;  %v2010_v33 = vsel %vm563_vm6, %v1995_v30, %v2003_v19 }
 0x665   : > { %v1977_v17 = vpop.permute.xlu0 %1976  ;;  %2174 = vmatprep.subr.bf16.mxu1 %v2083_v62  ;;  %v2019_v51 = vmul.f32 %v2014_v38, %v3144_v9  ;;  %v2018_v40 = vmul.f32 %v2010_v33, %v3141_v8 }
 0x666   : > { %v1981_v31 = vsel %vm522_vm5, %v1969_v13, %v1977_v17  ;;  %v1985_v52 = vsel %vm522_vm5, %v1977_v17, %v1969_v13  ;;  %v2020_v13 = vmul.f32 %v2011_v49, %v3141_v8 }
 0x667   : > { %v1992_v41 = vmul.f32 %v1981_v31, %v3109_v34  ;;  %v1993_v53 = vmul.f32 %v1985_v52, %v3112_v37  ;;  %v1999_v22 = vpop.permute.xlu1 %1998  ;;  %v2087_v15 = vpack.c.bf16 %v2021_v61, %v2019_v51  ;;  %v4553_v31 = vmov 0   ;;  %v2624_v51 = vld [vmem:[%s2749_s28 + $0x98] ss:$12 sps:$4 sm:$0xff]  }
 0x668   : > { %2175 = vmatpush1.bf16.msra.mxu1 %v2082_v28  ;;  %v2086_v1 = vpack.c.bf16 %v2020_v13, %v2018_v40 }
 0x669   : > { %v2084_v54 = vpack.c.bf16 %v1992_v41, %v1990_v58  ;;  %v2001_v45 = vpop.permute.xlu0 %2000  ;;  %v2085_v23 = vpack.c.bf16 %v1993_v53, %v1991_v35 }
 0x66b   : > { %v2007_v29 = vpop.permute.xlu1 %2006  ;;  %2176 = vmatprep.subr.bf16.mxu1 %v2085_v23 }
 0x66c   : > { %v2012_v34 = vsel %vm563_vm6, %v1999_v22, %v2007_v29  ;;  %v2016_v37 = vsel %vm563_vm6, %v2007_v29, %v1999_v22  ;;  %2177 = vmatpush1.bf16.msra.mxu1 %v2084_v54 }
 0x66d   : > { %v2009_v21 = vpop.permute.xlu0 %2008  ;;  %2178 = vmatprep.subr.bf16.mxu1 %v2087_v15  ;;  %v2022_v25 = vmul.f32 %v2012_v34, %v3141_v8  ;;  %v2023_v44 = vmul.f32 %v2016_v37, %v3144_v9 }
 0x66e   : > { %v2013_v16 = vsel %vm563_vm6, %v2001_v45, %v2009_v21  ;;  %v2017_v18 = vsel %vm563_vm6, %v2009_v21, %v2001_v45 }
 0x66f   : > { %v2024_v4 = vmul.f32 %v2013_v16, %v3141_v8  ;;  %v2025_v14 = vmul.f32 %v2017_v18, %v3144_v9  ;;  %v2027_v24 = vpop.permute.xlu1 %2026  ;;  %v4554_v18 = vld [vmem:[#allocation2_spill] sm:$0xff] }
 0x670   : > { %2179 = vmatpush1.bf16.msra.mxu1 %v2086_v1 }
 0x671   : > { %v2088_v6 = vpack.c.bf16 %v2024_v4, %v2022_v25  ;;  %v2029_v3 = vpop.permute.xlu0 %2028  ;;  %v2089_v47 = vpack.c.bf16 %v2025_v14, %v2023_v44  ;;  %v4555_v4 = vld [vmem:[#allocation4_spill] sm:$0xff] }
 0x673   : > { %v2035_v48 = vpop.permute.xlu1 %2034  ;;  %2180 = vmatprep.subr.bf16.mxu1 %v2089_v47 }
 0x674   : > { %v2042_v0 = vsel %vm604_vm7, %v2027_v24, %v2035_v48  ;;  %v2046_v59 = vsel %vm604_vm7, %v2035_v48, %v2027_v24  ;;  %2181 = vmatpush1.bf16.msra.mxu1 %v2088_v6 }
 0x675   : > { %v2037_v8 = vpop.permute.xlu0 %2036  ;;  %v2050_v42 = vmul.f32 %v4046_v5, %v2042_v0  ;;  %v2051_v30 = vmul.f32 %v4052_v10, %v2046_v59 }
 0x676   : > { %v2043_v9 = vsel %vm604_vm7, %v2029_v3, %v2037_v8  ;;  %v2047_v56 = vsel %vm604_vm7, %v2037_v8, %v2029_v3  ;;  %v4557_v3 = vld [vmem:[#allocation5_spill] sm:$0xff] }
 0x677   : > { %v2052_v39 = vmul.f32 %v4046_v5, %v2043_v9  ;;  %v2053_v50 = vmul.f32 %v4052_v10, %v2047_v56  ;;  %v2031_v27 = vpop.permute.xlu1 %2030  ;;  %2183 = vmatmul.mubr.bf16.vlgmr.msra.gmra.mrb[8].mxu1 %v2618_v2 }
 0x678   : > { %2192 = vmatprep.mubr.bf16.mxu1 %v2621_v63 }
 0x679   : > { %v2090_v7 = vpack.c.bf16 %v2052_v39, %v2050_v42  ;;  %v2033_v43 = vpop.permute.xlu0 %2032  ;;  %v2091_v32 = vpack.c.bf16 %v2053_v50, %v2051_v30 }
 0x67b   : > { %v2039_v57 = vpop.permute.xlu1 %2038  ;;  %2203 = vmatprep.subr.bf16.mxu1 %v2091_v32 }
 0x67c   : > { %v2044_v20 = vsel %vm604_vm7, %v2031_v27, %v2039_v57  ;;  %v2048_v19 = vsel %vm604_vm7, %v2039_v57, %v2031_v27  ;;  %2204 = vmatpush1.bf16.msra.mxu1 %v2090_v7 }
 0x67d   : > { %v2041_v62 = vpop.permute.xlu0 %2040  ;;  %v2054_v58 = vmul.f32 %v4046_v5, %v2044_v20  ;;  %v2055_v17 = vmul.f32 %v4052_v10, %v2048_v19 }
 0x67e   : > { %v2045_v38 = vsel %vm604_vm7, %v2033_v43, %v2041_v62  ;;  %v2049_v28 = vsel %vm604_vm7, %v2041_v62, %v2033_v43 }
 0x67f   : > { %v2056_v35 = vmul.f32 %v4046_v5, %v2045_v38  ;;  %v2057_v36 = vmul.f32 %v4052_v10, %v2049_v28  ;;  %2193 = vmatmul.mubr.bf16.gmra.mrb[12].mxu1 %v2623_v55 }
 0x680   : > { %2235 = vmatprep.mubr.bf16.mxu1 %v4553_v31 }
 0x681   : > { %v2092_v52 = vpack.c.bf16 %v2056_v35, %v2054_v58  ;;  %v2093_v33 = vpack.c.bf16 %v2057_v36, %v2055_v17 }
 0x683   : > { %2205 = vmatprep.subr.bf16.mxu1 %v2093_v33 }
 0x684   : > { %2206 = vmatpush1.bf16.msra.mxu1 %v2092_v52 }
 0x687   : > { %2473 = vmatmul.mubr.msk.bf16.vlgmr.msra.gmra.mrb[8].mxu1 %vm715_vm8, %v2624_v51 }
 0x688   : > { %2245 = vmatprep.mubr.bf16.mxu1 %v4553_v31 }
 0x68c   : > { %v2097_v41 = vpop.permute.xlu1 %2096 }
 0x68e   : > { %v2102_v22 = vpop.permute.xlu0 %2101 }
 0x68f   : > { %2474 = vmatmul.mubr.msk.bf16.gmra.mrb[12].mxu1 %vm715_vm8, %v2625_v11 }
 0x690   : > { %v2107_v34 = vpop.permute.xlu1 %2106 }
 0x692   : > { %v2112_v1 = vpop.permute.xlu0 %2111 }
 0x75a   : > { %v2237_v5 = vpop.f32.mrb[8].mxu1 }
 0x75b   : > { %v2502_v53 = vadd.f32 %v2237_v5, %v2097_v41  ;;  %v2239_v10 = vpop.f32.mrb[9].mxu1 }
 0x75c   : > { %v2503_v49 = vadd.f32 %v2239_v10, %v2097_v41  ;;  %v2241_v61 = vpop.f32.mrb[10].mxu1 }
 0x75d   : > { %v2256_v54 = vadd.f32 %v2502_v53, %v3637_v60  ;;  %v2504_v45 = vadd.f32 %v2241_v61, %v2102_v22  ;;  %v2243_v23 = vpop.f32.mrb[11].mxu1 }
 0x75e   : > { %v2257_v40 = vadd.f32 %v2503_v49, %v3661_v26  ;;  %v2505_v29 = vadd.f32 %v2243_v23, %v2102_v22 }
 0x75f   : > { %2264 = vst [vmem:[%s4505_s9] sm:$0xff] %v2256_v54  ;;  %v2258_v15 = vadd.f32 %v2504_v45, %v3640_v46 }
 0x760   : > { %2265 = vst [vmem:[%s4505_s9 + $0x8] sm:$0xff] %v2257_v40  ;;  %v2259_v13 = vadd.f32 %v2505_v29, %v3666_v12  ;;  %v4556_v12 = vld [vmem:[#allocation3_spill] sm:$0xff] }
 0x761   : > { %2266 = vst [vmem:[%s4505_s9 + $0x10] sm:$0xff] %v2258_v15 }
 0x762   : > { %2267 = vst [vmem:[%s4505_s9 + $0x18] sm:$0xff] %v2259_v13  ;;  %v2247_v37 = vpop.f32.mrb[12].mxu1 }
 0x763   : > { %v2506_v60 = vadd.f32 %v2247_v37, %v2107_v34  ;;  %v2249_v21 = vpop.f32.mrb[13].mxu1 }
 0x764   : > { %v2507_v16 = vadd.f32 %v2249_v21, %v2107_v34  ;;  %v2251_v26 = vpop.f32.mrb[14].mxu1 }
 0x765   : > { %v2260_v25 = vadd.f32 %v2506_v60, %v4554_v18  ;;  %v2508_v44 = vadd.f32 %v2251_v26, %v2112_v1  ;;  %v2253_v46 = vpop.f32.mrb[15].mxu1 }
 0x766   : > { %v2261_v14 = vadd.f32 %v2507_v16, %v4555_v4  ;;  %v2509_v24 = vadd.f32 %v2253_v46, %v2112_v1 }
 0x767   : > { %2268 = vst [vmem:[%s4505_s9 + $0x20] sm:$0xff] %v2260_v25  ;;  %v2262_v6 = vadd.f32 %v2508_v44, %v4556_v12 }
 0x768   : > { %2269 = vst [vmem:[%s4505_s9 + $0x28] sm:$0xff] %v2261_v14  ;;  %v2263_v47 = vadd.f32 %v2509_v24, %v4557_v3 }
 0x769   : > { %2270 = vst [vmem:[%s4505_s9 + $0x30] sm:$0xff] %v2262_v6 }
 0x76a   : > { %2271 = vst [vmem:[%s4505_s9 + $0x38] sm:$0xff] %v2263_v47 }
 0x76b PF: > { %s14_s19 = sadd.s32 1, %s2674_s19   ;;  %s4558_s15 = smov %s2666_s17 }
 0x76c   : > { %p11_p7 = scmp.ge.s32.totalorder %s14_s19, 6   ;;  %s4559_s16 = smov %s2670_s18 }
 0x76d   : > { %s4560_s17 = smov %s4563_s20  ;;  %s4561_s18 = smov %s4567_s21 }
 0x76e   :  { %13 = sbr.rel (!%p11_p7) target bundleno = 3 (0x3), region = 78 }

// kernel: _lambda_.4
= control target key start
LH: loop header
LB: loop body
LE: loop exit
PB: predicated region body
PF: predicated region fallthrough
CT: control target
= control target key end

     0   :  { %s3713_s30 = smov 0   ;;  %s5545_s0 = inlined_call_operand.vmem [shape: f32[9,256], index: 0, kind: input, shape index: {}]   ;;  %s5546_s1 = inlined_call_operand.vmem [shape: f32[2,2,32,256], index: 1, kind: input, shape index: {}, may-alias: {1,2}]   ;;  %s5547_s2 = inlined_call_operand.vmem [shape: f32[2,2,32,256], index: 2, kind: input, shape index: {}, may-alias: {1,2}]   ;;  %s5548_s3 = inlined_call_operand.vmem [shape: f32[12,64], index: 3, kind: input, shape index: {}]   ;;  %s5549_s4 = inlined_call_operand.vmem [shape: f32[12,1], index: 4, kind: input, shape index: {}]   ;;  %s5550_s5 = inlined_call_operand.vmem [shape: f32[256,110], index: 5, kind: input, shape index: {}]   ;;  %s5551_s6 = inlined_call_operand.vmem [shape: f32[64,4], index: 6, kind: input, shape index: {}]   ;;  %s5552_s7 = inlined_call_operand.vmem [shape: f32[64,1], index: 7, kind: input, shape index: {}]   ;;  %s5553_s8 = inlined_call_operand.vmem [shape: bf16[32,576], index: 8, kind: input, shape index: {}]   ;;  %s5554_s9 = inlined_call_operand.vmem [shape: f32[2,32,256], index: 9, kind: output, shape index: {}]  }
   0x1 LB: > { %s2960_s10 = sadd.s32 4294967295, %s3651_s30   ;;  %p2964_p0 = scmp.ge.s32.totalorder %s3651_s30, 1  ;;  %s3651_s30 = sphi %s3713_s30, %s19_s30  }
   0x2   : > { %p298_p1 = scmp.lt.s32.totalorder %s3651_s30, 3 }
   0x4   : > { %p299_p2 = pnand %p2964_p0, %p298_p1 }
   0x6   : > { %302 = sbr.rel (%p299_p2) target bundleno = 2167 (0x877), region = 56 }
   0xd   : > { %p340_p3 = scmp.lt.s32.totalorder %s2960_s10, 1  ;;  %v3653_v0 = vmov 0.0   ;;  %v379_v1 = vld [vmem:[%s5549_s4] sm:$0xff]  ;;  %v5555_v2 = vmov 0   ;;  %v380_v3 = vld [vmem:[%s5549_s4 + $0x8] sm:$0xf] }
   0xe   : > { %462 = vmatprep.mubr.f32.mxu0 %v3653_v0  ;;  %3493 = vset.pattern.permute.xlu0 %v5555_v2  ;;  %v508_v26 = vld [vmem:[%s5550_s5 + $0x80] sm:$0xff]  ;;  %v509_v27 = vld [vmem:[%s5550_s5 + $0x88] sm:$0xff]  ;;  %v510_v33 = vld [vmem:[%s5550_s5 + $0x90] sm:$0xff]  ;;  %vm391_vm0 = vcmask 523264   ;;  %vm528_vm1 = vcmask 1043456   ;;  %vm671_vm2 = vcmask 31744  }
   0xf   : > { %s5645_s10 = smov (!%p340_p3, %s2960_s10), 1  ;;  %383 = vperm.xlu0 %3493, %v379_v1   ;;  %v3371_v30 = vpack.c.bf16 %v509_v27, %v508_v26  ;;  %v492_v31 = vld [vmem:[%s5550_s5] sm:$0xff]  ;;  %v493_v32 = vld [vmem:[%s5550_s5 + $0x8] sm:$0xff]  ;;  %v511_v34 = vld [vmem:[%s5550_s5 + $0x98] sm:$0xff]  ;;  %vm996_vm3 = vcmask 900096   ;;  %s3655_s12 = smov 17  }
  0x10   : > { %s3725_s13 = sshll.u32 %s5645_s10, 6  ;;  %v377_v35 = vld [vmem:[%s5548_s3] sm:$0xff]  ;;  %v3373_v36 = vpack.c.bf16 %v493_v32, %v492_v31  ;;  %v3375_v37 = vpack.c.bf16 %v511_v34, %v510_v33  ;;  %v494_v38 = vld [vmem:[%s5550_s5 + $0x10] sm:$0xff]  ;;  %v495_v39 = vld [vmem:[%s5550_s5 + $0x18] sm:$0xff]  ;;  %s3656_s14 = smov 16  }
  0x11   : > { %s344_s18 = scalar_lea.vmem %s5546_s1, %s3725_s13  ;;  %s3738_s21 = scalar_lea.vmem %s5547_s2, %s3725_s13  ;;  %v512_v40 = vld [vmem:[%s5550_s5 + $0xa0] sm:$0xff]  ;;  %v513_v41 = vld [vmem:[%s5550_s5 + $0xa8] sm:$0xff]  ;;  %v3377_v43 = vpack.c.bf16 %v495_v39, %v494_v38  ;;  %v514_v47 = vld [vmem:[%s5550_s5 + $0xb0] sm:$0xff] }
  0x12   : > { %v362_v4 = vld [vmem:[%s344_s18 + $0x8] sm:$0xff]  ;;  %v364_v5 = vld [vmem:[%s344_s18 + $0x18] sm:$0xff]  ;;  %v361_v6 = vld [vmem:[%s344_s18] sm:$0xff]  ;;  %v3379_v44 = vpack.c.bf16 %v513_v41, %v512_v40  ;;  %s3657_s15 = smov 15   ;;  %s3658_s16 = smov 1  }
  0x13   : > { %v3355_v7 = vpack.c.bf16 %v364_v5, %v362_v4  ;;  %v363_v8 = vld [vmem:[%s344_s18 + $0x10] sm:$0xff]  ;;  %v366_v9 = vld [vmem:[%s344_s18 + $0x28] sm:$0xff]  ;;  %v368_v10 = vld [vmem:[%s344_s18 + $0x38] sm:$0xff]  ;;  %388 = vperm.xlu0 %3493, %v380_v3   ;;  %s3659_s17 = smov 127   ;;  %s3660_s23 = smov 113  }
  0x14   : > { %v3357_v11 = vpack.c.bf16 %v363_v8, %v361_v6  ;;  %v3359_v12 = vpack.c.bf16 %v368_v10, %v366_v9  ;;  %v365_v13 = vld [vmem:[%s344_s18 + $0x20] sm:$0xff]  ;;  %v367_v14 = vld [vmem:[%s344_s18 + $0x30] sm:$0xff]  ;;  %v2972_v15 = vld [vmem:[%s3738_s21 + $0x88] sm:$0xff]  ;;  %s3661_s26 = smov 112   ;;  %s3662_s27 = smov 111  }
  0x15   : > { %3356 = vmatprep.subr.bf16.mxu0 %v3355_v7  ;;  %v2974_v16 = vld [vmem:[%s3738_s21 + $0x98] sm:$0xff]  ;;  %v3361_v17 = vpack.c.bf16 %v367_v14, %v365_v13  ;;  %v2971_v19 = vld [vmem:[%s3738_s21 + $0x80] sm:$0xff]  ;;  %v2973_v20 = vld [vmem:[%s3738_s21 + $0x90] sm:$0xff] }
  0x16   : > { %3358 = vmatpush1.bf16.msra.mxu0 %v3357_v11  ;;  %v3363_v18 = vpack.c.bf16 %v2974_v16, %v2972_v15  ;;  %v2976_v21 = vld [vmem:[%s3738_s21 + $0xa8] sm:$0xff]  ;;  %v2978_v22 = vld [vmem:[%s3738_s21 + $0xb8] sm:$0xff]  ;;  %v2975_v23 = vld [vmem:[%s3738_s21 + $0xa0] sm:$0xff]  ;;  %v3365_v25 = vpack.c.bf16 %v2973_v20, %v2971_v19 }
  0x17   : > { %3360 = vmatprep.subr.bf16.mxu0 %v3359_v12  ;;  %v2977_v24 = vld [vmem:[%s3738_s21 + $0xb0] sm:$0xff]  ;;  %v3367_v28 = vpack.c.bf16 %v2978_v22, %v2976_v21  ;;  %v378_v42 = vld [vmem:[%s5548_s3 + $0x8] sm:$0xf]  ;;  %v496_v45 = vld [vmem:[%s5550_s5 + $0x20] sm:$0xff] }
  0x18   : > { %v3369_v29 = vpack.c.bf16 %v2977_v24, %v2975_v23  ;;  %v497_v46 = vld [vmem:[%s5550_s5 + $0x28] sm:$0xff]  ;;  %v515_v48 = vld [vmem:[%s5550_s5 + $0xb8] sm:$0xff]  ;;  %v498_v51 = vld [vmem:[%s5550_s5 + $0x30] sm:$0xff] }
  0x19   : > { %v3381_v49 = vpack.c.bf16 %v497_v46, %v496_v45  ;;  %v3383_v50 = vpack.c.bf16 %v515_v48, %v514_v47  ;;  %v499_v52 = vld [vmem:[%s5550_s5 + $0x38] sm:$0xff]  ;;  %v516_v53 = vld [vmem:[%s5550_s5 + $0xc0] sm:$0xff]  ;;  %v517_v54 = vld [vmem:[%s5550_s5 + $0xc8] sm:$0xff] }
  0x1a   : > { %3362 = vmatpush1.bf16.msra.mxu0 %v3361_v17  ;;  %v3385_v55 = vpack.c.bf16 %v499_v52, %v498_v51  ;;  %v3387_v56 = vpack.c.bf16 %v517_v54, %v516_v53  ;;  %v500_v57 = vld [vmem:[%s5550_s5 + $0x40] sm:$0xff]  ;;  %v501_v58 = vld [vmem:[%s5550_s5 + $0x48] sm:$0xff]  ;;  %v518_v60 = vld [vmem:[%s5550_s5 + $0xd0] sm:$0xff] }
  0x1b   : > { %3364 = vmatprep.subr.bf16.mxu0 %v3363_v18  ;;  %v3389_v59 = vpack.c.bf16 %v501_v58, %v500_v57  ;;  %v519_v61 = vld [vmem:[%s5550_s5 + $0xd8] sm:$0xff]  ;;  %v502_v63 = vld [vmem:[%s5550_s5 + $0x50] sm:$0xff]  ;;  %v520_v3 = vld [vmem:[%s5550_s5 + $0xe0] sm:$0xff] }
  0x1c   : > { %v3391_v62 = vpack.c.bf16 %v519_v61, %v518_v60  ;;  %v521_v4 = vld [vmem:[%s5550_s5 + $0xe8] sm:$0xff]  ;;  %v504_v6 = vld [vmem:[%s5550_s5 + $0x60] sm:$0xff]  ;;  %v522_v9 = vld [vmem:[%s5550_s5 + $0xf0] sm:$0xff] }
  0x1d   : > { %v3395_v5 = vpack.c.bf16 %v521_v4, %v520_v3  ;;  %v505_v7 = vld [vmem:[%s5550_s5 + $0x68] sm:$0xff]  ;;  %v523_v10 = vld [vmem:[%s5550_s5 + $0xf8] sm:$0xff]  ;;  %v506_v12 = vld [vmem:[%s5550_s5 + $0x70] sm:$0xff] }
  0x1e   : > { %3366 = vmatpush1.bf16.msra.mxu0 %v3365_v25  ;;  %v3397_v8 = vpack.c.bf16 %v505_v7, %v504_v6  ;;  %v3399_v11 = vpack.c.bf16 %v523_v10, %v522_v9  ;;  %v507_v13 = vld [vmem:[%s5550_s5 + $0x78] sm:$0xff]  ;;  %vm4276_vm4 = vmpackc.low %vm671_vm2, %vm671_vm2 }
  0x1f   : > { %3368 = vmatprep.subr.bf16.mxu0 %v3367_v28  ;;  %v3401_v14 = vpack.c.bf16 %v507_v13, %v506_v12 }
  0x22   : > { %3370 = vmatpush1.bf16.msra.mxu0 %v3369_v29 }
  0x23   : > { %3372 = vmatprep.subr.bf16.mxu0 %v3371_v30 }
  0x25   : > { %2979 = vmatmul.mubr.msk.f32.vlgmr.msra.gmra.mrb[0].mxu0 %vm391_vm0, %v377_v35 }
  0x26   : > { %468 = vmatprep.mubr.f32.mxu0 %v3653_v0  ;;  %3374 = vmatpush3.bf16.msra.mxu0 %v3373_v36  ;;  %v503_v0 = vld [vmem:[%s5550_s5 + $0x58] sm:$0xff] }
  0x27   : > { %3376 = vmatprep.subr.bf16.mxu0 %v3375_v37  ;;  %v3393_v1 = vpack.c.bf16 %v503_v0, %v502_v63 }
  0x29   : > { %2980 = vmatmul.mubr.msk.f32.gmra.mrb[2].mxu0 %vm391_vm0, %v378_v42 }
  0x2a   : > { %3378 = vmatpush3.bf16.msra.mxu0 %v3377_v43 }
  0x2b   : > { %3380 = vmatprep.subr.bf16.mxu0 %v3379_v44 }
  0x2e   : > { %3382 = vmatpush3.bf16.msra.mxu0 %v3381_v49 }
  0x2f   : > { %3384 = vmatprep.subr.bf16.mxu0 %v3383_v50 }
  0x32   : > { %3386 = vmatpush3.bf16.msra.mxu0 %v3385_v55 }
  0x33   : > { %3388 = vmatprep.subr.bf16.mxu0 %v3387_v56 }
  0x36   : > { %3390 = vmatpush3.bf16.msra.mxu0 %v3389_v59 }
  0x37   : > { %3392 = vmatprep.subr.bf16.mxu0 %v3391_v62 }
  0x3a   : > { %3394 = vmatpush3.bf16.msra.mxu0 %v3393_v1 }
  0x3b   : > { %3396 = vmatprep.subr.bf16.mxu0 %v3395_v5 }
  0x3e   : > { %3398 = vmatpush3.bf16.msra.mxu0 %v3397_v8 }
  0x3f   : > { %3400 = vmatprep.subr.bf16.mxu0 %v3399_v11 }
  0x42   : > { %3402 = vmatpush3.bf16.msra.mxu0 %v3401_v14 }
  0x8e   : > { %v384_v15 = vpop.permute.xlu0 %383 }
  0x92   : > { %v389_v21 = vpop.permute.xlu0 %388 }
  0xf8   : > { %v464_v16 = vpop.f32.mrb[0].mxu0 }
  0xf9   : > { %v465_v17 = vadd.f32 %v464_v16, %v384_v15  ;;  %v466_v18 = vpop.f32.mrb[1].mxu0 }
  0xfa   : > { %v467_v19 = vadd.f32 %v466_v18, %v384_v15 }
  0xfb   : > { %v480_v20 = vmax.f32 %v465_v17, 0.0 }
  0xfc   : > { %v481_v22 = vmax.f32 %v467_v19, 0.0  ;;  %v470_v23 = vpop.f32.mrb[2].mxu0 }
  0xfd   : > { %v471_v24 = vadd.f32 %v470_v23, %v389_v21  ;;  %v472_v25 = vpop.f32.mrb[3].mxu0  ;;  %607 = vxpose.xlu1.b32.start.end [1/1] (short) %v480_v20, 128  ;;  %v529_v27 = vrot.slane %v480_v20, 4 }
  0xfe   : > { %v473_v26 = vadd.f32 %v472_v25, %v389_v21  ;;  %v532_v29 = vrot.slane %v481_v22, 4 }
  0xff   : > { %v530_v28 = vrot.slane %v471_v24, 4 }
 0x100   : > { %v533_v30 = vrot.slane %v473_v26, 4 }
 0x101   : > { %v531_v31 = vsel %vm528_vm1, %v529_v27, %v530_v28 }
 0x102   : > { %v534_v32 = vsel %vm528_vm1, %v532_v29, %v533_v30 }
 0x103   : > { %601 = vmatprep.mubr.f32.mxu0 %v534_v32 }
 0x104   : > { %602 = vmatmul.mubr.f32.vlgmr.msra.gmra.mrb[4].mxu0 %v531_v31 }
 0x13a   : > { %639 = vxpose.xlu1.b32.start.end [1/1] (short) %v481_v22, 128 }
 0x158   : > { %3494 = vset.pattern.permute.xlu1 %v5555_v2 }
 0x17d   : > { %v623_v33 = vpop.trf.xlu1 }
 0x17e   : > { %3257 = vmatprep.mubr.msk.f32.mxu0 %vm671_vm2, %v623_v33 }
 0x181   : > { %v624_v34 = vpop.trf.xlu1 }
 0x185   : > { %v625_v35 = vpop.trf.xlu1 }
 0x189   : > { %v626_v36 = vpop.trf.xlu1 }
 0x18d   : > { %v627_v37 = vpop.trf.xlu1 }
 0x191   : > { %v628_v38 = vpop.trf.xlu1 }
 0x195   : > { %v629_v39 = vpop.trf.xlu1 }
 0x199   : > { %v630_v40 = vpop.trf.xlu1 }
 0x19d   : > { %v631_v41 = vpop.trf.xlu1 }
 0x1a1   : > { %v632_v42 = vpop.trf.xlu1 }
 0x1a5   : > { %v633_v43 = vpop.trf.xlu1 }
 0x1a9   : > { %v634_v44 = vpop.trf.xlu1 }
 0x1ad   : > { %v635_v45 = vpop.trf.xlu1 }
 0x1b1   : > { %v636_v46 = vpop.trf.xlu1 }
 0x1b5   : > { %v637_v47 = vpop.trf.xlu1 }
 0x1b9   : > { %v638_v48 = vpop.trf.xlu1 }
 0x1bd   : > { %v655_v49 = vpop.trf.xlu1 }
 0x1c1   : > { %v656_v50 = vpop.trf.xlu1 }
 0x1c5   : > { %v657_v51 = vpop.trf.xlu1 }
 0x1c9   : > { %v658_v52 = vpop.trf.xlu1 }
 0x1cd   : > { %v659_v53 = vpop.trf.xlu1 }
 0x1d1   : > { %v660_v57 = vpop.trf.xlu1 }
 0x1d5   : > { %v661_v59 = vpop.trf.xlu1 }
 0x1d7   : > { %v3138_v54 = vpop.f32.mrb[4].mxu0 }
 0x1d8   : > { %v3139_v55 = vpop.f32.mrb[5].mxu0 }
 0x1d9   : > { %v3140_v56 = vadd.f32 %v3139_v55, %v3138_v54  ;;  %v662_v60 = vpop.trf.xlu1 }
 0x1db   : > { %3255 = vmatprep.subr.msk.mxu0 %vm528_vm1, %v3140_v56  ;;  %v1349_v58 = vrot.slane %v3140_v56, 4 }
 0x1dc   : > { %3256 = vmatpush3.msk.msra.mxu0 %vm528_vm1, %v3140_v56 }
 0x1dd   : > { %3258 = vmatmul.mubr.msk.f32.vlgmr.msra.gmra.mrb[6].mxu0 %vm671_vm2, %v624_v34  ;;  %3305 = vmatprep.subr.msk.mxu1 %vm996_vm3, %v1349_v58  ;;  %v663_v61 = vpop.trf.xlu1 }
 0x1de   : > { %3260 = vmatprep.mubr.msk.f32.mxu0 %vm671_vm2, %v625_v35  ;;  %3306 = vmatpush3.xpose.msk.msra.mxu1 %vm996_vm3, %v1349_v58 }
 0x1e1   : > { %3261 = vmatmul.mubr.msk.f32.gmra.mrb[8].mxu0 %vm671_vm2, %v626_v36  ;;  %v664_v62 = vpop.trf.xlu1 }
 0x1e2   : > { %3263 = vmatprep.mubr.msk.f32.mxu0 %vm671_vm2, %v627_v37 }
 0x1e5   : > { %3264 = vmatmul.mubr.msk.f32.gmra.mrb[10].mxu0 %vm671_vm2, %v628_v38  ;;  %v665_v63 = vpop.trf.xlu1 }
 0x1e6   : > { %3266 = vmatprep.mubr.msk.f32.mxu0 %vm671_vm2, %v629_v39 }
 0x1e9   : > { %3267 = vmatmul.mubr.msk.f32.gmra.mrb[12].mxu0 %vm671_vm2, %v630_v40  ;;  %v666_v0 = vpop.trf.xlu1 }
 0x1ea   : > { %3269 = vmatprep.mubr.msk.f32.mxu0 %vm671_vm2, %v631_v41 }
 0x1ed   : > { %3270 = vmatmul.mubr.msk.f32.gmra.mrb[14].mxu0 %vm671_vm2, %v632_v42  ;;  %v667_v1 = vpop.trf.xlu1 }
 0x1ee   : > { %3272 = vmatprep.mubr.msk.f32.mxu0 %vm671_vm2, %v633_v43 }
 0x1f1   : > { %3273 = vmatmul.mubr.msk.f32.gmra.mrb[16].mxu0 %vm671_vm2, %v634_v44  ;;  %v668_v3 = vpop.trf.xlu1 }
 0x1f2   : > { %3275 = vmatprep.mubr.msk.f32.mxu0 %vm671_vm2, %v635_v45 }
 0x1f5   : > { %3276 = vmatmul.mubr.msk.f32.gmra.mrb[18].mxu0 %vm671_vm2, %v636_v46  ;;  %v669_v4 = vpop.trf.xlu1 }
 0x1f6   : > { %3278 = vmatprep.mubr.msk.f32.mxu0 %vm671_vm2, %v637_v47 }
 0x1f9   : > { %3279 = vmatmul.mubr.msk.f32.gmra.mrb[20].mxu0 %vm671_vm2, %v638_v48  ;;  %v670_v5 = vpop.trf.xlu1 }
 0x1fa   : > { %3281 = vmatprep.mubr.msk.f32.mxu0 %vm671_vm2, %v655_v49 }
 0x1fd   : > { %3282 = vmatmul.mubr.msk.f32.gmra.mrb[22].mxu0 %vm671_vm2, %v656_v50 }
 0x1fe   : > { %3284 = vmatprep.mubr.msk.f32.mxu0 %vm671_vm2, %v657_v51 }
 0x201   : > { %3285 = vmatmul.mubr.msk.f32.gmra.mrb[24].mxu0 %vm671_vm2, %v658_v52 }
 0x202   : > { %3287 = vmatprep.mubr.msk.f32.mxu0 %vm671_vm2, %v659_v53 }
 0x205   : > { %3288 = vmatmul.mubr.msk.f32.gmra.mrb[26].mxu0 %vm671_vm2, %v660_v57 }
 0x206   : > { %3290 = vmatprep.mubr.msk.f32.mxu0 %vm671_vm2, %v661_v59 }
 0x209   : > { %3291 = vmatmul.mubr.msk.f32.gmra.mrb[28].mxu0 %vm671_vm2, %v662_v60 }
 0x20a   : > { %3293 = vmatprep.mubr.msk.f32.mxu0 %vm671_vm2, %v663_v61 }
 0x20d   : > { %3294 = vmatmul.mubr.msk.f32.gmra.mrb[30].mxu0 %vm671_vm2, %v664_v62 }
 0x20e   : > { %3296 = vmatprep.mubr.msk.f32.mxu0 %vm671_vm2, %v665_v63 }
 0x211   : > { %3297 = vmatmul.mubr.msk.f32.gmra.mrb[32].mxu0 %vm671_vm2, %v666_v0 }
 0x212   : > { %3299 = vmatprep.mubr.msk.f32.mxu0 %vm671_vm2, %v667_v1 }
 0x215   : > { %3300 = vmatmul.mubr.msk.f32.gmra.mrb[34].mxu0 %vm671_vm2, %v668_v3 }
 0x216   : > { %3302 = vmatprep.mubr.msk.f32.mxu0 %vm671_vm2, %v669_v4 }
 0x219   : > { %3303 = vmatmul.mubr.msk.f32.gmra.mrb[36].mxu0 %vm671_vm2, %v670_v5 }
 0x2b0   : > { %v3891_v6 = vpop.f32.mrb[6].mxu0 }
 0x2b1   : > { %v3893_v7 = vpop.f32.mrb[7].mxu0  ;;  %v1000_v8 = vsel %vm996_vm3, %v3891_v6, -inf }
 0x2b2   : > { %1001 = vmax.xlane.f32.xlu0 %v1000_v8  ;;  %v997_v11 = vsel %vm996_vm3, %v3893_v7, -inf }
 0x2b4   : > { %v3897_v9 = vpop.f32.mrb[8].mxu0 }
 0x2b5   : > { %v3899_v10 = vpop.f32.mrb[9].mxu0  ;;  %v1006_v13 = vsel %vm996_vm3, %v3897_v9, -inf }
 0x2b6   : > { %998 = vmax.xlane.f32.xlu0 %v997_v11  ;;  %v1003_v16 = vsel %vm996_vm3, %v3899_v10, -inf }
 0x2b8   : > { %v3903_v12 = vpop.f32.mrb[10].mxu0 }
 0x2b9   : > { %v3907_v14 = vpop.f32.mrb[11].mxu0  ;;  %v1012_v20 = vsel %vm996_vm3, %v3903_v12, -inf }
 0x2ba   : > { %1007 = vmax.xlane.f32.xlu0 %v1006_v13  ;;  %v1009_v23 = vsel %vm996_vm3, %v3907_v14, -inf }
 0x2bc   : > { %v3909_v15 = vpop.f32.mrb[12].mxu0 }
 0x2bd   : > { %v3913_v17 = vpop.f32.mrb[13].mxu0  ;;  %v1018_v26 = vsel %vm996_vm3, %v3909_v15, -inf }
 0x2be   : > { %1004 = vmax.xlane.f32.xlu0 %v1003_v16  ;;  %v1015_v29 = vsel %vm996_vm3, %v3913_v17, -inf }
 0x2c0   : > { %v3915_v18 = vpop.f32.mrb[14].mxu0 }
 0x2c1   : > { %v3917_v19 = vpop.f32.mrb[15].mxu0  ;;  %v1024_v32 = vsel %vm996_vm3, %v3915_v18, -inf }
 0x2c2   : > { %1013 = vmax.xlane.f32.xlu0 %v1012_v20  ;;  %v1021_v21 = vsel %vm996_vm3, %v3917_v19, -inf }
 0x2c3   : > { %1022 = vmax.xlane.f32.xlu1 %v1021_v21 }
 0x2c4   : > { %v3923_v22 = vpop.f32.mrb[16].mxu0 }
 0x2c5   : > { %v3927_v24 = vpop.f32.mrb[17].mxu0  ;;  %v1030_v34 = vsel %vm996_vm3, %v3923_v22, -inf }
 0x2c6   : > { %1010 = vmax.xlane.f32.xlu0 %v1009_v23  ;;  %v1027_v38 = vsel %vm996_vm3, %v3927_v24, -inf }
 0x2c8   : > { %v3929_v25 = vpop.f32.mrb[18].mxu0 }
 0x2c9   : > { %v3933_v27 = vpop.f32.mrb[19].mxu0  ;;  %v1036_v40 = vsel %vm996_vm3, %v3929_v25, -inf }
 0x2ca   : > { %1019 = vmax.xlane.f32.xlu0 %v1018_v26  ;;  %v1033_v44 = vsel %vm996_vm3, %v3933_v27, -inf }
 0x2cc   : > { %v3935_v28 = vpop.f32.mrb[20].mxu0 }
 0x2cd   : > { %v3939_v30 = vpop.f32.mrb[21].mxu0  ;;  %v1042_v46 = vsel %vm996_vm3, %v3935_v28, -inf }
 0x2ce   : > { %1016 = vmax.xlane.f32.xlu0 %v1015_v29  ;;  %v1039_v50 = vsel %vm996_vm3, %v3939_v30, -inf }
 0x2d0   : > { %v3941_v31 = vpop.f32.mrb[22].mxu0 }
 0x2d1   : > { %v3945_v33 = vpop.f32.mrb[23].mxu0  ;;  %v1048_v52 = vsel %vm996_vm3, %v3941_v31, -inf }
 0x2d2   : > { %1025 = vmax.xlane.f32.xlu0 %v1024_v32  ;;  %v1045_v55 = vsel %vm996_vm3, %v3945_v33, -inf }
 0x2d4   : > { %v3949_v35 = vpop.f32.mrb[24].mxu0 }
 0x2d5   : > { %v3951_v36 = vpop.f32.mrb[25].mxu0  ;;  %v1054_v56 = vsel %vm996_vm3, %v3949_v35, -inf }
 0x2d6   : > { %1031 = vmax.xlane.f32.xlu0 %v1030_v34  ;;  %v1051_v57 = vsel %vm996_vm3, %v3951_v36, -inf }
 0x2d8   : > { %v3953_v37 = vpop.f32.mrb[26].mxu0 }
 0x2d9   : > { %v3957_v39 = vpop.f32.mrb[27].mxu0  ;;  %v1060_v58 = vsel %vm996_vm3, %v3953_v37, -inf }
 0x2da   : > { %1028 = vmax.xlane.f32.xlu0 %v1027_v38  ;;  %v1057_v59 = vsel %vm996_vm3, %v3957_v39, -inf }
 0x2dc   : > { %v3961_v41 = vpop.f32.mrb[28].mxu0 }
 0x2dd   : > { %v3963_v42 = vpop.f32.mrb[29].mxu0  ;;  %v1066_v60 = vsel %vm996_vm3, %v3961_v41, -inf }
 0x2de   : > { %1037 = vmax.xlane.f32.xlu0 %v1036_v40  ;;  %v1063_v61 = vsel %vm996_vm3, %v3963_v42, -inf }
 0x2e0   : > { %v3965_v43 = vpop.f32.mrb[30].mxu0 }
 0x2e1   : > { %v3969_v45 = vpop.f32.mrb[31].mxu0  ;;  %v1072_v62 = vsel %vm996_vm3, %v3965_v43, -inf }
 0x2e2   : > { %1034 = vmax.xlane.f32.xlu0 %v1033_v44  ;;  %v1069_v63 = vsel %vm996_vm3, %v3969_v45, -inf }
 0x2e4   : > { %v3973_v47 = vpop.f32.mrb[32].mxu0 }
 0x2e5   : > { %v3975_v48 = vpop.f32.mrb[33].mxu0  ;;  %v1078_v0 = vsel %vm996_vm3, %v3973_v47, -inf }
 0x2e6   : > { %1043 = vmax.xlane.f32.xlu0 %v1042_v46  ;;  %v1075_v1 = vsel %vm996_vm3, %v3975_v48, -inf }
 0x2e8   : > { %v3977_v49 = vpop.f32.mrb[34].mxu0 }
 0x2e9   : > { %v3981_v51 = vpop.f32.mrb[35].mxu0  ;;  %v1084_v3 = vsel %vm996_vm3, %v3977_v49, -inf }
 0x2ea   : > { %1040 = vmax.xlane.f32.xlu0 %v1039_v50  ;;  %v1081_v4 = vsel %vm996_vm3, %v3981_v51, -inf }
 0x2ec   : > { %v3985_v53 = vpop.f32.mrb[36].mxu0 }
 0x2ed   : > { %v3987_v54 = vpop.f32.mrb[37].mxu0  ;;  %v1090_v5 = vsel %vm996_vm3, %v3985_v53, -inf }
 0x2ee   : > { %1049 = vmax.xlane.f32.xlu0 %v1048_v52  ;;  %v1087_v8 = vsel %vm996_vm3, %v3987_v54, -inf }
 0x2f2   : > { %1046 = vmax.xlane.f32.xlu0 %v1045_v55 }
 0x2f6   : > { %1055 = vmax.xlane.f32.xlu0 %v1054_v56 }
 0x2fa   : > { %1052 = vmax.xlane.f32.xlu0 %v1051_v57 }
 0x2fe   : > { %1061 = vmax.xlane.f32.xlu0 %v1060_v58 }
 0x302   : > { %1058 = vmax.xlane.f32.xlu0 %v1057_v59 }
 0x306   : > { %1067 = vmax.xlane.f32.xlu0 %v1066_v60 }
 0x30a   : > { %1064 = vmax.xlane.f32.xlu0 %v1063_v61 }
 0x30e   : > { %1073 = vmax.xlane.f32.xlu0 %v1072_v62 }
 0x312   : > { %1070 = vmax.xlane.f32.xlu0 %v1069_v63 }
 0x316   : > { %1079 = vmax.xlane.f32.xlu0 %v1078_v0 }
 0x31a   : > { %1076 = vmax.xlane.f32.xlu0 %v1075_v1 }
 0x31e   : > { %1085 = vmax.xlane.f32.xlu0 %v1084_v3 }
 0x322   : > { %1082 = vmax.xlane.f32.xlu0 %v1081_v4 }
 0x326   : > { %1091 = vmax.xlane.f32.xlu0 %v1090_v5 }
 0x32a   : > { %1088 = vmax.xlane.f32.xlu0 %v1087_v8 }
 0x33f   : > { %v1002_v11 = vpop.xlane.xlu0 %1001 }
 0x340   : > { %v1094_v13 = vsub.f32 %v3891_v6, %v1002_v11 }
 0x342   : > { %v1127_v21 = vmul.f32 1.442695, %v1094_v13 }
 0x343   : > { %v999_v16 = vpop.xlane.xlu0 %998 }
 0x344   : > { %v1093_v20 = vsub.f32 %v3893_v7, %v999_v16 }
 0x346   : > { %v1125_v23 = vmul.f32 1.442695, %v1093_v20 }
 0x347   : > { %v1008_v26 = vpop.xlane.xlu0 %1007 }
 0x348   : > { %3509 = vpow2.f32 %v1125_v23  ;;  %v1096_v29 = vsub.f32 %v3897_v9, %v1008_v26 }
 0x349   : > { %3511 = vpow2.f32 %v1127_v21 }
 0x34a   : > { %v1131_v32 = vmul.f32 1.442695, %v1096_v29 }
 0x34b   : > { %v1005_v34 = vpop.xlane.xlu0 %1004 }
 0x34c   : > { %v1095_v38 = vsub.f32 %v3899_v10, %v1005_v34  ;;  %3513 = vpow2.f32 %v1131_v32 }
 0x34e   : > { %v1129_v40 = vmul.f32 1.442695, %v1095_v38 }
 0x34f   : > { %v1014_v44 = vpop.xlane.xlu0 %1013 }
 0x350   : > { %3515 = vpow2.f32 %v1129_v40  ;;  %v1098_v6 = vsub.f32 %v3903_v12, %v1014_v44  ;;  %v1023_v56 = vpop.xlane.xlu1 %1022 }
 0x351   : > { %v1101_v61 = vsub.f32 %v3917_v19, %v1023_v56 }
 0x352   : > { %v4024_v46 = vpop.eup %3509  ;;  %v1135_v7 = vmul.f32 1.442695, %v1098_v6 }
 0x353   : > { %v1011_v50 = vpop.xlane.xlu0 %1010  ;;  %v1189_v52 = vsel %vm996_vm3, %v4024_v46, 0.0  ;;  %v4028_v55 = vpop.eup %3511 }
 0x354   : > { %3517 = vpow2.f32 %v1135_v7  ;;  %v1097_v9 = vsub.f32 %v3907_v14, %v1011_v50  ;;  %1190 = vadd.xlane.f32.xlu0 %v1189_v52  ;;  %v1192_v58 = vsel %vm996_vm3, %v4028_v55, 0.0 }
 0x356   : > { %v1133_v10 = vmul.f32 1.442695, %v1097_v9  ;;  %v4033_v12 = vpop.eup %3513 }
 0x357   : > { %v1020_v57 = vpop.xlane.xlu0 %1019  ;;  %v1198_v0 = vsel %vm996_vm3, %v4033_v12, 0.0 }
 0x358   : > { %3519 = vpow2.f32 %v1133_v10  ;;  %v1100_v59 = vsub.f32 %v3909_v15, %v1020_v57  ;;  %1193 = vadd.xlane.f32.xlu0 %v1192_v58  ;;  %v1141_v15 = vmul.f32 1.442695, %v1101_v61 }
 0x35a   : > { %v4036_v60 = vpop.eup %3515  ;;  %v1139_v62 = vmul.f32 1.442695, %v1100_v59 }
 0x35b   : > { %v1017_v63 = vpop.xlane.xlu0 %1016  ;;  %v1195_v14 = vsel %vm996_vm3, %v4036_v60, 0.0 }
 0x35c   : > { %3521 = vpow2.f32 %v1139_v62  ;;  %v1099_v1 = vsub.f32 %v3913_v17, %v1017_v63  ;;  %1196 = vadd.xlane.f32.xlu1 %v1195_v14  ;;  %1199 = vadd.xlane.f32.xlu0 %v1198_v0 }
 0x35e   : > { %v4044_v3 = vpop.eup %3517  ;;  %v1137_v4 = vmul.f32 1.442695, %v1099_v1 }
 0x35f   : > { %v1026_v5 = vpop.xlane.xlu0 %1025  ;;  %v1204_v19 = vsel %vm996_vm3, %v4044_v3, 0.0 }
 0x360   : > { %3523 = vpow2.f32 %v1137_v4  ;;  %v1102_v8 = vsub.f32 %v3915_v18, %v1026_v5  ;;  %1205 = vadd.xlane.f32.xlu0 %v1204_v19 }
 0x361   : > { %3525 = vpow2.f32 %v1141_v15 }
 0x362   : > { %v4049_v11 = vpop.eup %3519  ;;  %v1143_v13 = vmul.f32 1.442695, %v1102_v8 }
 0x363   : > { %v1032_v16 = vpop.xlane.xlu0 %1031  ;;  %v1201_v17 = vsel %vm996_vm3, %v4049_v11, 0.0 }
 0x364   : > { %3527 = vpow2.f32 %v1143_v13  ;;  %v1104_v20 = vsub.f32 %v3923_v22, %v1032_v16  ;;  %1202 = vadd.xlane.f32.xlu1 %v1201_v17 }
 0x366   : > { %v4054_v21 = vpop.eup %3521  ;;  %v1147_v23 = vmul.f32 1.442695, %v1104_v20 }
 0x367   : > { %v1029_v26 = vpop.xlane.xlu0 %1028  ;;  %v1210_v18 = vsel %vm996_vm3, %v4054_v21, 0.0 }
 0x368   : > { %3529 = vpow2.f32 %v1147_v23  ;;  %v1103_v29 = vsub.f32 %v3927_v24, %v1029_v26  ;;  %1211 = vadd.xlane.f32.xlu0 %v1210_v18 }
 0x36a   : > { %v4059_v32 = vpop.eup %3523  ;;  %v1145_v34 = vmul.f32 1.442695, %v1103_v29 }
 0x36b   : > { %v1038_v38 = vpop.xlane.xlu0 %1037  ;;  %v1207_v40 = vsel %vm996_vm3, %v4059_v32, 0.0  ;;  %v4063_v22 = vpop.eup %3525 }
 0x36c   : > { %3531 = vpow2.f32 %v1145_v34  ;;  %v1106_v44 = vsub.f32 %v3929_v25, %v1038_v38  ;;  %1208 = vadd.xlane.f32.xlu1 %v1207_v40  ;;  %v1213_v24 = vsel %vm996_vm3, %v4063_v22, 0.0 }
 0x36e   : > { %v4066_v6 = vpop.eup %3527  ;;  %v1151_v7 = vmul.f32 1.442695, %v1106_v44 }
 0x36f   : > { %v1035_v50 = vpop.xlane.xlu0 %1034  ;;  %v1216_v52 = vsel %vm996_vm3, %v4066_v6, 0.0 }
 0x370   : > { %3533 = vpow2.f32 %v1151_v7  ;;  %v1105_v9 = vsub.f32 %v3933_v27, %v1035_v50  ;;  %1214 = vadd.xlane.f32.xlu1 %v1213_v24  ;;  %1217 = vadd.xlane.f32.xlu0 %v1216_v52 }
 0x372   : > { %v4073_v10 = vpop.eup %3529  ;;  %v1149_v56 = vmul.f32 1.442695, %v1105_v9 }
 0x373   : > { %v1044_v25 = vpop.xlane.xlu0 %1043  ;;  %v1222_v57 = vsel %vm996_vm3, %v4073_v10, 0.0 }
 0x374   : > { %3535 = vpow2.f32 %v1149_v56  ;;  %v1108_v58 = vsub.f32 %v3935_v28, %v1044_v25  ;;  %1223 = vadd.xlane.f32.xlu0 %v1222_v57 }
 0x376   : > { %v4078_v59 = vpop.eup %3531  ;;  %v1155_v61 = vmul.f32 1.442695, %v1108_v58 }
 0x377   : > { %v1041_v62 = vpop.xlane.xlu0 %1040  ;;  %v1219_v27 = vsel %vm996_vm3, %v4078_v59, 0.0 }
 0x378   : > { %3537 = vpow2.f32 %v1155_v61  ;;  %v1107_v63 = vsub.f32 %v3939_v30, %v1041_v62  ;;  %1220 = vadd.xlane.f32.xlu1 %v1219_v27 }
 0x37a   : > { %v4083_v14 = vpop.eup %3533  ;;  %v1153_v0 = vmul.f32 1.442695, %v1107_v63 }
 0x37b   : > { %v1050_v1 = vpop.xlane.xlu0 %1049  ;;  %v1228_v15 = vsel %vm996_vm3, %v4083_v14, 0.0 }
 0x37c   : > { %3539 = vpow2.f32 %v1153_v0  ;;  %v1110_v28 = vsub.f32 %v3941_v31, %v1050_v1  ;;  %1229 = vadd.xlane.f32.xlu0 %v1228_v15 }
 0x37e   : > { %v4088_v4 = vpop.eup %3535  ;;  %v1159_v5 = vmul.f32 1.442695, %v1110_v28 }
 0x37f   : > { %v1047_v19 = vpop.xlane.xlu0 %1046  ;;  %v1225_v8 = vsel %vm996_vm3, %v4088_v4, 0.0 }
 0x380   : > { %3541 = vpow2.f32 %v1159_v5  ;;  %v1109_v30 = vsub.f32 %v3945_v33, %v1047_v19  ;;  %1226 = vadd.xlane.f32.xlu1 %v1225_v8 }
 0x382   : > { %v4093_v13 = vpop.eup %3537  ;;  %v1157_v16 = vmul.f32 1.442695, %v1109_v30 }
 0x383   : > { %v1056_v17 = vpop.xlane.xlu0 %1055  ;;  %v1234_v20 = vsel %vm996_vm3, %v4093_v13, 0.0 }
 0x384   : > { %3543 = vpow2.f32 %v1157_v16  ;;  %v1112_v31 = vsub.f32 %v3949_v35, %v1056_v17  ;;  %1235 = vadd.xlane.f32.xlu0 %v1234_v20 }
 0x386   : > { %v4098_v23 = vpop.eup %3539  ;;  %v1163_v26 = vmul.f32 1.442695, %v1112_v31 }
 0x387   : > { %v1053_v18 = vpop.xlane.xlu0 %1052  ;;  %v1231_v29 = vsel %vm996_vm3, %v4098_v23, 0.0 }
 0x388   : > { %3545 = vpow2.f32 %v1163_v26  ;;  %v1111_v33 = vsub.f32 %v3951_v36, %v1053_v18  ;;  %1232 = vadd.xlane.f32.xlu1 %v1231_v29 }
 0x38a   : > { %v4103_v34 = vpop.eup %3541  ;;  %v1161_v38 = vmul.f32 1.442695, %v1111_v33 }
 0x38b   : > { %v1062_v40 = vpop.xlane.xlu0 %1061  ;;  %v1240_v44 = vsel %vm996_vm3, %v4103_v34, 0.0 }
 0x38c   : > { %3547 = vpow2.f32 %v1161_v38  ;;  %v1114_v35 = vsub.f32 %v3953_v37, %v1062_v40  ;;  %1241 = vadd.xlane.f32.xlu0 %v1240_v44 }
 0x38e   : > { %v4108_v7 = vpop.eup %3543  ;;  %v1167_v50 = vmul.f32 1.442695, %v1114_v35 }
 0x38f   : > { %v1059_v24 = vpop.xlane.xlu0 %1058  ;;  %v1237_v52 = vsel %vm996_vm3, %v4108_v7, 0.0 }
 0x390   : > { %3549 = vpow2.f32 %v1167_v50  ;;  %v1113_v36 = vsub.f32 %v3957_v39, %v1059_v24  ;;  %1238 = vadd.xlane.f32.xlu1 %v1237_v52 }
 0x392   : > { %v4113_v9 = vpop.eup %3545  ;;  %v1165_v56 = vmul.f32 1.442695, %v1113_v36 }
 0x393   : > { %v1068_v25 = vpop.xlane.xlu0 %1067  ;;  %v1246_v57 = vsel %vm996_vm3, %v4113_v9, 0.0 }
 0x394   : > { %3551 = vpow2.f32 %v1165_v56  ;;  %v1116_v37 = vsub.f32 %v3961_v41, %v1068_v25  ;;  %1247 = vadd.xlane.f32.xlu0 %v1246_v57 }
 0x396   : > { %v4118_v58 = vpop.eup %3547  ;;  %v1171_v61 = vmul.f32 1.442695, %v1116_v37 }
 0x397   : > { %v1065_v62 = vpop.xlane.xlu0 %1064  ;;  %v1243_v27 = vsel %vm996_vm3, %v4118_v58, 0.0 }
 0x398   : > { %3553 = vpow2.f32 %v1171_v61  ;;  %v1115_v39 = vsub.f32 %v3963_v42, %v1065_v62  ;;  %1244 = vadd.xlane.f32.xlu1 %v1243_v27 }
 0x39a   : > { %v4123_v63 = vpop.eup %3549  ;;  %v1169_v0 = vmul.f32 1.442695, %v1115_v39 }
 0x39b   : > { %v1074_v1 = vpop.xlane.xlu0 %1073  ;;  %v1252_v15 = vsel %vm996_vm3, %v4123_v63, 0.0 }
 0x39c   : > { %3555 = vpow2.f32 %v1169_v0  ;;  %v1118_v41 = vsub.f32 %v3965_v43, %v1074_v1  ;;  %1253 = vadd.xlane.f32.xlu0 %v1252_v15 }
 0x39e   : > { %v4128_v28 = vpop.eup %3551  ;;  %v1175_v5 = vmul.f32 1.442695, %v1118_v41 }
 0x39f   : > { %v1071_v19 = vpop.xlane.xlu0 %1070  ;;  %v1249_v8 = vsel %vm996_vm3, %v4128_v28, 0.0 }
 0x3a0   : > { %3557 = vpow2.f32 %v1175_v5  ;;  %v1117_v42 = vsub.f32 %v3969_v45, %v1071_v19  ;;  %1250 = vadd.xlane.f32.xlu1 %v1249_v8  ;;  %v1682_v8 = vld [vmem:[%s5552_s7 + $0x8] sm:$0xff] }
 0x3a2   : > { %v4133_v30 = vpop.eup %3553  ;;  %v1173_v16 = vmul.f32 1.442695, %v1117_v42  ;;  %v1685_v42 = vld [vmem:[%s5552_s7 + $0x20] sm:$0xff] }
 0x3a3   : > { %v1080_v17 = vpop.xlane.xlu0 %1079  ;;  %v1258_v20 = vsel %vm996_vm3, %v4133_v30, 0.0 }
 0x3a4   : > { %3559 = vpow2.f32 %v1173_v16  ;;  %v1120_v43 = vsub.f32 %v3973_v47, %v1080_v17  ;;  %1259 = vadd.xlane.f32.xlu0 %v1258_v20  ;;  %v1687_v16 = vld [vmem:[%s5552_s7 + $0x30] sm:$0xff] }
 0x3a6   : > { %v4138_v31 = vpop.eup %3555  ;;  %v1179_v26 = vmul.f32 1.442695, %v1120_v43 }
 0x3a7   : > { %v1077_v18 = vpop.xlane.xlu0 %1076  ;;  %v1255_v29 = vsel %vm996_vm3, %v4138_v31, 0.0 }
 0x3a8   : > { %3561 = vpow2.f32 %v1179_v26  ;;  %v1119_v45 = vsub.f32 %v3975_v48, %v1077_v18  ;;  %1256 = vadd.xlane.f32.xlu1 %v1255_v29 }
 0x3aa   : > { %v4143_v33 = vpop.eup %3557  ;;  %v1177_v38 = vmul.f32 1.442695, %v1119_v45 }
 0x3ab   : > { %v1086_v40 = vpop.xlane.xlu0 %1085  ;;  %v1264_v44 = vsel %vm996_vm3, %v4143_v33, 0.0 }
 0x3ac   : > { %3563 = vpow2.f32 %v1177_v38  ;;  %v1122_v47 = vsub.f32 %v3977_v49, %v1086_v40  ;;  %1265 = vadd.xlane.f32.xlu0 %v1264_v44 }
 0x3ae   : > { %v4148_v35 = vpop.eup %3559  ;;  %v1183_v50 = vmul.f32 1.442695, %v1122_v47 }
 0x3af   : > { %v1083_v24 = vpop.xlane.xlu0 %1082  ;;  %v1261_v52 = vsel %vm996_vm3, %v4148_v35, 0.0 }
 0x3b0   : > { %3565 = vpow2.f32 %v1183_v50  ;;  %v1121_v48 = vsub.f32 %v3981_v51, %v1083_v24  ;;  %1262 = vadd.xlane.f32.xlu1 %v1261_v52 }
 0x3b2   : > { %v4153_v36 = vpop.eup %3561  ;;  %v1181_v56 = vmul.f32 1.442695, %v1121_v48 }
 0x3b3   : > { %v1092_v25 = vpop.xlane.xlu0 %1091  ;;  %v1270_v57 = vsel %vm996_vm3, %v4153_v36, 0.0 }
 0x3b4   : > { %3567 = vpow2.f32 %v1181_v56  ;;  %v1124_v49 = vsub.f32 %v3985_v53, %v1092_v25  ;;  %1271 = vadd.xlane.f32.xlu0 %v1270_v57 }
 0x3b6   : > { %v4158_v37 = vpop.eup %3563  ;;  %v1187_v61 = vmul.f32 1.442695, %v1124_v49 }
 0x3b7   : > { %v1089_v62 = vpop.xlane.xlu0 %1088  ;;  %v1267_v27 = vsel %vm996_vm3, %v4158_v37, 0.0 }
 0x3b8   : > { %3569 = vpow2.f32 %v1187_v61  ;;  %v1123_v51 = vsub.f32 %v3987_v54, %v1089_v62  ;;  %1268 = vadd.xlane.f32.xlu1 %v1267_v27 }
 0x3ba   : > { %v4163_v39 = vpop.eup %3565  ;;  %v1185_v0 = vmul.f32 1.442695, %v1123_v51 }
 0x3bb   : > { %v1276_v1 = vsel %vm996_vm3, %v4163_v39, 0.0 }
 0x3bc   : > { %3571 = vpow2.f32 %v1185_v0  ;;  %1277 = vadd.xlane.f32.xlu0 %v1276_v1 }
 0x3be   : > { %v4167_v53 = vpop.eup %3567 }
 0x3bf   : > { %v1273_v15 = vsel %vm996_vm3, %v4167_v53, 0.0 }
 0x3c0   : > { %1274 = vadd.xlane.f32.xlu1 %v1273_v15 }
 0x3c2   : > { %v4171_v41 = vpop.eup %3569 }
 0x3c3   : > { %v1282_v54 = vsel %vm996_vm3, %v4171_v41, 0.0 }
 0x3c4   : > { %1283 = vadd.xlane.f32.xlu0 %v1282_v54 }
 0x3c6   : > { %v4175_v5 = vpop.eup %3571 }
 0x3c7   : > { %v1279_v19 = vsel %vm996_vm3, %v4175_v5, 0.0 }
 0x3c8   : > { %1280 = vadd.xlane.f32.xlu1 %v1279_v19 }
 0x3da   : > { %1696 = vperm.xlu0 %3493, %v1682_v8  }
 0x3de   : > { %1711 = vperm.xlu0 %3493, %v1685_v42  }
 0x3e1   : > { %v1191_v17 = vpop.xlane.xlu0 %1190 }
 0x3e2   : > { %3573 = vrcp.f32 %v1191_v17  ;;  %1721 = vperm.xlu0 %3493, %v1687_v16  }
 0x3e5   : > { %v1194_v20 = vpop.xlane.xlu0 %1193 }
 0x3e6   : > { %3575 = vrcp.f32 %v1194_v20 }
 0x3e9   : > { %v1197_v43 = vpop.xlane.xlu1 %1196  ;;  %v1200_v26 = vpop.xlane.xlu0 %1199 }
 0x3ea   : > { %3577 = vrcp.f32 %v1197_v43 }
 0x3eb   : > { %3579 = vrcp.f32 %v1200_v26 }
 0x3ec   : > { %v3574_v18 = vpop.eup %3573 }
 0x3ed   : > { %v1317_v29 = vmul.f32 %v3574_v18, %v4024_v46  ;;  %v1206_v45 = vpop.xlane.xlu0 %1205 }
 0x3ee   : > { %3581 = vrcp.f32 %v1206_v45 }
 0x3ef   : > { %3307 = vmatprep.mubr.msk.f32.mxu1 %vm996_vm3, %v1317_v29 }
 0x3f0   : > { %v3576_v38 = vpop.eup %3575 }
 0x3f1   : > { %v1203_v40 = vpop.xlane.xlu1 %1202  ;;  %v1318_v44 = vmul.f32 %v3576_v38, %v4028_v55 }
 0x3f2   : > { %3583 = vrcp.f32 %v1203_v40 }
 0x3f3   : > { %3308 = vmatmul.mubr.msk.f32.vlgmr.msra.gmra.mrb[0].mxu1 %vm996_vm3, %v1318_v44 }
 0x3f4   : > { %v3578_v47 = vpop.eup %3577 }
 0x3f5   : > { %v3580_v50 = vpop.eup %3579  ;;  %v1319_v24 = vmul.f32 %v3578_v47, %v4036_v60  ;;  %v1212_v52 = vpop.xlane.xlu0 %1211 }
 0x3f6   : > { %v1320_v48 = vmul.f32 %v3580_v50, %v4033_v12  ;;  %3585 = vrcp.f32 %v1212_v52 }
 0x3f7   : > { %3310 = vmatprep.mubr.msk.f32.mxu1 %vm996_vm3, %v1319_v24 }
 0x3f8   : > { %3311 = vmatmul.mubr.msk.f32.gmra.mrb[2].mxu1 %vm996_vm3, %v1320_v48  ;;  %v3582_v56 = vpop.eup %3581 }
 0x3f9   : > { %v1209_v46 = vpop.xlane.xlu1 %1208  ;;  %v1322_v61 = vmul.f32 %v3582_v56, %v4044_v3 }
 0x3fa   : > { %3587 = vrcp.f32 %v1209_v46 }
 0x3fc   : > { %v3584_v25 = vpop.eup %3583 }
 0x3fd   : > { %v1215_v55 = vpop.xlane.xlu1 %1214  ;;  %v1218_v57 = vpop.xlane.xlu0 %1217  ;;  %v1321_v49 = vmul.f32 %v3584_v25, %v4049_v11 }
 0x3fe   : > { %3589 = vrcp.f32 %v1215_v55 }
 0x3ff   : > { %3591 = vrcp.f32 %v1218_v57  ;;  %3313 = vmatprep.mubr.msk.f32.mxu1 %vm996_vm3, %v1321_v49 }
 0x400   : > { %3314 = vmatmul.mubr.msk.f32.gmra.mrb[4].mxu1 %vm996_vm3, %v1322_v61  ;;  %v3586_v60 = vpop.eup %3585 }
 0x401   : > { %v1224_v12 = vpop.xlane.xlu0 %1223  ;;  %v1324_v0 = vmul.f32 %v3586_v60, %v4054_v21 }
 0x402   : > { %3593 = vrcp.f32 %v1224_v12 }
 0x404   : > { %v3588_v62 = vpop.eup %3587 }
 0x405   : > { %v1221_v27 = vpop.xlane.xlu1 %1220  ;;  %v1323_v51 = vmul.f32 %v3588_v62, %v4059_v32 }
 0x406   : > { %3595 = vrcp.f32 %v1221_v27 }
 0x407   : > { %3316 = vmatprep.mubr.msk.f32.mxu1 %vm996_vm3, %v1323_v51 }
 0x408   : > { %v3590_v11 = vpop.eup %3589  ;;  %3317 = vmatmul.mubr.msk.f32.gmra.mrb[6].mxu1 %vm996_vm3, %v1324_v0 }
 0x409   : > { %v3592_v3 = vpop.eup %3591  ;;  %v1325_v1 = vmul.f32 %v3590_v11, %v4063_v22  ;;  %v1230_v15 = vpop.xlane.xlu0 %1229 }
 0x40a   : > { %v1326_v54 = vmul.f32 %v3592_v3, %v4066_v6  ;;  %3597 = vrcp.f32 %v1230_v15 }
 0x40b   : > { %3319 = vmatprep.mubr.msk.f32.mxu1 %vm996_vm3, %v1325_v1 }
 0x40c   : > { %3320 = vmatmul.mubr.msk.f32.gmra.mrb[8].mxu1 %vm996_vm3, %v1326_v54  ;;  %v3594_v19 = vpop.eup %3593 }
 0x40d   : > { %v1227_v32 = vpop.xlane.xlu1 %1226  ;;  %v1328_v16 = vmul.f32 %v3594_v19, %v4073_v10 }
 0x40e   : > { %3599 = vrcp.f32 %v1227_v32 }
 0x410   : > { %v3596_v21 = vpop.eup %3595 }
 0x411   : > { %v1327_v8 = vmul.f32 %v3596_v21, %v4078_v59  ;;  %v1236_v42 = vpop.xlane.xlu0 %1235 }
 0x412   : > { %3601 = vrcp.f32 %v1236_v42 }
 0x413   : > { %3322 = vmatprep.mubr.msk.f32.mxu1 %vm996_vm3, %v1327_v8 }
 0x414   : > { %3323 = vmatmul.mubr.msk.f32.gmra.mrb[10].mxu1 %vm996_vm3, %v1328_v16  ;;  %v3598_v6 = vpop.eup %3597 }
 0x415   : > { %v1233_v22 = vpop.xlane.xlu1 %1232  ;;  %v1330_v26 = vmul.f32 %v3598_v6, %v4083_v14 }
 0x416   : > { %3603 = vrcp.f32 %v1233_v22 }
 0x418   : > { %v3600_v17 = vpop.eup %3599 }
 0x419   : > { %v1329_v20 = vmul.f32 %v3600_v17, %v4088_v4  ;;  %v1242_v43 = vpop.xlane.xlu0 %1241 }
 0x41a   : > { %3605 = vrcp.f32 %v1242_v43 }
 0x41b   : > { %3325 = vmatprep.mubr.msk.f32.mxu1 %vm996_vm3, %v1329_v20 }
 0x41c   : > { %3326 = vmatmul.mubr.msk.f32.gmra.mrb[12].mxu1 %vm996_vm3, %v1330_v26  ;;  %v3602_v59 = vpop.eup %3601 }
 0x41d   : > { %v1239_v10 = vpop.xlane.xlu1 %1238  ;;  %v1332_v38 = vmul.f32 %v3602_v59, %v4093_v13 }
 0x41e   : > { %3607 = vrcp.f32 %v1239_v10 }
 0x420   : > { %v3604_v18 = vpop.eup %3603 }
 0x421   : > { %v1331_v29 = vmul.f32 %v3604_v18, %v4098_v23  ;;  %v1248_v45 = vpop.xlane.xlu0 %1247  ;;  %v1681_v18 = vld [vmem:[%s5552_s7] sm:$0xff] }
 0x422   : > { %3609 = vrcp.f32 %v1248_v45  ;;  %1691 = vperm.xlu1 %3494, %v1681_v18  }
 0x423   : > { %3328 = vmatprep.mubr.msk.f32.mxu1 %vm996_vm3, %v1331_v29 }
 0x424   : > { %3329 = vmatmul.mubr.msk.f32.gmra.mrb[14].mxu1 %vm996_vm3, %v1332_v38  ;;  %v3606_v4 = vpop.eup %3605  ;;  %v1683_v38 = vld [vmem:[%s5552_s7 + $0x10] sm:$0xff] }
 0x425   : > { %v1245_v14 = vpop.xlane.xlu1 %1244  ;;  %v1334_v50 = vmul.f32 %v3606_v4, %v4103_v34 }
 0x426   : > { %3611 = vrcp.f32 %v1245_v14  ;;  %1701 = vperm.xlu1 %3494, %v1683_v38   ;;  %v1684_v14 = vld [vmem:[%s5552_s7 + $0x18] sm:$0xff] }
 0x428   : > { %v3608_v40 = vpop.eup %3607 }
 0x429   : > { %v1333_v44 = vmul.f32 %v3608_v40, %v4108_v7  ;;  %v1254_v47 = vpop.xlane.xlu0 %1253 }
 0x42a   : > { %3613 = vrcp.f32 %v1254_v47  ;;  %1706 = vperm.xlu1 %3494, %v1684_v14   ;;  %v1686_v47 = vld [vmem:[%s5552_s7 + $0x28] sm:$0xff] }
 0x42b   : > { %3331 = vmatprep.mubr.msk.f32.mxu1 %vm996_vm3, %v1333_v44 }
 0x42c   : > { %3332 = vmatmul.mubr.msk.f32.gmra.mrb[16].mxu1 %vm996_vm3, %v1334_v50  ;;  %v3610_v23 = vpop.eup %3609  ;;  %v1688_v50 = vld [vmem:[%s5552_s7 + $0x38] sm:$0xff] }
 0x42d   : > { %v1251_v13 = vpop.xlane.xlu1 %1250  ;;  %v1336_v46 = vmul.f32 %v3610_v23, %v4113_v9 }
 0x42e   : > { %3615 = vrcp.f32 %v1251_v13  ;;  %1716 = vperm.xlu1 %3494, %v1686_v47  }
 0x430   : > { %v3612_v24 = vpop.eup %3611 }
 0x431   : > { %v1335_v52 = vmul.f32 %v3612_v24, %v4118_v58  ;;  %v1260_v48 = vpop.xlane.xlu0 %1259 }
 0x432   : > { %3617 = vrcp.f32 %v1260_v48  ;;  %1726 = vperm.xlu1 %3494, %v1688_v50  }
 0x433   : > { %3334 = vmatprep.mubr.msk.f32.mxu1 %vm996_vm3, %v1335_v52 }
 0x434   : > { %3335 = vmatmul.mubr.msk.f32.gmra.mrb[18].mxu1 %vm996_vm3, %v1336_v46  ;;  %v3614_v7 = vpop.eup %3613 }
 0x435   : > { %v1257_v34 = vpop.xlane.xlu1 %1256  ;;  %v1338_v57 = vmul.f32 %v3614_v7, %v4123_v63 }
 0x436   : > { %3619 = vrcp.f32 %v1257_v34 }
 0x438   : > { %v3616_v56 = vpop.eup %3615 }
 0x439   : > { %v1337_v25 = vmul.f32 %v3616_v56, %v4128_v28  ;;  %v1266_v55 = vpop.xlane.xlu0 %1265 }
 0x43a   : > { %3621 = vrcp.f32 %v1266_v55 }
 0x43b   : > { %3337 = vmatprep.mubr.msk.f32.mxu1 %vm996_vm3, %v1337_v25 }
 0x43c   : > { %3338 = vmatmul.mubr.msk.f32.gmra.mrb[20].mxu1 %vm996_vm3, %v1338_v57  ;;  %v3618_v58 = vpop.eup %3617 }
 0x43d   : > { %v1263_v9 = vpop.xlane.xlu1 %1262  ;;  %v1340_v60 = vmul.f32 %v3618_v58, %v4133_v30 }
 0x43e   : > { %3623 = vrcp.f32 %v1263_v9 }
 0x440   : > { %v3620_v49 = vpop.eup %3619 }
 0x441   : > { %v1339_v61 = vmul.f32 %v3620_v49, %v4138_v31  ;;  %v1272_v12 = vpop.xlane.xlu0 %1271 }
 0x442   : > { %3625 = vrcp.f32 %v1272_v12 }
 0x443   : > { %3340 = vmatprep.mubr.msk.f32.mxu1 %vm996_vm3, %v1339_v61 }
 0x444   : > { %3341 = vmatmul.mubr.msk.f32.gmra.mrb[22].mxu1 %vm996_vm3, %v1340_v60  ;;  %v3622_v28 = vpop.eup %3621 }
 0x445   : > { %v1269_v63 = vpop.xlane.xlu1 %1268  ;;  %v1342_v0 = vmul.f32 %v3622_v28, %v4143_v33 }
 0x446   : > { %3627 = vrcp.f32 %v1269_v63 }
 0x448   : > { %v3624_v62 = vpop.eup %3623 }
 0x449   : > { %v1341_v27 = vmul.f32 %v3624_v62, %v4148_v35  ;;  %v1278_v51 = vpop.xlane.xlu0 %1277 }
 0x44a   : > { %3629 = vrcp.f32 %v1278_v51 }
 0x44b   : > { %3343 = vmatprep.mubr.msk.f32.mxu1 %vm996_vm3, %v1341_v27 }
 0x44c   : > { %3344 = vmatmul.mubr.msk.f32.gmra.mrb[24].mxu1 %vm996_vm3, %v1342_v0  ;;  %v3626_v31 = vpop.eup %3625 }
 0x44d   : > { %v1275_v30 = vpop.xlane.xlu1 %1274  ;;  %v1344_v15 = vmul.f32 %v3626_v31, %v4153_v36 }
 0x44e   : > { %3631 = vrcp.f32 %v1275_v30 }
 0x450   : > { %v3628_v11 = vpop.eup %3627 }
 0x451   : > { %v1343_v3 = vmul.f32 %v3628_v11, %v4158_v37  ;;  %v1284_v1 = vpop.xlane.xlu0 %1283 }
 0x452   : > { %3633 = vrcp.f32 %v1284_v1 }
 0x453   : > { %3346 = vmatprep.mubr.msk.f32.mxu1 %vm996_vm3, %v1343_v3 }
 0x454   : > { %3347 = vmatmul.mubr.msk.f32.gmra.mrb[26].mxu1 %vm996_vm3, %v1344_v15  ;;  %v3630_v35 = vpop.eup %3629 }
 0x455   : > { %v1281_v33 = vpop.xlane.xlu1 %1280  ;;  %v1346_v19 = vmul.f32 %v3630_v35, %v4163_v39  ;;  %v1674_v35 = vld [vmem:[%s5551_s6 + $0x8] sm:$0xff] }
 0x456   : > { %3635 = vrcp.f32 %v1281_v33 }
 0x458   : > { %v3632_v54 = vpop.eup %3631 }
 0x459   : > { %v1345_v32 = vmul.f32 %v3632_v54, %v4167_v53  ;;  %v4255_v53 = vld [vmem:[%s5551_s6] sm:$0xff]  ;;  %v1675_v54 = vld [vmem:[%s5551_s6 + $0x10] sm:$0xff] }
 0x45a   : > { %3239 = vmatprep.mubr.msk.f32.mxu0 %vm671_vm2, %v4255_v53 }
 0x45b   : > { %3349 = vmatprep.mubr.msk.f32.mxu1 %vm996_vm3, %v1345_v32  ;;  %v1676_v32 = vld [vmem:[%s5551_s6 + $0x18] sm:$0xff] }
 0x45c   : > { %3350 = vmatmul.mubr.msk.f32.gmra.mrb[28].mxu1 %vm996_vm3, %v1346_v19  ;;  %v3634_v37 = vpop.eup %3633  ;;  %v1677_v19 = vld [vmem:[%s5551_s6 + $0x20] sm:$0xff] }
 0x45d   : > { %v1348_v8 = vmul.f32 %v3634_v37, %v4171_v41  ;;  %v1678_v37 = vld [vmem:[%s5551_s6 + $0x28] sm:$0xff] }
 0x460   : > { %v3636_v21 = vpop.eup %3635 }
 0x461   : > { %v1347_v36 = vmul.f32 %v3636_v21, %v4175_v5  ;;  %v1679_v21 = vld [vmem:[%s5551_s6 + $0x30] sm:$0xff] }
 0x463   : > { %3352 = vmatprep.mubr.msk.f32.mxu1 %vm996_vm3, %v1347_v36  ;;  %v1680_v36 = vld [vmem:[%s5551_s6 + $0x38] sm:$0xff] }
 0x464   : > { %3353 = vmatmul.mubr.msk.f32.gmra.mrb[30].mxu1 %vm996_vm3, %v1348_v8 }
 0x4a1   : > { %v1692_v8 = vpop.permute.xlu1 %1691 }
 0x4c6   : > { %v3309_v39 = vpop.f32.mrb[0].mxu1 }
 0x4c7   : > { %v1514_v42 = vpop.f32.mrb[1].mxu1 }
 0x4c8   : > { %v3406_v16 = vpack.c.bf16 %v3309_v39, %v1514_v42 }
 0x4cb   : > { %v3312_v22 = vpop.f32.mrb[2].mxu1 }
 0x4cc   : > { %v1524_v6 = vpop.f32.mrb[3].mxu1 }
 0x4cd   : > { %v3412_v5 = vpack.c.bf16 %v3312_v22, %v1524_v6 }
 0x4d3   : > { %v3315_v17 = vpop.f32.mrb[4].mxu1 }
 0x4d4   : > { %v1534_v41 = vpop.f32.mrb[5].mxu1 }
 0x4d5   : > { %v3418_v20 = vpack.c.bf16 %v3315_v17, %v1534_v41 }
 0x4db   : > { %v3318_v43 = vpop.f32.mrb[6].mxu1 }
 0x4dc   : > { %v1544_v26 = vpop.f32.mrb[7].mxu1 }
 0x4dd   : > { %v3424_v10 = vpack.c.bf16 %v3318_v43, %v1544_v26 }
 0x4df   : > { %v3321_v59 = vpop.f32.mrb[8].mxu1 }
 0x4e0   : > { %v1554_v29 = vpop.f32.mrb[9].mxu1 }
 0x4e1   : > { %v3430_v45 = vpack.c.bf16 %v3321_v59, %v1554_v29 }
 0x4e7   : > { %v3324_v4 = vpop.f32.mrb[10].mxu1 }
 0x4e8   : > { %v1564_v40 = vpop.f32.mrb[11].mxu1 }
 0x4e9   : > { %v3436_v44 = vpack.c.bf16 %v3324_v4, %v1564_v40 }
 0x4ef   : > { %v3327_v13 = vpop.f32.mrb[12].mxu1 }
 0x4f0   : > { %v1574_v23 = vpop.f32.mrb[13].mxu1 }
 0x4f1   : > { %v3442_v24 = vpack.c.bf16 %v3327_v13, %v1574_v23 }
 0x4f7   : > { %v3330_v52 = vpop.f32.mrb[14].mxu1 }
 0x4f8   : > { %v1584_v48 = vpop.f32.mrb[15].mxu1 }
 0x4f9   : > { %v3448_v46 = vpack.c.bf16 %v3330_v52, %v1584_v48 }
 0x4ff   : > { %v3333_v34 = vpop.f32.mrb[16].mxu1 }
 0x500   : > { %v1594_v7 = vpop.f32.mrb[17].mxu1 }
 0x501   : > { %v3403_v25 = vpack.c.bf16 %v3333_v34, %v1594_v7 }
 0x503   : > { %3405 = vmatprep.subr.msk.bf16.mxu0 %vm4276_vm4, %v3403_v25 }
 0x504   : > { %3408 = vmatpush3.bf16.xpose.msk.msra.mxu0 %vm4276_vm4, %v3406_v16  ;;  %v1697_v16 = vpop.permute.xlu0 %1696 }
 0x507   : > { %v3336_v55 = vpop.f32.mrb[18].mxu1 }
 0x508   : > { %v1604_v57 = vpop.f32.mrb[19].mxu1  ;;  %v1712_v52 = vpop.permute.xlu0 %1711 }
 0x509   : > { %v3409_v9 = vpack.c.bf16 %v3336_v55, %v1604_v57 }
 0x50b   : > { %3411 = vmatprep.subr.msk.bf16.mxu0 %vm4276_vm4, %v3409_v9 }
 0x50c   : > { %3414 = vmatpush3.bf16.xpose.msk.msra.mxu0 %vm4276_vm4, %v3412_v5  ;;  %v1722_v25 = vpop.permute.xlu0 %1721 }
 0x50f   : > { %v3339_v58 = vpop.f32.mrb[20].mxu1 }
 0x510   : > { %v1614_v49 = vpop.f32.mrb[21].mxu1 }
 0x511   : > { %v3415_v61 = vpack.c.bf16 %v3339_v58, %v1614_v49 }
 0x513   : > { %3417 = vmatprep.subr.msk.bf16.mxu0 %vm4276_vm4, %v3415_v61 }
 0x514   : > { %3420 = vmatpush3.bf16.xpose.msk.msra.mxu0 %vm4276_vm4, %v3418_v20 }
 0x517   : > { %v3342_v12 = vpop.f32.mrb[22].mxu1 }
 0x518   : > { %v1624_v60 = vpop.f32.mrb[23].mxu1 }
 0x519   : > { %v3421_v63 = vpack.c.bf16 %v3342_v12, %v1624_v60 }
 0x51b   : > { %3423 = vmatprep.subr.msk.bf16.mxu0 %vm4276_vm4, %v3421_v63 }
 0x51c   : > { %3426 = vmatpush3.bf16.xpose.msk.msra.mxu0 %vm4276_vm4, %v3424_v10 }
 0x51f   : > { %v3345_v28 = vpop.f32.mrb[24].mxu1 }
 0x520   : > { %v1634_v62 = vpop.f32.mrb[25].mxu1 }
 0x521   : > { %v3427_v27 = vpack.c.bf16 %v3345_v28, %v1634_v62  ;;  %v2006_v62 = vlaneseq }
 0x523   : > { %3429 = vmatprep.subr.msk.bf16.mxu0 %vm4276_vm4, %v3427_v27 }
 0x524   : > { %3432 = vmatpush3.bf16.xpose.msk.msra.mxu0 %vm4276_vm4, %v3430_v45 }
 0x527   : > { %v3348_v51 = vpop.f32.mrb[26].mxu1 }
 0x528   : > { %v1644_v0 = vpop.f32.mrb[27].mxu1 }
 0x529   : > { %v3433_v30 = vpack.c.bf16 %v3348_v51, %v1644_v0  ;;  %v4528_v0 = vshrl.u32 %v2006_v62, 7 }
 0x52b   : > { %3435 = vmatprep.subr.msk.bf16.mxu0 %vm4276_vm4, %v3433_v30 }
 0x52c   : > { %3438 = vmatpush3.bf16.xpose.msk.msra.mxu0 %vm4276_vm4, %v3436_v44  ;;  %v1702_v44 = vpop.permute.xlu1 %1701 }
 0x52f   : > { %v3351_v31 = vpop.f32.mrb[28].mxu1 }
 0x530   : > { %v1654_v11 = vpop.f32.mrb[29].mxu1  ;;  %v1707_v50 = vpop.permute.xlu1 %1706 }
 0x531   : > { %v3439_v3 = vpack.c.bf16 %v3351_v31, %v1654_v11  ;;  %v4534_v11 = vand.u32 127, %v2006_v62 }
 0x533   : > { %3441 = vmatprep.subr.msk.bf16.mxu0 %vm4276_vm4, %v3439_v3  ;;  %v2027_v3 = vsub.s32 0, %v4528_v0  ;;  %vm2008_vm5 = vcmp.lt.s32.totalorder %v4534_v11, 17  ;;  %vm2081_vm6 = vcmp.lt.s32.totalorder %v4534_v11, 16  ;;  %vm2154_vm7 = vcmp.lt.s32.totalorder %v4534_v11, 15 }
 0x534   : > { %3444 = vmatpush3.bf16.xpose.msk.msra.mxu0 %vm4276_vm4, %v3442_v24  ;;  %vm2227_vm8 = vcmp.lt.s32.totalorder %v4534_v11, 1  ;;  %vm2300_vm9 = vcmp.lt.s32.totalorder %v4534_v11, 127  ;;  %vm2373_vm10 = vcmp.lt.s32.totalorder %v4534_v11, 113  ;;  %vm2446_vm11 = vcmp.lt.s32.totalorder %v4534_v11, 112 }
 0x535   : > { %vm2519_vm12 = vcmp.lt.s32.totalorder %v4534_v11, 111  ;;  %v3508_v11 = vld [vmem:[%s5553_s8 + $0x38] ss:$20 sps:$4 sm:$0xff]  }
 0x537   : > { %v3354_v1 = vpop.f32.mrb[30].mxu1 }
 0x538   : > { %v1664_v15 = vpop.f32.mrb[31].mxu1 }
 0x539   : > { %v3445_v33 = vpack.c.bf16 %v3354_v1, %v1664_v15  ;;  %v4544_v1 = vld [vmem:[%s5545_s0] sm:$0xff]  ;;  %v4549_v15 = vld [vmem:[%s5545_s0 + $0x8] sm:$0xff] }
 0x53b   : > { %3447 = vmatprep.subr.msk.bf16.mxu0 %vm4276_vm4, %v3445_v33 }
 0x53c   : > { %3450 = vmatpush3.bf16.xpose.msk.msra.mxu0 %vm4276_vm4, %v3448_v46  ;;  %v1717_v46 = vpop.permute.xlu1 %1716 }
 0x540   : > { %v1727_v57 = vpop.permute.xlu1 %1726 }
 0x543   : > { %3240 = vmatmul.mubr.msk.f32.vlgmr.msra.gmra.mrb[38].mxu0 %vm671_vm2, %v4255_v53 }
 0x544   : > { %3241 = vmatprep.mubr.msk.f32.mxu0 %vm671_vm2, %v1674_v35 }
 0x547   : > { %3242 = vmatmul.mubr.msk.f32.gmra.mrb[40].mxu0 %vm671_vm2, %v1674_v35 }
 0x548   : > { %3243 = vmatprep.mubr.msk.f32.mxu0 %vm671_vm2, %v1675_v54 }
 0x54b   : > { %3244 = vmatmul.mubr.msk.f32.gmra.mrb[42].mxu0 %vm671_vm2, %v1675_v54  ;;  %v4555_v54 = vrot.slane %v4544_v1, %v2027_v3 }
 0x54c   : > { %3245 = vmatprep.mubr.msk.f32.mxu0 %vm671_vm2, %v1676_v32 }
 0x54f   : > { %3246 = vmatmul.mubr.msk.f32.gmra.mrb[44].mxu0 %vm671_vm2, %v1676_v32  ;;  %v4558_v32 = vrot.slane %v4549_v15, %v2027_v3  ;;  %v2100_v3 = vsub.s32 1, %v4528_v0 }
 0x550   : > { %3247 = vmatprep.mubr.msk.f32.mxu0 %vm671_vm2, %v1677_v19 }
 0x553   : > { %3248 = vmatmul.mubr.msk.f32.gmra.mrb[46].mxu0 %vm671_vm2, %v1677_v19 }
 0x554   : > { %3249 = vmatprep.mubr.msk.f32.mxu0 %vm671_vm2, %v1678_v37 }
 0x557   : > { %3250 = vmatmul.mubr.msk.f32.gmra.mrb[48].mxu0 %vm671_vm2, %v1678_v37 }
 0x558   : > { %3251 = vmatprep.mubr.msk.f32.mxu0 %vm671_vm2, %v1679_v21 }
 0x55b   : > { %3252 = vmatmul.mubr.msk.f32.gmra.mrb[50].mxu0 %vm671_vm2, %v1679_v21 }
 0x55c   : > { %3253 = vmatprep.mubr.msk.f32.mxu0 %vm671_vm2, %v1680_v36 }
 0x55f   : > { %3254 = vmatmul.mubr.msk.f32.gmra.mrb[52].mxu0 %vm671_vm2, %v1680_v36 }
 0x560   : > { %2826 = vmatprep.mubr.bf16.mxu0 %v5555_v2 }
 0x616   : > { %v1915_v53 = vpop.f32.mrb[38].mxu0 }
 0x617   : > { %v4350_v39 = vadd.f32 %v1915_v53, %v1692_v8  ;;  %v1917_v42 = vpop.f32.mrb[39].mxu0 }
 0x618   : > { %v4372_v18 = vadd.f32 %v1917_v42, %v1692_v8 }
 0x619   : > { %5583 = vst [vmem:[#allocation2_spill] sm:$0xff] %v4350_v39  ;;  %1974 = vrot.lane.b32.xlu0 %v4350_v39, %s3655_s12 }
 0x61a   : > { %v1921_v22 = vpop.f32.mrb[40].mxu0  ;;  %5585 = vst [vmem:[#allocation4_spill] sm:$0xff] %v4372_v18 }
 0x61b   : > { %v4354_v6 = vadd.f32 %v1921_v22, %v1697_v16  ;;  %v1923_v5 = vpop.f32.mrb[41].mxu0 }
 0x61c   : > { %v4378_v38 = vadd.f32 %v1923_v5, %v1697_v16 }
 0x61d   : > { %5584 = vst [vmem:[#allocation3_spill] sm:$0xff] %v4354_v6  ;;  %2049 = vrot.lane.b32.xlu0 %v4350_v39, %s3656_s14  ;;  %1976 = vrot.lane.b32.xlu1 %v4354_v6, %s3655_s12 }
 0x61e   : > { %v1927_v17 = vpop.f32.mrb[42].mxu0  ;;  %5586 = vst [vmem:[#allocation5_spill] sm:$0xff] %v4378_v38 }
 0x61f   : > { %v1929_v41 = vpop.f32.mrb[43].mxu0  ;;  %v4400_v47 = vadd.f32 %v1927_v17, %v1702_v44 }
 0x620   : > { %v4420_v23 = vadd.f32 %v1929_v41, %v1702_v44 }
 0x621   : > { %2122 = vrot.lane.b32.xlu0 %v4350_v39, %s3657_s15  ;;  %2051 = vrot.lane.b32.xlu1 %v4354_v6, %s3656_s14  ;;  %5587 = vst [vmem:[#allocation6_spill] sm:$0xff] %v4400_v47 }
 0x622   : > { %v1933_v20 = vpop.f32.mrb[44].mxu0  ;;  %5589 = vst [vmem:[#allocation8_spill] sm:$0xff] %v4420_v23 }
 0x623   : > { %v1935_v43 = vpop.f32.mrb[45].mxu0  ;;  %v4406_v13 = vadd.f32 %v1933_v20, %v1707_v50 }
 0x624   : > { %v4426_v24 = vadd.f32 %v1935_v43, %v1707_v50 }
 0x625   : > { %2195 = vrot.lane.b32.xlu0 %v4350_v39, %s3658_s16  ;;  %2124 = vrot.lane.b32.xlu1 %v4354_v6, %s3657_s15  ;;  %5588 = vst [vmem:[#allocation7_spill] sm:$0xff] %v4406_v13 }
 0x626   : > { %v1939_v26 = vpop.f32.mrb[46].mxu0 }
 0x627   : > { %v1941_v10 = vpop.f32.mrb[47].mxu0  ;;  %v4440_v48 = vadd.f32 %v1939_v26, %v1712_v52 }
 0x628   : > { %v4460_v7 = vadd.f32 %v1941_v10, %v1712_v52 }
 0x629   : > { %2268 = vrot.lane.b32.xlu0 %v4350_v39, %s3659_s17  ;;  %2197 = vrot.lane.b32.xlu1 %v4354_v6, %s3658_s16 }
 0x62a   : > { %v1945_v59 = vpop.f32.mrb[48].mxu0 }
 0x62b   : > { %v1947_v29 = vpop.f32.mrb[49].mxu0  ;;  %v4446_v34 = vadd.f32 %v1945_v59, %v1717_v46 }
 0x62c   : > { %v4466_v56 = vadd.f32 %v1947_v29, %v1717_v46 }
 0x62d   : > { %1990 = vrot.lane.b32.xlu0 %v4372_v18, %s3655_s12  ;;  %2270 = vrot.lane.b32.xlu1 %v4354_v6, %s3659_s17 }
 0x62e   : > { %v1951_v45 = vpop.f32.mrb[50].mxu0 }
 0x62f   : > { %v4380_v14 = vpop.f32.mrb[51].mxu0  ;;  %v4480_v55 = vadd.f32 %v1951_v45, %v1722_v25 }
 0x630   : > { %v4501_v49 = vadd.f32 %v4380_v14, %v1722_v25  ;;  %v3497_v25 = vld [vmem:[%s5553_s8 + $0x4] ss:$20 sps:$4 sm:$0xff]  }
 0x631   : > { %2065 = vrot.lane.b32.xlu0 %v4372_v18, %s3656_s14  ;;  %1992 = vrot.lane.b32.xlu1 %v4378_v38, %s3655_s12 }
 0x632   : > { %v1957_v4 = vpop.f32.mrb[52].mxu0  ;;  %2720 = vmatprep.mubr.bf16.mxu1 %v3497_v25 }
 0x633   : > { %v4386_v40 = vpop.f32.mrb[53].mxu0  ;;  %v4486_v9 = vadd.f32 %v1957_v4, %v1727_v57 }
 0x634   : > { %v4510_v60 = vadd.f32 %v4386_v40, %v1727_v57 }
 0x635   : > { %2138 = vrot.lane.b32.xlu0 %v4372_v18, %s3657_s15  ;;  %2067 = vrot.lane.b32.xlu1 %v4378_v38, %s3656_s14 }
 0x639   : > { %2211 = vrot.lane.b32.xlu0 %v4372_v18, %s3658_s16  ;;  %2140 = vrot.lane.b32.xlu1 %v4378_v38, %s3657_s15 }
 0x63d   : > { %2284 = vrot.lane.b32.xlu0 %v4372_v18, %s3659_s17  ;;  %2213 = vrot.lane.b32.xlu1 %v4378_v38, %s3658_s16 }
 0x641   : > { %1978 = vrot.lane.b32.xlu0 %v4400_v47, %s3655_s12  ;;  %2286 = vrot.lane.b32.xlu1 %v4378_v38, %s3659_s17 }
 0x645   : > { %2053 = vrot.lane.b32.xlu0 %v4400_v47, %s3656_s14  ;;  %1980 = vrot.lane.b32.xlu1 %v4406_v13, %s3655_s12 }
 0x649   : > { %2126 = vrot.lane.b32.xlu0 %v4400_v47, %s3657_s15  ;;  %2055 = vrot.lane.b32.xlu1 %v4406_v13, %s3656_s14 }
 0x64d   : > { %2199 = vrot.lane.b32.xlu0 %v4400_v47, %s3658_s16  ;;  %2128 = vrot.lane.b32.xlu1 %v4406_v13, %s3657_s15 }
 0x651   : > { %1994 = vrot.lane.b32.xlu0 %v4420_v23, %s3655_s12  ;;  %2201 = vrot.lane.b32.xlu1 %v4406_v13, %s3658_s16 }
 0x655   : > { %2069 = vrot.lane.b32.xlu0 %v4420_v23, %s3656_s14  ;;  %1996 = vrot.lane.b32.xlu1 %v4426_v24, %s3655_s12 }
 0x659   : > { %2142 = vrot.lane.b32.xlu0 %v4420_v23, %s3657_s15  ;;  %2071 = vrot.lane.b32.xlu1 %v4426_v24, %s3656_s14 }
 0x65d   : > { %2215 = vrot.lane.b32.xlu0 %v4420_v23, %s3658_s16  ;;  %2144 = vrot.lane.b32.xlu1 %v4426_v24, %s3657_s15 }
 0x661   : > { %2217 = vrot.lane.b32.xlu1 %v4426_v24, %s3658_s16  ;;  %1982 = vrot.lane.b32.xlu0 %v4440_v48, %s3655_s12 }
 0x665   : > { %1984 = vrot.lane.b32.xlu1 %v4446_v34, %s3655_s12  ;;  %2057 = vrot.lane.b32.xlu0 %v4440_v48, %s3656_s14 }
 0x669   : > { %2059 = vrot.lane.b32.xlu1 %v4446_v34, %s3656_s14  ;;  %2130 = vrot.lane.b32.xlu0 %v4440_v48, %s3657_s15 }
 0x66d   : > { %2132 = vrot.lane.b32.xlu1 %v4446_v34, %s3657_s15  ;;  %2203 = vrot.lane.b32.xlu0 %v4440_v48, %s3658_s16 }
 0x671   : > { %2205 = vrot.lane.b32.xlu1 %v4446_v34, %s3658_s16  ;;  %1998 = vrot.lane.b32.xlu0 %v4460_v7, %s3655_s12 }
 0x675   : > { %2000 = vrot.lane.b32.xlu1 %v4466_v56, %s3655_s12  ;;  %2073 = vrot.lane.b32.xlu0 %v4460_v7, %s3656_s14 }
 0x679   : > { %2075 = vrot.lane.b32.xlu1 %v4466_v56, %s3656_s14  ;;  %2146 = vrot.lane.b32.xlu0 %v4460_v7, %s3657_s15 }
 0x67d   : > { %2148 = vrot.lane.b32.xlu1 %v4466_v56, %s3657_s15  ;;  %2219 = vrot.lane.b32.xlu0 %v4460_v7, %s3658_s16 }
 0x681   : > { %2221 = vrot.lane.b32.xlu1 %v4466_v56, %s3658_s16  ;;  %1986 = vrot.lane.b32.xlu0 %v4480_v55, %s3655_s12 }
 0x685   : > { %1988 = vrot.lane.b32.xlu1 %v4486_v9, %s3655_s12  ;;  %2061 = vrot.lane.b32.xlu0 %v4480_v55, %s3656_s14 }
 0x689   : > { %2063 = vrot.lane.b32.xlu1 %v4486_v9, %s3656_s14  ;;  %2134 = vrot.lane.b32.xlu0 %v4480_v55, %s3657_s15 }
 0x68b   : > { %v1975_v58 = vpop.permute.xlu0 %1974 }
 0x68d   : > { %2136 = vrot.lane.b32.xlu1 %v4486_v9, %s3657_s15  ;;  %2207 = vrot.lane.b32.xlu0 %v4480_v55, %s3658_s16 }
 0x68f   : > { %v1977_v61 = vpop.permute.xlu1 %1976  ;;  %v4503_v12 = vpop.permute.xlu0 %2049 }
 0x691   : > { %2209 = vrot.lane.b32.xlu1 %v4486_v9, %s3658_s16  ;;  %2002 = vrot.lane.b32.xlu0 %v4501_v49, %s3655_s12 }
 0x693   : > { %v4512_v63 = vpop.permute.xlu1 %2051  ;;  %v4514_v28 = vpop.permute.xlu0 %2122 }
 0x695   : > { %2004 = vrot.lane.b32.xlu1 %v4510_v60, %s3655_s12  ;;  %2272 = vrot.lane.b32.xlu0 %v4400_v47, %s3659_s17 }
 0x697   : > { %v4520_v27 = vpop.permute.xlu1 %2124  ;;  %v4522_v51 = vpop.permute.xlu0 %2195 }
 0x698   : > { %5590 = vst [vmem:[#allocation9_spill] sm:$0xff] %v4522_v51 }
 0x699   : > { %2274 = vrot.lane.b32.xlu1 %v4406_v13, %s3659_s17  ;;  %2077 = vrot.lane.b32.xlu0 %v4501_v49, %s3656_s14 }
 0x69b   : > { %v4530_v30 = vpop.permute.xlu1 %2197  ;;  %v4532_v31 = vpop.permute.xlu0 %2268 }
 0x69c   : > { %5591 = vst [vmem:[#allocation10_spill] sm:$0xff] %v4530_v30  ;;  %5592 = vst [vmem:[#allocation11_spill] sm:$0xff] %v4532_v31 }
 0x69d   : > { %2290 = vrot.lane.b32.xlu1 %v4426_v24, %s3659_s17  ;;  %2150 = vrot.lane.b32.xlu0 %v4501_v49, %s3657_s15 }
 0x69f   : > { %v4551_v33 = vpop.permute.xlu1 %2270  ;;  %v1991_v35 = vpop.permute.xlu0 %1990 }
 0x6a0   : > { %5593 = vst [vmem:[#allocation12_spill] sm:$0xff] %v4551_v33  ;;  %v2009_v19 = vsel %vm2008_vm5, %v1975_v58, %v1991_v35  ;;  %v2017_v37 = vsel %vm2008_vm5, %v1991_v35, %v1975_v58 }
 0x6a1   : > { %2278 = vrot.lane.b32.xlu1 %v4446_v34, %s3659_s17  ;;  %2223 = vrot.lane.b32.xlu0 %v4501_v49, %s3658_s16  ;;  %v2033_v42 = vmul.f32 %v4555_v54, %v2017_v37  ;;  %v2034_v16 = vmul.f32 %v4558_v32, %v2009_v19 }
 0x6a3   : > { %v1993_v21 = vpop.permute.xlu1 %1992  ;;  %v4568_v36 = vpop.permute.xlu0 %2065 }
 0x6a4   : > { %v2010_v8 = vsel %vm2008_vm5, %v1977_v61, %v1993_v21  ;;  %v2018_v53 = vsel %vm2008_vm5, %v1993_v21, %v1977_v61 }
 0x6a5   : > { %v2035_v22 = vmul.f32 %v4555_v54, %v2018_v53  ;;  %v2036_v5 = vmul.f32 %v4558_v32, %v2010_v8  ;;  %2079 = vrot.lane.b32.xlu1 %v4510_v60, %s3656_s14  ;;  %2288 = vrot.lane.b32.xlu0 %v4420_v23, %s3659_s17 }
 0x6a7   : > { %v2560_v17 = vpack.c.bf16 %v2035_v22, %v2033_v42  ;;  %v4582_v41 = vpop.permute.xlu1 %2067  ;;  %v4584_v20 = vpop.permute.xlu0 %2138  ;;  %v2561_v43 = vpack.c.bf16 %v2036_v5, %v2034_v16  ;;  %v2173_v22 = vsub.s32 2, %v4528_v0 }
 0x6a9   : > { %2294 = vrot.lane.b32.xlu1 %v4466_v56, %s3659_s17  ;;  %2276 = vrot.lane.b32.xlu0 %v4440_v48, %s3659_s17 }
 0x6aa   : > { %2688 = vmatprep.subr.bf16.mxu1 %v2561_v43  ;;  %v4657_v43 = vrot.slane %v4544_v1, %v2100_v3 }
 0x6ab   : > { %2689 = vmatpush1.bf16.msra.mxu1 %v2560_v17  ;;  %v4590_v26 = vpop.permute.xlu1 %2140  ;;  %v4592_v10 = vpop.permute.xlu0 %2211 }
 0x6ac   : > { %5594 = vst [vmem:[#allocation13_spill] sm:$0xff] %v4592_v10 }
 0x6ad   : > { %2282 = vrot.lane.b32.xlu1 %v4486_v9, %s3659_s17  ;;  %2292 = vrot.lane.b32.xlu0 %v4460_v7, %s3659_s17 }
 0x6af   : > { %v4598_v59 = vpop.permute.xlu1 %2213  ;;  %v4600_v29 = vpop.permute.xlu0 %2284 }
 0x6b0   : > { %5595 = vst [vmem:[#allocation14_spill] sm:$0xff] %v4600_v29 }
 0x6b1   : > { %2343 = vrot.lane.b32.xlu1 %v4354_v6, %s3660_s23  ;;  %2280 = vrot.lane.b32.xlu0 %v4480_v55, %s3659_s17 }
 0x6b3   : > { %v4606_v45 = vpop.permute.xlu1 %2286  ;;  %v1979_v14 = vpop.permute.xlu0 %1978 }
 0x6b4   : > { %5596 = vst [vmem:[#allocation15_spill] sm:$0xff] %v4606_v45 }
 0x6b5   : > { %2152 = vrot.lane.b32.xlu1 %v4510_v60, %s3657_s15  ;;  %2296 = vrot.lane.b32.xlu0 %v4501_v49, %s3659_s17  ;;  %s5524_s15 = scalar_lea.vmem %s5554_s9, %s3725_s13 }
 0x6b7   : > { %v1981_v4 = vpop.permute.xlu1 %1980  ;;  %v2054_v40 = vpop.permute.xlu0 %2053 }
 0x6b9   : > { %2359 = vrot.lane.b32.xlu1 %v4378_v38, %s3660_s23  ;;  %2341 = vrot.lane.b32.xlu0 %v4350_v39, %s3660_s23 }
 0x6bb   : > { %v2056_v44 = vpop.permute.xlu1 %2055  ;;  %v2127_v50 = vpop.permute.xlu0 %2126 }
 0x6bd   : > { %2347 = vrot.lane.b32.xlu1 %v4406_v13, %s3660_s23  ;;  %2357 = vrot.lane.b32.xlu0 %v4372_v18, %s3660_s23 }
 0x6bf   : > { %v2129_v52 = vpop.permute.xlu1 %2128  ;;  %v2200_v46 = vpop.permute.xlu0 %2199 }
 0x6c1   : > { %2363 = vrot.lane.b32.xlu1 %v4426_v24, %s3660_s23  ;;  %2345 = vrot.lane.b32.xlu0 %v4400_v47, %s3660_s23 }
 0x6c3   : > { %v4627_v57 = vpop.permute.xlu1 %2201  ;;  %v1995_v58 = vpop.permute.xlu0 %1994 }
 0x6c4   : > { %v2011_v61 = vsel %vm2008_vm5, %v1979_v14, %v1995_v58  ;;  %v2019_v62 = vsel %vm2008_vm5, %v1995_v58, %v1979_v14  ;;  %v4660_v14 = vrot.slane %v4549_v15, %v2100_v3 }
 0x6c5   : > { %2225 = vrot.lane.b32.xlu1 %v4510_v60, %s3658_s16  ;;  %2361 = vrot.lane.b32.xlu0 %v4420_v23, %s3660_s23  ;;  %v2037_v8 = vmul.f32 %v4555_v54, %v2019_v62  ;;  %v2038_v53 = vmul.f32 %v4558_v32, %v2011_v61 }
 0x6c7   : > { %v1997_v35 = vpop.permute.xlu1 %1996  ;;  %v2070_v19 = vpop.permute.xlu0 %2069 }
 0x6c8   : > { %v2012_v37 = vsel %vm2008_vm5, %v1981_v4, %v1997_v35  ;;  %v2020_v21 = vsel %vm2008_vm5, %v1997_v35, %v1981_v4  ;;  %v2084_v5 = vsel %vm2081_vm6, %v2054_v40, %v2070_v19  ;;  %v2092_v17 = vsel %vm2081_vm6, %v2070_v19, %v2054_v40 }
 0x6c9   : > { %v2039_v42 = vmul.f32 %v4555_v54, %v2020_v21  ;;  %v2040_v16 = vmul.f32 %v4558_v32, %v2012_v37  ;;  %2351 = vrot.lane.b32.xlu1 %v4446_v34, %s3660_s23  ;;  %2349 = vrot.lane.b32.xlu0 %v4440_v48, %s3660_s23  ;;  %v4668_v35 = vmul.f32 %v4657_v43, %v2092_v17 }
 0x6ca   : > { %v4671_v19 = vmul.f32 %v4660_v14, %v2084_v5  ;;  %v4682_v21 = vrot.slane %v4544_v1, %v2173_v22 }
 0x6cb   : > { %v2562_v4 = vpack.c.bf16 %v2039_v42, %v2037_v8  ;;  %v2072_v25 = vpop.permute.xlu1 %2071  ;;  %v2143_v58 = vpop.permute.xlu0 %2142  ;;  %v2563_v61 = vpack.c.bf16 %v2040_v16, %v2038_v53  ;;  %v4691_v53 = vrot.slane %v4549_v15, %v2173_v22  ;;  %v2246_v42 = vsub.s32 3, %v4528_v0 }
 0x6cc   : > { %v2085_v62 = vsel %vm2081_vm6, %v2056_v44, %v2072_v25  ;;  %v2093_v40 = vsel %vm2081_vm6, %v2072_v25, %v2056_v44  ;;  %v2157_v44 = vsel %vm2154_vm7, %v2127_v50, %v2143_v58  ;;  %v2165_v8 = vsel %vm2154_vm7, %v2143_v58, %v2127_v50 }
 0x6cd   : > { %v4674_v3 = vmul.f32 %v4657_v43, %v2093_v40  ;;  %v4677_v37 = vmul.f32 %v4660_v14, %v2085_v62  ;;  %2367 = vrot.lane.b32.xlu1 %v4466_v56, %s3660_s23  ;;  %2365 = vrot.lane.b32.xlu0 %v4460_v7, %s3660_s23  ;;  %v4704_v58 = vmul.f32 %v4682_v21, %v2165_v8 }
 0x6ce   : > { %2690 = vmatprep.subr.bf16.mxu1 %v2563_v61  ;;  %v4707_v61 = vmul.f32 %v4691_v53, %v2157_v44  ;;  %v4724_v44 = vrot.slane %v4544_v1, %v2246_v42  ;;  %v4727_v8 = vrot.slane %v4549_v15, %v2246_v42 }
 0x6cf   : > { %2691 = vmatpush1.bf16.msra.mxu1 %v2562_v4  ;;  %v2145_v5 = vpop.permute.xlu1 %2144  ;;  %v2216_v17 = vpop.permute.xlu0 %2215  ;;  %5597 = vst [vmem:[#allocation16_spill] sm:$0xff] %v4704_v58 }
 0x6d0   : > { %v2158_v50 = vsel %vm2154_vm7, %v2129_v52, %v2145_v5  ;;  %v2166_v22 = vsel %vm2154_vm7, %v2145_v5, %v2129_v52  ;;  %v2230_v40 = vsel %vm2227_vm8, %v2200_v46, %v2216_v17  ;;  %v2238_v52 = vsel %vm2227_vm8, %v2216_v17, %v2200_v46 }
 0x6d1   : > { %v4710_v4 = vmul.f32 %v4682_v21, %v2166_v22  ;;  %v4713_v62 = vmul.f32 %v4691_v53, %v2158_v50  ;;  %2355 = vrot.lane.b32.xlu1 %v4486_v9, %s3660_s23  ;;  %2353 = vrot.lane.b32.xlu0 %v4480_v55, %s3660_s23  ;;  %v4740_v16 = vmul.f32 %v4724_v44, %v2238_v52 }
 0x6d2   : > { %v4743_v42 = vmul.f32 %v4727_v8, %v2230_v40 }
 0x6d3   : > { %5598 = vst [vmem:[#allocation17_spill] sm:$0xff] %v4710_v4  ;;  %v2218_v50 = vpop.permute.xlu1 %2217  ;;  %v1983_v22 = vpop.permute.xlu0 %1982  ;;  %5599 = vst [vmem:[#allocation18_spill] sm:$0xff] %v4740_v16 }
 0x6d4   : > { %v2231_v46 = vsel %vm2227_vm8, %v4627_v57, %v2218_v50  ;;  %v2239_v17 = vsel %vm2227_vm8, %v2218_v50, %v4627_v57  ;;  %5600 = vst [vmem:[#allocation19_spill] sm:$0xff] %v4743_v42 }
 0x6d5   : > { %v4746_v5 = vmul.f32 %v4724_v44, %v2239_v17  ;;  %v4749_v25 = vmul.f32 %v4727_v8, %v2231_v46  ;;  %2416 = vrot.lane.b32.xlu1 %v4354_v6, %s3661_s26  ;;  %2369 = vrot.lane.b32.xlu0 %v4501_v49, %s3660_s23 }
 0x6d7   : > { %5601 = vst [vmem:[#allocation20_spill] sm:$0xff] %v4746_v5  ;;  %5602 = vst [vmem:[#allocation21_spill] sm:$0xff] %v4749_v25  ;;  %v1985_v52 = vpop.permute.xlu1 %1984  ;;  %v4757_v50 = vpop.permute.xlu0 %2057 }
 0x6d9   : > { %2432 = vrot.lane.b32.xlu1 %v4378_v38, %s3661_s26  ;;  %2414 = vrot.lane.b32.xlu0 %v4350_v39, %s3661_s26 }
 0x6db   : > { %v4765_v46 = vpop.permute.xlu1 %2059  ;;  %v2131_v17 = vpop.permute.xlu0 %2130 }
 0x6dd   : > { %2420 = vrot.lane.b32.xlu1 %v4406_v13, %s3661_s26  ;;  %2430 = vrot.lane.b32.xlu0 %v4372_v18, %s3661_s26 }
 0x6df   : > { %v2133_v57 = vpop.permute.xlu1 %2132  ;;  %v2204_v2 = vpop.permute.xlu0 %2203 }
 0x6e1   : > { %2436 = vrot.lane.b32.xlu1 %v4426_v24, %s3661_s26  ;;  %2418 = vrot.lane.b32.xlu0 %v4400_v47, %s3661_s26 }
 0x6e3   : > { %v2206_v40 = vpop.permute.xlu1 %2205  ;;  %v1999_v29 = vpop.permute.xlu0 %1998 }
 0x6e4   : > { %v2013_v31 = vsel %vm2008_vm5, %v1983_v22, %v1999_v29  ;;  %v2021_v45 = vsel %vm2008_vm5, %v1999_v29, %v1983_v22 }
 0x6e5   : > { %2298 = vrot.lane.b32.xlu1 %v4510_v60, %s3659_s17  ;;  %2434 = vrot.lane.b32.xlu0 %v4420_v23, %s3661_s26  ;;  %v2041_v25 = vmul.f32 %v4555_v54, %v2021_v45  ;;  %v2042_v51 = vmul.f32 %v4558_v32, %v2013_v31 }
 0x6e7   : > { %v2001_v33 = vpop.permute.xlu1 %2000  ;;  %v4783_v16 = vpop.permute.xlu0 %2073 }
 0x6e8   : > { %v2014_v5 = vsel %vm2008_vm5, %v1985_v52, %v2001_v33  ;;  %v2022_v42 = vsel %vm2008_vm5, %v2001_v33, %v1985_v52 }
 0x6e9   : > { %v2043_v10 = vmul.f32 %v4555_v54, %v2022_v42  ;;  %v2044_v29 = vmul.f32 %v4558_v32, %v2014_v5  ;;  %2424 = vrot.lane.b32.xlu1 %v4446_v34, %s3661_s26  ;;  %2422 = vrot.lane.b32.xlu0 %v4440_v48, %s3661_s26 }
 0x6eb   : > { %v2564_v22 = vpack.c.bf16 %v2043_v10, %v2041_v25  ;;  %v4797_v58 = vpop.permute.xlu1 %2075  ;;  %v2147_v4 = vpop.permute.xlu0 %2146  ;;  %v2565_v30 = vpack.c.bf16 %v2044_v29, %v2042_v51 }
 0x6ec   : > { %v2159_v31 = vsel %vm2154_vm7, %v2131_v17, %v2147_v4  ;;  %v2167_v33 = vsel %vm2154_vm7, %v2147_v4, %v2131_v17 }
 0x6ed   : > { %2440 = vrot.lane.b32.xlu1 %v4466_v56, %s3661_s26  ;;  %2438 = vrot.lane.b32.xlu0 %v4460_v7, %s3661_s26  ;;  %v4816_v4 = vmul.f32 %v4682_v21, %v2167_v33 }
 0x6ee   : > { %2692 = vmatprep.subr.bf16.mxu1 %v2565_v30  ;;  %v4819_v30 = vmul.f32 %v4691_v53, %v2159_v31 }
 0x6ef   : > { %2693 = vmatpush1.bf16.msra.mxu1 %v2564_v22  ;;  %v2149_v45 = vpop.permute.xlu1 %2148  ;;  %v2220_v10 = vpop.permute.xlu0 %2219 }
 0x6f0   : > { %v2160_v25 = vsel %vm2154_vm7, %v2133_v57, %v2149_v45  ;;  %v2168_v51 = vsel %vm2154_vm7, %v2149_v45, %v2133_v57  ;;  %v2232_v5 = vsel %vm2227_vm8, %v2204_v2, %v2220_v10  ;;  %v2240_v42 = vsel %vm2227_vm8, %v2220_v10, %v2204_v2 }
 0x6f1   : > { %v4822_v52 = vmul.f32 %v4682_v21, %v2168_v51  ;;  %v4825_v17 = vmul.f32 %v4691_v53, %v2160_v25  ;;  %2428 = vrot.lane.b32.xlu1 %v4486_v9, %s3661_s26  ;;  %2426 = vrot.lane.b32.xlu0 %v4480_v55, %s3661_s26  ;;  %v4840_v45 = vmul.f32 %v4724_v44, %v2240_v42 }
 0x6f2   : > { %v4843_v10 = vmul.f32 %v4727_v8, %v2232_v5 }
 0x6f3   : > { %v2222_v57 = vpop.permute.xlu1 %2221  ;;  %v1987_v29 = vpop.permute.xlu0 %1986  ;;  %5603 = vst [vmem:[#allocation22_spill] sm:$0xff] %v4840_v45  ;;  %v2091_v45 = vsel %vm2081_vm6, %v4582_v41, %v4512_v63 }
 0x6f4   : > { %v2233_v31 = vsel %vm2227_vm8, %v2206_v40, %v2222_v57  ;;  %v2241_v33 = vsel %vm2227_vm8, %v2222_v57, %v2206_v40  ;;  %5604 = vst [vmem:[#allocation23_spill] sm:$0xff] %v4843_v10 }
 0x6f5   : > { %v4846_v25 = vmul.f32 %v4724_v44, %v2241_v33  ;;  %v4849_v51 = vmul.f32 %v4727_v8, %v2233_v31  ;;  %2371 = vrot.lane.b32.xlu1 %v4510_v60, %s3660_s23  ;;  %2442 = vrot.lane.b32.xlu0 %v4501_v49, %s3661_s26 }
 0x6f7   : > { %5605 = vst [vmem:[#allocation24_spill] sm:$0xff] %v4846_v25  ;;  %5606 = vst [vmem:[#allocation25_spill] sm:$0xff] %v4849_v51  ;;  %v1989_v42 = vpop.permute.xlu1 %1988  ;;  %v4857_v57 = vpop.permute.xlu0 %2061 }
 0x6f9   : > { %2489 = vrot.lane.b32.xlu1 %v4354_v6, %s3662_s27  ;;  %2487 = vrot.lane.b32.xlu0 %v4350_v39, %s3662_s27  ;;  %v2083_v6 = vsel %vm2081_vm6, %v4512_v63, %v4582_v41 }
 0x6fa   : > { %v2109_v25 = vmul.f32 %v4660_v14, %v2083_v6  ;;  %v2090_v6 = vsel %vm2081_vm6, %v4568_v36, %v4503_v12 }
 0x6fb   : > { %v4865_v31 = vpop.permute.xlu1 %2063  ;;  %v4867_v33 = vpop.permute.xlu0 %2134 }
 0x6fd   : > { %2505 = vrot.lane.b32.xlu1 %v4378_v38, %s3662_s27  ;;  %2503 = vrot.lane.b32.xlu0 %v4372_v18, %s3662_s27 }
 0x6ff   : > { %v4873_v40 = vpop.permute.xlu1 %2136  ;;  %v4875_v5 = vpop.permute.xlu0 %2207 }
 0x701   : > { %2493 = vrot.lane.b32.xlu1 %v4406_v13, %s3662_s27  ;;  %2491 = vrot.lane.b32.xlu0 %v4400_v47, %s3662_s27  ;;  %v2082_v47 = vsel %vm2081_vm6, %v4503_v12, %v4568_v36  ;;  %v2087_v12 = vsel %vm2081_vm6, %v4765_v46, %v4797_v58 }
 0x703   : > { %v4881_v2 = vpop.permute.xlu1 %2209  ;;  %v2003_v22 = vpop.permute.xlu0 %2002 }
 0x704   : > { %5607 = vst [vmem:[#allocation26_spill] sm:$0xff] %v4881_v2  ;;  %v2015_v39 = vsel %vm2008_vm5, %v1987_v29, %v2003_v22  ;;  %v2023_v13 = vsel %vm2008_vm5, %v2003_v22, %v1987_v29 }
 0x705   : > { %2444 = vrot.lane.b32.xlu1 %v4510_v60, %s3661_s26  ;;  %2507 = vrot.lane.b32.xlu0 %v4420_v23, %s3662_s27  ;;  %v2045_v23 = vmul.f32 %v4555_v54, %v2023_v13  ;;  %v2046_v2 = vmul.f32 %v4558_v32, %v2015_v39 }
 0x707   : > { %v2005_v38 = vpop.permute.xlu1 %2004  ;;  %v4899_v18 = vpop.permute.xlu0 %2272 }
 0x708   : > { %v2016_v29 = vsel %vm2008_vm5, %v1989_v42, %v2005_v38  ;;  %v2024_v22 = vsel %vm2008_vm5, %v2005_v38, %v1989_v42  ;;  %v2107_v38 = vmul.f32 %v4660_v14, %v2082_v47  ;;  %v2106_v42 = vmul.f32 %v4657_v43, %v2090_v6 }
 0x709   : > { %v2047_v10 = vmul.f32 %v4555_v54, %v2024_v22  ;;  %v2048_v51 = vmul.f32 %v4558_v32, %v2016_v29  ;;  %2509 = vrot.lane.b32.xlu1 %v4426_v24, %s3662_s27  ;;  %2495 = vrot.lane.b32.xlu0 %v4440_v48, %s3662_s27  ;;  %v2108_v54 = vmul.f32 %v4657_v43, %v2091_v45 }
 0x70a   : > { %v2569_v32 = vpack.c.bf16 %v2109_v25, %v2107_v38  ;;  %v2095_v45 = vsel %vm2081_vm6, %v4797_v58, %v4765_v46  ;;  %v2117_v25 = vmul.f32 %v4660_v14, %v2087_v12  ;;  %v2094_v29 = vsel %vm2081_vm6, %v4783_v16, %v4757_v50 }
 0x70b   : > { %v2566_v13 = vpack.c.bf16 %v2047_v10, %v2045_v23  ;;  %v2275_v63 = vpop.permute.xlu1 %2274  ;;  %v2078_v39 = vpop.permute.xlu0 %2077  ;;  %v2567_v41 = vpack.c.bf16 %v2048_v51, %v2046_v2  ;;  %v2568_v36 = vpack.c.bf16 %v2108_v54, %v2106_v42  ;;  %v2086_v2 = vsel %vm2081_vm6, %v4757_v50, %v4783_v16 }
 0x70c   : > { %v2319_v51 = vsub.s32 5, %v4528_v0  ;;  %v2115_v58 = vmul.f32 %v4660_v14, %v2086_v2  ;;  %v2116_v46 = vmul.f32 %v4657_v43, %v2095_v45  ;;  %v5608_v6 = vpack.c.bf16 %v4677_v37, %v4671_v19 }
 0x70d   : > { %2497 = vrot.lane.b32.xlu1 %v4446_v34, %s3662_s27  ;;  %2694 = vmatprep.subr.bf16.mxu1 %v2567_v41  ;;  %v2156_v16 = vsel %vm2154_vm7, %v4520_v27, %v4590_v26  ;;  %v2114_v50 = vmul.f32 %v4657_v43, %v2094_v29  ;;  %v2096_v41 = vsel %vm2081_vm6, %v2078_v39, %v4857_v57 }
 0x70e   : > { %2511 = vrot.lane.b32.xlu0 %v4460_v7, %s3662_s27  ;;  %2695 = vmatpush1.bf16.msra.mxu1 %v2566_v13  ;;  %v2088_v13 = vsel %vm2081_vm6, %v4857_v57, %v2078_v39  ;;  %v2573_v19 = vpack.c.bf16 %v2117_v25, %v2115_v58  ;;  %v2155_v37 = vsel %vm2154_vm7, %v4514_v28, %v4584_v20 }
 0x70f   : > { %v2291_v47 = vpop.permute.xlu1 %2290  ;;  %2696 = vmatprep.subr.bf16.mxu1 %v2569_v32  ;;  %v4934_v23 = vpop.permute.xlu0 %2150  ;;  %v4983_v54 = vrot.slane %v4544_v1, %v2319_v51  ;;  %v4986_v32 = vrot.slane %v4549_v15, %v2319_v51  ;;  %v5609_v57 = vpack.c.bf16 %v4674_v3, %v4668_v35  ;;  %v2164_v39 = vsel %vm2154_vm7, %v4590_v26, %v4520_v27 }
 0x710   : > { %v2304_v10 = vsel %vm2300_vm9, %v2275_v63, %v2291_v47  ;;  %v2182_v42 = vmul.f32 %v4691_v53, %v2156_v16  ;;  %v2572_v12 = vpack.c.bf16 %v2116_v46, %v2114_v50  ;;  %v2118_v45 = vmul.f32 %v4657_v43, %v2096_v41 }
 0x711   : > { %2513 = vrot.lane.b32.xlu1 %v4466_v56, %s3662_s27  ;;  %v2119_v25 = vmul.f32 %v4660_v14, %v2088_v13  ;;  %v5019_v29 = vmul.f32 %v4983_v54, %v2304_v10  ;;  %v2180_v58 = vmul.f32 %v4691_v53, %v2155_v37  ;;  %v2181_v16 = vmul.f32 %v4682_v21, %v2164_v39 }
 0x712   : > { %2499 = vrot.lane.b32.xlu0 %v4480_v55, %s3662_s27  ;;  %2697 = vmatpush1.bf16.msra.mxu1 %v2568_v36  ;;  %v2312_v36 = vsel %vm2300_vm9, %v2291_v47, %v2275_v63 }
 0x713   : > { %v4958_v22 = vpop.permute.xlu1 %2278  ;;  %2698 = vmatprep.subr.bf16.mxu1 %v5608_v6  ;;  %v4963_v38 = vpop.permute.xlu0 %2223 }
 0x715   : > { %2501 = vrot.lane.b32.xlu1 %v4486_v9, %s3662_s27 }
 0x716   : > { %2515 = vrot.lane.b32.xlu0 %v4501_v49, %s3662_s27  ;;  %2699 = vmatpush1.bf16.msra.mxu1 %v5609_v57 }
 0x717   : > { %v2080_v2 = vpop.permute.xlu1 %2079  ;;  %2700 = vmatprep.subr.bf16.mxu1 %v2573_v19  ;;  %v2289_v26 = vpop.permute.xlu0 %2288  ;;  %v2577_v19 = vpack.c.bf16 %v2182_v42, %v2180_v58  ;;  %v5611_v42 = vld [vmem:[#allocation10_spill] sm:$0xff] }
 0x718   : > { %v2089_v35 = vsel %vm2081_vm6, %v4865_v31, %v2080_v2  ;;  %v2097_v27 = vsel %vm2081_vm6, %v2080_v2, %v4865_v31  ;;  %v2303_v63 = vsel %vm2300_vm9, %v4899_v18, %v2289_v26  ;;  %v2311_v47 = vsel %vm2300_vm9, %v2289_v26, %v4899_v18  ;;  %v5616_v26 = vld [vmem:[#allocation9_spill] sm:$0xff] }
 0x719   : > { %v2120_v3 = vmul.f32 %v4657_v43, %v2097_v27  ;;  %v2121_v51 = vmul.f32 %v4660_v14, %v2089_v35  ;;  %2517 = vrot.lane.b32.xlu1 %v4510_v60, %s3662_s27  ;;  %v5022_v31 = vmul.f32 %v4986_v32, %v2312_v36  ;;  %v5025_v43 = vmul.f32 %v4983_v54, %v2303_v63  ;;  %v5612_v35 = vld [vmem:[#allocation17_spill] sm:$0xff] }
 0x71a   : > { %v5028_v14 = vmul.f32 %v4986_v32, %v2311_v47  ;;  %2701 = vmatpush1.bf16.msra.mxu1 %v2572_v12  ;;  %v2163_v18 = vsel %vm2154_vm7, %v4584_v20, %v4514_v28  ;;  %v5610_v12 = vpack.c.bf16 %v4713_v62, %v4707_v61  ;;  %v2229_v2 = vsel %vm2227_vm8, %v5611_v42, %v4598_v59  ;;  %v5613_v61 = vld [vmem:[#allocation16_spill] sm:$0xff]  ;;  %v5615_v27 = vld [vmem:[#allocation13_spill] sm:$0xff] }
 0x71b   : > { %v2574_v46 = vpack.c.bf16 %v2120_v3, %v2118_v45  ;;  %v5035_v10 = vpop.permute.xlu1 %2294  ;;  %v2575_v6 = vpack.c.bf16 %v2121_v51, %v2119_v25  ;;  %v2602_v50 = vpack.c.bf16 %v5019_v29, %v5025_v43  ;;  %v5040_v13 = vpop.permute.xlu0 %2276  ;;  %v2179_v28 = vmul.f32 %v4682_v21, %v2163_v18 }
 0x71c   : > { %v2603_v41 = vpack.c.bf16 %v5022_v31, %v5028_v14  ;;  %v2161_v45 = vsel %vm2154_vm7, %v4867_v33, %v4934_v23  ;;  %v2169_v25 = vsel %vm2154_vm7, %v4934_v23, %v4867_v33  ;;  %v5614_v62 = vpack.c.bf16 %v5612_v35, %v5613_v61  ;;  %v5620_v35 = vld [vmem:[#allocation19_spill] sm:$0xff] }
 0x71d   : > { %2702 = vmatprep.subr.bf16.mxu1 %v2575_v6  ;;  %v2576_v37 = vpack.c.bf16 %v2181_v16, %v2179_v28  ;;  %v2228_v3 = vsel %vm2227_vm8, %v5616_v26, %v5615_v27  ;;  %v5617_v63 = vpack.c.bf16 %v4825_v17, %v4819_v30  ;;  %v2237_v47 = vsel %vm2227_vm8, %v4598_v59, %v5611_v42 }
 0x71e   : > { %2703 = vmatpush1.bf16.msra.mxu1 %v2574_v46  ;;  %v2255_v33 = vmul.f32 %v4727_v8, %v2229_v2  ;;  %v2191_v30 = vmul.f32 %v4682_v21, %v2169_v25  ;;  %v2192_v17 = vmul.f32 %v4691_v53, %v2161_v45  ;;  %v5618_v6 = vpack.c.bf16 %v4822_v52, %v4816_v4  ;;  %v5619_v25 = vld [vmem:[#allocation21_spill] sm:$0xff] }
 0x71f   : > { %v5045_v20 = vpop.permute.xlu1 %2282  ;;  %2704 = vmatprep.subr.bf16.mxu1 %v2577_v19  ;;  %v5047_v57 = vpop.permute.xlu0 %2292  ;;  %v2236_v16 = vsel %vm2227_vm8, %v5615_v27, %v5616_v26  ;;  %v5621_v61 = vpack.c.bf16 %v5619_v25, %v5620_v35  ;;  %v2234_v27 = vsel %vm2227_vm8, %v4875_v5, %v4963_v38  ;;  %v2242_v26 = vsel %vm2227_vm8, %v4963_v38, %v4875_v5  ;;  %v5632_v25 = vld [vmem:[#allocation4_spill] sm:$0xff]  ;;  %v5633_v35 = vld [vmem:[#allocation5_spill] sm:$0xff] }
 0x720   : > { %v2252_v4 = vmul.f32 %v4724_v44, %v2236_v16  ;;  %v2264_v5 = vmul.f32 %v4724_v44, %v2242_v26  ;;  %v2265_v38 = vmul.f32 %v4727_v8, %v2234_v27 }
 0x722   : > { %2705 = vmatpush1.bf16.msra.mxu1 %v2576_v37 }
 0x723   : > { %v5049_v39 = vpop.permute.xlu1 %2343  ;;  %2706 = vmatprep.subr.bf16.mxu1 %v5610_v12  ;;  %v5054_v36 = vpop.permute.xlu0 %2280  ;;  %v2254_v12 = vmul.f32 %v4724_v44, %v2237_v47 }
 0x725   : > { %v2584_v42 = vpack.c.bf16 %v2254_v12, %v2252_v4 }
 0x726   : > { %2707 = vmatpush1.bf16.msra.mxu1 %v5614_v62 }
 0x727   : > { %v2153_v51 = vpop.permute.xlu1 %2152  ;;  %2708 = vmatprep.subr.bf16.mxu1 %v5617_v63  ;;  %v5089_v58 = vpop.permute.xlu0 %2296 }
 0x728   : > { %v2162_v23 = vsel %vm2154_vm7, %v4873_v40, %v2153_v51  ;;  %v2170_v18 = vsel %vm2154_vm7, %v2153_v51, %v4873_v40  ;;  %v2253_v40 = vmul.f32 %v4727_v8, %v2228_v3  ;;  %v5622_v3 = vld [vmem:[#allocation20_spill] sm:$0xff]  ;;  %v5623_v51 = vld [vmem:[#allocation18_spill] sm:$0xff] }
 0x729   : > { %v2193_v46 = vmul.f32 %v4682_v21, %v2170_v18  ;;  %v2194_v59 = vmul.f32 %v4691_v53, %v2162_v23  ;;  %v5624_v63 = vpack.c.bf16 %v5622_v3, %v5623_v51  ;;  %v5626_v23 = vld [vmem:[#allocation23_spill] sm:$0xff]  ;;  %v5634_v3 = vld [vmem:[#allocation2_spill] sm:$0xff] }
 0x72a   : > { %2709 = vmatpush1.bf16.msra.mxu1 %v5618_v6  ;;  %v2585_v53 = vpack.c.bf16 %v2255_v33, %v2253_v40  ;;  %v5625_v33 = vld [vmem:[#allocation25_spill] sm:$0xff]  ;;  %v5629_v40 = vld [vmem:[#allocation24_spill] sm:$0xff]  ;;  %v5635_v51 = vld [vmem:[#allocation3_spill] sm:$0xff] }
 0x72b   : > { %v2582_v19 = vpack.c.bf16 %v2193_v46, %v2191_v30  ;;  %v5103_v28 = vpop.permute.xlu1 %2359  ;;  %v2583_v37 = vpack.c.bf16 %v2194_v59, %v2192_v17  ;;  %v5106_v21 = vpop.permute.xlu0 %2341  ;;  %v5627_v18 = vpack.c.bf16 %v5625_v33, %v5626_v23  ;;  %v5628_v30 = vld [vmem:[#allocation26_spill] sm:$0xff] }
 0x72d   : > { %2710 = vmatprep.subr.bf16.mxu1 %v2583_v37 }
 0x72e   : > { %2711 = vmatpush1.bf16.msra.mxu1 %v2582_v19  ;;  %v5630_v19 = vld [vmem:[#allocation22_spill] sm:$0xff] }
 0x72f   : > { %v5109_v52 = vpop.permute.xlu1 %2347  ;;  %2712 = vmatprep.subr.bf16.mxu1 %v2585_v53  ;;  %v5111_v2 = vpop.permute.xlu0 %2357  ;;  %v5631_v37 = vpack.c.bf16 %v5629_v40, %v5630_v19  ;;  %v3503_v40 = vld [vmem:[%s5553_s8 + $0xc] ss:$20 sps:$4 sm:$0xff]  }
 0x730   : > { %v2382_v31 = vsel %vm2373_vm10, %v5111_v2, %v5106_v21 }
 0x732   : > { %2713 = vmatpush1.bf16.msra.mxu1 %v2584_v42 }
 0x733   : > { %v5113_v45 = vpop.permute.xlu1 %2363  ;;  %2714 = vmatprep.subr.bf16.mxu1 %v5621_v61  ;;  %v5118_v62 = vpop.permute.xlu0 %2345  ;;  %v2593_v61 = vpack.c.bf16 %v5633_v35, %v5632_v25 }
 0x736   : > { %2715 = vmatpush1.bf16.msra.mxu1 %v5624_v63  ;;  %v2592_v63 = vpack.c.bf16 %v5635_v51, %v5634_v3 }
 0x737   : > { %v2226_v47 = vpop.permute.xlu1 %2225  ;;  %2716 = vmatprep.subr.bf16.mxu1 %v5627_v18  ;;  %v5140_v59 = vpop.permute.xlu0 %2361 }
 0x738   : > { %v2235_v17 = vsel %vm2227_vm8, %v5628_v30, %v2226_v47  ;;  %v2243_v46 = vsel %vm2227_vm8, %v2226_v47, %v5628_v30  ;;  %v5636_v47 = vld [vmem:[#allocation8_spill] sm:$0xff]  ;;  %v5637_v30 = vld [vmem:[#allocation6_spill] sm:$0xff] }
 0x739   : > { %v2266_v6 = vmul.f32 %v4724_v44, %v2243_v46  ;;  %v2267_v16 = vmul.f32 %v4727_v8, %v2235_v17  ;;  %v3495_v44 = vld [vmem:[%s5553_s8] ss:$20 sps:$4 sm:$0xff]   ;;  %v2595_v33 = vpack.c.bf16 %v4426_v24, %v5636_v47  ;;  %v5638_v17 = vld [vmem:[#allocation7_spill] sm:$0xff] }
 0x73a   : > { %2717 = vmatpush1.bf16.msra.mxu1 %v5631_v37  ;;  %v3498_v8 = vld [vmem:[%s5553_s8 + $0x2c] ss:$20 sps:$4 sm:$0xff]   ;;  %v2594_v46 = vpack.c.bf16 %v5638_v17, %v5637_v30  ;;  %v2314_v30 = vsel %vm2300_vm9, %v5035_v10, %v4958_v22 }
 0x73b   : > { %v2590_v12 = vpack.c.bf16 %v2266_v6, %v2264_v5  ;;  %v5149_v53 = vpop.permute.xlu1 %2351  ;;  %v2591_v4 = vpack.c.bf16 %v2267_v16, %v2265_v38  ;;  %v5151_v42 = vpop.permute.xlu0 %2349  ;;  %v2597_v5 = vpack.c.bf16 %v4466_v56, %v4460_v7  ;;  %v3500_v38 = vld [vmem:[%s5553_s8 + $0x28] ss:$20 sps:$4 sm:$0xff]   ;;  %v5639_v6 = vld [vmem:[#allocation12_spill] sm:$0xff] }
 0x73c   : > { %v5640_v16 = vld [vmem:[#allocation15_spill] sm:$0xff] }
 0x73d   : > { %2718 = vmatprep.subr.bf16.mxu1 %v2591_v4  ;;  %v2310_v24 = vsel %vm2300_vm9, %v5640_v16, %v5639_v6  ;;  %v5641_v37 = vld [vmem:[#allocation11_spill] sm:$0xff]  ;;  %v2596_v4 = vpack.c.bf16 %v4446_v34, %v4440_v48  ;;  %v2302_v25 = vsel %vm2300_vm9, %v5639_v6, %v5640_v16  ;;  %v2392_v6 = vsub.s32 6, %v4528_v0 }
 0x73e   : > { %2719 = vmatpush1.bf16.msra.mxu1 %v2590_v12  ;;  %v5642_v12 = vld [vmem:[#allocation14_spill] sm:$0xff]  ;;  %v2328_v35 = vmul.f32 %v4986_v32, %v2310_v24 }
 0x73f   : > { %v5161_v27 = vpop.permute.xlu1 %2367  ;;  %2741 = vmatprep.subr.bf16.mxu1 %v2593_v61  ;;  %v5163_v26 = vpop.permute.xlu0 %2365  ;;  %v2309_v7 = vsel %vm2300_vm9, %v5642_v12, %v5641_v37  ;;  %v2599_v61 = vpack.c.bf16 %v4510_v60, %v4501_v49  ;;  %v2598_v49 = vpack.c.bf16 %v4486_v9, %v4480_v55  ;;  %v2305_v55 = vsel %vm2300_vm9, %v5040_v13, %v5047_v57 }
 0x740   : > { %v2326_v48 = vmul.f32 %v4986_v32, %v2309_v7 }
 0x741   : > { %2721 = vmatmul.mubr.bf16.vlgmr.msra.gmra.mrb[32].mxu1 %v3495_v44  ;;  %v2301_v44 = vsel %vm2300_vm9, %v5641_v37, %v5642_v12  ;;  %v2374_v12 = vsel %vm2373_vm10, %v5106_v21, %v5111_v2 }
 0x742   : > { %2742 = vmatpush1.bf16.msra.mxu1 %v2592_v63  ;;  %2730 = vmatprep.mubr.bf16.mxu1 %v3498_v8  ;;  %v2327_v8 = vmul.f32 %v4983_v54, %v2302_v25  ;;  %v2601_v60 = vpack.c.bf16 %v2328_v35, %v2326_v48  ;;  %v2325_v51 = vmul.f32 %v4983_v54, %v2301_v44 }
 0x743   : > { %v5169_v23 = vpop.permute.xlu1 %2355  ;;  %2743 = vmatprep.subr.bf16.mxu1 %v2595_v33  ;;  %v5171_v18 = vpop.permute.xlu0 %2353  ;;  %v2313_v63 = vsel %vm2300_vm9, %v5047_v57, %v5040_v13  ;;  %v2307_v13 = vsel %vm2300_vm9, %v5054_v36, %v5089_v58  ;;  %v2393_v35 = vrot.slane %v4544_v1, %v2392_v6  ;;  %v2385_v48 = vsel %vm2373_vm10, %v5113_v45, %v5109_v52 }
 0x744   : > { %v2600_v33 = vpack.c.bf16 %v2327_v8, %v2325_v51  ;;  %v2334_v17 = vmul.f32 %v4986_v32, %v2313_v63  ;;  %v2387_v51 = vsel %vm2373_vm10, %v5161_v27, %v5149_v53  ;;  %v2386_v63 = vsel %vm2373_vm10, %v5163_v26, %v5151_v42 }
 0x746   : > { %2744 = vmatpush1.bf16.msra.mxu1 %v2594_v46  ;;  %v2306_v46 = vsel %vm2300_vm9, %v4958_v22, %v5035_v10  ;;  %v2315_v10 = vsel %vm2300_vm9, %v5089_v58, %v5054_v36  ;;  %v2383_v58 = vsel %vm2373_vm10, %v5103_v28, %v5049_v39 }
 0x747   : > { %v5187_v19 = vpop.permute.xlu1 %2416  ;;  %2745 = vmatprep.subr.bf16.mxu1 %v2597_v5  ;;  %v5193_v56 = vpop.permute.xlu0 %2369  ;;  %v2336_v5 = vmul.f32 %v4986_v32, %v2314_v30  ;;  %v2335_v22 = vmul.f32 %v4983_v54, %v2306_v46  ;;  %v2338_v36 = vmul.f32 %v4986_v32, %v2315_v10  ;;  %v2378_v46 = vsel %vm2373_vm10, %v5151_v42, %v5163_v26 }
 0x748   : > { %v2406_v10 = vmul.f32 %v2393_v35, %v2378_v46  ;;  %v2380_v42 = vsel %vm2373_vm10, %v5171_v18, %v5193_v56 }
 0x749   : > { %2731 = vmatmul.mubr.bf16.gmra.mrb[36].mxu1 %v3500_v38  ;;  %v2333_v38 = vmul.f32 %v4983_v54, %v2305_v55  ;;  %v2605_v24 = vpack.c.bf16 %v2336_v5, %v2334_v17  ;;  %v2379_v17 = vsel %vm2373_vm10, %v5149_v53, %v5161_v27 }
 0x74a   : > { %2746 = vmatpush1.bf16.msra.mxu1 %v2596_v4  ;;  %2773 = vmatprep.mubr.bf16.mxu1 %v3503_v40  ;;  %v5267_v40 = vrot.slane %v4549_v15, %v2392_v6 }
 0x74b   : > { %v5209_v34 = vpop.permute.xlu1 %2432  ;;  %2747 = vmatprep.subr.bf16.mxu1 %v2599_v61  ;;  %v5212_v3 = vpop.permute.xlu0 %2414  ;;  %v2604_v14 = vpack.c.bf16 %v2335_v22, %v2333_v38  ;;  %v2375_v61 = vsel %vm2373_vm10, %v5049_v39, %v5103_v28  ;;  %v2408_v22 = vmul.f32 %v2393_v35, %v2379_v17 }
 0x74c   : > { %v2399_v7 = vmul.f32 %v5267_v40, %v2382_v31  ;;  %v2401_v21 = vmul.f32 %v5267_v40, %v2383_v58 }
 0x74e   : > { %2748 = vmatpush1.bf16.msra.mxu1 %v2598_v49  ;;  %v2376_v49 = vsel %vm2373_vm10, %v5118_v62, %v5140_v59  ;;  %v2609_v28 = vpack.c.bf16 %v2401_v21, %v2399_v7 }
 0x74f   : > { %v5221_v47 = vpop.permute.xlu1 %2420  ;;  %2749 = vmatprep.subr.bf16.mxu1 %v2601_v60  ;;  %v5231_v9 = vpop.permute.xlu0 %2430  ;;  %v2400_v60 = vmul.f32 %v2393_v35, %v2375_v61  ;;  %v2402_v55 = vmul.f32 %v2393_v35, %v2376_v49 }
 0x752   : > { %2750 = vmatpush1.bf16.msra.mxu1 %v2600_v33 }
 0x753   : > { %v5241_v16 = vpop.permute.xlu1 %2436  ;;  %2751 = vmatprep.subr.bf16.mxu1 %v2603_v41  ;;  %v5250_v57 = vpop.permute.xlu0 %2418  ;;  %v2337_v41 = vmul.f32 %v4983_v54, %v2307_v13  ;;  %v2465_v13 = vsub.s32 7, %v4528_v0  ;;  %v2388_v0 = vsel %vm2373_vm10, %v5193_v56, %v5171_v18  ;;  %v2456_v18 = vsel %vm2446_vm11, %v5209_v34, %v5187_v19 }
 0x754   : > { %v2411_v56 = vmul.f32 %v5267_v40, %v2388_v0 }
 0x755   : > { %v5354_v31 = vrot.slane %v4544_v1, %v2465_v13  ;;  %v2447_v1 = vsel %vm2446_vm11, %v5212_v3, %v5231_v9 }
 0x756   : > { %2752 = vmatpush1.bf16.msra.mxu1 %v2602_v50 }
 0x757   : > { %v2299_v37 = vpop.permute.xlu1 %2298  ;;  %2753 = vmatprep.subr.bf16.mxu1 %v2605_v24  ;;  %v5280_v50 = vpop.permute.xlu0 %2434 }
 0x758   : > { %v2308_v29 = vsel %vm2300_vm9, %v5045_v20, %v2299_v37  ;;  %v2316_v43 = vsel %vm2300_vm9, %v2299_v37, %v5045_v20  ;;  %v2384_v20 = vsel %vm2373_vm10, %v5140_v59, %v5118_v62  ;;  %v2377_v62 = vsel %vm2373_vm10, %v5109_v52, %v5113_v45 }
 0x759   : > { %v2339_v4 = vmul.f32 %v4983_v54, %v2308_v29  ;;  %v2340_v25 = vmul.f32 %v4986_v32, %v2316_v43  ;;  %v2398_v32 = vmul.f32 %v2393_v35, %v2374_v12  ;;  %v2403_v39 = vmul.f32 %v5267_v40, %v2384_v20 }
 0x75a   : > { %2754 = vmatpush1.bf16.msra.mxu1 %v2604_v14  ;;  %v2405_v59 = vmul.f32 %v5267_v40, %v2385_v48  ;;  %v2409_v52 = vmul.f32 %v5267_v40, %v2387_v51  ;;  %v2407_v45 = vmul.f32 %v5267_v40, %v2386_v63  ;;  %v2404_v6 = vmul.f32 %v2393_v35, %v2377_v62 }
 0x75b   : > { %v2606_v2 = vpack.c.bf16 %v2339_v4, %v2337_v41  ;;  %v5299_v44 = vpop.permute.xlu1 %2424  ;;  %v2607_v54 = vpack.c.bf16 %v2340_v25, %v2338_v36  ;;  %v5305_v8 = vpop.permute.xlu0 %2422  ;;  %v2608_v30 = vpack.c.bf16 %v2400_v60, %v2398_v32  ;;  %v5357_v14 = vrot.slane %v4549_v15, %v2465_v13 }
 0x75c   : > { %v2611_v38 = vpack.c.bf16 %v2405_v59, %v2403_v39  ;;  %v2610_v53 = vpack.c.bf16 %v2404_v6, %v2402_v55  ;;  %v2613_v26 = vpack.c.bf16 %v2409_v52, %v2407_v45  ;;  %v2455_v41 = vsel %vm2446_vm11, %v5231_v9, %v5212_v3  ;;  %v5423_v39 = vld [vmem:[%s5545_s0 + $0x18] ss:$0 sm:$0xff] }
 0x75d   : > { %2755 = vmatprep.subr.bf16.mxu1 %v2607_v54  ;;  %v2612_v37 = vpack.c.bf16 %v2408_v22, %v2406_v10  ;;  %v2410_v36 = vmul.f32 %v2393_v35, %v2380_v42  ;;  %v2457_v58 = vsel %vm2446_vm11, %v5280_v50, %v5250_v57  ;;  %v2448_v3 = vsel %vm2446_vm11, %v5187_v19, %v5209_v34 }
 0x75e   : > { %2756 = vmatpush1.bf16.msra.mxu1 %v2606_v2  ;;  %v2472_v9 = vmul.f32 %v5357_v14, %v2455_v41  ;;  %v2474_v25 = vmul.f32 %v5357_v14, %v2456_v18  ;;  %v2471_v20 = vmul.f32 %v5354_v31, %v2447_v1  ;;  %v2450_v19 = vsel %vm2446_vm11, %v5221_v47, %v5241_v16 }
 0x75f   : > { %v5325_v33 = vpop.permute.xlu1 %2440  ;;  %2757 = vmatprep.subr.bf16.mxu1 %v2609_v28  ;;  %v5335_v5 = vpop.permute.xlu0 %2438  ;;  %v2476_v34 = vmul.f32 %v5357_v14, %v2457_v58  ;;  %v2473_v21 = vmul.f32 %v5354_v31, %v2448_v3  ;;  %v2449_v2 = vsel %vm2446_vm11, %v5250_v57, %v5280_v50  ;;  %v2477_v57 = vmul.f32 %v5354_v31, %v2450_v19  ;;  %v5418_v50 = vld [vmem:[%s5545_s0 + $0x10] ss:$0 sm:$0xff]  ;;  %v3501_v19 = vld [vmem:[%s5553_s8 + $0x8] ss:$20 sps:$4 sm:$0xff]  }
 0x760   : > { %v2460_v54 = vsel %vm2446_vm11, %v5325_v33, %v5299_v44  ;;  %v2617_v48 = vpack.c.bf16 %v2474_v25, %v2472_v9  ;;  %v2475_v28 = vmul.f32 %v5354_v31, %v2449_v2  ;;  %v2452_v60 = vsel %vm2446_vm11, %v5299_v44, %v5325_v33 }
 0x761   : > { %v2616_v49 = vpack.c.bf16 %v2473_v21, %v2471_v20  ;;  %v2482_v51 = vmul.f32 %v5357_v14, %v2460_v54  ;;  %v2451_v59 = vsel %vm2446_vm11, %v5305_v8, %v5335_v5  ;;  %v2481_v13 = vmul.f32 %v5354_v31, %v2452_v60 }
 0x762   : > { %2758 = vmatpush1.bf16.msra.mxu1 %v2608_v30  ;;  %v2479_v22 = vmul.f32 %v5354_v31, %v2451_v59 }
 0x763   : > { %v5340_v24 = vpop.permute.xlu1 %2428  ;;  %2759 = vmatprep.subr.bf16.mxu1 %v2611_v38  ;;  %v5347_v27 = vpop.permute.xlu0 %2426  ;;  %v2618_v38 = vpack.c.bf16 %v2477_v57, %v2475_v28 }
 0x766   : > { %2760 = vmatpush1.bf16.msra.mxu1 %v2610_v53 }
 0x767   : > { %v2372_v15 = vpop.permute.xlu1 %2371  ;;  %2761 = vmatprep.subr.bf16.mxu1 %v2613_v26  ;;  %v2443_v12 = vpop.permute.xlu0 %2442 }
 0x768   : > { %v2381_v29 = vsel %vm2373_vm10, %v5169_v23, %v2372_v15  ;;  %v2389_v43 = vsel %vm2373_vm10, %v2372_v15, %v5169_v23  ;;  %v2458_v23 = vsel %vm2446_vm11, %v5241_v16, %v5221_v47  ;;  %v2459_v16 = vsel %vm2446_vm11, %v5335_v5, %v5305_v8 }
 0x769   : > { %v2412_v7 = vmul.f32 %v2393_v35, %v2381_v29  ;;  %v2413_v4 = vmul.f32 %v5267_v40, %v2389_v43  ;;  %v2478_v47 = vmul.f32 %v5357_v14, %v2458_v23  ;;  %v2480_v30 = vmul.f32 %v5357_v14, %v2459_v16 }
 0x76a   : > { %2762 = vmatpush1.bf16.msra.mxu1 %v2612_v37  ;;  %v2453_v26 = vsel %vm2446_vm11, %v5347_v27, %v2443_v12  ;;  %v2461_v41 = vsel %vm2446_vm11, %v2443_v12, %v5347_v27 }
 0x76b   : > { %v2614_v35 = vpack.c.bf16 %v2412_v7, %v2410_v36  ;;  %v2490_v61 = vpop.permute.xlu1 %2489  ;;  %v2615_v40 = vpack.c.bf16 %v2413_v4, %v2411_v56  ;;  %v2488_v32 = vpop.permute.xlu0 %2487  ;;  %v2619_v62 = vpack.c.bf16 %v2478_v47, %v2476_v34  ;;  %v2621_v0 = vpack.c.bf16 %v2482_v51, %v2480_v30  ;;  %v3506_v51 = vld [vmem:[%s5553_s8 + $0x30] ss:$20 sps:$4 sm:$0xff]  }
 0x76c   : > { %v2620_v36 = vpack.c.bf16 %v2481_v13, %v2479_v22  ;;  %v2483_v56 = vmul.f32 %v5354_v31, %v2453_v26  ;;  %v2484_v58 = vmul.f32 %v5357_v14, %v2461_v41  ;;  %v3507_v22 = vld [vmem:[%s5553_s8 + $0x10] ss:$20 sps:$4 sm:$0xff]  }
 0x76d   : > { %2763 = vmatprep.subr.bf16.mxu1 %v2615_v40  ;;  %v3504_v40 = vld [vmem:[%s5553_s8 + $0x34] ss:$20 sps:$4 sm:$0xff]  }
 0x76e   : > { %2764 = vmatpush1.bf16.msra.mxu1 %v2614_v35 }
 0x76f   : > { %v2506_v63 = vpop.permute.xlu1 %2505  ;;  %2765 = vmatprep.subr.bf16.mxu1 %v2617_v48  ;;  %v2504_v46 = vpop.permute.xlu0 %2503 }
 0x770   : > { %v2521_v55 = vsel %vm2519_vm12, %v2490_v61, %v2506_v63  ;;  %v2529_v17 = vsel %vm2519_vm12, %v2506_v63, %v2490_v61  ;;  %v2520_v52 = vsel %vm2519_vm12, %v2488_v32, %v2504_v46  ;;  %v2528_v45 = vsel %vm2519_vm12, %v2504_v46, %v2488_v32 }
 0x771   : > { %v2546_v44 = vmul.f32 %v5418_v50, %v2521_v55  ;;  %v2547_v33 = vmul.f32 %v5423_v39, %v2529_v17  ;;  %v2544_v8 = vmul.f32 %v5418_v50, %v2520_v52  ;;  %v2545_v5 = vmul.f32 %v5423_v39, %v2528_v45 }
 0x772   : > { %2766 = vmatpush1.bf16.msra.mxu1 %v2616_v49 }
 0x773   : > { %v2494_v6 = vpop.permute.xlu1 %2493  ;;  %2767 = vmatprep.subr.bf16.mxu1 %v2619_v62  ;;  %v2624_v10 = vpack.c.bf16 %v2546_v44, %v2544_v8  ;;  %v2492_v53 = vpop.permute.xlu0 %2491  ;;  %v2625_v42 = vpack.c.bf16 %v2547_v33, %v2545_v5  ;;  %v5643_v44 = vmov 0  }
 0x775   : > { %2794 = vmatprep.subr.bf16.mxu0 %v2625_v42 }
 0x776   : > { %2768 = vmatpush1.bf16.msra.mxu1 %v2618_v38  ;;  %2795 = vmatpush1.bf16.msra.mxu0 %v2624_v10 }
 0x777   : > { %v2445_v37 = vpop.permute.xlu1 %2444  ;;  %2769 = vmatprep.subr.bf16.mxu1 %v2621_v0  ;;  %v2508_v15 = vpop.permute.xlu0 %2507 }
 0x778   : > { %v2454_v18 = vsel %vm2446_vm11, %v5340_v24, %v2445_v37  ;;  %v2462_v1 = vsel %vm2446_vm11, %v2445_v37, %v5340_v24  ;;  %v2522_v43 = vsel %vm2519_vm12, %v2492_v53, %v2508_v15  ;;  %v2530_v12 = vsel %vm2519_vm12, %v2508_v15, %v2492_v53 }
 0x779   : > { %v2485_v27 = vmul.f32 %v5354_v31, %v2454_v18  ;;  %v2486_v29 = vmul.f32 %v5357_v14, %v2462_v1  ;;  %v2548_v31 = vmul.f32 %v5418_v50, %v2522_v43  ;;  %v2549_v14 = vmul.f32 %v5423_v39, %v2530_v12 }
 0x77a   : > { %2770 = vmatpush1.bf16.msra.mxu1 %v2620_v36 }
 0x77b   : > { %v2622_v3 = vpack.c.bf16 %v2485_v27, %v2483_v56  ;;  %v2510_v9 = vpop.permute.xlu1 %2509  ;;  %v2623_v7 = vpack.c.bf16 %v2486_v29, %v2484_v58  ;;  %v2496_v25 = vpop.permute.xlu0 %2495 }
 0x77c   : > { %v2523_v24 = vsel %vm2519_vm12, %v2494_v6, %v2510_v9  ;;  %v2531_v4 = vsel %vm2519_vm12, %v2510_v9, %v2494_v6 }
 0x77d   : > { %v2550_v20 = vmul.f32 %v5418_v50, %v2523_v24  ;;  %v2551_v23 = vmul.f32 %v5423_v39, %v2531_v4  ;;  %2771 = vmatprep.subr.bf16.mxu1 %v2623_v7 }
 0x77e   : > { %2772 = vmatpush1.bf16.msra.mxu1 %v2622_v3  ;;  %v3637_v3 = vld [vmem:[%s3738_s21 + $0xa0] sm:$0xff] }
 0x77f   : > { %v2626_v34 = vpack.c.bf16 %v2550_v20, %v2548_v31  ;;  %v2498_v35 = vpop.permute.xlu1 %2497  ;;  %3451 = vmatprep.subr.bf16.mxu1 %v2625_v42  ;;  %v2627_v61 = vpack.c.bf16 %v2551_v23, %v2549_v14  ;;  %v3639_v20 = vld [vmem:[%s3738_s21 + $0x80] sm:$0xff] }
 0x780   : > { %v2512_v21 = vpop.permute.xlu0 %2511 }
 0x781   : > { %2774 = vmatmul.mubr.bf16.vlgmr.msra.gmra.mrb[32].mxu1 %v3501_v19  ;;  %2796 = vmatprep.subr.bf16.mxu0 %v2627_v61  ;;  %v2524_v2 = vsel %vm2519_vm12, %v2496_v25, %v2512_v21  ;;  %v2532_v54 = vsel %vm2519_vm12, %v2512_v21, %v2496_v25  ;;  %v3638_v25 = vld [vmem:[%s3738_s21 + $0xa8] sm:$0xff] }
 0x782   : > { %3455 = vmatpush1.bf16.msra.mxu1 %v2624_v10  ;;  %2797 = vmatpush1.bf16.msra.mxu0 %v2626_v34  ;;  %v2552_v49 = vmul.f32 %v5418_v50, %v2524_v2  ;;  %v2553_v57 = vmul.f32 %v5423_v39, %v2532_v54  ;;  %v3641_v2 = vld [vmem:[%s3738_s21 + $0x90] sm:$0xff] }
 0x783   : > { %v2514_v32 = vpop.permute.xlu1 %2513  ;;  %3452 = vmatprep.subr.bf16.mxu1 %v2627_v61  ;;  %2783 = vmatprep.mubr.bf16.mxu1 %v3504_v40 }
 0x784   : > { %v2525_v47 = vsel %vm2519_vm12, %v2498_v35, %v2514_v32  ;;  %v2533_v16 = vsel %vm2519_vm12, %v2514_v32, %v2498_v35  ;;  %v2500_v48 = vpop.permute.xlu0 %2499  ;;  %v3640_v35 = vld [vmem:[%s3738_s21 + $0x88] sm:$0xff] }
 0x785   : > { %v2554_v28 = vmul.f32 %v5418_v50, %v2525_v47  ;;  %v2555_v60 = vmul.f32 %v5423_v39, %v2533_v16  ;;  %v3642_v16 = vld [vmem:[%s3738_s21 + $0xb0] sm:$0xff] }
 0x786   : > { %3456 = vmatpush1.bf16.msra.mxu1 %v2626_v34 }
 0x787   : > { %v2628_v63 = vpack.c.bf16 %v2554_v28, %v2552_v49  ;;  %v2502_v62 = vpop.permute.xlu1 %2501  ;;  %v2629_v59 = vpack.c.bf16 %v2555_v60, %v2553_v57  ;;  %v3643_v60 = vld [vmem:[%s3738_s21 + $0xb8] sm:$0xff] }
 0x788   : > { %v2516_v30 = vpop.permute.xlu0 %2515 }
 0x789   : > { %2784 = vmatmul.mubr.bf16.gmra.mrb[36].mxu1 %v3506_v51  ;;  %2798 = vmatprep.subr.bf16.mxu0 %v2629_v59  ;;  %v2526_v55 = vsel %vm2519_vm12, %v2500_v48, %v2516_v30  ;;  %v2534_v17 = vsel %vm2519_vm12, %v2516_v30, %v2500_v48 }
 0x78a   : > { %3453 = vmatprep.subr.bf16.mxu1 %v2629_v59  ;;  %2799 = vmatpush1.bf16.msra.mxu0 %v2628_v63  ;;  %v2556_v45 = vmul.f32 %v5418_v50, %v2526_v55  ;;  %v2557_v8 = vmul.f32 %v5423_v39, %v2534_v17 }
 0x78b   : > { %3457 = vmatpush1.bf16.msra.mxu1 %v2628_v63  ;;  %v2518_v46 = vpop.permute.xlu1 %2517  ;;  %2836 = vmatprep.mubr.bf16.mxu1 %v5643_v44  ;;  %v3644_v63 = vld [vmem:[%s3738_s21 + $0x98] sm:$0xff] }
 0x78c   : > { %v2527_v33 = vsel %vm2519_vm12, %v2502_v62, %v2518_v46  ;;  %v2535_v52 = vsel %vm2519_vm12, %v2518_v46, %v2502_v62 }
 0x78d   : > { %v2558_v5 = vmul.f32 %v5418_v50, %v2527_v33  ;;  %v2559_v38 = vmul.f32 %v5423_v39, %v2535_v52 }
 0x78f   : > { %v2630_v6 = vpack.c.bf16 %v2558_v5, %v2556_v45  ;;  %v2631_v13 = vpack.c.bf16 %v2559_v38, %v2557_v8 }
 0x791   : > { %2800 = vmatprep.subr.bf16.mxu0 %v2631_v13  ;;  %3454 = vmatprep.subr.bf16.mxu1 %v2631_v13 }
 0x792   : > { %2801 = vmatpush1.bf16.msra.mxu0 %v2630_v6  ;;  %3458 = vmatpush1.bf16.msra.mxu1 %v2630_v6 }
 0x795   : > { %3099 = vmatmul.mubr.msk.bf16.vlgmr.msra.gmra.mrb[56].mxu0 %vm391_vm0, %v3507_v22  ;;  %3100 = vmatmul.mubr.msk.bf16.vlgmr.msra.gmra.mrb[36].mxu1 %vm391_vm0, %v3508_v11 }
 0x854   : > { %v2775_v50 = vpop.f32.mrb[32].mxu1 }
 0x855   : > { %v2777_v39 = vpop.f32.mrb[33].mxu1 }
 0x856   : > { %v2779_v10 = vpop.f32.mrb[34].mxu1 }
 0x857   : > { %v2781_v53 = vpop.f32.mrb[35].mxu1 }
 0x868   : > { %v2828_v42 = vpop.f32.mrb[56].mxu0  ;;  %v2838_v0 = vpop.f32.mrb[36].mxu1 }
 0x869   : > { %v3459_v26 = vadd.f32 %v2828_v42, %v2775_v50  ;;  %vm2851_vm13 = vcmp.ge.f32.partialorder %v2838_v0, 0.0  ;;  %v2859_v41 = vmul.f32 0.25, %v2838_v0  ;;  %v2830_v37 = vpop.f32.mrb[57].mxu0  ;;  %v2840_v36 = vpop.f32.mrb[37].mxu1 }
 0x86a   : > { %v3460_v18 = vadd.f32 %v2830_v37, %v2777_v39  ;;  %vm2852_vm14 = vcmp.ge.f32.partialorder %v2840_v36, 0.0  ;;  %v2860_v1 = vmul.f32 0.25, %v2840_v36  ;;  %v2832_v15 = vpop.f32.mrb[58].mxu0  ;;  %v2842_v56 = vpop.f32.mrb[38].mxu1 }
 0x86b   : > { %vm2847_vm15 = vcmp.ge.f32.partialorder %v3459_v26, 0.0  ;;  %v2855_v58 = vmul.f32 0.25, %v3459_v26  ;;  %v2867_v27 = vsel %vm2851_vm13, %v2838_v0, %v2859_v41  ;;  %v3461_v29 = vadd.f32 %v2832_v15, %v2779_v10  ;;  %v2834_v43 = vpop.f32.mrb[59].mxu0  ;;  %v2844_v12 = vpop.f32.mrb[39].mxu1 }
 0x86c   : > { %v2875_v9 = vmul.f32 %v3637_v3, %v2867_v27  ;;  %vm2848_vm0 = vcmp.ge.f32.partialorder %v3460_v18, 0.0  ;;  %v2856_v7 = vmul.f32 0.25, %v3460_v18  ;;  %v2868_v24 = vsel %vm2852_vm14, %v2840_v36, %v2860_v1 }
 0x86d   : > { %v2863_v4 = vsel %vm2847_vm15, %v3459_v26, %v2855_v58  ;;  %v2876_v31 = vmul.f32 %v3638_v25, %v2868_v24  ;;  %vm2849_vm1 = vcmp.ge.f32.partialorder %v3461_v29, 0.0  ;;  %v2857_v14 = vmul.f32 0.25, %v3461_v29 }
 0x86e   : > { %v2871_v23 = vmul.f32 %v3639_v20, %v2863_v4  ;;  %2883 = vst [vmem:[%s5524_s15 + $0x20] sm:$0xff] %v2875_v9  ;;  %v2864_v19 = vsel %vm2848_vm0, %v3460_v18, %v2856_v7  ;;  %vm2853_vm2 = vcmp.ge.f32.partialorder %v2842_v56, 0.0  ;;  %v2861_v34 = vmul.f32 0.25, %v2842_v56 }
 0x86f   : > { %v2872_v61 = vmul.f32 %v3640_v35, %v2864_v19  ;;  %2884 = vst [vmem:[%s5524_s15 + $0x28] sm:$0xff] %v2876_v31  ;;  %v2865_v40 = vsel %vm2849_vm1, %v3461_v29, %v2857_v14  ;;  %v3462_v21 = vadd.f32 %v2834_v43, %v2781_v53  ;;  %vm2854_vm3 = vcmp.ge.f32.partialorder %v2844_v12, 0.0 }
 0x870   : > { %2879 = vst [vmem:[%s5524_s15] sm:$0xff] %v2871_v23  ;;  %v2873_v54 = vmul.f32 %v3641_v2, %v2865_v40  ;;  %v2869_v32 = vsel %vm2853_vm2, %v2842_v56, %v2861_v34  ;;  %v2862_v47 = vmul.f32 0.25, %v2844_v12 }
 0x871   : > { %2880 = vst [vmem:[%s5524_s15 + $0x8] sm:$0xff] %v2872_v61  ;;  %v2877_v48 = vmul.f32 %v3642_v16, %v2869_v32  ;;  %vm2850_vm4 = vcmp.ge.f32.partialorder %v3462_v21, 0.0  ;;  %v2858_v49 = vmul.f32 0.25, %v3462_v21 }
 0x872   : > { %2881 = vst [vmem:[%s5524_s15 + $0x10] sm:$0xff] %v2873_v54  ;;  %v2870_v57 = vsel %vm2854_vm3, %v2844_v12, %v2862_v47 }
 0x873   : > { %2885 = vst [vmem:[%s5524_s15 + $0x30] sm:$0xff] %v2877_v48  ;;  %v2866_v28 = vsel %vm2850_vm4, %v3462_v21, %v2858_v49  ;;  %v2878_v51 = vmul.f32 %v3643_v60, %v2870_v57 }
 0x874   : > { %v2874_v62 = vmul.f32 %v3644_v63, %v2866_v28 }
 0x875   : > { %2886 = vst [vmem:[%s5524_s15 + $0x38] sm:$0xff] %v2878_v51 }
 0x876   : > { %2882 = vst [vmem:[%s5524_s15 + $0x18] sm:$0xff] %v2874_v62 }
 0x877 PF: > { %s19_s30 = sadd.s32 1, %s3651_s30  }
 0x878   : > { %p16_p4 = scmp.ge.s32.totalorder %s19_s30, 4  }
 0x87a   :  { %18 = sbr.rel (!%p16_p4) target bundleno = 1 (0x1), region = 89 }

// kernel: _lambda_.5
= control target key start
LH: loop header
LB: loop body
LE: loop exit
PB: predicated region body
PF: predicated region fallthrough
CT: control target
= control target key end

     0   :  { %s2703_s15 = smov 0   ;;  %s2705_s16 = smov 0   ;;  %s4578_s0 = inlined_call_operand.vmem [shape: f32[9,256], index: 0, kind: input, shape index: {}]   ;;  %s4579_s1 = inlined_call_operand.vmem [shape: f32[1,2,32,256], index: 1, kind: input, shape index: {}]   ;;  %s4580_s2 = inlined_call_operand.vmem [shape: bf16[1,4,32,288], index: 2, kind: input, shape index: {}]   ;;  %s4581_s3 = inlined_call_operand.vmem [shape: f32[1,4,32,1], index: 3, kind: input, shape index: {}]   ;;  %s4582_s4 = inlined_call_operand.vmem [shape: f32[1,2,32,256], index: 4, kind: output, shape index: {}]  }
   0x1   :  { %s2707_s17 = smov 0  }
   0x2 LB: > { %s23_s18 = sadd.s32 1, %s2663_s16  ;;  %p2425_p0 = scmp.ge.s32.totalorder %s2667_s17, 1  ;;  %s2667_s17 = sphi %s2707_s17, %s14_s17   ;;  %s2663_s16 = sphi %s2705_s16, %s4599_s16   ;;  %s2659_s15 = sphi %s2703_s15, %s4598_s15  }
   0x3   : > { %p24_p1 = scmp.ge.s32.totalorder %s23_s18, 2  ;;  %p202_p2 = scmp.lt.s32.totalorder %s2667_s17, 3 }
   0x5   : > { %s4601_s18 = smov (%p24_p1, %s23_s18), 0  ;;  %p203_p3 = pnand %p2425_p0, %p202_p2 }
   0x7   : > { %206 = sbr.rel (%p203_p3) target bundleno = 1897 (0x769), region = 36 }
   0xe   : > { %p248_p4 = scmp.lt.s32.totalorder %s2659_s15, 1  ;;  %s2669_s23 = smov 17   ;;  %v2605_v8 = vld [vmem:[%s4580_s2 + $0x4] ss:$12 sps:$4 sm:$0xff]   ;;  %v315_v9 = vlaneseq  ;;  %v2882_v13 = vld [vmem:[%s4578_s0 + $0x8] sm:$0xff]  ;;  %v4583_v23 = vmov 0  }
   0xf   : > { %s2670_s24 = smov 16   ;;  %s2671_s25 = smov 15   ;;  %754 = vmatprep.mubr.bf16.mxu0 %v2605_v8  ;;  %v2888_v14 = vld [vmem:[%s4578_s0] sm:$0xff]  ;;  %2602 = vset.pattern.permute.xlu1 %v4583_v23  ;;  %v296_v45 = vld [vmem:[%s4581_s3 + $0x8] sm:$0xff]  ;;  %v297_v51 = vld [vmem:[%s4581_s3 + $0x10] sm:$0xff]  ;;  %vm715_vm8 = vcmask 261120  }
  0x10   : > { %s4603_s15 = smov (!%p248_p4, %s2659_s15), 1  ;;  %s2672_s26 = smov 1   ;;  %v2866_v10 = vshrl.u32 %v315_v9, 7  ;;  %v2872_v11 = vand.u32 127, %v315_v9  ;;  %2601 = vset.pattern.permute.xlu0 %v4583_v23  ;;  %v295_v46 = vld [vmem:[%s4581_s3] sm:$0xff]  ;;  %v298_v52 = vld [vmem:[%s4581_s3 + $0x18] sm:$0xff] }
  0x11   : > { %s2502_s19 = sshll.u32 %s4603_s15, 6  ;;  %s2673_s27 = smov 127  }
  0x12   : > { %s2729_s22 = scalar_lea.vmem %s4579_s1, %s2502_s19  ;;  %s2674_s28 = smov 113   ;;  %v328_v12 = vsub.s32 0, %v2866_v10  ;;  %vm317_vm0 = vcmp.lt.s32.totalorder %v2872_v11, 17  ;;  %v369_v36 = vsub.s32 1, %v2866_v10  ;;  %vm358_vm1 = vcmp.lt.s32.totalorder %v2872_v11, 16 }
  0x13   : > { %v2732_v0 = vld [vmem:[%s2729_s22 + $0x8] sm:$0xff]  ;;  %v2735_v1 = vld [vmem:[%s2729_s22] sm:$0xff]  ;;  %v2742_v2 = vld [vmem:[%s2729_s22 + $0x18] sm:$0xff]  ;;  %s2675_s29 = smov 112   ;;  %s2676_s6 = smov 111   ;;  %vm399_vm2 = vcmp.lt.s32.totalorder %v2872_v11, 15 }
  0x14   : > { %307 = vrot.lane.b32.xlu1 %v2732_v0, %s2669_s23  ;;  %299 = vrot.lane.b32.xlu0 %v2735_v1, %s2669_s23  ;;  %v2745_v3 = vld [vmem:[%s2729_s22 + $0x10] sm:$0xff]  ;;  %v2751_v5 = vld [vmem:[%s2729_s22 + $0x20] sm:$0xff]  ;;  %v2891_v17 = vrot.slane %v2882_v13, %v328_v12  ;;  %v2900_v19 = vrot.slane %v2888_v14, %v328_v12  ;;  %v2949_v53 = vrot.slane %v2888_v14, %v369_v36  ;;  %vm440_vm3 = vcmp.lt.s32.totalorder %v2872_v11, 1 }
  0x15   : > { %v2748_v4 = vld [vmem:[%s2729_s22 + $0x30] sm:$0xff]  ;;  %v2758_v6 = vld [vmem:[%s2729_s22 + $0x38] sm:$0xff]  ;;  %v2761_v7 = vld [vmem:[%s2729_s22 + $0x28] sm:$0xff]  ;;  %v2952_v54 = vrot.slane %v2882_v13, %v369_v36  ;;  %vm481_vm4 = vcmp.lt.s32.totalorder %v2872_v11, 127  ;;  %vm522_vm5 = vcmp.lt.s32.totalorder %v2872_v11, 113  ;;  %vm563_vm6 = vcmp.lt.s32.totalorder %v2872_v11, 112 }
  0x16   : > { %vm604_vm7 = vcmp.lt.s32.totalorder %v2872_v11, 111  ;;  %v2634_v11 = vld [vmem:[%s4580_s2 + $0xb0] ss:$12 sps:$4 sm:$0xff]  }
  0x18   : > { %309 = vrot.lane.b32.xlu1 %v2742_v2, %s2669_s23  ;;  %301 = vrot.lane.b32.xlu0 %v2745_v3, %s2669_s23 }
  0x1c   : > { %305 = vrot.lane.b32.xlu1 %v2748_v4, %s2669_s23  ;;  %303 = vrot.lane.b32.xlu0 %v2751_v5, %s2669_s23 }
  0x20   : > { %313 = vrot.lane.b32.xlu1 %v2758_v6, %s2669_s23  ;;  %311 = vrot.lane.b32.xlu0 %v2761_v7, %s2669_s23 }
  0x24   : > { %344 = vrot.lane.b32.xlu1 %v2745_v3, %s2670_s24  ;;  %342 = vrot.lane.b32.xlu0 %v2735_v1, %s2670_s24 }
  0x28   : > { %352 = vrot.lane.b32.xlu1 %v2742_v2, %s2670_s24  ;;  %350 = vrot.lane.b32.xlu0 %v2732_v0, %s2670_s24 }
  0x2c   : > { %348 = vrot.lane.b32.xlu1 %v2748_v4, %s2670_s24  ;;  %346 = vrot.lane.b32.xlu0 %v2751_v5, %s2670_s24 }
  0x30   : > { %356 = vrot.lane.b32.xlu1 %v2758_v6, %s2670_s24  ;;  %354 = vrot.lane.b32.xlu0 %v2761_v7, %s2670_s24 }
  0x34   : > { %385 = vrot.lane.b32.xlu1 %v2745_v3, %s2671_s25  ;;  %383 = vrot.lane.b32.xlu0 %v2735_v1, %s2671_s25 }
  0x38   : > { %393 = vrot.lane.b32.xlu1 %v2742_v2, %s2671_s25  ;;  %391 = vrot.lane.b32.xlu0 %v2732_v0, %s2671_s25 }
  0x3c   : > { %389 = vrot.lane.b32.xlu1 %v2748_v4, %s2671_s25  ;;  %387 = vrot.lane.b32.xlu0 %v2751_v5, %s2671_s25 }
  0x40   : > { %397 = vrot.lane.b32.xlu1 %v2758_v6, %s2671_s25  ;;  %395 = vrot.lane.b32.xlu0 %v2761_v7, %s2671_s25 }
  0x44   : > { %426 = vrot.lane.b32.xlu1 %v2745_v3, %s2672_s26  ;;  %424 = vrot.lane.b32.xlu0 %v2735_v1, %s2672_s26 }
  0x48   : > { %434 = vrot.lane.b32.xlu1 %v2742_v2, %s2672_s26  ;;  %432 = vrot.lane.b32.xlu0 %v2732_v0, %s2672_s26 }
  0x4c   : > { %430 = vrot.lane.b32.xlu1 %v2748_v4, %s2672_s26  ;;  %428 = vrot.lane.b32.xlu0 %v2751_v5, %s2672_s26 }
  0x50   : > { %438 = vrot.lane.b32.xlu1 %v2758_v6, %s2672_s26  ;;  %436 = vrot.lane.b32.xlu0 %v2761_v7, %s2672_s26 }
  0x54   : > { %467 = vrot.lane.b32.xlu1 %v2745_v3, %s2673_s27  ;;  %465 = vrot.lane.b32.xlu0 %v2735_v1, %s2673_s27 }
  0x58   : > { %475 = vrot.lane.b32.xlu1 %v2742_v2, %s2673_s27  ;;  %473 = vrot.lane.b32.xlu0 %v2732_v0, %s2673_s27 }
  0x5c   : > { %471 = vrot.lane.b32.xlu1 %v2748_v4, %s2673_s27  ;;  %469 = vrot.lane.b32.xlu0 %v2751_v5, %s2673_s27 }
  0x60   : > { %479 = vrot.lane.b32.xlu1 %v2758_v6, %s2673_s27  ;;  %477 = vrot.lane.b32.xlu0 %v2761_v7, %s2673_s27 }
  0x64   : > { %508 = vrot.lane.b32.xlu1 %v2745_v3, %s2674_s28  ;;  %506 = vrot.lane.b32.xlu0 %v2735_v1, %s2674_s28 }
  0x68   : > { %516 = vrot.lane.b32.xlu1 %v2742_v2, %s2674_s28  ;;  %514 = vrot.lane.b32.xlu0 %v2732_v0, %s2674_s28 }
  0x6c   : > { %512 = vrot.lane.b32.xlu1 %v2748_v4, %s2674_s28  ;;  %510 = vrot.lane.b32.xlu0 %v2751_v5, %s2674_s28 }
  0x70   : > { %520 = vrot.lane.b32.xlu1 %v2758_v6, %s2674_s28  ;;  %518 = vrot.lane.b32.xlu0 %v2761_v7, %s2674_s28 }
  0x74   : > { %549 = vrot.lane.b32.xlu1 %v2745_v3, %s2675_s29  ;;  %547 = vrot.lane.b32.xlu0 %v2735_v1, %s2675_s29 }
  0x78   : > { %557 = vrot.lane.b32.xlu1 %v2742_v2, %s2675_s29  ;;  %555 = vrot.lane.b32.xlu0 %v2732_v0, %s2675_s29 }
  0x7c   : > { %553 = vrot.lane.b32.xlu1 %v2748_v4, %s2675_s29  ;;  %551 = vrot.lane.b32.xlu0 %v2751_v5, %s2675_s29 }
  0x80   : > { %561 = vrot.lane.b32.xlu1 %v2758_v6, %s2675_s29  ;;  %559 = vrot.lane.b32.xlu0 %v2761_v7, %s2675_s29 }
  0x84   : > { %590 = vrot.lane.b32.xlu1 %v2745_v3, %s2676_s6  ;;  %588 = vrot.lane.b32.xlu0 %v2735_v1, %s2676_s6 }
  0x86   : > { %v308_v15 = vpop.permute.xlu1 %307  ;;  %v300_v16 = vpop.permute.xlu0 %299 }
  0x87   : > { %v318_v18 = vsel %vm317_vm0, %v300_v16, %v308_v15  ;;  %v322_v20 = vsel %vm317_vm0, %v308_v15, %v300_v16 }
  0x88   : > { %598 = vrot.lane.b32.xlu1 %v2742_v2, %s2676_s6  ;;  %596 = vrot.lane.b32.xlu0 %v2732_v0, %s2676_s6  ;;  %v335_v26 = vmul.f32 %v2891_v17, %v318_v18  ;;  %v334_v28 = vmul.f32 %v2900_v19, %v322_v20 }
  0x8a   : > { %v310_v21 = vpop.permute.xlu1 %309  ;;  %v302_v22 = vpop.permute.xlu0 %301 }
  0x8b   : > { %v323_v24 = vsel %vm317_vm0, %v310_v21, %v302_v22  ;;  %v319_v25 = vsel %vm317_vm0, %v302_v22, %v310_v21  ;;  %v410_v21 = vsub.s32 2, %v2866_v10 }
  0x8c   : > { %594 = vrot.lane.b32.xlu1 %v2748_v4, %s2676_s6  ;;  %592 = vrot.lane.b32.xlu0 %v2751_v5, %s2676_s6  ;;  %v337_v27 = vmul.f32 %v2891_v17, %v319_v25  ;;  %v336_v29 = vmul.f32 %v2900_v19, %v323_v24 }
  0x8d   : > { %v2984_v36 = vrot.slane %v2882_v13, %v410_v21 }
  0x8e   : > { %v306_v30 = vpop.permute.xlu1 %305  ;;  %v304_v31 = vpop.permute.xlu0 %303  ;;  %v630_v32 = vpack.c.bf16 %v337_v27, %v335_v26  ;;  %v629_v33 = vpack.c.bf16 %v336_v29, %v334_v28 }
  0x90   : > { %602 = vrot.lane.b32.xlu1 %v2758_v6, %s2676_s6  ;;  %600 = vrot.lane.b32.xlu0 %v2761_v7, %s2676_s6 }
  0x91   : > { %722 = vmatprep.subr.bf16.mxu0 %v630_v32 }
  0x92   : > { %723 = vmatpush1.bf16.msra.mxu0 %v629_v33  ;;  %v314_v34 = vpop.permute.xlu1 %313  ;;  %v312_v35 = vpop.permute.xlu0 %311 }
  0x93   : > { %v321_v37 = vsel %vm317_vm0, %v306_v30, %v314_v34  ;;  %v325_v38 = vsel %vm317_vm0, %v314_v34, %v306_v30  ;;  %v320_v39 = vsel %vm317_vm0, %v304_v31, %v312_v35  ;;  %v324_v40 = vsel %vm317_vm0, %v312_v35, %v304_v31 }
  0x94   : > { %v340_v41 = vmul.f32 %v2900_v19, %v325_v38  ;;  %v341_v42 = vmul.f32 %v2891_v17, %v321_v37  ;;  %v338_v43 = vmul.f32 %v2900_v19, %v324_v40  ;;  %v339_v44 = vmul.f32 %v2891_v17, %v320_v39  ;;  %672 = vperm.xlu1 %2602, %v296_v45  }
  0x95   : > { %667 = vperm.xlu0 %2601, %v295_v46   ;;  %v2981_v35 = vrot.slane %v2888_v14, %v410_v21 }
  0x96   : > { %v345_v47 = vpop.permute.xlu1 %344  ;;  %v343_v48 = vpop.permute.xlu0 %342  ;;  %v632_v49 = vpack.c.bf16 %v341_v42, %v339_v44  ;;  %v631_v50 = vpack.c.bf16 %v340_v41, %v338_v43 }
  0x98   : > { %724 = vmatprep.subr.bf16.mxu0 %v632_v49  ;;  %677 = vperm.xlu1 %2602, %v297_v51  }
  0x99   : > { %725 = vmatpush1.bf16.msra.mxu0 %v631_v50  ;;  %682 = vperm.xlu0 %2601, %v298_v52  }
  0x9a   : > { %v353_v55 = vpop.permute.xlu1 %352  ;;  %v351_v56 = vpop.permute.xlu0 %350 }
  0x9b   : > { %v360_v57 = vsel %vm358_vm1, %v345_v47, %v353_v55  ;;  %v364_v58 = vsel %vm358_vm1, %v353_v55, %v345_v47  ;;  %v359_v59 = vsel %vm358_vm1, %v343_v48, %v351_v56  ;;  %v363_v60 = vsel %vm358_vm1, %v351_v56, %v343_v48 }
  0x9c   : > { %v377_v61 = vmul.f32 %v2949_v53, %v364_v58  ;;  %v378_v62 = vmul.f32 %v2952_v54, %v360_v57  ;;  %v375_v63 = vmul.f32 %v2949_v53, %v363_v60  ;;  %v376_v8 = vmul.f32 %v2952_v54, %v359_v59 }
  0x9d   : > { %v451_v55 = vsub.s32 3, %v2866_v10 }
  0x9e   : > { %v349_v9 = vpop.permute.xlu1 %348  ;;  %v347_v12 = vpop.permute.xlu0 %346  ;;  %v634_v15 = vpack.c.bf16 %v378_v62, %v376_v8  ;;  %v633_v16 = vpack.c.bf16 %v377_v61, %v375_v63 }
  0xa0   : > { %726 = vmatprep.subr.bf16.mxu0 %v634_v15 }
  0xa1   : > { %727 = vmatpush1.bf16.msra.mxu0 %v633_v16  ;;  %v3013_v16 = vrot.slane %v2888_v14, %v451_v55 }
  0xa2   : > { %v357_v18 = vpop.permute.xlu1 %356  ;;  %v355_v20 = vpop.permute.xlu0 %354 }
  0xa3   : > { %v362_v22 = vsel %vm358_vm1, %v349_v9, %v357_v18  ;;  %v366_v24 = vsel %vm358_vm1, %v357_v18, %v349_v9  ;;  %v361_v25 = vsel %vm358_vm1, %v347_v12, %v355_v20  ;;  %v365_v26 = vsel %vm358_vm1, %v355_v20, %v347_v12 }
  0xa4   : > { %v381_v27 = vmul.f32 %v2949_v53, %v366_v24  ;;  %v382_v28 = vmul.f32 %v2952_v54, %v362_v22  ;;  %v379_v29 = vmul.f32 %v2949_v53, %v365_v26  ;;  %v380_v30 = vmul.f32 %v2952_v54, %v361_v25 }
  0xa5   : > { %v3016_v18 = vrot.slane %v2882_v13, %v451_v55 }
  0xa6   : > { %v386_v31 = vpop.permute.xlu1 %385  ;;  %v384_v32 = vpop.permute.xlu0 %383  ;;  %v636_v33 = vpack.c.bf16 %v382_v28, %v380_v30  ;;  %v635_v34 = vpack.c.bf16 %v381_v27, %v379_v29 }
  0xa8   : > { %728 = vmatprep.subr.bf16.mxu0 %v636_v33 }
  0xa9   : > { %729 = vmatpush1.bf16.msra.mxu0 %v635_v34 }
  0xaa   : > { %v394_v37 = vpop.permute.xlu1 %393  ;;  %v392_v38 = vpop.permute.xlu0 %391 }
  0xab   : > { %v401_v39 = vsel %vm399_vm2, %v386_v31, %v394_v37  ;;  %v405_v40 = vsel %vm399_vm2, %v394_v37, %v386_v31  ;;  %v400_v41 = vsel %vm399_vm2, %v384_v32, %v392_v38  ;;  %v404_v42 = vsel %vm399_vm2, %v392_v38, %v384_v32 }
  0xac   : > { %v418_v43 = vmul.f32 %v2981_v35, %v405_v40  ;;  %v419_v44 = vmul.f32 %v2984_v36, %v401_v39  ;;  %v416_v45 = vmul.f32 %v2981_v35, %v404_v42  ;;  %v417_v46 = vmul.f32 %v2984_v36, %v400_v41 }
  0xad   : > { %v492_v39 = vsub.s32 5, %v2866_v10 }
  0xae   : > { %v390_v47 = vpop.permute.xlu1 %389  ;;  %v388_v48 = vpop.permute.xlu0 %387  ;;  %v638_v49 = vpack.c.bf16 %v419_v44, %v417_v46  ;;  %v637_v50 = vpack.c.bf16 %v418_v43, %v416_v45 }
  0xaf   : > { %v3047_v55 = vrot.slane %v2882_v13, %v492_v39 }
  0xb0   : > { %730 = vmatprep.subr.bf16.mxu0 %v638_v49 }
  0xb1   : > { %731 = vmatpush1.bf16.msra.mxu0 %v637_v50 }
  0xb2   : > { %v398_v51 = vpop.permute.xlu1 %397  ;;  %v396_v52 = vpop.permute.xlu0 %395 }
  0xb3   : > { %v403_v56 = vsel %vm399_vm2, %v390_v47, %v398_v51  ;;  %v407_v57 = vsel %vm399_vm2, %v398_v51, %v390_v47  ;;  %v402_v58 = vsel %vm399_vm2, %v388_v48, %v396_v52  ;;  %v406_v59 = vsel %vm399_vm2, %v396_v52, %v388_v48 }
  0xb4   : > { %v422_v60 = vmul.f32 %v2981_v35, %v407_v57  ;;  %v423_v61 = vmul.f32 %v2984_v36, %v403_v56  ;;  %v420_v62 = vmul.f32 %v2981_v35, %v406_v59  ;;  %v421_v63 = vmul.f32 %v2984_v36, %v402_v58 }
  0xb5   : > { %v646_v52 = vpack.c.bf16 %v2742_v2, %v2732_v0  ;;  %v645_v56 = vpack.c.bf16 %v2745_v3, %v2735_v1  ;;  %v3052_v57 = vrot.slane %v2888_v14, %v492_v39 }
  0xb6   : > { %v427_v8 = vpop.permute.xlu1 %426  ;;  %v425_v9 = vpop.permute.xlu0 %424  ;;  %v640_v12 = vpack.c.bf16 %v423_v61, %v421_v63  ;;  %v639_v15 = vpack.c.bf16 %v422_v60, %v420_v62  ;;  %v648_v60 = vpack.c.bf16 %v2758_v6, %v2761_v7  ;;  %v647_v6 = vpack.c.bf16 %v2748_v4, %v2751_v5 }
  0xb8   : > { %732 = vmatprep.subr.bf16.mxu0 %v640_v12 }
  0xb9   : > { %733 = vmatpush1.bf16.msra.mxu0 %v639_v15 }
  0xba   : > { %v435_v20 = vpop.permute.xlu1 %434  ;;  %v433_v21 = vpop.permute.xlu0 %432 }
  0xbb   : > { %v442_v22 = vsel %vm440_vm3, %v427_v8, %v435_v20  ;;  %v446_v24 = vsel %vm440_vm3, %v435_v20, %v427_v8  ;;  %v441_v25 = vsel %vm440_vm3, %v425_v9, %v433_v21  ;;  %v445_v26 = vsel %vm440_vm3, %v433_v21, %v425_v9 }
  0xbc   : > { %v459_v27 = vmul.f32 %v3013_v16, %v446_v24  ;;  %v460_v28 = vmul.f32 %v3016_v18, %v442_v22  ;;  %v457_v29 = vmul.f32 %v3013_v16, %v445_v26  ;;  %v458_v30 = vmul.f32 %v3016_v18, %v441_v25 }
  0xbd   : > { %v533_v22 = vsub.s32 6, %v2866_v10 }
  0xbe   : > { %v431_v31 = vpop.permute.xlu1 %430  ;;  %v429_v32 = vpop.permute.xlu0 %428  ;;  %v642_v33 = vpack.c.bf16 %v460_v28, %v458_v30  ;;  %v641_v34 = vpack.c.bf16 %v459_v27, %v457_v29 }
  0xc0   : > { %734 = vmatprep.subr.bf16.mxu0 %v642_v33 }
  0xc1   : > { %735 = vmatpush1.bf16.msra.mxu0 %v641_v34  ;;  %v3085_v34 = vrot.slane %v2888_v14, %v533_v22 }
  0xc2   : > { %v439_v37 = vpop.permute.xlu1 %438  ;;  %v437_v38 = vpop.permute.xlu0 %436 }
  0xc3   : > { %v444_v40 = vsel %vm440_vm3, %v431_v31, %v439_v37  ;;  %v448_v41 = vsel %vm440_vm3, %v439_v37, %v431_v31  ;;  %v443_v42 = vsel %vm440_vm3, %v429_v32, %v437_v38  ;;  %v447_v43 = vsel %vm440_vm3, %v437_v38, %v429_v32 }
  0xc4   : > { %v463_v44 = vmul.f32 %v3013_v16, %v448_v41  ;;  %v464_v45 = vmul.f32 %v3016_v18, %v444_v40  ;;  %v461_v46 = vmul.f32 %v3013_v16, %v447_v43  ;;  %v462_v47 = vmul.f32 %v3016_v18, %v443_v42 }
  0xc5   : > { %v3088_v37 = vrot.slane %v2882_v13, %v533_v22 }
  0xc6   : > { %v468_v48 = vpop.permute.xlu1 %467  ;;  %v466_v49 = vpop.permute.xlu0 %465  ;;  %v644_v50 = vpack.c.bf16 %v464_v45, %v462_v47  ;;  %v643_v51 = vpack.c.bf16 %v463_v44, %v461_v46 }
  0xc8   : > { %736 = vmatprep.subr.bf16.mxu0 %v644_v50 }
  0xc9   : > { %737 = vmatpush1.bf16.msra.mxu0 %v643_v51 }
  0xca   : > { %v476_v58 = vpop.permute.xlu1 %475  ;;  %v474_v59 = vpop.permute.xlu0 %473  ;;  %738 = vmatprep.subr.bf16.mxu0 %v646_v52 }
  0xcb   : > { %v483_v0 = vsel %vm481_vm4, %v468_v48, %v476_v58  ;;  %v487_v2 = vsel %vm481_vm4, %v476_v58, %v468_v48  ;;  %v482_v61 = vsel %vm481_vm4, %v466_v49, %v474_v59  ;;  %v486_v1 = vsel %vm481_vm4, %v474_v59, %v466_v49 }
  0xcc   : > { %v501_v3 = vmul.f32 %v3047_v55, %v487_v2  ;;  %v499_v62 = vmul.f32 %v3047_v55, %v486_v1  ;;  %v500_v7 = vmul.f32 %v3052_v57, %v483_v0  ;;  %v498_v63 = vmul.f32 %v3052_v57, %v482_v61 }
  0xcd   : > { %739 = vmatpush1.bf16.msra.mxu0 %v645_v56  ;;  %v574_v58 = vsub.s32 7, %v2866_v10 }
  0xce   : > { %v472_v8 = vpop.permute.xlu1 %471  ;;  %v470_v9 = vpop.permute.xlu0 %469  ;;  %740 = vmatprep.subr.bf16.mxu0 %v648_v60  ;;  %v650_v12 = vpack.c.bf16 %v501_v3, %v499_v62  ;;  %v649_v21 = vpack.c.bf16 %v500_v7, %v498_v63 }
  0xd1   : > { %741 = vmatpush1.bf16.msra.mxu0 %v647_v6 }
  0xd2   : > { %v480_v15 = vpop.permute.xlu1 %479  ;;  %v478_v20 = vpop.permute.xlu0 %477  ;;  %742 = vmatprep.subr.bf16.mxu0 %v650_v12 }
  0xd3   : > { %v485_v24 = vsel %vm481_vm4, %v472_v8, %v480_v15  ;;  %v489_v4 = vsel %vm481_vm4, %v480_v15, %v472_v8  ;;  %v484_v5 = vsel %vm481_vm4, %v470_v9, %v478_v20  ;;  %v488_v25 = vsel %vm481_vm4, %v478_v20, %v470_v9 }
  0xd4   : > { %v504_v26 = vmul.f32 %v3052_v57, %v485_v24  ;;  %v505_v27 = vmul.f32 %v3047_v55, %v489_v4  ;;  %v502_v28 = vmul.f32 %v3052_v57, %v484_v5  ;;  %v503_v29 = vmul.f32 %v3047_v55, %v488_v25 }
  0xd5   : > { %743 = vmatpush1.bf16.msra.mxu0 %v649_v21  ;;  %v3117_v8 = vrot.slane %v2888_v14, %v574_v58  ;;  %v3120_v9 = vrot.slane %v2882_v13, %v574_v58 }
  0xd6   : > { %v509_v30 = vpop.permute.xlu1 %508  ;;  %v507_v31 = vpop.permute.xlu0 %506  ;;  %v652_v32 = vpack.c.bf16 %v505_v27, %v503_v29  ;;  %v651_v33 = vpack.c.bf16 %v504_v26, %v502_v28 }
  0xd8   : > { %744 = vmatprep.subr.bf16.mxu0 %v652_v32 }
  0xd9   : > { %745 = vmatpush1.bf16.msra.mxu0 %v651_v33 }
  0xda   : > { %v517_v38 = vpop.permute.xlu1 %516  ;;  %v515_v39 = vpop.permute.xlu0 %514 }
  0xdb   : > { %v524_v40 = vsel %vm522_vm5, %v509_v30, %v517_v38  ;;  %v528_v41 = vsel %vm522_vm5, %v517_v38, %v509_v30  ;;  %v523_v42 = vsel %vm522_vm5, %v507_v31, %v515_v39  ;;  %v527_v43 = vsel %vm522_vm5, %v515_v39, %v507_v31 }
  0xdc   : > { %v541_v44 = vmul.f32 %v3085_v34, %v524_v40  ;;  %v542_v45 = vmul.f32 %v3088_v37, %v528_v41  ;;  %v539_v46 = vmul.f32 %v3085_v34, %v523_v42  ;;  %v540_v47 = vmul.f32 %v3088_v37, %v527_v43 }
  0xde   : > { %v513_v48 = vpop.permute.xlu1 %512  ;;  %v511_v49 = vpop.permute.xlu0 %510  ;;  %v654_v50 = vpack.c.bf16 %v542_v45, %v540_v47  ;;  %v653_v51 = vpack.c.bf16 %v541_v44, %v539_v46  ;;  %v2603_v47 = vld [vmem:[%s4580_s2] ss:$12 sps:$4 sm:$0xff]  }
  0xe0   : > { %746 = vmatprep.subr.bf16.mxu0 %v654_v50  ;;  %v2606_v50 = vld [vmem:[%s4580_s2 + $0x1c] ss:$12 sps:$4 sm:$0xff]  }
  0xe1   : > { %747 = vmatpush1.bf16.msra.mxu0 %v653_v51 }
  0xe2   : > { %v521_v52 = vpop.permute.xlu1 %520  ;;  %v519_v56 = vpop.permute.xlu0 %518 }
  0xe3   : > { %v526_v59 = vsel %vm522_vm5, %v513_v48, %v521_v52  ;;  %v530_v60 = vsel %vm522_vm5, %v521_v52, %v513_v48  ;;  %v525_v0 = vsel %vm522_vm5, %v511_v49, %v519_v56  ;;  %v529_v2 = vsel %vm522_vm5, %v519_v56, %v511_v49  ;;  %v3153_v48 = vld [vmem:[%s4578_s0 + $0x10] ss:$0 sm:$0xff]  ;;  %v3158_v49 = vld [vmem:[%s4578_s0 + $0x18] ss:$0 sm:$0xff] }
  0xe4   : > { %v545_v61 = vmul.f32 %v3085_v34, %v526_v59  ;;  %v546_v1 = vmul.f32 %v3088_v37, %v530_v60  ;;  %v543_v3 = vmul.f32 %v3085_v34, %v525_v0  ;;  %v544_v10 = vmul.f32 %v3088_v37, %v529_v2 }
  0xe6   : > { %v550_v62 = vpop.permute.xlu1 %549  ;;  %v548_v6 = vpop.permute.xlu0 %547  ;;  %v656_v7 = vpack.c.bf16 %v546_v1, %v544_v10  ;;  %v655_v63 = vpack.c.bf16 %v545_v61, %v543_v3 }
  0xe8   : > { %748 = vmatprep.subr.bf16.mxu0 %v656_v7  ;;  %v2608_v7 = vld [vmem:[%s4580_s2 + $0x18] ss:$12 sps:$4 sm:$0xff]  }
  0xe9   : > { %749 = vmatpush1.bf16.msra.mxu0 %v655_v63 }
  0xea   : > { %v558_v12 = vpop.permute.xlu1 %557  ;;  %v556_v15 = vpop.permute.xlu0 %555 }
  0xeb   : > { %v565_v20 = vsel %vm563_vm6, %v550_v62, %v558_v12  ;;  %v569_v21 = vsel %vm563_vm6, %v558_v12, %v550_v62  ;;  %v564_v22 = vsel %vm563_vm6, %v548_v6, %v556_v15  ;;  %v568_v24 = vsel %vm563_vm6, %v556_v15, %v548_v6 }
  0xec   : > { %v582_v14 = vmul.f32 %v3117_v8, %v565_v20  ;;  %v583_v13 = vmul.f32 %v3120_v9, %v569_v21  ;;  %v580_v4 = vmul.f32 %v3117_v8, %v564_v22  ;;  %v581_v5 = vmul.f32 %v3120_v9, %v568_v24 }
  0xee   : > { %v554_v25 = vpop.permute.xlu1 %553  ;;  %v552_v26 = vpop.permute.xlu0 %551  ;;  %v658_v27 = vpack.c.bf16 %v583_v13, %v581_v5  ;;  %v657_v28 = vpack.c.bf16 %v582_v14, %v580_v4 }
  0xf0   : > { %750 = vmatprep.subr.bf16.mxu0 %v658_v27  ;;  %v2610_v27 = vld [vmem:[%s4580_s2 + $0x20] ss:$12 sps:$4 sm:$0xff]  }
  0xf1   : > { %751 = vmatpush1.bf16.msra.mxu0 %v657_v28 }
  0xf2   : > { %v562_v29 = vpop.permute.xlu1 %561  ;;  %v560_v30 = vpop.permute.xlu0 %559 }
  0xf3   : > { %v567_v31 = vsel %vm563_vm6, %v554_v25, %v562_v29  ;;  %v571_v32 = vsel %vm563_vm6, %v562_v29, %v554_v25  ;;  %v566_v33 = vsel %vm563_vm6, %v552_v26, %v560_v30  ;;  %v570_v38 = vsel %vm563_vm6, %v560_v30, %v552_v26  ;;  %v2609_v26 = vld [vmem:[%s4580_s2 + $0x8] ss:$12 sps:$4 sm:$0xff]  }
  0xf4   : > { %v586_v39 = vmul.f32 %v3117_v8, %v567_v31  ;;  %v587_v40 = vmul.f32 %v3120_v9, %v571_v32  ;;  %v584_v41 = vmul.f32 %v3117_v8, %v566_v33  ;;  %v585_v42 = vmul.f32 %v3120_v9, %v570_v38 }
  0xf6   : > { %v591_v43 = vpop.permute.xlu1 %590  ;;  %v589_v44 = vpop.permute.xlu0 %588  ;;  %v660_v45 = vpack.c.bf16 %v587_v40, %v585_v42  ;;  %v659_v46 = vpack.c.bf16 %v586_v39, %v584_v41 }
  0xf8   : > { %752 = vmatprep.subr.bf16.mxu0 %v660_v45 }
  0xf9   : > { %753 = vmatpush1.bf16.msra.mxu0 %v659_v46 }
  0xfa   : > { %v599_v51 = vpop.permute.xlu1 %598  ;;  %v597_v52 = vpop.permute.xlu0 %596 }
  0xfb   : > { %v606_v56 = vsel %vm604_vm7, %v591_v43, %v599_v51  ;;  %v610_v58 = vsel %vm604_vm7, %v599_v51, %v591_v43  ;;  %v605_v59 = vsel %vm604_vm7, %v589_v44, %v597_v52  ;;  %v609_v60 = vsel %vm604_vm7, %v597_v52, %v589_v44 }
  0xfc   : > { %v623_v0 = vmul.f32 %v3153_v48, %v606_v56  ;;  %v624_v2 = vmul.f32 %v3158_v49, %v610_v58  ;;  %v621_v61 = vmul.f32 %v3153_v48, %v605_v59  ;;  %v622_v1 = vmul.f32 %v3158_v49, %v609_v60  ;;  %755 = vmatmul.mubr.bf16.vlgmr.msra.gmra.mrb[0].mxu0 %v2603_v47 }
  0xfd   : > { %764 = vmatprep.mubr.bf16.mxu0 %v2606_v50 }
  0xfe   : > { %v661_v3 = vpack.c.bf16 %v623_v0, %v621_v61  ;;  %v595_v10 = vpop.permute.xlu1 %594  ;;  %v593_v62 = vpop.permute.xlu0 %592  ;;  %v662_v6 = vpack.c.bf16 %v624_v2, %v622_v1 }
 0x100   : > { %775 = vmatprep.subr.bf16.mxu0 %v662_v6 }
 0x101   : > { %776 = vmatpush1.bf16.msra.mxu0 %v661_v3 }
 0x102   : > { %v603_v63 = vpop.permute.xlu1 %602  ;;  %v601_v12 = vpop.permute.xlu0 %600 }
 0x103   : > { %v608_v15 = vsel %vm604_vm7, %v595_v10, %v603_v63  ;;  %v612_v20 = vsel %vm604_vm7, %v603_v63, %v595_v10  ;;  %v607_v21 = vsel %vm604_vm7, %v593_v62, %v601_v12  ;;  %v611_v22 = vsel %vm604_vm7, %v601_v12, %v593_v62  ;;  %v2613_v10 = vld [vmem:[%s4580_s2 + $0x34] ss:$12 sps:$4 sm:$0xff]  }
 0x104   : > { %v627_v24 = vmul.f32 %v3153_v48, %v608_v15  ;;  %v628_v14 = vmul.f32 %v3158_v49, %v612_v20  ;;  %v625_v13 = vmul.f32 %v3153_v48, %v607_v21  ;;  %v626_v4 = vmul.f32 %v3158_v49, %v611_v22  ;;  %765 = vmatmul.mubr.bf16.gmra.mrb[4].mxu0 %v2608_v7  ;;  %v2448_v20 = vld [vmem:[%s4581_s3 + $0x20] sm:$0xff]  ;;  %v2449_v22 = vld [vmem:[%s4581_s3 + $0x28] sm:$0xff] }
 0x105   : > { %807 = vmatprep.mubr.bf16.mxu0 %v4583_v23  ;;  %1230 = vmatprep.mubr.bf16.mxu1 %v2613_v10 }
 0x106   : > { %v663_v5 = vpack.c.bf16 %v627_v24, %v625_v13  ;;  %v664_v25 = vpack.c.bf16 %v628_v14, %v626_v4  ;;  %v2450_v14 = vld [vmem:[%s4581_s3 + $0x30] sm:$0xff]  ;;  %v2451_v4 = vld [vmem:[%s4581_s3 + $0x38] sm:$0xff] }
 0x108   : > { %777 = vmatprep.subr.bf16.mxu0 %v664_v25 }
 0x109   : > { %778 = vmatpush1.bf16.msra.mxu0 %v663_v5 }
 0x10c   : > { %2438 = vmatmul.mubr.msk.bf16.vlgmr.msra.gmra.mrb[0].mxu0 %vm715_vm8, %v2609_v26 }
 0x10d   : > { %817 = vmatprep.mubr.bf16.mxu0 %v4583_v23 }
 0x113   : > { %v673_v32 = vpop.permute.xlu1 %672 }
 0x114   : > { %2439 = vmatmul.mubr.msk.bf16.gmra.mrb[4].mxu0 %vm715_vm8, %v2610_v27  ;;  %v668_v28 = vpop.permute.xlu0 %667 }
 0x117   : > { %v678_v52 = vpop.permute.xlu1 %677 }
 0x118   : > { %v683_v58 = vpop.permute.xlu0 %682 }
 0x1df   : > { %v809_v29 = vpop.f32.mrb[0].mxu0 }
 0x1e0   : > { %v2504_v30 = vadd.f32 %v809_v29, %v668_v28  ;;  %v811_v31 = vpop.f32.mrb[1].mxu0 }
 0x1e1   : > { %v813_v33 = vpop.f32.mrb[2].mxu0  ;;  %v2505_v46 = vadd.f32 %v811_v31, %v668_v28 }
 0x1e2   : > { %v3200_v38 = vmax.f32 %v2504_v30, 0.0  ;;  %v2506_v39 = vadd.f32 %v813_v33, %v673_v32  ;;  %v815_v40 = vpop.f32.mrb[3].mxu0 }
 0x1e3   : > { %v2507_v47 = vadd.f32 %v815_v40, %v673_v32  ;;  %v3222_v50 = vmax.f32 %v2505_v46, 0.0 }
 0x1e4   : > { %v3202_v41 = vmax.f32 %v2506_v39, 0.0  ;;  %850 = vrot.lane.b32.xlu1 %v3200_v38, %s2669_s23 }
 0x1e5   : > { %v3226_v51 = vmax.f32 %v2507_v47, 0.0 }
 0x1e6   : > { %852 = vrot.lane.b32.xlu0 %v3202_v41, %s2669_s23 }
 0x1e7   : > { %v819_v42 = vpop.f32.mrb[4].mxu0 }
 0x1e8   : > { %v821_v43 = vpop.f32.mrb[5].mxu0  ;;  %882 = vrot.lane.b32.xlu1 %v3200_v38, %s2670_s24  ;;  %v2508_v56 = vadd.f32 %v819_v42, %v678_v52 }
 0x1e9   : > { %v823_v44 = vpop.f32.mrb[6].mxu0  ;;  %v2509_v2 = vadd.f32 %v821_v43, %v678_v52 }
 0x1ea   : > { %v825_v45 = vpop.f32.mrb[7].mxu0  ;;  %884 = vrot.lane.b32.xlu0 %v3202_v41, %s2670_s24  ;;  %v2510_v59 = vadd.f32 %v823_v44, %v683_v58  ;;  %v3242_v60 = vmax.f32 %v2508_v56, 0.0 }
 0x1eb   : > { %v2511_v61 = vadd.f32 %v825_v45, %v683_v58  ;;  %v3262_v1 = vmax.f32 %v2509_v2, 0.0 }
 0x1ec   : > { %914 = vrot.lane.b32.xlu1 %v3200_v38, %s2671_s25  ;;  %v3246_v0 = vmax.f32 %v2510_v59, 0.0 }
 0x1ed   : > { %v3266_v3 = vmax.f32 %v2511_v61, 0.0 }
 0x1ee   : > { %916 = vrot.lane.b32.xlu0 %v3202_v41, %s2671_s25 }
 0x1f0   : > { %946 = vrot.lane.b32.xlu1 %v3200_v38, %s2672_s26 }
 0x1f2   : > { %948 = vrot.lane.b32.xlu0 %v3202_v41, %s2672_s26 }
 0x1f4   : > { %978 = vrot.lane.b32.xlu1 %v3200_v38, %s2673_s27 }
 0x1f6   : > { %980 = vrot.lane.b32.xlu0 %v3202_v41, %s2673_s27 }
 0x1f8   : > { %858 = vrot.lane.b32.xlu1 %v3222_v50, %s2669_s23 }
 0x1fa   : > { %860 = vrot.lane.b32.xlu0 %v3226_v51, %s2669_s23 }
 0x1fc   : > { %890 = vrot.lane.b32.xlu1 %v3222_v50, %s2670_s24 }
 0x1fe   : > { %892 = vrot.lane.b32.xlu0 %v3226_v51, %s2670_s24 }
 0x200   : > { %922 = vrot.lane.b32.xlu1 %v3222_v50, %s2671_s25 }
 0x202   : > { %924 = vrot.lane.b32.xlu0 %v3226_v51, %s2671_s25 }
 0x204   : > { %954 = vrot.lane.b32.xlu1 %v3222_v50, %s2672_s26 }
 0x206   : > { %956 = vrot.lane.b32.xlu0 %v3226_v51, %s2672_s26 }
 0x208   : > { %854 = vrot.lane.b32.xlu1 %v3242_v60, %s2669_s23 }
 0x20a   : > { %856 = vrot.lane.b32.xlu0 %v3246_v0, %s2669_s23 }
 0x20c   : > { %886 = vrot.lane.b32.xlu1 %v3242_v60, %s2670_s24 }
 0x20e   : > { %888 = vrot.lane.b32.xlu0 %v3246_v0, %s2670_s24 }
 0x210   : > { %918 = vrot.lane.b32.xlu1 %v3242_v60, %s2671_s25 }
 0x212   : > { %920 = vrot.lane.b32.xlu0 %v3246_v0, %s2671_s25 }
 0x214   : > { %950 = vrot.lane.b32.xlu1 %v3242_v60, %s2672_s26 }
 0x216   : > { %952 = vrot.lane.b32.xlu0 %v3246_v0, %s2672_s26 }
 0x218   : > { %862 = vrot.lane.b32.xlu1 %v3262_v1, %s2669_s23 }
 0x21a   : > { %864 = vrot.lane.b32.xlu0 %v3266_v3, %s2669_s23 }
 0x21c   : > { %986 = vrot.lane.b32.xlu1 %v3222_v50, %s2673_s27 }
 0x21e   : > { %988 = vrot.lane.b32.xlu0 %v3226_v51, %s2673_s27 }
 0x220   : > { %894 = vrot.lane.b32.xlu1 %v3262_v1, %s2670_s24 }
 0x222   : > { %896 = vrot.lane.b32.xlu0 %v3266_v3, %s2670_s24 }
 0x224   : > { %926 = vrot.lane.b32.xlu1 %v3262_v1, %s2671_s25 }
 0x226   : > { %984 = vrot.lane.b32.xlu0 %v3246_v0, %s2673_s27 }
 0x228   : > { %958 = vrot.lane.b32.xlu1 %v3262_v1, %s2672_s26 }
 0x22a   : > { %928 = vrot.lane.b32.xlu0 %v3266_v3, %s2671_s25 }
 0x22c   : > { %982 = vrot.lane.b32.xlu1 %v3242_v60, %s2673_s27 }
 0x22e   : > { %1012 = vrot.lane.b32.xlu0 %v3202_v41, %s2674_s28 }
 0x230   : > { %990 = vrot.lane.b32.xlu1 %v3262_v1, %s2673_s27 }
 0x232   : > { %960 = vrot.lane.b32.xlu0 %v3266_v3, %s2672_s26 }
 0x234   : > { %1010 = vrot.lane.b32.xlu1 %v3200_v38, %s2674_s28 }
 0x236   : > { %1020 = vrot.lane.b32.xlu0 %v3226_v51, %s2674_s28 }
 0x238   : > { %1018 = vrot.lane.b32.xlu1 %v3222_v50, %s2674_s28 }
 0x23a   : > { %1016 = vrot.lane.b32.xlu0 %v3246_v0, %s2674_s28 }
 0x23c   : > { %1014 = vrot.lane.b32.xlu1 %v3242_v60, %s2674_s28 }
 0x23e   : > { %1044 = vrot.lane.b32.xlu0 %v3202_v41, %s2675_s29 }
 0x240   : > { %1022 = vrot.lane.b32.xlu1 %v3262_v1, %s2674_s28 }
 0x242   : > { %992 = vrot.lane.b32.xlu0 %v3266_v3, %s2673_s27 }
 0x244   : > { %1042 = vrot.lane.b32.xlu1 %v3200_v38, %s2675_s29 }
 0x246   : > { %1052 = vrot.lane.b32.xlu0 %v3226_v51, %s2675_s29 }
 0x248   : > { %1050 = vrot.lane.b32.xlu1 %v3222_v50, %s2675_s29 }
 0x24a   : > { %1024 = vrot.lane.b32.xlu0 %v3266_v3, %s2674_s28 }
 0x24c   : > { %1046 = vrot.lane.b32.xlu1 %v3242_v60, %s2675_s29 }
 0x24e   : > { %1048 = vrot.lane.b32.xlu0 %v3246_v0, %s2675_s29 }
 0x250   : > { %1054 = vrot.lane.b32.xlu1 %v3262_v1, %s2675_s29 }
 0x252   : > { %1056 = vrot.lane.b32.xlu0 %v3266_v3, %s2675_s29 }
 0x254   : > { %1074 = vrot.lane.b32.xlu1 %v3200_v38, %s2676_s6 }
 0x256   : > { %1076 = vrot.lane.b32.xlu0 %v3202_v41, %s2676_s6  ;;  %v851_v62 = vpop.permute.xlu1 %850 }
 0x258   : > { %v853_v6 = vpop.permute.xlu0 %852  ;;  %1082 = vrot.lane.b32.xlu1 %v3222_v50, %s2676_s6 }
 0x25a   : > { %1084 = vrot.lane.b32.xlu0 %v3226_v51, %s2676_s6  ;;  %v3339_v7 = vpop.permute.xlu1 %882 }
 0x25c   : > { %v885_v63 = vpop.permute.xlu0 %884  ;;  %1078 = vrot.lane.b32.xlu1 %v3242_v60, %s2676_s6 }
 0x25e   : > { %1080 = vrot.lane.b32.xlu0 %v3246_v0, %s2676_s6  ;;  %v3345_v12 = vpop.permute.xlu1 %914 }
 0x260   : > { %v3347_v15 = vpop.permute.xlu0 %916  ;;  %1086 = vrot.lane.b32.xlu1 %v3262_v1, %s2676_s6 }
 0x262   : > { %1088 = vrot.lane.b32.xlu0 %v3266_v3, %s2676_s6  ;;  %v3356_v21 = vpop.permute.xlu1 %946 }
 0x264   : > { %v3361_v24 = vpop.permute.xlu0 %948  ;;  %1144 = vperm.xlu1 %2602, %v2448_v20  }
 0x266   : > { %1149 = vperm.xlu0 %2601, %v2449_v22   ;;  %v3366_v13 = vpop.permute.xlu1 %978 }
 0x268   : > { %v3371_v5 = vpop.permute.xlu0 %980  ;;  %1154 = vperm.xlu1 %2602, %v2450_v14  }
 0x26a   : > { %1159 = vperm.xlu0 %2601, %v2451_v4   ;;  %v859_v25 = vpop.permute.xlu1 %858 }
 0x26b   : > { %v870_v26 = vsel %vm317_vm0, %v859_v25, %v851_v62  ;;  %v866_v27 = vsel %vm317_vm0, %v851_v62, %v859_v25 }
 0x26c   : > { %v861_v28 = vpop.permute.xlu0 %860  ;;  %v875_v32 = vmul.f32 %v866_v27, %v2891_v17  ;;  %v874_v39 = vmul.f32 %v870_v26, %v2900_v19 }
 0x26d   : > { %v871_v29 = vsel %vm317_vm0, %v861_v28, %v853_v6  ;;  %v867_v30 = vsel %vm317_vm0, %v853_v6, %v861_v28 }
 0x26e   : > { %v891_v31 = vpop.permute.xlu1 %890  ;;  %v877_v33 = vmul.f32 %v867_v30, %v2891_v17  ;;  %v876_v40 = vmul.f32 %v871_v29, %v2900_v19 }
 0x26f   : > { %v898_v25 = vsel %vm358_vm1, %v3339_v7, %v891_v31 }
 0x270   : > { %v893_v42 = vpop.permute.xlu0 %892  ;;  %v1107_v43 = vpack.c.bf16 %v877_v33, %v875_v32  ;;  %v1106_v44 = vpack.c.bf16 %v876_v40, %v874_v39 }
 0x271   : > { %v899_v20 = vsel %vm358_vm1, %v885_v63, %v893_v42  ;;  %v903_v27 = vsel %vm358_vm1, %v893_v42, %v885_v63  ;;  %v902_v63 = vsel %vm358_vm1, %v891_v31, %v3339_v7  ;;  %v907_v42 = vmul.f32 %v898_v25, %v2952_v54 }
 0x272   : > { %1198 = vmatprep.subr.bf16.mxu1 %v1107_v43  ;;  %v923_v45 = vpop.permute.xlu1 %922  ;;  %v909_v28 = vmul.f32 %v899_v20, %v2952_v54 }
 0x273   : > { %1199 = vmatpush1.bf16.msra.mxu1 %v1106_v44  ;;  %v908_v44 = vmul.f32 %v903_v27, %v2949_v53  ;;  %v930_v25 = vsel %vm399_vm2, %v3345_v12, %v923_v45 }
 0x274   : > { %v925_v46 = vpop.permute.xlu0 %924 }
 0x276   : > { %v3385_v47 = vpop.permute.xlu1 %954 }
 0x278   : > { %v3387_v52 = vpop.permute.xlu0 %956 }
 0x27a   : > { %v855_v56 = vpop.permute.xlu1 %854 }
 0x27c   : > { %v857_v58 = vpop.permute.xlu0 %856 }
 0x27e   : > { %v887_v59 = vpop.permute.xlu1 %886 }
 0x280   : > { %v889_v2 = vpop.permute.xlu0 %888 }
 0x282   : > { %v919_v61 = vpop.permute.xlu1 %918 }
 0x284   : > { %v3389_v10 = vpop.permute.xlu0 %920 }
 0x286   : > { %v3391_v62 = vpop.permute.xlu1 %950 }
 0x288   : > { %v3393_v6 = vpop.permute.xlu0 %952 }
 0x28a   : > { %v863_v22 = vpop.permute.xlu1 %862 }
 0x28b   : > { %v868_v14 = vsel %vm317_vm0, %v855_v56, %v863_v22  ;;  %v872_v4 = vsel %vm317_vm0, %v863_v22, %v855_v56  ;;  %v906_v22 = vmul.f32 %v902_v63, %v2949_v53 }
 0x28c   : > { %v865_v26 = vpop.permute.xlu0 %864  ;;  %v878_v32 = vmul.f32 %v872_v4, %v2900_v19  ;;  %v879_v33 = vmul.f32 %v868_v14, %v2891_v17  ;;  %v931_v14 = vsel %vm399_vm2, %v3347_v15, %v925_v46 }
 0x28d   : > { %v869_v29 = vsel %vm317_vm0, %v857_v58, %v865_v26  ;;  %v873_v30 = vsel %vm317_vm0, %v865_v26, %v857_v58  ;;  %v1111_v26 = vpack.c.bf16 %v909_v28, %v907_v42  ;;  %v941_v28 = vmul.f32 %v931_v14, %v2984_v36 }
 0x28e   : > { %v880_v39 = vmul.f32 %v873_v30, %v2900_v19  ;;  %v881_v40 = vmul.f32 %v869_v29, %v2891_v17  ;;  %v3415_v43 = vpop.permute.xlu1 %986  ;;  %v1110_v29 = vpack.c.bf16 %v908_v44, %v906_v22  ;;  %v935_v30 = vsel %vm399_vm2, %v925_v46, %v3347_v15 }
 0x28f   : > { %v934_v15 = vsel %vm399_vm2, %v923_v45, %v3345_v12  ;;  %v939_v46 = vmul.f32 %v930_v25, %v2984_v36  ;;  %v940_v44 = vmul.f32 %v935_v30, %v2981_v35  ;;  %v963_v14 = vsel %vm440_vm3, %v3361_v24, %v3387_v52 }
 0x290   : > { %v3422_v56 = vpop.permute.xlu0 %988  ;;  %v1109_v58 = vpack.c.bf16 %v881_v40, %v879_v33  ;;  %v1108_v20 = vpack.c.bf16 %v880_v39, %v878_v32  ;;  %v938_v22 = vmul.f32 %v934_v15, %v2981_v35 }
 0x292   : > { %1200 = vmatprep.subr.bf16.mxu1 %v1109_v58  ;;  %v895_v4 = vpop.permute.xlu1 %894  ;;  %v1114_v25 = vpack.c.bf16 %v940_v44, %v938_v22 }
 0x293   : > { %v900_v7 = vsel %vm358_vm1, %v887_v59, %v895_v4  ;;  %v904_v31 = vsel %vm358_vm1, %v895_v4, %v887_v59  ;;  %1201 = vmatpush1.bf16.msra.mxu1 %v1108_v20 }
 0x294   : > { %v897_v27 = vpop.permute.xlu0 %896  ;;  %1202 = vmatprep.subr.bf16.mxu1 %v1111_v26  ;;  %v910_v33 = vmul.f32 %v904_v31, %v2949_v53  ;;  %v911_v39 = vmul.f32 %v900_v7, %v2952_v54  ;;  %v1115_v26 = vpack.c.bf16 %v941_v28, %v939_v46  ;;  %v962_v7 = vsel %vm440_vm3, %v3356_v21, %v3385_v47 }
 0x295   : > { %v901_v32 = vsel %vm358_vm1, %v889_v2, %v897_v27  ;;  %v905_v59 = vsel %vm358_vm1, %v897_v27, %v889_v2  ;;  %v967_v27 = vsel %vm440_vm3, %v3387_v52, %v3361_v24  ;;  %v966_v24 = vsel %vm440_vm3, %v3385_v47, %v3356_v21 }
 0x296   : > { %v912_v40 = vmul.f32 %v905_v59, %v2949_v53  ;;  %v913_v63 = vmul.f32 %v901_v32, %v2952_v54  ;;  %v927_v42 = vpop.permute.xlu1 %926  ;;  %v971_v52 = vmul.f32 %v962_v7, %v3016_v18  ;;  %v970_v44 = vmul.f32 %v966_v24, %v3013_v16 }
 0x297   : > { %1203 = vmatpush1.bf16.msra.mxu1 %v1110_v29  ;;  %v932_v12 = vsel %vm399_vm2, %v919_v61, %v927_v42  ;;  %v936_v45 = vsel %vm399_vm2, %v927_v42, %v919_v61  ;;  %v973_v29 = vmul.f32 %v963_v14, %v3016_v18  ;;  %v972_v42 = vmul.f32 %v967_v27, %v3013_v16 }
 0x298   : > { %v3452_v58 = vpop.permute.xlu0 %984  ;;  %v1113_v2 = vpack.c.bf16 %v913_v63, %v911_v39  ;;  %v1112_v20 = vpack.c.bf16 %v912_v40, %v910_v33  ;;  %v942_v28 = vmul.f32 %v936_v45, %v2981_v35  ;;  %v943_v32 = vmul.f32 %v932_v12, %v2984_v36 }
 0x299   : > { %v1119_v46 = vpack.c.bf16 %v973_v29, %v971_v52  ;;  %v1118_v14 = vpack.c.bf16 %v972_v42, %v970_v44  ;;  %v1123_v29 = vpack.c.bf16 %v3226_v51, %v3222_v50  ;;  %v1122_v50 = vpack.c.bf16 %v3202_v41, %v3200_v38 }
 0x29a   : > { %1204 = vmatprep.subr.bf16.mxu1 %v1113_v2  ;;  %v959_v4 = vpop.permute.xlu1 %958  ;;  %v1124_v41 = vpack.c.bf16 %v3246_v0, %v3242_v60 }
 0x29b   : > { %1205 = vmatpush1.bf16.msra.mxu1 %v1112_v20  ;;  %v964_v2 = vsel %vm440_vm3, %v3391_v62, %v959_v4  ;;  %v968_v21 = vsel %vm440_vm3, %v959_v4, %v3391_v62 }
 0x29c   : > { %v929_v31 = vpop.permute.xlu0 %928  ;;  %1206 = vmatprep.subr.bf16.mxu1 %v1115_v26  ;;  %v974_v26 = vmul.f32 %v968_v21, %v3013_v16  ;;  %v975_v12 = vmul.f32 %v964_v2, %v3016_v18 }
 0x29d   : > { %v933_v61 = vsel %vm399_vm2, %v3389_v10, %v929_v31  ;;  %v937_v30 = vsel %vm399_vm2, %v929_v31, %v3389_v10 }
 0x29e   : > { %v944_v59 = vmul.f32 %v937_v30, %v2981_v35  ;;  %v945_v33 = vmul.f32 %v933_v61, %v2984_v36  ;;  %v983_v39 = vpop.permute.xlu1 %982  ;;  %v998_v30 = vsel %vm481_vm4, %v3415_v43, %v3366_v13 }
 0x29f   : > { %1207 = vmatpush1.bf16.msra.mxu1 %v1114_v25  ;;  %v1003_v24 = vmul.f32 %v998_v30, %v3047_v55 }
 0x2a0   : > { %v3487_v40 = vpop.permute.xlu0 %1012  ;;  %v1117_v10 = vpack.c.bf16 %v945_v33, %v943_v32  ;;  %v1116_v63 = vpack.c.bf16 %v944_v59, %v942_v28  ;;  %v995_v28 = vsel %vm481_vm4, %v3371_v5, %v3422_v56  ;;  %v1125_v59 = vpack.c.bf16 %v3266_v3, %v3262_v1 }
 0x2a1   : > { %v994_v33 = vsel %vm481_vm4, %v3366_v13, %v3415_v43  ;;  %v1004_v52 = vmul.f32 %v995_v28, %v3052_v57 }
 0x2a2   : > { %1208 = vmatprep.subr.bf16.mxu1 %v1117_v10  ;;  %v991_v15 = vpop.permute.xlu1 %990  ;;  %v1002_v1 = vmul.f32 %v994_v33, %v3052_v57 }
 0x2a3   : > { %1209 = vmatpush1.bf16.msra.mxu1 %v1116_v63  ;;  %v996_v38 = vsel %vm481_vm4, %v983_v39, %v991_v15  ;;  %v1000_v13 = vsel %vm481_vm4, %v991_v15, %v983_v39 }
 0x2a4   : > { %v961_v47 = vpop.permute.xlu0 %960  ;;  %1210 = vmatprep.subr.bf16.mxu1 %v1119_v46  ;;  %v1006_v10 = vmul.f32 %v996_v38, %v3052_v57  ;;  %v1126_v42 = vpack.c.bf16 %v1004_v52, %v1002_v1  ;;  %v1007_v46 = vmul.f32 %v1000_v13, %v3047_v55 }
 0x2a5   : > { %v965_v20 = vsel %vm440_vm3, %v3393_v6, %v961_v47  ;;  %v969_v22 = vsel %vm440_vm3, %v961_v47, %v3393_v6  ;;  %v999_v6 = vsel %vm481_vm4, %v3422_v56, %v3371_v5 }
 0x2a6   : > { %v976_v45 = vmul.f32 %v969_v22, %v3013_v16  ;;  %v977_v62 = vmul.f32 %v965_v20, %v3016_v18  ;;  %v1011_v4 = vpop.permute.xlu1 %1010  ;;  %v1005_v51 = vmul.f32 %v999_v6, %v3047_v55 }
 0x2a7   : > { %1211 = vmatpush1.bf16.msra.mxu1 %v1118_v14 }
 0x2a8   : > { %v1021_v7 = vpop.permute.xlu0 %1020  ;;  %v1121_v31 = vpack.c.bf16 %v977_v62, %v975_v12  ;;  %v1120_v25 = vpack.c.bf16 %v976_v45, %v974_v26  ;;  %v1127_v56 = vpack.c.bf16 %v1005_v51, %v1003_v24 }
 0x2a9   : > { %v1031_v60 = vsel %vm522_vm5, %v1021_v7, %v3487_v40  ;;  %v1027_v20 = vsel %vm522_vm5, %v3487_v40, %v1021_v7 }
 0x2aa   : > { %1212 = vmatprep.subr.bf16.mxu1 %v1121_v31  ;;  %v1019_v27 = vpop.permute.xlu1 %1018  ;;  %v1037_v22 = vmul.f32 %v1031_v60, %v3088_v37  ;;  %v1036_v62 = vmul.f32 %v1027_v20, %v3085_v34 }
 0x2ab   : > { %1213 = vmatpush1.bf16.msra.mxu1 %v1120_v25  ;;  %v1030_v43 = vsel %vm522_vm5, %v1019_v27, %v1011_v4  ;;  %v1026_v0 = vsel %vm522_vm5, %v1011_v4, %v1019_v27 }
 0x2ac   : > { %v1017_v61 = vpop.permute.xlu0 %1016  ;;  %1214 = vmatprep.subr.bf16.mxu1 %v1123_v29  ;;  %v1035_v44 = vmul.f32 %v1030_v43, %v3088_v37  ;;  %v1034_v14 = vmul.f32 %v1026_v0, %v3085_v34 }
 0x2ae   : > { %v1015_v32 = vpop.permute.xlu1 %1014  ;;  %v1131_v25 = vpack.c.bf16 %v1037_v22, %v1035_v44  ;;  %v1130_v29 = vpack.c.bf16 %v1036_v62, %v1034_v14  ;;  %v2611_v14 = vld [vmem:[%s4580_s2 + $0x30] ss:$12 sps:$4 sm:$0xff]  }
 0x2af   : > { %1215 = vmatpush1.bf16.msra.mxu1 %v1122_v50 }
 0x2b0   : > { %v1045_v5 = vpop.permute.xlu0 %1044  ;;  %1216 = vmatprep.subr.bf16.mxu1 %v1125_v59 }
 0x2b2   : > { %v1023_v3 = vpop.permute.xlu1 %1022 }
 0x2b3   : > { %1217 = vmatpush1.bf16.msra.mxu1 %v1124_v41  ;;  %v1028_v45 = vsel %vm522_vm5, %v1015_v32, %v1023_v3  ;;  %v1032_v4 = vsel %vm522_vm5, %v1023_v3, %v1015_v32 }
 0x2b4   : > { %v993_v63 = vpop.permute.xlu0 %992  ;;  %1218 = vmatprep.subr.bf16.mxu1 %v1127_v56  ;;  %v1038_v7 = vmul.f32 %v1028_v45, %v3085_v34  ;;  %v1039_v6 = vmul.f32 %v1032_v4, %v3088_v37 }
 0x2b5   : > { %v997_v39 = vsel %vm481_vm4, %v3452_v58, %v993_v63  ;;  %v1001_v15 = vsel %vm481_vm4, %v993_v63, %v3452_v58 }
 0x2b6   : > { %v1008_v2 = vmul.f32 %v997_v39, %v3052_v57  ;;  %v1009_v21 = vmul.f32 %v1001_v15, %v3047_v55  ;;  %v1043_v47 = vpop.permute.xlu1 %1042 }
 0x2b7   : > { %1219 = vmatpush1.bf16.msra.mxu1 %v1126_v42 }
 0x2b8   : > { %v1053_v26 = vpop.permute.xlu0 %1052  ;;  %v1129_v58 = vpack.c.bf16 %v1009_v21, %v1007_v46  ;;  %v1128_v12 = vpack.c.bf16 %v1008_v2, %v1006_v10 }
 0x2b9   : > { %v1063_v30 = vsel %vm563_vm6, %v1053_v26, %v1045_v5  ;;  %v1059_v52 = vsel %vm563_vm6, %v1045_v5, %v1053_v26 }
 0x2ba   : > { %v1051_v31 = vpop.permute.xlu1 %1050  ;;  %1220 = vmatprep.subr.bf16.mxu1 %v1129_v58  ;;  %v1069_v38 = vmul.f32 %v1063_v30, %v3120_v9  ;;  %v1068_v43 = vmul.f32 %v1059_v52, %v3117_v8 }
 0x2bb   : > { %v1062_v40 = vsel %vm563_vm6, %v1051_v31, %v1043_v47  ;;  %1221 = vmatpush1.bf16.msra.mxu1 %v1128_v12  ;;  %v1058_v51 = vsel %vm563_vm6, %v1043_v47, %v1051_v31  ;;  %v2614_v12 = vld [vmem:[%s4580_s2 + $0x4c] ss:$12 sps:$4 sm:$0xff]  }
 0x2bc   : > { %v1025_v27 = vpop.permute.xlu0 %1024  ;;  %1222 = vmatprep.subr.bf16.mxu1 %v1131_v25  ;;  %v1067_v32 = vmul.f32 %v1062_v40, %v3120_v9 }
 0x2bd   : > { %v1029_v28 = vsel %vm522_vm5, %v1017_v61, %v1025_v27  ;;  %v1033_v50 = vsel %vm522_vm5, %v1025_v27, %v1017_v61  ;;  %v1066_v61 = vmul.f32 %v1058_v51, %v3117_v8 }
 0x2be   : > { %v1040_v59 = vmul.f32 %v1029_v28, %v3085_v34  ;;  %v1041_v33 = vmul.f32 %v1033_v50, %v3088_v37  ;;  %v1047_v24 = vpop.permute.xlu1 %1046  ;;  %v1135_v13 = vpack.c.bf16 %v1069_v38, %v1067_v32  ;;  %v2616_v50 = vld [vmem:[%s4580_s2 + $0x48] ss:$12 sps:$4 sm:$0xff]  }
 0x2bf   : > { %1223 = vmatpush1.bf16.msra.mxu1 %v1130_v29  ;;  %v1134_v0 = vpack.c.bf16 %v1068_v43, %v1066_v61 }
 0x2c0   : > { %v1049_v41 = vpop.permute.xlu0 %1048  ;;  %v1133_v1 = vpack.c.bf16 %v1041_v33, %v1039_v6  ;;  %v1132_v3 = vpack.c.bf16 %v1040_v59, %v1038_v7 }
 0x2c2   : > { %v1055_v56 = vpop.permute.xlu1 %1054  ;;  %1224 = vmatprep.subr.bf16.mxu1 %v1133_v1 }
 0x2c3   : > { %v1060_v10 = vsel %vm563_vm6, %v1047_v24, %v1055_v56  ;;  %v1064_v63 = vsel %vm563_vm6, %v1055_v56, %v1047_v24  ;;  %1225 = vmatpush1.bf16.msra.mxu1 %v1132_v3  ;;  %v2617_v56 = vld [vmem:[%s4580_s2 + $0x38] ss:$12 sps:$4 sm:$0xff]  }
 0x2c4   : > { %v1057_v5 = vpop.permute.xlu0 %1056  ;;  %1226 = vmatprep.subr.bf16.mxu1 %v1135_v13  ;;  %v1070_v39 = vmul.f32 %v1060_v10, %v3117_v8  ;;  %v1071_v15 = vmul.f32 %v1064_v63, %v3120_v9 }
 0x2c5   : > { %v1061_v42 = vsel %vm563_vm6, %v1049_v41, %v1057_v5  ;;  %v1065_v60 = vsel %vm563_vm6, %v1057_v5, %v1049_v41 }
 0x2c6   : > { %v1072_v46 = vmul.f32 %v1061_v42, %v3117_v8  ;;  %v1073_v44 = vmul.f32 %v1065_v60, %v3120_v9  ;;  %v1075_v2 = vpop.permute.xlu1 %1074  ;;  %v2635_v42 = vld [vmem:[%s2729_s22] sm:$0xff] }
 0x2c7   : > { %1227 = vmatpush1.bf16.msra.mxu1 %v1134_v0 }
 0x2c8   : > { %v1077_v21 = vpop.permute.xlu0 %1076  ;;  %v1137_v47 = vpack.c.bf16 %v1073_v44, %v1071_v15  ;;  %v1136_v20 = vpack.c.bf16 %v1072_v46, %v1070_v39  ;;  %v2636_v15 = vld [vmem:[%s2729_s22 + $0x10] sm:$0xff] }
 0x2ca   : > { %v1083_v22 = vpop.permute.xlu1 %1082  ;;  %1228 = vmatprep.subr.bf16.mxu1 %v1137_v47 }
 0x2cb   : > { %v1090_v26 = vsel %vm604_vm7, %v1075_v2, %v1083_v22  ;;  %v1094_v58 = vsel %vm604_vm7, %v1083_v22, %v1075_v2  ;;  %1229 = vmatpush1.bf16.msra.mxu1 %v1136_v20 }
 0x2cc   : > { %v1085_v45 = vpop.permute.xlu0 %1084  ;;  %v1098_v31 = vmul.f32 %v3153_v48, %v1090_v26  ;;  %v1099_v25 = vmul.f32 %v3158_v49, %v1094_v58  ;;  %v2638_v58 = vld [vmem:[%s2729_s22 + $0x18] sm:$0xff] }
 0x2cd   : > { %v1091_v62 = vsel %vm604_vm7, %v1077_v21, %v1085_v45  ;;  %v1095_v4 = vsel %vm604_vm7, %v1085_v45, %v1077_v21 }
 0x2ce   : > { %v1100_v40 = vmul.f32 %v3153_v48, %v1091_v62  ;;  %v1101_v7 = vmul.f32 %v3158_v49, %v1095_v4  ;;  %v1079_v27 = vpop.permute.xlu1 %1078  ;;  %1231 = vmatmul.mubr.bf16.vlgmr.msra.gmra.mrb[0].mxu1 %v2611_v14  ;;  %v2637_v14 = vld [vmem:[%s2729_s22 + $0x8] sm:$0xff] }
 0x2cf   : > { %1240 = vmatprep.mubr.bf16.mxu1 %v2614_v12 }
 0x2d0   : > { %v1138_v29 = vpack.c.bf16 %v1100_v40, %v1098_v31  ;;  %v1081_v6 = vpop.permute.xlu0 %1080  ;;  %v1139_v30 = vpack.c.bf16 %v1101_v7, %v1099_v25  ;;  %v2639_v25 = vld [vmem:[%s2729_s22 + $0x20] sm:$0xff]  ;;  %v2640_v7 = vld [vmem:[%s2729_s22 + $0x30] sm:$0xff] }
 0x2d2   : > { %v1087_v28 = vpop.permute.xlu1 %1086  ;;  %1251 = vmatprep.subr.bf16.mxu1 %v1139_v30  ;;  %v2641_v30 = vld [vmem:[%s2729_s22 + $0x28] sm:$0xff] }
 0x2d3   : > { %v1092_v51 = vsel %vm604_vm7, %v1079_v27, %v1087_v28  ;;  %v1096_v32 = vsel %vm604_vm7, %v1087_v28, %v1079_v27  ;;  %1252 = vmatpush1.bf16.msra.mxu1 %v1138_v29 }
 0x2d4   : > { %v1089_v59 = vpop.permute.xlu0 %1088  ;;  %v1102_v52 = vmul.f32 %v3153_v48, %v1092_v51  ;;  %v1103_v38 = vmul.f32 %v3158_v49, %v1096_v32  ;;  %v2621_v32 = vld [vmem:[%s4580_s2 + $0x64] ss:$12 sps:$4 sm:$0xff]  }
 0x2d5   : > { %v1093_v33 = vsel %vm604_vm7, %v1081_v6, %v1089_v59  ;;  %v1097_v24 = vsel %vm604_vm7, %v1089_v59, %v1081_v6  ;;  %1706 = vmatprep.mubr.bf16.mxu0 %v2621_v32 }
 0x2d6   : > { %v1104_v41 = vmul.f32 %v3153_v48, %v1093_v33  ;;  %v1105_v1 = vmul.f32 %v3158_v49, %v1097_v24  ;;  %1241 = vmatmul.mubr.bf16.gmra.mrb[4].mxu1 %v2616_v50  ;;  %v2618_v48 = vld [vmem:[%s4580_s2 + $0x50] ss:$12 sps:$4 sm:$0xff]  }
 0x2d7   : > { %1283 = vmatprep.mubr.bf16.mxu1 %v4583_v23  ;;  %v2642_v50 = vld [vmem:[%s2729_s22 + $0x38] sm:$0xff] }
 0x2d8   : > { %v1140_v3 = vpack.c.bf16 %v1104_v41, %v1102_v52  ;;  %v1141_v61 = vpack.c.bf16 %v1105_v1, %v1103_v38  ;;  %v2468_v1 = vld [vmem:[%s4581_s3 + $0x40] sm:$0xff] }
 0x2da   : > { %1253 = vmatprep.subr.bf16.mxu1 %v1141_v61  ;;  %v2469_v61 = vld [vmem:[%s4581_s3 + $0x48] sm:$0xff] }
 0x2db   : > { %1254 = vmatpush1.bf16.msra.mxu1 %v1140_v3 }
 0x2de   : > { %2458 = vmatmul.mubr.msk.bf16.vlgmr.msra.gmra.mrb[0].mxu1 %vm715_vm8, %v2617_v56 }
 0x2df   : > { %1293 = vmatprep.mubr.bf16.mxu1 %v4583_v23 }
 0x2e3   : > { %v1145_v49 = vpop.permute.xlu1 %1144 }
 0x2e5   : > { %v1150_v63 = vpop.permute.xlu0 %1149 }
 0x2e6   : > { %2459 = vmatmul.mubr.msk.bf16.gmra.mrb[4].mxu1 %vm715_vm8, %v2618_v48  ;;  %v2470_v48 = vld [vmem:[%s4581_s3 + $0x50] sm:$0xff] }
 0x2e7   : > { %v1155_v45 = vpop.permute.xlu1 %1154 }
 0x2e9   : > { %v1160_v4 = vpop.permute.xlu0 %1159 }
 0x3b1   : > { %v1285_v13 = vpop.f32.mrb[0].mxu1 }
 0x3b2   : > { %v2512_v43 = vadd.f32 %v1285_v13, %v1145_v49  ;;  %v1287_v10 = vpop.f32.mrb[1].mxu1  ;;  %v2471_v13 = vld [vmem:[%s4581_s3 + $0x58] sm:$0xff] }
 0x3b3   : > { %v1289_v5 = vpop.f32.mrb[2].mxu1  ;;  %v2513_v20 = vadd.f32 %v1287_v10, %v1145_v49 }
 0x3b4   : > { %v3643_v60 = vadd.f32 %v2635_v42, %v2512_v43  ;;  %v2514_v0 = vadd.f32 %v1289_v5, %v1150_v63  ;;  %v1291_v39 = vpop.f32.mrb[3].mxu1 }
 0x3b5   : > { %v2515_v22 = vadd.f32 %v1291_v39, %v1150_v63  ;;  %v3667_v26 = vadd.f32 %v2637_v14, %v2513_v20 }
 0x3b6   : > { %v3646_v46 = vadd.f32 %v2636_v15, %v2514_v0  ;;  %1326 = vrot.lane.b32.xlu1 %v3643_v60, %s2669_s23 }
 0x3b7   : > { %v3672_v12 = vadd.f32 %v2638_v58, %v2515_v22 }
 0x3b8   : > { %1328 = vrot.lane.b32.xlu0 %v3646_v46, %s2669_s23 }
 0x3b9   : > { %v1295_v44 = vpop.f32.mrb[4].mxu1 }
 0x3ba   : > { %v1297_v2 = vpop.f32.mrb[5].mxu1  ;;  %1358 = vrot.lane.b32.xlu1 %v3643_v60, %s2670_s24  ;;  %v2516_v62 = vadd.f32 %v1295_v44, %v1155_v45 }
 0x3bb   : > { %v1299_v21 = vpop.f32.mrb[6].mxu1  ;;  %v2517_v29 = vadd.f32 %v1297_v2, %v1155_v45 }
 0x3bc   : > { %v1301_v47 = vpop.f32.mrb[7].mxu1  ;;  %1360 = vrot.lane.b32.xlu0 %v3646_v46, %s2670_s24  ;;  %v2518_v31 = vadd.f32 %v1299_v21, %v1160_v4  ;;  %v3689_v40 = vadd.f32 %v2639_v25, %v2516_v62 }
 0x3bd   : > { %v2519_v6 = vadd.f32 %v1301_v47, %v1160_v4  ;;  %v3711_v28 = vadd.f32 %v2641_v30, %v2517_v29 }
 0x3be   : > { %1390 = vrot.lane.b32.xlu1 %v3643_v60, %s2671_s25  ;;  %4589 = vst [vmem:[#allocation2_spill] sm:$0xff] %v3689_v40  ;;  %v3694_v27 = vadd.f32 %v2640_v7, %v2518_v31 }
 0x3bf   : > { %4591 = vst [vmem:[#allocation4_spill] sm:$0xff] %v3711_v28  ;;  %v3716_v51 = vadd.f32 %v2642_v50, %v2519_v6 }
 0x3c0   : > { %1392 = vrot.lane.b32.xlu0 %v3646_v46, %s2671_s25  ;;  %4590 = vst [vmem:[#allocation3_spill] sm:$0xff] %v3694_v27 }
 0x3c1   : > { %4592 = vst [vmem:[#allocation5_spill] sm:$0xff] %v3716_v51 }
 0x3c2   : > { %1422 = vrot.lane.b32.xlu1 %v3643_v60, %s2672_s26 }
 0x3c4   : > { %1424 = vrot.lane.b32.xlu0 %v3646_v46, %s2672_s26 }
 0x3c6   : > { %1454 = vrot.lane.b32.xlu1 %v3643_v60, %s2673_s27 }
 0x3c8   : > { %1456 = vrot.lane.b32.xlu0 %v3646_v46, %s2673_s27 }
 0x3ca   : > { %1334 = vrot.lane.b32.xlu1 %v3667_v26, %s2669_s23 }
 0x3cc   : > { %1336 = vrot.lane.b32.xlu0 %v3672_v12, %s2669_s23 }
 0x3ce   : > { %1366 = vrot.lane.b32.xlu1 %v3667_v26, %s2670_s24 }
 0x3d0   : > { %1368 = vrot.lane.b32.xlu0 %v3672_v12, %s2670_s24 }
 0x3d2   : > { %1398 = vrot.lane.b32.xlu1 %v3667_v26, %s2671_s25 }
 0x3d4   : > { %1400 = vrot.lane.b32.xlu0 %v3672_v12, %s2671_s25 }
 0x3d6   : > { %1430 = vrot.lane.b32.xlu1 %v3667_v26, %s2672_s26 }
 0x3d8   : > { %1432 = vrot.lane.b32.xlu0 %v3672_v12, %s2672_s26 }
 0x3da   : > { %1330 = vrot.lane.b32.xlu1 %v3689_v40, %s2669_s23 }
 0x3dc   : > { %1332 = vrot.lane.b32.xlu0 %v3694_v27, %s2669_s23 }
 0x3de   : > { %1362 = vrot.lane.b32.xlu1 %v3689_v40, %s2670_s24 }
 0x3e0   : > { %1364 = vrot.lane.b32.xlu0 %v3694_v27, %s2670_s24 }
 0x3e2   : > { %1394 = vrot.lane.b32.xlu1 %v3689_v40, %s2671_s25 }
 0x3e4   : > { %1396 = vrot.lane.b32.xlu0 %v3694_v27, %s2671_s25 }
 0x3e6   : > { %1426 = vrot.lane.b32.xlu1 %v3689_v40, %s2672_s26 }
 0x3e8   : > { %1428 = vrot.lane.b32.xlu0 %v3694_v27, %s2672_s26 }
 0x3ea   : > { %1338 = vrot.lane.b32.xlu1 %v3711_v28, %s2669_s23 }
 0x3ec   : > { %1340 = vrot.lane.b32.xlu0 %v3716_v51, %s2669_s23 }
 0x3ee   : > { %1462 = vrot.lane.b32.xlu1 %v3667_v26, %s2673_s27 }
 0x3f0   : > { %1464 = vrot.lane.b32.xlu0 %v3672_v12, %s2673_s27 }
 0x3f2   : > { %1370 = vrot.lane.b32.xlu1 %v3711_v28, %s2670_s24 }
 0x3f4   : > { %1372 = vrot.lane.b32.xlu0 %v3716_v51, %s2670_s24 }
 0x3f6   : > { %1402 = vrot.lane.b32.xlu1 %v3711_v28, %s2671_s25 }
 0x3f8   : > { %1460 = vrot.lane.b32.xlu0 %v3694_v27, %s2673_s27 }
 0x3fa   : > { %1434 = vrot.lane.b32.xlu1 %v3711_v28, %s2672_s26 }
 0x3fc   : > { %1404 = vrot.lane.b32.xlu0 %v3716_v51, %s2671_s25 }
 0x3fe   : > { %1458 = vrot.lane.b32.xlu1 %v3689_v40, %s2673_s27 }
 0x400   : > { %1488 = vrot.lane.b32.xlu0 %v3646_v46, %s2674_s28 }
 0x402   : > { %1466 = vrot.lane.b32.xlu1 %v3711_v28, %s2673_s27 }
 0x404   : > { %1436 = vrot.lane.b32.xlu0 %v3716_v51, %s2672_s26 }
 0x406   : > { %1486 = vrot.lane.b32.xlu1 %v3643_v60, %s2674_s28 }
 0x408   : > { %1496 = vrot.lane.b32.xlu0 %v3672_v12, %s2674_s28 }
 0x40a   : > { %1494 = vrot.lane.b32.xlu1 %v3667_v26, %s2674_s28 }
 0x40c   : > { %1492 = vrot.lane.b32.xlu0 %v3694_v27, %s2674_s28 }
 0x40e   : > { %1490 = vrot.lane.b32.xlu1 %v3689_v40, %s2674_s28 }
 0x410   : > { %1520 = vrot.lane.b32.xlu0 %v3646_v46, %s2675_s29 }
 0x412   : > { %1498 = vrot.lane.b32.xlu1 %v3711_v28, %s2674_s28 }
 0x414   : > { %1468 = vrot.lane.b32.xlu0 %v3716_v51, %s2673_s27 }
 0x416   : > { %1518 = vrot.lane.b32.xlu1 %v3643_v60, %s2675_s29 }
 0x418   : > { %1528 = vrot.lane.b32.xlu0 %v3672_v12, %s2675_s29 }
 0x41a   : > { %1526 = vrot.lane.b32.xlu1 %v3667_v26, %s2675_s29 }
 0x41c   : > { %1500 = vrot.lane.b32.xlu0 %v3716_v51, %s2674_s28 }
 0x41e   : > { %1522 = vrot.lane.b32.xlu1 %v3689_v40, %s2675_s29 }
 0x420   : > { %1524 = vrot.lane.b32.xlu0 %v3694_v27, %s2675_s29 }
 0x422   : > { %1530 = vrot.lane.b32.xlu1 %v3711_v28, %s2675_s29 }
 0x424   : > { %1532 = vrot.lane.b32.xlu0 %v3716_v51, %s2675_s29 }
 0x426   : > { %1550 = vrot.lane.b32.xlu1 %v3643_v60, %s2676_s6 }
 0x428   : > { %1552 = vrot.lane.b32.xlu0 %v3646_v46, %s2676_s6  ;;  %v1327_v59 = vpop.permute.xlu1 %1326 }
 0x42a   : > { %v1329_v33 = vpop.permute.xlu0 %1328  ;;  %1558 = vrot.lane.b32.xlu1 %v3667_v26, %s2676_s6 }
 0x42c   : > { %1560 = vrot.lane.b32.xlu0 %v3672_v12, %s2676_s6  ;;  %v3789_v24 = vpop.permute.xlu1 %1358 }
 0x42e   : > { %v1361_v52 = vpop.permute.xlu0 %1360  ;;  %1554 = vrot.lane.b32.xlu1 %v3689_v40, %s2676_s6 }
 0x430   : > { %1556 = vrot.lane.b32.xlu0 %v3694_v27, %s2676_s6  ;;  %v3795_v38 = vpop.permute.xlu1 %1390 }
 0x432   : > { %v3797_v41 = vpop.permute.xlu0 %1392  ;;  %1562 = vrot.lane.b32.xlu1 %v3711_v28, %s2676_s6 }
 0x434   : > { %1564 = vrot.lane.b32.xlu0 %v3716_v51, %s2676_s6  ;;  %v3806_v3 = vpop.permute.xlu1 %1422 }
 0x436   : > { %v3811_v56 = vpop.permute.xlu0 %1424  ;;  %1620 = vperm.xlu1 %2602, %v2468_v1  }
 0x438   : > { %1625 = vperm.xlu0 %2601, %v2469_v61   ;;  %v3816_v49 = vpop.permute.xlu1 %1454 }
 0x43a   : > { %v3821_v43 = vpop.permute.xlu0 %1456  ;;  %1630 = vperm.xlu1 %2602, %v2470_v48  }
 0x43c   : > { %1635 = vperm.xlu0 %2601, %v2471_v13   ;;  %v1335_v10 = vpop.permute.xlu1 %1334 }
 0x43d   : > { %v1342_v63 = vsel %vm317_vm0, %v1327_v59, %v1335_v10  ;;  %v1346_v5 = vsel %vm317_vm0, %v1335_v10, %v1327_v59 }
 0x43e   : > { %v1337_v42 = vpop.permute.xlu0 %1336  ;;  %v1350_v15 = vmul.f32 %v1346_v5, %v2900_v19  ;;  %v1351_v44 = vmul.f32 %v1342_v63, %v2891_v17 }
 0x43f   : > { %v1343_v0 = vsel %vm317_vm0, %v1329_v33, %v1337_v42  ;;  %v1347_v39 = vsel %vm317_vm0, %v1337_v42, %v1329_v33 }
 0x440   : > { %v1352_v2 = vmul.f32 %v1347_v39, %v2900_v19  ;;  %v1353_v21 = vmul.f32 %v1343_v0, %v2891_v17  ;;  %v1367_v47 = vpop.permute.xlu1 %1366 }
 0x441   : > { %v1374_v48 = vsel %vm358_vm1, %v3789_v24, %v1367_v47 }
 0x442   : > { %v1582_v20 = vpack.c.bf16 %v1352_v2, %v1350_v15  ;;  %v1369_v22 = vpop.permute.xlu0 %1368  ;;  %v1583_v14 = vpack.c.bf16 %v1353_v21, %v1351_v44  ;;  %v1383_v21 = vmul.f32 %v1374_v48, %v2952_v54 }
 0x443   : > { %v1375_v59 = vsel %vm358_vm1, %v1361_v52, %v1369_v22  ;;  %v1379_v10 = vsel %vm358_vm1, %v1369_v22, %v1361_v52  ;;  %v1378_v52 = vsel %vm358_vm1, %v1367_v47, %v3789_v24 }
 0x444   : > { %1674 = vmatprep.subr.bf16.mxu0 %v1583_v14  ;;  %v1399_v58 = vpop.permute.xlu1 %1398  ;;  %v1385_v63 = vmul.f32 %v1375_v59, %v2952_v54 }
 0x445   : > { %1675 = vmatpush1.bf16.msra.mxu0 %v1582_v20  ;;  %v1384_v20 = vmul.f32 %v1379_v10, %v2949_v53  ;;  %v1406_v48 = vsel %vm399_vm2, %v3795_v38, %v1399_v58 }
 0x446   : > { %v1401_v45 = vpop.permute.xlu0 %1400 }
 0x447   : > { %v1407_v59 = vsel %vm399_vm2, %v3797_v41, %v1401_v45  ;;  %v1411_v10 = vsel %vm399_vm2, %v1401_v45, %v3797_v41  ;;  %v1410_v41 = vsel %vm399_vm2, %v1399_v58, %v3795_v38  ;;  %v1415_v45 = vmul.f32 %v1406_v48, %v2984_v36 }
 0x448   : > { %v3835_v62 = vpop.permute.xlu1 %1430 }
 0x44a   : > { %v3837_v4 = vpop.permute.xlu0 %1432 }
 0x44c   : > { %v1331_v31 = vpop.permute.xlu1 %1330 }
 0x44e   : > { %v1333_v25 = vpop.permute.xlu0 %1332 }
 0x450   : > { %v1363_v7 = vpop.permute.xlu1 %1362 }
 0x452   : > { %v1365_v29 = vpop.permute.xlu0 %1364 }
 0x454   : > { %v1395_v6 = vpop.permute.xlu1 %1394 }
 0x456   : > { %v3839_v30 = vpop.permute.xlu0 %1396 }
 0x458   : > { %v3841_v50 = vpop.permute.xlu1 %1426 }
 0x45a   : > { %v3843_v32 = vpop.permute.xlu0 %1428 }
 0x45c   : > { %v1339_v33 = vpop.permute.xlu1 %1338 }
 0x45d   : > { %v1344_v1 = vsel %vm317_vm0, %v1331_v31, %v1339_v33  ;;  %v1348_v61 = vsel %vm317_vm0, %v1339_v33, %v1331_v31 }
 0x45e   : > { %v1341_v13 = vpop.permute.xlu0 %1340  ;;  %v1354_v0 = vmul.f32 %v1348_v61, %v2900_v19  ;;  %v1355_v39 = vmul.f32 %v1344_v1, %v2891_v17  ;;  %v1587_v1 = vpack.c.bf16 %v1385_v63, %v1383_v21  ;;  %v1417_v63 = vmul.f32 %v1407_v59, %v2984_v36 }
 0x45f   : > { %v1345_v5 = vsel %vm317_vm0, %v1333_v25, %v1341_v13  ;;  %v1349_v42 = vsel %vm317_vm0, %v1341_v13, %v1333_v25  ;;  %v1382_v25 = vmul.f32 %v1378_v52, %v2949_v53  ;;  %v1416_v52 = vmul.f32 %v1411_v10, %v2981_v35 }
 0x460   : > { %v1356_v15 = vmul.f32 %v1349_v42, %v2900_v19  ;;  %v1357_v44 = vmul.f32 %v1345_v5, %v2891_v17  ;;  %v3865_v2 = vpop.permute.xlu1 %1462  ;;  %v1591_v59 = vpack.c.bf16 %v1417_v63, %v1415_v45 }
 0x461   : > { %v1586_v61 = vpack.c.bf16 %v1384_v20, %v1382_v25 }
 0x462   : > { %v1584_v22 = vpack.c.bf16 %v1356_v15, %v1354_v0  ;;  %v3872_v14 = vpop.permute.xlu0 %1464  ;;  %v1585_v31 = vpack.c.bf16 %v1357_v44, %v1355_v39 }
 0x464   : > { %1676 = vmatprep.subr.bf16.mxu0 %v1585_v31  ;;  %v1371_v33 = vpop.permute.xlu1 %1370  ;;  %v1439_v31 = vsel %vm440_vm3, %v3811_v56, %v3837_v4 }
 0x465   : > { %v1376_v24 = vsel %vm358_vm1, %v1363_v7, %v1371_v33  ;;  %v1380_v47 = vsel %vm358_vm1, %v1371_v33, %v1363_v7  ;;  %1677 = vmatpush1.bf16.msra.mxu0 %v1584_v22  ;;  %v1414_v22 = vmul.f32 %v1410_v41, %v2981_v35 }
 0x466   : > { %v1373_v13 = vpop.permute.xlu0 %1372  ;;  %1678 = vmatprep.subr.bf16.mxu0 %v1587_v1  ;;  %v1386_v42 = vmul.f32 %v1380_v47, %v2949_v53  ;;  %v1387_v0 = vmul.f32 %v1376_v24, %v2952_v54  ;;  %v1438_v1 = vsel %vm440_vm3, %v3806_v3, %v3835_v62  ;;  %v1443_v47 = vsel %vm440_vm3, %v3837_v4, %v3811_v56 }
 0x467   : > { %v1377_v5 = vsel %vm358_vm1, %v1365_v29, %v1373_v13  ;;  %v1381_v7 = vsel %vm358_vm1, %v1373_v13, %v1365_v29  ;;  %v1590_v33 = vpack.c.bf16 %v1416_v52, %v1414_v22  ;;  %v1442_v56 = vsel %vm440_vm3, %v3835_v62, %v3806_v3 }
 0x468   : > { %v1388_v39 = vmul.f32 %v1381_v7, %v2949_v53  ;;  %v1389_v15 = vmul.f32 %v1377_v5, %v2952_v54  ;;  %v1403_v44 = vpop.permute.xlu1 %1402  ;;  %v1447_v4 = vmul.f32 %v1438_v1, %v3016_v18  ;;  %v1446_v41 = vmul.f32 %v1442_v56, %v3013_v16 }
 0x469   : > { %1679 = vmatpush1.bf16.msra.mxu0 %v1586_v61  ;;  %v1408_v38 = vsel %vm399_vm2, %v1395_v6, %v1403_v44  ;;  %v1412_v58 = vsel %vm399_vm2, %v1403_v44, %v1395_v6  ;;  %v1449_v61 = vmul.f32 %v1439_v31, %v3016_v18 }
 0x46a   : > { %v1588_v21 = vpack.c.bf16 %v1388_v39, %v1386_v42  ;;  %v3902_v29 = vpop.permute.xlu0 %1460  ;;  %v1589_v20 = vpack.c.bf16 %v1389_v15, %v1387_v0  ;;  %v1418_v13 = vmul.f32 %v1412_v58, %v2981_v35  ;;  %v1419_v10 = vmul.f32 %v1408_v38, %v2984_v36 }
 0x46b   : > { %v1448_v39 = vmul.f32 %v1443_v47, %v3013_v16  ;;  %v1595_v44 = vpack.c.bf16 %v1449_v61, %v1447_v4  ;;  %v1474_v61 = vsel %vm481_vm4, %v3865_v2, %v3816_v49 }
 0x46c   : > { %1680 = vmatprep.subr.bf16.mxu0 %v1589_v20  ;;  %v1435_v25 = vpop.permute.xlu1 %1434  ;;  %v1479_v56 = vmul.f32 %v1474_v61, %v3047_v55 }
 0x46d   : > { %1681 = vmatpush1.bf16.msra.mxu0 %v1588_v21  ;;  %v1440_v45 = vsel %vm440_vm3, %v3841_v50, %v1435_v25  ;;  %v1444_v3 = vsel %vm440_vm3, %v1435_v25, %v3841_v50  ;;  %v1594_v52 = vpack.c.bf16 %v1448_v39, %v1446_v41 }
 0x46e   : > { %v1405_v24 = vpop.permute.xlu0 %1404  ;;  %1682 = vmatprep.subr.bf16.mxu0 %v1591_v59  ;;  %v1450_v22 = vmul.f32 %v1444_v3, %v3013_v16  ;;  %v1451_v31 = vmul.f32 %v1440_v45, %v3016_v18 }
 0x46f   : > { %v1409_v6 = vsel %vm399_vm2, %v3839_v30, %v1405_v24  ;;  %v1413_v48 = vsel %vm399_vm2, %v1405_v24, %v3839_v30  ;;  %v1599_v24 = vpack.c.bf16 %v3672_v12, %v3667_v26 }
 0x470   : > { %v1420_v63 = vmul.f32 %v1413_v48, %v2981_v35  ;;  %v1421_v5 = vmul.f32 %v1409_v6, %v2984_v36  ;;  %v1459_v7 = vpop.permute.xlu1 %1458  ;;  %v1471_v6 = vsel %vm481_vm4, %v3821_v43, %v3872_v14  ;;  %v1598_v48 = vpack.c.bf16 %v3646_v46, %v3643_v60 }
 0x471   : > { %1683 = vmatpush1.bf16.msra.mxu0 %v1590_v33  ;;  %v1480_v4 = vmul.f32 %v1471_v6, %v3052_v57 }
 0x472   : > { %v1592_v42 = vpack.c.bf16 %v1420_v63, %v1418_v13  ;;  %v3937_v0 = vpop.permute.xlu0 %1488  ;;  %v1593_v30 = vpack.c.bf16 %v1421_v5, %v1419_v10  ;;  %v1601_v63 = vpack.c.bf16 %v3716_v51, %v3711_v28  ;;  %v1470_v5 = vsel %vm481_vm4, %v3816_v49, %v3865_v2 }
 0x474   : > { %1684 = vmatprep.subr.bf16.mxu0 %v1593_v30  ;;  %v1467_v15 = vpop.permute.xlu1 %1466  ;;  %v1478_v30 = vmul.f32 %v1470_v5, %v3052_v57 }
 0x475   : > { %1685 = vmatpush1.bf16.msra.mxu0 %v1592_v42  ;;  %v1600_v42 = vpack.c.bf16 %v3694_v27, %v3689_v40  ;;  %v1476_v49 = vsel %vm481_vm4, %v1467_v15, %v1459_v7 }
 0x476   : > { %v1437_v62 = vpop.permute.xlu0 %1436  ;;  %1686 = vmatprep.subr.bf16.mxu0 %v1595_v44  ;;  %v1602_v41 = vpack.c.bf16 %v1480_v4, %v1478_v30 }
 0x477   : > { %v1441_v21 = vsel %vm440_vm3, %v3843_v32, %v1437_v62  ;;  %v1445_v20 = vsel %vm440_vm3, %v1437_v62, %v3843_v32  ;;  %v1475_v32 = vsel %vm481_vm4, %v3872_v14, %v3821_v43  ;;  %v1472_v14 = vsel %vm481_vm4, %v1459_v7, %v1467_v15 }
 0x478   : > { %v1452_v59 = vmul.f32 %v1445_v20, %v3013_v16  ;;  %v1453_v50 = vmul.f32 %v1441_v21, %v3016_v18  ;;  %v1487_v25 = vpop.permute.xlu1 %1486  ;;  %v1481_v13 = vmul.f32 %v1475_v32, %v3047_v55  ;;  %v1482_v45 = vmul.f32 %v1472_v14, %v3052_v57 }
 0x479   : > { %1687 = vmatpush1.bf16.msra.mxu0 %v1594_v52  ;;  %v1483_v21 = vmul.f32 %v1476_v49, %v3047_v55 }
 0x47a   : > { %v1596_v38 = vpack.c.bf16 %v1452_v59, %v1450_v22  ;;  %v1497_v58 = vpop.permute.xlu0 %1496  ;;  %v1597_v33 = vpack.c.bf16 %v1453_v50, %v1451_v31  ;;  %v1603_v44 = vpack.c.bf16 %v1481_v13, %v1479_v56 }
 0x47b   : > { %v1507_v62 = vsel %vm522_vm5, %v1497_v58, %v3937_v0  ;;  %v1503_v50 = vsel %vm522_vm5, %v3937_v0, %v1497_v58 }
 0x47c   : > { %1688 = vmatprep.subr.bf16.mxu0 %v1597_v33  ;;  %v1495_v1 = vpop.permute.xlu1 %1494  ;;  %v1512_v32 = vmul.f32 %v1503_v50, %v3085_v34 }
 0x47d   : > { %1689 = vmatpush1.bf16.msra.mxu0 %v1596_v38  ;;  %v1506_v2 = vsel %vm522_vm5, %v1495_v1, %v1487_v25  ;;  %v1502_v52 = vsel %vm522_vm5, %v1487_v25, %v1495_v1  ;;  %v1513_v25 = vmul.f32 %v1507_v62, %v3088_v37 }
 0x47e   : > { %v1493_v47 = vpop.permute.xlu0 %1492  ;;  %1690 = vmatprep.subr.bf16.mxu0 %v1599_v24  ;;  %v1511_v20 = vmul.f32 %v1506_v2, %v3088_v37  ;;  %v1510_v38 = vmul.f32 %v1502_v52, %v3085_v34 }
 0x480   : > { %v1491_v10 = vpop.permute.xlu1 %1490  ;;  %v1606_v58 = vpack.c.bf16 %v1512_v32, %v1510_v38 }
 0x481   : > { %1691 = vmatpush1.bf16.msra.mxu0 %v1598_v48  ;;  %v1607_v48 = vpack.c.bf16 %v1513_v25, %v1511_v20 }
 0x482   : > { %v1521_v43 = vpop.permute.xlu0 %1520  ;;  %1692 = vmatprep.subr.bf16.mxu0 %v1601_v63 }
 0x484   : > { %v1499_v39 = vpop.permute.xlu1 %1498 }
 0x485   : > { %1693 = vmatpush1.bf16.msra.mxu0 %v1600_v42  ;;  %v1504_v24 = vsel %vm522_vm5, %v1491_v10, %v1499_v39  ;;  %v1508_v61 = vsel %vm522_vm5, %v1499_v39, %v1491_v10 }
 0x486   : > { %v1469_v3 = vpop.permute.xlu0 %1468  ;;  %1694 = vmatprep.subr.bf16.mxu0 %v1603_v44  ;;  %v1514_v13 = vmul.f32 %v1504_v24, %v3085_v34  ;;  %v1515_v5 = vmul.f32 %v1508_v61, %v3088_v37  ;;  %v2619_v61 = vld [vmem:[%s4580_s2 + $0x60] ss:$12 sps:$4 sm:$0xff]  }
 0x487   : > { %v1473_v7 = vsel %vm481_vm4, %v3902_v29, %v1469_v3  ;;  %v1477_v15 = vsel %vm481_vm4, %v1469_v3, %v3902_v29 }
 0x488   : > { %v1484_v22 = vmul.f32 %v1473_v7, %v3052_v57  ;;  %v1485_v31 = vmul.f32 %v1477_v15, %v3047_v55  ;;  %v1519_v59 = vpop.permute.xlu1 %1518 }
 0x489   : > { %1695 = vmatpush1.bf16.msra.mxu0 %v1602_v41 }
 0x48a   : > { %v1604_v33 = vpack.c.bf16 %v1484_v22, %v1482_v45  ;;  %v1529_v29 = vpop.permute.xlu0 %1528  ;;  %v1605_v1 = vpack.c.bf16 %v1485_v31, %v1483_v21 }
 0x48b   : > { %v1539_v56 = vsel %vm563_vm6, %v1529_v29, %v1521_v43  ;;  %v1535_v49 = vsel %vm563_vm6, %v1521_v43, %v1529_v29 }
 0x48c   : > { %v1527_v6 = vpop.permute.xlu1 %1526  ;;  %1696 = vmatprep.subr.bf16.mxu0 %v1605_v1  ;;  %v1545_v2 = vmul.f32 %v1539_v56, %v3120_v9  ;;  %v1544_v7 = vmul.f32 %v1535_v49, %v3117_v8 }
 0x48d   : > { %v1538_v0 = vsel %vm563_vm6, %v1527_v6, %v1519_v59  ;;  %1697 = vmatpush1.bf16.msra.mxu0 %v1604_v33  ;;  %v1534_v14 = vsel %vm563_vm6, %v1519_v59, %v1527_v6 }
 0x48e   : > { %v1501_v63 = vpop.permute.xlu0 %1500  ;;  %1698 = vmatprep.subr.bf16.mxu0 %v1607_v48  ;;  %v1543_v42 = vmul.f32 %v1538_v0, %v3120_v9  ;;  %v2622_v0 = vld [vmem:[%s4580_s2 + $0x7c] ss:$12 sps:$4 sm:$0xff]  }
 0x48f   : > { %v1505_v10 = vsel %vm522_vm5, %v1493_v47, %v1501_v63  ;;  %v1509_v4 = vsel %vm522_vm5, %v1501_v63, %v1493_v47  ;;  %v1542_v47 = vmul.f32 %v1534_v14, %v3117_v8 }
 0x490   : > { %v1516_v30 = vmul.f32 %v1505_v10, %v3085_v34  ;;  %v1517_v39 = vmul.f32 %v1509_v4, %v3088_v37  ;;  %v1523_v44 = vpop.permute.xlu1 %1522  ;;  %v1611_v52 = vpack.c.bf16 %v1545_v2, %v1543_v42  ;;  %v4072_v10 = vld [vmem:[%s4578_s0 + $0x18] ss:$0 sm:$0xff] }
 0x491   : > { %1699 = vmatpush1.bf16.msra.mxu0 %v1606_v58  ;;  %v1610_v20 = vpack.c.bf16 %v1544_v7, %v1542_v47 }
 0x492   : > { %v1608_v41 = vpack.c.bf16 %v1516_v30, %v1514_v13  ;;  %v1525_v45 = vpop.permute.xlu0 %1524  ;;  %v1609_v3 = vpack.c.bf16 %v1517_v39, %v1515_v5  ;;  %v4066_v5 = vld [vmem:[%s4578_s0 + $0x10] ss:$0 sm:$0xff] }
 0x494   : > { %v1531_v62 = vpop.permute.xlu1 %1530  ;;  %1700 = vmatprep.subr.bf16.mxu0 %v1609_v3 }
 0x495   : > { %v1536_v15 = vsel %vm563_vm6, %v1523_v44, %v1531_v62  ;;  %v1540_v21 = vsel %vm563_vm6, %v1531_v62, %v1523_v44  ;;  %1701 = vmatpush1.bf16.msra.mxu0 %v1608_v41  ;;  %v2624_v41 = vld [vmem:[%s4580_s2 + $0x78] ss:$12 sps:$4 sm:$0xff]  }
 0x496   : > { %v1533_v43 = vpop.permute.xlu0 %1532  ;;  %1702 = vmatprep.subr.bf16.mxu0 %v1611_v52  ;;  %v1546_v59 = vmul.f32 %v1536_v15, %v3117_v8  ;;  %v1547_v50 = vmul.f32 %v1540_v21, %v3120_v9 }
 0x497   : > { %v1537_v22 = vsel %vm563_vm6, %v1525_v45, %v1533_v43  ;;  %v1541_v31 = vsel %vm563_vm6, %v1533_v43, %v1525_v45 }
 0x498   : > { %v1548_v25 = vmul.f32 %v1537_v22, %v3117_v8  ;;  %v1549_v38 = vmul.f32 %v1541_v31, %v3120_v9  ;;  %v1551_v33 = vpop.permute.xlu1 %1550  ;;  %v2625_v31 = vld [vmem:[%s4580_s2 + $0x68] ss:$12 sps:$4 sm:$0xff]  }
 0x499   : > { %1703 = vmatpush1.bf16.msra.mxu0 %v1610_v20 }
 0x49a   : > { %v1612_v29 = vpack.c.bf16 %v1548_v25, %v1546_v59  ;;  %v1553_v1 = vpop.permute.xlu0 %1552  ;;  %v1613_v24 = vpack.c.bf16 %v1549_v38, %v1547_v50  ;;  %v2626_v59 = vld [vmem:[%s4580_s2 + $0x80] ss:$12 sps:$4 sm:$0xff]  }
 0x49c   : > { %v1559_v32 = vpop.permute.xlu1 %1558  ;;  %1704 = vmatprep.subr.bf16.mxu0 %v1613_v24 }
 0x49d   : > { %v1566_v6 = vsel %vm604_vm7, %v1551_v33, %v1559_v32  ;;  %v1570_v48 = vsel %vm604_vm7, %v1559_v32, %v1551_v33  ;;  %1705 = vmatpush1.bf16.msra.mxu0 %v1612_v29 }
 0x49e   : > { %v1561_v58 = vpop.permute.xlu0 %1560  ;;  %v1574_v56 = vmul.f32 %v4066_v5, %v1566_v6  ;;  %v1575_v4 = vmul.f32 %v4072_v10, %v1570_v48 }
 0x49f   : > { %v1567_v13 = vsel %vm604_vm7, %v1553_v1, %v1561_v58  ;;  %v1571_v63 = vsel %vm604_vm7, %v1561_v58, %v1553_v1 }
 0x4a0   : > { %v1576_v14 = vmul.f32 %v4066_v5, %v1567_v13  ;;  %v1577_v42 = vmul.f32 %v4072_v10, %v1571_v63  ;;  %v1555_v30 = vpop.permute.xlu1 %1554  ;;  %1707 = vmatmul.mubr.bf16.vlgmr.msra.gmra.mrb[8].mxu0 %v2619_v61 }
 0x4a1   : > { %1716 = vmatprep.mubr.bf16.mxu0 %v2622_v0 }
 0x4a2   : > { %v1614_v39 = vpack.c.bf16 %v1576_v14, %v1574_v56  ;;  %v1557_v44 = vpop.permute.xlu0 %1556  ;;  %v1615_v49 = vpack.c.bf16 %v1577_v42, %v1575_v4 }
 0x4a4   : > { %v1563_v2 = vpop.permute.xlu1 %1562  ;;  %1727 = vmatprep.subr.bf16.mxu0 %v1615_v49 }
 0x4a5   : > { %v1568_v45 = vsel %vm604_vm7, %v1555_v30, %v1563_v2  ;;  %v1572_v3 = vsel %vm604_vm7, %v1563_v2, %v1555_v30  ;;  %1728 = vmatpush1.bf16.msra.mxu0 %v1614_v39 }
 0x4a6   : > { %v1565_v47 = vpop.permute.xlu0 %1564  ;;  %v1578_v7 = vmul.f32 %v4066_v5, %v1568_v45  ;;  %v1579_v15 = vmul.f32 %v4072_v10, %v1572_v3 }
 0x4a7   : > { %v1569_v62 = vsel %vm604_vm7, %v1557_v44, %v1565_v47  ;;  %v1573_v52 = vsel %vm604_vm7, %v1565_v47, %v1557_v44 }
 0x4a8   : > { %v1580_v21 = vmul.f32 %v4066_v5, %v1569_v62  ;;  %v1581_v43 = vmul.f32 %v4072_v10, %v1573_v52  ;;  %1717 = vmatmul.mubr.bf16.gmra.mrb[12].mxu0 %v2624_v41  ;;  %v2629_v62 = vld [vmem:[%s4580_s2 + $0x94] ss:$12 sps:$4 sm:$0xff]  }
 0x4a9   : > { %1759 = vmatprep.mubr.bf16.mxu0 %v4583_v23  ;;  %2182 = vmatprep.mubr.bf16.mxu1 %v2629_v62 }
 0x4aa   : > { %v1616_v20 = vpack.c.bf16 %v1580_v21, %v1578_v7  ;;  %v1617_v22 = vpack.c.bf16 %v1581_v43, %v1579_v15 }
 0x4ac   : > { %1729 = vmatprep.subr.bf16.mxu0 %v1617_v22  ;;  %v2488_v22 = vld [vmem:[%s4581_s3 + $0x60] sm:$0xff] }
 0x4ad   : > { %1730 = vmatpush1.bf16.msra.mxu0 %v1616_v20 }
 0x4b0   : > { %2478 = vmatmul.mubr.msk.bf16.vlgmr.msra.gmra.mrb[8].mxu0 %vm715_vm8, %v2625_v31 }
 0x4b1   : > { %1769 = vmatprep.mubr.bf16.mxu0 %v4583_v23 }
 0x4b5   : > { %v1621_v50 = vpop.permute.xlu1 %1620 }
 0x4b7   : > { %v1626_v29 = vpop.permute.xlu0 %1625 }
 0x4b8   : > { %2479 = vmatmul.mubr.msk.bf16.gmra.mrb[12].mxu0 %vm715_vm8, %v2626_v59  ;;  %v2489_v59 = vld [vmem:[%s4581_s3 + $0x68] sm:$0xff] }
 0x4b9   : > { %v1631_v42 = vpop.permute.xlu1 %1630 }
 0x4bb   : > { %v1636_v39 = vpop.permute.xlu0 %1635 }
 0x583   : > { %v1761_v25 = vpop.f32.mrb[8].mxu0 }
 0x584   : > { %v2520_v38 = vadd.f32 %v1761_v25, %v1621_v50  ;;  %v1763_v33 = vpop.f32.mrb[9].mxu0  ;;  %v2490_v25 = vld [vmem:[%s4581_s3 + $0x70] sm:$0xff] }
 0x585   : > { %v1765_v1 = vpop.f32.mrb[10].mxu0  ;;  %v2521_v63 = vadd.f32 %v1763_v33, %v1621_v50  ;;  %v2491_v33 = vld [vmem:[%s4581_s3 + $0x78] sm:$0xff] }
 0x586   : > { %v4102_v24 = vmax.f32 %v2520_v38, 0.0  ;;  %v2522_v32 = vadd.f32 %v1765_v1, %v1626_v29  ;;  %v1767_v61 = vpop.f32.mrb[11].mxu0 }
 0x587   : > { %v2523_v56 = vadd.f32 %v1767_v61, %v1626_v29  ;;  %v4124_v4 = vmax.f32 %v2521_v63, 0.0 }
 0x588   : > { %v4104_v6 = vmax.f32 %v2522_v32, 0.0  ;;  %1802 = vrot.lane.b32.xlu1 %v4102_v24, %s2669_s23 }
 0x589   : > { %v4128_v14 = vmax.f32 %v2523_v56, 0.0 }
 0x58a   : > { %1804 = vrot.lane.b32.xlu0 %v4104_v6, %s2669_s23 }
 0x58b   : > { %v1771_v48 = vpop.f32.mrb[12].mxu0 }
 0x58c   : > { %v1773_v0 = vpop.f32.mrb[13].mxu0  ;;  %1834 = vrot.lane.b32.xlu1 %v4102_v24, %s2670_s24  ;;  %v2524_v30 = vadd.f32 %v1771_v48, %v1631_v42 }
 0x58d   : > { %v1775_v58 = vpop.f32.mrb[14].mxu0  ;;  %v2525_v41 = vadd.f32 %v1773_v0, %v1631_v42 }
 0x58e   : > { %v1777_v13 = vpop.f32.mrb[15].mxu0  ;;  %1836 = vrot.lane.b32.xlu0 %v4104_v6, %s2670_s24  ;;  %v2526_v44 = vadd.f32 %v1775_v58, %v1636_v39  ;;  %v4144_v49 = vmax.f32 %v2524_v30, 0.0 }
 0x58f   : > { %v2527_v45 = vadd.f32 %v1777_v13, %v1636_v39  ;;  %v4164_v3 = vmax.f32 %v2525_v41, 0.0 }
 0x590   : > { %1866 = vrot.lane.b32.xlu1 %v4102_v24, %s2671_s25  ;;  %v4148_v2 = vmax.f32 %v2526_v44, 0.0 }
 0x591   : > { %v4168_v47 = vmax.f32 %v2527_v45, 0.0 }
 0x592   : > { %1868 = vrot.lane.b32.xlu0 %v4104_v6, %s2671_s25 }
 0x594   : > { %1898 = vrot.lane.b32.xlu1 %v4102_v24, %s2672_s26 }
 0x596   : > { %1900 = vrot.lane.b32.xlu0 %v4104_v6, %s2672_s26 }
 0x598   : > { %1930 = vrot.lane.b32.xlu1 %v4102_v24, %s2673_s27 }
 0x59a   : > { %1932 = vrot.lane.b32.xlu0 %v4104_v6, %s2673_s27 }
 0x59c   : > { %1810 = vrot.lane.b32.xlu1 %v4124_v4, %s2669_s23 }
 0x59e   : > { %1812 = vrot.lane.b32.xlu0 %v4128_v14, %s2669_s23 }
 0x5a0   : > { %1842 = vrot.lane.b32.xlu1 %v4124_v4, %s2670_s24 }
 0x5a2   : > { %1844 = vrot.lane.b32.xlu0 %v4128_v14, %s2670_s24 }
 0x5a4   : > { %1874 = vrot.lane.b32.xlu1 %v4124_v4, %s2671_s25 }
 0x5a6   : > { %1876 = vrot.lane.b32.xlu0 %v4128_v14, %s2671_s25 }
 0x5a8   : > { %1906 = vrot.lane.b32.xlu1 %v4124_v4, %s2672_s26 }
 0x5aa   : > { %1908 = vrot.lane.b32.xlu0 %v4128_v14, %s2672_s26 }
 0x5ac   : > { %1806 = vrot.lane.b32.xlu1 %v4144_v49, %s2669_s23 }
 0x5ae   : > { %1808 = vrot.lane.b32.xlu0 %v4148_v2, %s2669_s23 }
 0x5b0   : > { %1838 = vrot.lane.b32.xlu1 %v4144_v49, %s2670_s24 }
 0x5b2   : > { %1840 = vrot.lane.b32.xlu0 %v4148_v2, %s2670_s24 }
 0x5b4   : > { %1870 = vrot.lane.b32.xlu1 %v4144_v49, %s2671_s25 }
 0x5b6   : > { %1872 = vrot.lane.b32.xlu0 %v4148_v2, %s2671_s25 }
 0x5b8   : > { %1902 = vrot.lane.b32.xlu1 %v4144_v49, %s2672_s26 }
 0x5ba   : > { %1904 = vrot.lane.b32.xlu0 %v4148_v2, %s2672_s26 }
 0x5bc   : > { %1814 = vrot.lane.b32.xlu1 %v4164_v3, %s2669_s23 }
 0x5be   : > { %1816 = vrot.lane.b32.xlu0 %v4168_v47, %s2669_s23 }
 0x5c0   : > { %1938 = vrot.lane.b32.xlu1 %v4124_v4, %s2673_s27 }
 0x5c2   : > { %1940 = vrot.lane.b32.xlu0 %v4128_v14, %s2673_s27 }
 0x5c4   : > { %1846 = vrot.lane.b32.xlu1 %v4164_v3, %s2670_s24 }
 0x5c6   : > { %1848 = vrot.lane.b32.xlu0 %v4168_v47, %s2670_s24  ;;  %s4553_s24 = scalar_lea.vmem %s4582_s4, %s2502_s19 }
 0x5c8   : > { %1878 = vrot.lane.b32.xlu1 %v4164_v3, %s2671_s25 }
 0x5ca   : > { %1936 = vrot.lane.b32.xlu0 %v4148_v2, %s2673_s27 }
 0x5cc   : > { %1910 = vrot.lane.b32.xlu1 %v4164_v3, %s2672_s26 }
 0x5ce   : > { %1880 = vrot.lane.b32.xlu0 %v4168_v47, %s2671_s25 }
 0x5d0   : > { %1934 = vrot.lane.b32.xlu1 %v4144_v49, %s2673_s27 }
 0x5d2   : > { %1964 = vrot.lane.b32.xlu0 %v4104_v6, %s2674_s28 }
 0x5d4   : > { %1942 = vrot.lane.b32.xlu1 %v4164_v3, %s2673_s27 }
 0x5d6   : > { %1912 = vrot.lane.b32.xlu0 %v4168_v47, %s2672_s26 }
 0x5d8   : > { %1962 = vrot.lane.b32.xlu1 %v4102_v24, %s2674_s28 }
 0x5da   : > { %1972 = vrot.lane.b32.xlu0 %v4128_v14, %s2674_s28 }
 0x5dc   : > { %1970 = vrot.lane.b32.xlu1 %v4124_v4, %s2674_s28 }
 0x5de   : > { %1968 = vrot.lane.b32.xlu0 %v4148_v2, %s2674_s28 }
 0x5e0   : > { %1966 = vrot.lane.b32.xlu1 %v4144_v49, %s2674_s28 }
 0x5e2   : > { %1996 = vrot.lane.b32.xlu0 %v4104_v6, %s2675_s29 }
 0x5e4   : > { %1974 = vrot.lane.b32.xlu1 %v4164_v3, %s2674_s28 }
 0x5e6   : > { %1944 = vrot.lane.b32.xlu0 %v4168_v47, %s2673_s27 }
 0x5e8   : > { %1994 = vrot.lane.b32.xlu1 %v4102_v24, %s2675_s29 }
 0x5ea   : > { %2004 = vrot.lane.b32.xlu0 %v4128_v14, %s2675_s29 }
 0x5ec   : > { %2002 = vrot.lane.b32.xlu1 %v4124_v4, %s2675_s29 }
 0x5ee   : > { %1976 = vrot.lane.b32.xlu0 %v4168_v47, %s2674_s28 }
 0x5f0   : > { %1998 = vrot.lane.b32.xlu1 %v4144_v49, %s2675_s29 }
 0x5f2   : > { %2000 = vrot.lane.b32.xlu0 %v4148_v2, %s2675_s29 }
 0x5f4   : > { %2006 = vrot.lane.b32.xlu1 %v4164_v3, %s2675_s29 }
 0x5f6   : > { %2008 = vrot.lane.b32.xlu0 %v4168_v47, %s2675_s29 }
 0x5f8   : > { %2026 = vrot.lane.b32.xlu1 %v4102_v24, %s2676_s6 }
 0x5fa   : > { %2028 = vrot.lane.b32.xlu0 %v4104_v6, %s2676_s6  ;;  %v1803_v52 = vpop.permute.xlu1 %1802 }
 0x5fc   : > { %v1805_v7 = vpop.permute.xlu0 %1804  ;;  %2034 = vrot.lane.b32.xlu1 %v4124_v4, %s2676_s6 }
 0x5fe   : > { %2036 = vrot.lane.b32.xlu0 %v4128_v14, %s2676_s6  ;;  %v1835_v15 = vpop.permute.xlu1 %1834 }
 0x600   : > { %v1837_v21 = vpop.permute.xlu0 %1836  ;;  %2030 = vrot.lane.b32.xlu1 %v4144_v49, %s2676_s6 }
 0x602   : > { %2032 = vrot.lane.b32.xlu0 %v4148_v2, %s2676_s6  ;;  %v4245_v43 = vpop.permute.xlu1 %1866 }
 0x604   : > { %v4247_v20 = vpop.permute.xlu0 %1868  ;;  %2038 = vrot.lane.b32.xlu1 %v4164_v3, %s2676_s6 }
 0x606   : > { %2040 = vrot.lane.b32.xlu0 %v4168_v47, %s2676_s6  ;;  %v4256_v31 = vpop.permute.xlu1 %1898 }
 0x608   : > { %v4261_v50 = vpop.permute.xlu0 %1900  ;;  %2096 = vperm.xlu1 %2602, %v2488_v22  }
 0x60a   : > { %2101 = vperm.xlu0 %2601, %v2489_v59   ;;  %v1931_v38 = vpop.permute.xlu1 %1930 }
 0x60c   : > { %v1933_v29 = vpop.permute.xlu0 %1932  ;;  %2106 = vperm.xlu1 %2602, %v2490_v25  }
 0x60e   : > { %2111 = vperm.xlu0 %2601, %v2491_v33   ;;  %v1811_v1 = vpop.permute.xlu1 %1810 }
 0x60f   : > { %v1818_v32 = vsel %vm317_vm0, %v1803_v52, %v1811_v1  ;;  %v1822_v61 = vsel %vm317_vm0, %v1811_v1, %v1803_v52 }
 0x610   : > { %v1813_v48 = vpop.permute.xlu0 %1812  ;;  %v1826_v13 = vmul.f32 %v1822_v61, %v2900_v19  ;;  %v1827_v63 = vmul.f32 %v1818_v32, %v2891_v17 }
 0x611   : > { %v1819_v0 = vsel %vm317_vm0, %v1805_v7, %v1813_v48  ;;  %v1823_v58 = vsel %vm317_vm0, %v1813_v48, %v1805_v7 }
 0x612   : > { %v1828_v56 = vmul.f32 %v1823_v58, %v2900_v19  ;;  %v1829_v42 = vmul.f32 %v1819_v0, %v2891_v17  ;;  %v1843_v30 = vpop.permute.xlu1 %1842 }
 0x614   : > { %v2058_v39 = vpack.c.bf16 %v1828_v56, %v1826_v13  ;;  %v1845_v44 = vpop.permute.xlu0 %1844  ;;  %v2059_v41 = vpack.c.bf16 %v1829_v42, %v1827_v63  ;;  %v1850_v56 = vsel %vm358_vm1, %v1835_v15, %v1843_v30  ;;  %v1854_v42 = vsel %vm358_vm1, %v1843_v30, %v1835_v15 }
 0x615   : > { %v1851_v0 = vsel %vm358_vm1, %v1837_v21, %v1845_v44  ;;  %v1859_v40 = vmul.f32 %v1850_v56, %v2952_v54 }
 0x616   : > { %2150 = vmatprep.subr.bf16.mxu1 %v2059_v41  ;;  %v4281_v45 = vpop.permute.xlu1 %1874  ;;  %v1855_v41 = vsel %vm358_vm1, %v1845_v44, %v1837_v21  ;;  %v1861_v23 = vmul.f32 %v1851_v0, %v2952_v54  ;;  %v1858_v0 = vmul.f32 %v1854_v42, %v2949_v53 }
 0x617   : > { %2151 = vmatpush1.bf16.msra.mxu1 %v2058_v39 }
 0x618   : > { %v1877_v62 = vpop.permute.xlu0 %1876 }
 0x61a   : > { %v4283_v52 = vpop.permute.xlu1 %1906 }
 0x61c   : > { %v4285_v7 = vpop.permute.xlu0 %1908 }
 0x61e   : > { %v1807_v22 = vpop.permute.xlu1 %1806 }
 0x620   : > { %v1809_v59 = vpop.permute.xlu0 %1808 }
 0x622   : > { %v1839_v25 = vpop.permute.xlu1 %1838 }
 0x624   : > { %v1841_v33 = vpop.permute.xlu0 %1840 }
 0x626   : > { %v4287_v1 = vpop.permute.xlu1 %1870 }
 0x628   : > { %v4289_v32 = vpop.permute.xlu0 %1872 }
 0x62a   : > { %v4291_v61 = vpop.permute.xlu1 %1902 }
 0x62c   : > { %v4293_v48 = vpop.permute.xlu0 %1904 }
 0x62e   : > { %v1815_v58 = vpop.permute.xlu1 %1814 }
 0x62f   : > { %v1820_v13 = vsel %vm317_vm0, %v1807_v22, %v1815_v58  ;;  %v1824_v63 = vsel %vm317_vm0, %v1815_v58, %v1807_v22 }
 0x630   : > { %v1817_v39 = vpop.permute.xlu0 %1816  ;;  %v1830_v22 = vmul.f32 %v1824_v63, %v2900_v19  ;;  %v1831_v58 = vmul.f32 %v1820_v13, %v2891_v17 }
 0x631   : > { %v1821_v51 = vsel %vm317_vm0, %v1809_v59, %v1817_v39  ;;  %v1825_v27 = vsel %vm317_vm0, %v1817_v39, %v1809_v59  ;;  %v1860_v59 = vmul.f32 %v1855_v41, %v2949_v53 }
 0x632   : > { %v1832_v28 = vmul.f32 %v1825_v27, %v2900_v19  ;;  %v1833_v15 = vmul.f32 %v1821_v51, %v2891_v17  ;;  %v1939_v30 = vpop.permute.xlu1 %1938  ;;  %v1883_v17 = vsel %vm399_vm2, %v4247_v20, %v1877_v62  ;;  %v2063_v51 = vpack.c.bf16 %v1861_v23, %v1859_v40 }
 0x633   : > { %v1946_v21 = vsel %vm481_vm4, %v1931_v38, %v1939_v30  ;;  %v1950_v44 = vsel %vm481_vm4, %v1939_v30, %v1931_v38  ;;  %v2062_v40 = vpack.c.bf16 %v1860_v59, %v1858_v0 }
 0x634   : > { %v2060_v63 = vpack.c.bf16 %v1832_v28, %v1830_v22  ;;  %v1941_v39 = vpop.permute.xlu0 %1940  ;;  %v2061_v13 = vpack.c.bf16 %v1833_v15, %v1831_v58  ;;  %v4331_v38 = vmul.f32 %v1946_v21, %v3052_v57  ;;  %v4334_v56 = vmul.f32 %v1950_v44, %v3047_v55 }
 0x635   : > { %v1947_v19 = vsel %vm481_vm4, %v1933_v29, %v1941_v39  ;;  %v1951_v27 = vsel %vm481_vm4, %v1941_v39, %v1933_v29  ;;  %v1882_v29 = vsel %vm399_vm2, %v4245_v43, %v4281_v45  ;;  %v1887_v21 = vsel %vm399_vm2, %v1877_v62, %v4247_v20 }
 0x636   : > { %v4337_v28 = vmul.f32 %v1947_v19, %v3052_v57  ;;  %v4340_v42 = vmul.f32 %v1951_v27, %v3047_v55  ;;  %2152 = vmatprep.subr.bf16.mxu1 %v2061_v13  ;;  %v1847_v41 = vpop.permute.xlu1 %1846  ;;  %v1886_v20 = vsel %vm399_vm2, %v4281_v45, %v4245_v43  ;;  %v1891_v62 = vmul.f32 %v1882_v29, %v2984_v36 }
 0x637   : > { %v1852_v22 = vsel %vm358_vm1, %v1839_v25, %v1847_v41  ;;  %v1856_v23 = vsel %vm358_vm1, %v1847_v41, %v1839_v25  ;;  %2153 = vmatpush1.bf16.msra.mxu1 %v2060_v63  ;;  %v1893_v25 = vmul.f32 %v1883_v17, %v2984_v36  ;;  %v1892_v17 = vmul.f32 %v1887_v21, %v2981_v35 }
 0x638   : > { %v2078_v58 = vpack.c.bf16 %v4337_v28, %v4331_v38  ;;  %v1849_v15 = vpop.permute.xlu0 %1848  ;;  %2154 = vmatprep.subr.bf16.mxu1 %v2063_v51  ;;  %v2079_v30 = vpack.c.bf16 %v4340_v42, %v4334_v56  ;;  %v1862_v59 = vmul.f32 %v1856_v23, %v2949_v53  ;;  %v1863_v63 = vmul.f32 %v1852_v22, %v2952_v54 }
 0x639   : > { %v1853_v44 = vsel %vm358_vm1, %v1841_v33, %v1849_v15  ;;  %v1857_v0 = vsel %vm358_vm1, %v1849_v15, %v1841_v33  ;;  %v1890_v41 = vmul.f32 %v1886_v20, %v2981_v35  ;;  %v2067_v22 = vpack.c.bf16 %v1893_v25, %v1891_v62 }
 0x63a   : > { %v1864_v39 = vmul.f32 %v1857_v0, %v2949_v53  ;;  %v1865_v13 = vmul.f32 %v1853_v44, %v2952_v54  ;;  %v1879_v19 = vpop.permute.xlu1 %1878  ;;  %v1915_v53 = vsel %vm440_vm3, %v4261_v50, %v4285_v7  ;;  %v1919_v15 = vsel %vm440_vm3, %v4285_v7, %v4261_v50 }
 0x63b   : > { %2155 = vmatpush1.bf16.msra.mxu1 %v2062_v40  ;;  %v1884_v43 = vsel %vm399_vm2, %v4287_v1, %v1879_v19  ;;  %v1888_v45 = vsel %vm399_vm2, %v1879_v19, %v4287_v1  ;;  %v2066_v23 = vpack.c.bf16 %v1892_v17, %v1890_v41  ;;  %v1914_v40 = vsel %vm440_vm3, %v4256_v31, %v4283_v52 }
 0x63c   : > { %v2064_v33 = vpack.c.bf16 %v1864_v39, %v1862_v59  ;;  %v4372_v27 = vpop.permute.xlu0 %1936  ;;  %v2065_v51 = vpack.c.bf16 %v1865_v13, %v1863_v63  ;;  %v1925_v21 = vmul.f32 %v1915_v53, %v3016_v18  ;;  %v1894_v44 = vmul.f32 %v1888_v45, %v2981_v35 }
 0x63d   : > { %v1895_v0 = vmul.f32 %v1884_v43, %v2984_v36  ;;  %v1918_v50 = vsel %vm440_vm3, %v4283_v52, %v4256_v31  ;;  %v1923_v7 = vmul.f32 %v1914_v40, %v3016_v18  ;;  %v1924_v20 = vmul.f32 %v1919_v15, %v3013_v16 }
 0x63e   : > { %2156 = vmatprep.subr.bf16.mxu1 %v2065_v51  ;;  %v1911_v54 = vpop.permute.xlu1 %1910  ;;  %v2075_v15 = vpack.c.bf16 %v4128_v14, %v4124_v4 }
 0x63f   : > { %2157 = vmatpush1.bf16.msra.mxu1 %v2064_v33  ;;  %v2071_v17 = vpack.c.bf16 %v1925_v21, %v1923_v7  ;;  %v1920_v31 = vsel %vm440_vm3, %v1911_v54, %v4291_v61  ;;  %v2074_v21 = vpack.c.bf16 %v4104_v6, %v4102_v24 }
 0x640   : > { %v1881_v29 = vpop.permute.xlu0 %1880  ;;  %2158 = vmatprep.subr.bf16.mxu1 %v2067_v22  ;;  %v1926_v53 = vmul.f32 %v1920_v31, %v3013_v16 }
 0x641   : > { %v1885_v1 = vsel %vm399_vm2, %v4289_v32, %v1881_v29  ;;  %v1889_v25 = vsel %vm399_vm2, %v1881_v29, %v4289_v32 }
 0x642   : > { %v1896_v59 = vmul.f32 %v1889_v25, %v2981_v35  ;;  %v1897_v63 = vmul.f32 %v1885_v1, %v2984_v36  ;;  %v1935_v39 = vpop.permute.xlu1 %1934  ;;  %v1922_v35 = vmul.f32 %v1918_v50, %v3013_v16  ;;  %v1916_v36 = vsel %vm440_vm3, %v4291_v61, %v1911_v54 }
 0x643   : > { %2159 = vmatpush1.bf16.msra.mxu1 %v2066_v23  ;;  %v1927_v22 = vmul.f32 %v1916_v36, %v3016_v18 }
 0x644   : > { %v2068_v13 = vpack.c.bf16 %v1896_v59, %v1894_v44  ;;  %v1965_v19 = vpop.permute.xlu0 %1964  ;;  %v2069_v32 = vpack.c.bf16 %v1897_v63, %v1895_v0  ;;  %v2070_v33 = vpack.c.bf16 %v1924_v20, %v1922_v35  ;;  %v2076_v44 = vpack.c.bf16 %v4148_v2, %v4144_v49 }
 0x646   : > { %2160 = vmatprep.subr.bf16.mxu1 %v2069_v32  ;;  %v1943_v62 = vpop.permute.xlu1 %1942 }
 0x647   : > { %2161 = vmatpush1.bf16.msra.mxu1 %v2068_v13  ;;  %v1948_v25 = vsel %vm481_vm4, %v1935_v39, %v1943_v62  ;;  %v1952_v14 = vsel %vm481_vm4, %v1943_v62, %v1935_v39 }
 0x648   : > { %v1913_v52 = vpop.permute.xlu0 %1912  ;;  %2162 = vmatprep.subr.bf16.mxu1 %v2071_v17  ;;  %v1958_v6 = vmul.f32 %v1948_v25, %v3052_v57  ;;  %v1959_v59 = vmul.f32 %v1952_v14, %v3047_v55 }
 0x649   : > { %v1917_v51 = vsel %vm440_vm3, %v4293_v48, %v1913_v52  ;;  %v1921_v41 = vsel %vm440_vm3, %v1913_v52, %v4293_v48 }
 0x64a   : > { %v1928_v43 = vmul.f32 %v1921_v41, %v3013_v16  ;;  %v1929_v61 = vmul.f32 %v1917_v51, %v3016_v18  ;;  %v1963_v54 = vpop.permute.xlu1 %1962  ;;  %v2077_v16 = vpack.c.bf16 %v4168_v47, %v4164_v3 }
 0x64b   : > { %2163 = vmatpush1.bf16.msra.mxu1 %v2070_v33 }
 0x64c   : > { %v2072_v45 = vpack.c.bf16 %v1928_v43, %v1926_v53  ;;  %v1973_v23 = vpop.permute.xlu0 %1972  ;;  %v2073_v40 = vpack.c.bf16 %v1929_v61, %v1927_v22 }
 0x64d   : > { %v1983_v47 = vsel %vm522_vm5, %v1973_v23, %v1965_v19  ;;  %v1979_v39 = vsel %vm522_vm5, %v1965_v19, %v1973_v23 }
 0x64e   : > { %2164 = vmatprep.subr.bf16.mxu1 %v2073_v40  ;;  %v1971_v29 = vpop.permute.xlu1 %1970  ;;  %v1989_v50 = vmul.f32 %v1983_v47, %v3088_v37 }
 0x64f   : > { %2165 = vmatpush1.bf16.msra.mxu1 %v2072_v45  ;;  %v1982_v24 = vsel %vm522_vm5, %v1971_v29, %v1963_v54  ;;  %v1978_v49 = vsel %vm522_vm5, %v1963_v54, %v1971_v29 }
 0x650   : > { %v1969_v48 = vpop.permute.xlu0 %1968  ;;  %2166 = vmatprep.subr.bf16.mxu1 %v2075_v15  ;;  %v1987_v63 = vmul.f32 %v1982_v24, %v3088_v37 }
 0x652   : > { %v1967_v1 = vpop.permute.xlu1 %1966  ;;  %v2083_v62 = vpack.c.bf16 %v1989_v50, %v1987_v63 }
 0x653   : > { %2167 = vmatpush1.bf16.msra.mxu1 %v2074_v21 }
 0x654   : > { %v1997_v18 = vpop.permute.xlu0 %1996  ;;  %2168 = vmatprep.subr.bf16.mxu1 %v2077_v16 }
 0x656   : > { %v1975_v4 = vpop.permute.xlu1 %1974 }
 0x657   : > { %2169 = vmatpush1.bf16.msra.mxu1 %v2076_v44  ;;  %v1984_v20 = vsel %vm522_vm5, %v1975_v4, %v1967_v1 }
 0x658   : > { %v1945_v3 = vpop.permute.xlu0 %1944  ;;  %2170 = vmatprep.subr.bf16.mxu1 %v2079_v30  ;;  %v1991_v35 = vmul.f32 %v1984_v20, %v3088_v37 }
 0x659   : > { %v1949_v2 = vsel %vm481_vm4, %v4372_v27, %v1945_v3  ;;  %v1953_v0 = vsel %vm481_vm4, %v1945_v3, %v4372_v27  ;;  %v1986_v27 = vmul.f32 %v1978_v49, %v3085_v34 }
 0x65a   : > { %v1960_v56 = vmul.f32 %v1949_v2, %v3052_v57  ;;  %v1961_v42 = vmul.f32 %v1953_v0, %v3047_v55  ;;  %v1995_v30 = vpop.permute.xlu1 %1994  ;;  %v1980_v57 = vsel %vm522_vm5, %v1967_v1, %v1975_v4  ;;  %v1988_v55 = vmul.f32 %v1979_v39, %v3085_v34  ;;  %v2627_v2 = vld [vmem:[%s4580_s2 + $0x90] ss:$12 sps:$4 sm:$0xff]  }
 0x65b   : > { %2171 = vmatpush1.bf16.msra.mxu1 %v2078_v58  ;;  %v1990_v58 = vmul.f32 %v1980_v57, %v3085_v34 }
 0x65c   : > { %v2080_v7 = vpack.c.bf16 %v1960_v56, %v1958_v6  ;;  %v2005_v13 = vpop.permute.xlu0 %2004  ;;  %v2081_v32 = vpack.c.bf16 %v1961_v42, %v1959_v59  ;;  %v2082_v28 = vpack.c.bf16 %v1988_v55, %v1986_v27  ;;  %v2632_v55 = vld [vmem:[%s4580_s2 + $0xa8] ss:$12 sps:$4 sm:$0xff]  }
 0x65d   : > { %v2015_v36 = vsel %vm563_vm6, %v2005_v13, %v1997_v18  ;;  %v2011_v43 = vsel %vm563_vm6, %v1997_v18, %v2005_v13 }
 0x65e   : > { %v2003_v19 = vpop.permute.xlu1 %2002  ;;  %2172 = vmatprep.subr.bf16.mxu1 %v2081_v32  ;;  %v2021_v61 = vmul.f32 %v2015_v36, %v3120_v9 }
 0x65f   : > { %v2014_v38 = vsel %vm563_vm6, %v2003_v19, %v1995_v30  ;;  %2173 = vmatpush1.bf16.msra.mxu1 %v2080_v7  ;;  %v2010_v33 = vsel %vm563_vm6, %v1995_v30, %v2003_v19 }
 0x660   : > { %v1977_v17 = vpop.permute.xlu0 %1976  ;;  %2174 = vmatprep.subr.bf16.mxu1 %v2083_v62  ;;  %v2019_v51 = vmul.f32 %v2014_v38, %v3120_v9  ;;  %v2018_v40 = vmul.f32 %v2010_v33, %v3117_v8 }
 0x661   : > { %v1981_v31 = vsel %vm522_vm5, %v1969_v48, %v1977_v17  ;;  %v1985_v52 = vsel %vm522_vm5, %v1977_v17, %v1969_v48  ;;  %v2020_v48 = vmul.f32 %v2011_v43, %v3117_v8 }
 0x662   : > { %v1992_v41 = vmul.f32 %v1981_v31, %v3085_v34  ;;  %v1993_v53 = vmul.f32 %v1985_v52, %v3088_v37  ;;  %v1999_v22 = vpop.permute.xlu1 %1998  ;;  %v2087_v15 = vpack.c.bf16 %v2021_v61, %v2019_v51  ;;  %v4593_v31 = vmov 0   ;;  %v2633_v51 = vld [vmem:[%s4580_s2 + $0x98] ss:$12 sps:$4 sm:$0xff]  }
 0x663   : > { %2175 = vmatpush1.bf16.msra.mxu1 %v2082_v28  ;;  %v2086_v1 = vpack.c.bf16 %v2020_v48, %v2018_v40 }
 0x664   : > { %v2084_v54 = vpack.c.bf16 %v1992_v41, %v1990_v58  ;;  %v2001_v45 = vpop.permute.xlu0 %2000  ;;  %v2085_v23 = vpack.c.bf16 %v1993_v53, %v1991_v35 }
 0x666   : > { %v2007_v29 = vpop.permute.xlu1 %2006  ;;  %2176 = vmatprep.subr.bf16.mxu1 %v2085_v23 }
 0x667   : > { %v2012_v34 = vsel %vm563_vm6, %v1999_v22, %v2007_v29  ;;  %v2016_v37 = vsel %vm563_vm6, %v2007_v29, %v1999_v22  ;;  %2177 = vmatpush1.bf16.msra.mxu1 %v2084_v54 }
 0x668   : > { %v2009_v21 = vpop.permute.xlu0 %2008  ;;  %2178 = vmatprep.subr.bf16.mxu1 %v2087_v15  ;;  %v2022_v25 = vmul.f32 %v2012_v34, %v3117_v8  ;;  %v2023_v44 = vmul.f32 %v2016_v37, %v3120_v9 }
 0x669   : > { %v2013_v16 = vsel %vm563_vm6, %v2001_v45, %v2009_v21  ;;  %v2017_v18 = vsel %vm563_vm6, %v2009_v21, %v2001_v45 }
 0x66a   : > { %v2024_v4 = vmul.f32 %v2013_v16, %v3117_v8  ;;  %v2025_v14 = vmul.f32 %v2017_v18, %v3120_v9  ;;  %v2027_v24 = vpop.permute.xlu1 %2026  ;;  %v2630_v8 = vld [vmem:[%s4580_s2 + $0xac] ss:$12 sps:$4 sm:$0xff]  }
 0x66b   : > { %2179 = vmatpush1.bf16.msra.mxu1 %v2086_v1 }
 0x66c   : > { %v2088_v6 = vpack.c.bf16 %v2024_v4, %v2022_v25  ;;  %v2029_v3 = vpop.permute.xlu0 %2028  ;;  %v2089_v47 = vpack.c.bf16 %v2025_v14, %v2023_v44 }
 0x66e   : > { %v2035_v49 = vpop.permute.xlu1 %2034  ;;  %2180 = vmatprep.subr.bf16.mxu1 %v2089_v47 }
 0x66f   : > { %v2042_v0 = vsel %vm604_vm7, %v2027_v24, %v2035_v49  ;;  %v2046_v59 = vsel %vm604_vm7, %v2035_v49, %v2027_v24  ;;  %2181 = vmatpush1.bf16.msra.mxu1 %v2088_v6 }
 0x670   : > { %v2037_v9 = vpop.permute.xlu0 %2036  ;;  %v2050_v42 = vmul.f32 %v4066_v5, %v2042_v0  ;;  %v2051_v30 = vmul.f32 %v4072_v10, %v2046_v59 }
 0x671   : > { %v2043_v63 = vsel %vm604_vm7, %v2029_v3, %v2037_v9  ;;  %v2047_v56 = vsel %vm604_vm7, %v2037_v9, %v2029_v3  ;;  %v4596_v9 = vld [vmem:[#allocation3_spill] sm:$0xff] }
 0x672   : > { %v2052_v39 = vmul.f32 %v4066_v5, %v2043_v63  ;;  %v2053_v50 = vmul.f32 %v4072_v10, %v2047_v56  ;;  %v2031_v27 = vpop.permute.xlu1 %2030  ;;  %2183 = vmatmul.mubr.bf16.vlgmr.msra.gmra.mrb[8].mxu1 %v2627_v2  ;;  %v4595_v2 = vld [vmem:[#allocation4_spill] sm:$0xff] }
 0x673   : > { %2192 = vmatprep.mubr.bf16.mxu1 %v2630_v8 }
 0x674   : > { %v2090_v7 = vpack.c.bf16 %v2052_v39, %v2050_v42  ;;  %v2033_v13 = vpop.permute.xlu0 %2032  ;;  %v2091_v32 = vpack.c.bf16 %v2053_v50, %v2051_v30  ;;  %v4597_v42 = vld [vmem:[#allocation5_spill] sm:$0xff] }
 0x676   : > { %v2039_v57 = vpop.permute.xlu1 %2038  ;;  %2203 = vmatprep.subr.bf16.mxu1 %v2091_v32 }
 0x677   : > { %v2044_v20 = vsel %vm604_vm7, %v2031_v27, %v2039_v57  ;;  %v2048_v19 = vsel %vm604_vm7, %v2039_v57, %v2031_v27  ;;  %2204 = vmatpush1.bf16.msra.mxu1 %v2090_v7 }
 0x678   : > { %v2041_v62 = vpop.permute.xlu0 %2040  ;;  %v2054_v58 = vmul.f32 %v4066_v5, %v2044_v20  ;;  %v2055_v17 = vmul.f32 %v4072_v10, %v2048_v19 }
 0x679   : > { %v2045_v38 = vsel %vm604_vm7, %v2033_v13, %v2041_v62  ;;  %v2049_v28 = vsel %vm604_vm7, %v2041_v62, %v2033_v13 }
 0x67a   : > { %v2056_v35 = vmul.f32 %v4066_v5, %v2045_v38  ;;  %v2057_v36 = vmul.f32 %v4072_v10, %v2049_v28  ;;  %2193 = vmatmul.mubr.bf16.gmra.mrb[12].mxu1 %v2632_v55 }
 0x67b   : > { %2235 = vmatprep.mubr.bf16.mxu1 %v4593_v31 }
 0x67c   : > { %v2092_v52 = vpack.c.bf16 %v2056_v35, %v2054_v58  ;;  %v2093_v33 = vpack.c.bf16 %v2057_v36, %v2055_v17 }
 0x67e   : > { %2205 = vmatprep.subr.bf16.mxu1 %v2093_v33 }
 0x67f   : > { %2206 = vmatpush1.bf16.msra.mxu1 %v2092_v52 }
 0x682   : > { %2498 = vmatmul.mubr.msk.bf16.vlgmr.msra.gmra.mrb[8].mxu1 %vm715_vm8, %v2633_v51 }
 0x683   : > { %2245 = vmatprep.mubr.bf16.mxu1 %v4593_v31 }
 0x687   : > { %v2097_v5 = vpop.permute.xlu1 %2096 }
 0x689   : > { %v2102_v22 = vpop.permute.xlu0 %2101 }
 0x68a   : > { %2499 = vmatmul.mubr.msk.bf16.gmra.mrb[12].mxu1 %vm715_vm8, %v2634_v11 }
 0x68b   : > { %v2107_v21 = vpop.permute.xlu1 %2106 }
 0x755   : > { %v2237_v10 = vpop.f32.mrb[8].mxu1 }
 0x756   : > { %v2528_v41 = vadd.f32 %v2237_v10, %v2097_v5  ;;  %v2239_v53 = vpop.f32.mrb[9].mxu1 }
 0x757   : > { %v2529_v43 = vadd.f32 %v2239_v53, %v2097_v5  ;;  %v2241_v61 = vpop.f32.mrb[10].mxu1 }
 0x758   : > { %v2256_v54 = vadd.f32 %v2528_v41, %v3643_v60  ;;  %v2530_v45 = vadd.f32 %v2241_v61, %v2102_v22  ;;  %v2243_v23 = vpop.f32.mrb[11].mxu1 }
 0x759   : > { %v2257_v40 = vadd.f32 %v2529_v43, %v3667_v26  ;;  %v2531_v29 = vadd.f32 %v2243_v23, %v2102_v22 }
 0x75a   : > { %vm2264_vm9 = vcmp.ge.f32.partialorder %v2256_v54, 0.0  ;;  %v2272_v15 = vmul.f32 0.2, %v2256_v54  ;;  %v2258_v48 = vadd.f32 %v2530_v45, %v3646_v46  ;;  %v2112_v46 = vpop.permute.xlu0 %2111 }
 0x75b   : > { %vm2265_vm10 = vcmp.ge.f32.partialorder %v2257_v40, 0.0  ;;  %v2273_v34 = vmul.f32 0.2, %v2257_v40  ;;  %v2259_v60 = vadd.f32 %v2531_v29, %v3672_v12  ;;  %v4594_v12 = vld [vmem:[#allocation2_spill] sm:$0xff] }
 0x75c   : > { %v2280_v37 = vsel %vm2264_vm9, %v2256_v54, %v2272_v15  ;;  %vm2266_vm11 = vcmp.ge.f32.partialorder %v2258_v48, 0.0  ;;  %v2274_v26 = vmul.f32 0.2, %v2258_v48 }
 0x75d   : > { %2288 = vst [vmem:[%s4553_s24] sm:$0xff] %v2280_v37  ;;  %v2281_v1 = vsel %vm2265_vm10, %v2257_v40, %v2273_v34  ;;  %vm2267_vm12 = vcmp.ge.f32.partialorder %v2259_v60, 0.0  ;;  %v2275_v16 = vmul.f32 0.2, %v2259_v60  ;;  %v2247_v18 = vpop.f32.mrb[12].mxu1 }
 0x75e   : > { %2289 = vst [vmem:[%s4553_s24 + $0x8] sm:$0xff] %v2281_v1  ;;  %v2282_v25 = vsel %vm2266_vm11, %v2258_v48, %v2274_v26  ;;  %v2532_v44 = vadd.f32 %v2247_v18, %v2107_v21  ;;  %v2249_v4 = vpop.f32.mrb[13].mxu1 }
 0x75f   : > { %2290 = vst [vmem:[%s4553_s24 + $0x10] sm:$0xff] %v2282_v25  ;;  %v2283_v14 = vsel %vm2267_vm12, %v2259_v60, %v2275_v16  ;;  %v2533_v24 = vadd.f32 %v2249_v4, %v2107_v21  ;;  %v2251_v6 = vpop.f32.mrb[14].mxu1 }
 0x760   : > { %2291 = vst [vmem:[%s4553_s24 + $0x18] sm:$0xff] %v2283_v14  ;;  %v2260_v3 = vadd.f32 %v2532_v44, %v4594_v12  ;;  %v2534_v47 = vadd.f32 %v2251_v6, %v2112_v46  ;;  %v2253_v49 = vpop.f32.mrb[15].mxu1 }
 0x761   : > { %v2261_v0 = vadd.f32 %v2533_v24, %v4595_v2  ;;  %v2535_v59 = vadd.f32 %v2253_v49, %v2112_v46 }
 0x762   : > { %vm2268_vm13 = vcmp.ge.f32.partialorder %v2260_v3, 0.0  ;;  %v2276_v8 = vmul.f32 0.2, %v2260_v3  ;;  %v2262_v63 = vadd.f32 %v2534_v47, %v4596_v9 }
 0x763   : > { %vm2269_vm14 = vcmp.ge.f32.partialorder %v2261_v0, 0.0  ;;  %v2277_v56 = vmul.f32 0.2, %v2261_v0  ;;  %v2263_v30 = vadd.f32 %v2535_v59, %v4597_v42 }
 0x764   : > { %v2284_v39 = vsel %vm2268_vm13, %v2260_v3, %v2276_v8  ;;  %vm2270_vm15 = vcmp.ge.f32.partialorder %v2262_v63, 0.0  ;;  %v2278_v50 = vmul.f32 0.2, %v2262_v63 }
 0x765   : > { %2292 = vst [vmem:[%s4553_s24 + $0x20] sm:$0xff] %v2284_v39  ;;  %v2285_v27 = vsel %vm2269_vm14, %v2261_v0, %v2277_v56  ;;  %vm2271_vm0 = vcmp.ge.f32.partialorder %v2263_v30, 0.0  ;;  %v2279_v7 = vmul.f32 0.2, %v2263_v30 }
 0x766   : > { %2293 = vst [vmem:[%s4553_s24 + $0x28] sm:$0xff] %v2285_v27  ;;  %v2286_v13 = vsel %vm2270_vm15, %v2262_v63, %v2278_v50 }
 0x767   : > { %2294 = vst [vmem:[%s4553_s24 + $0x30] sm:$0xff] %v2286_v13  ;;  %v2287_v32 = vsel %vm2271_vm0, %v2263_v30, %v2279_v7 }
 0x768   : > { %2295 = vst [vmem:[%s4553_s24 + $0x38] sm:$0xff] %v2287_v32 }
 0x769 PF: > { %s14_s17 = sadd.s32 1, %s2667_s17   ;;  %s4598_s15 = smov %s2663_s16 }
 0x76a   : > { %p11_p5 = scmp.ge.s32.totalorder %s14_s17, 4   ;;  %s4599_s16 = smov %s4601_s18 }
 0x76c   :  { %13 = sbr.rel (!%p11_p5) target bundleno = 2 (0x2), region = 78 }

</bundles_post_ra>
